<compile_context>
chip_gen: v7x
topology: tpu7x:2x2x1
jax: 0.10.0
libtpu: 0.0.40
codegen_flags: <defaults>
</compile_context>

<pallas_src>
import numpy as np

import jax
import jax.numpy as jnp
from jax.experimental import pallas as pl
from jax.experimental.pallas import tpu as pltpu

# ----------------------------- configuration -------------------------------
N_LAYERS = 4          # Waveunet n_layers (reference default: 12)
CH = 8                # channels_interval (reference default: 24)
N_SRC = 1
MIDDLE = [(15, 1)]    # (kernel_size, dilation) pairs for the middle block
B = 2                 # batch
L = 64                # input length, multiple of 2**N_LAYERS (valid_length)
BN_EPS = 1e-5
ENC_K = 15
DEC_K = 5
PAD_C = 16            # channel padding granularity (bf16 vreg sublane height)

ENC_IN = [1] + [i * CH for i in range(1, N_LAYERS)]          # [1, 8, 16, 24]
ENC_OUT = [i * CH for i in range(1, N_LAYERS + 1)]           # [8, 16, 24, 32]
MID_SIZE = N_LAYERS * CH                                     # 32
DEC_OUT = ENC_OUT[::-1]                                      # [32, 24, 16, 8]
DEC_UP_IN = [MID_SIZE] + DEC_OUT[:-1]                        # [32, 32, 24, 16]
DEC_SKIP_IN = ENC_OUT[::-1]                                  # [32, 24, 16, 8]
ENC_L = [L // (2 ** i) for i in range(N_LAYERS)]             # [64, 32, 16, 8]
MID_L = L // (2 ** N_LAYERS)                                 # 4
DEC_L = [MID_L * (2 ** (i + 1)) for i in range(N_LAYERS)]    # [8, 16, 32, 64]


def _cpad(c):
    return ((c + PAD_C - 1) // PAD_C) * PAD_C


ENC_IN_P = [_cpad(c) for c in ENC_IN]          # [16, 16, 16, 32]
ENC_OUT_P = [_cpad(c) for c in ENC_OUT]        # [16, 16, 32, 32]
MID_P = _cpad(MID_SIZE)                        # 32
DEC_OUT_P = [_cpad(c) for c in DEC_OUT]        # [32, 32, 16, 16]
DEC_UP_IN_P = [_cpad(c) for c in DEC_UP_IN]    # [32, 32, 32, 16]
DEC_SK_IN_P = [_cpad(c) for c in DEC_SKIP_IN]  # [32, 32, 16, 16]

# ------------------------------ slab layouts --------------------------------
def _build_w_layout():
    """Row layout of the single bf16 weight slab: key -> (row0, cout_pad, K*cin_pad)."""
    layout = {}
    r = 0

    def add(key, cout_p, kcin):
        nonlocal r
        layout[key] = (r, cout_p, kcin)
        r += cout_p

    for i in range(N_LAYERS):
        add(("enc", i), ENC_OUT_P[i], ENC_K * ENC_IN_P[i])
    for j, (k, _d) in enumerate(MIDDLE):
        add(("mid", j), MID_P, k * MID_P)
    for i in range(N_LAYERS):
        add(("dec_up", i), DEC_OUT_P[i], DEC_K * DEC_UP_IN_P[i])
        add(("dec_sk", i), DEC_OUT_P[i], DEC_K * DEC_SK_IN_P[i])
    width = max(v[2] for v in layout.values())
    width = ((width + 127) // 128) * 128       # lane-align the slab
    return layout, r, width


W_LAYOUT, W_ROWS, W_COLS = _build_w_layout()

# gamma/beta/output-conv slab (f32): col 2*i = gamma_i, col 2*i+1 = beta_i,
# trailing N_SRC columns hold [out_w(:CH); out_w(CH); out_b] for the 1x1 output conv.
N_BN = 2 * N_LAYERS + len(MIDDLE)
OUT_COL = 2 * N_BN
GB_COLS = OUT_COL + N_SRC
GB_ROWS = max(max(ENC_OUT_P), MID_P, max(DEC_OUT_P), CH + 2)


def _build_ops_layout():
    """Row layout of the constant-operator slab: ::2 decimation and x2 upsample matrices."""
    layout = {}
    r = 0
    for i in range(N_LAYERS):
        rows, cols = B * ENC_L[i], (B * ENC_L[i]) // 2
        layout[("decim", i)] = (r, rows, cols)
        r += rows
    for i in range(N_LAYERS):
        rows, cols = (B * DEC_L[i]) // 2, B * DEC_L[i]
        layout[("up", i)] = (r, rows, cols)
        r += rows
    width = max(v[2] for v in layout.values())
    return layout, r, width


OPS_LAYOUT, OPS_ROWS, OPS_COLS = _build_ops_layout()


# --------------------- constant operator matrices (exact) ---------------------
def _decimate_matrix(seg, batch):
    """(B*seg, B*seg//2) 0/1 selection matrix realizing o[:, ::2] per batch segment."""
    half = seg // 2
    blk = np.zeros((seg, half), np.float32)
    blk[np.arange(half) * 2, np.arange(half)] = 1.0
    full = np.zeros((batch * seg, batch * half), np.float32)
    for bb in range(batch):
        full[bb * seg:(bb + 1) * seg, bb * half:(bb + 1) * half] = blk
    return full


def _upsample_matrix(seg, batch):
    """(B*seg, B*2seg): F.interpolate(scale=2, mode='linear', align_corners=True)."""
    lo = 2 * seg
    blk = np.zeros((seg, lo), np.float32)
    if seg == 1:
        blk[0, :] = 1.0
    else:
        coord = np.arange(lo, dtype=np.float64) * (seg - 1) / (lo - 1)
        i0 = np.floor(coord).astype(np.int64)
        i1 = np.minimum(i0 + 1, seg - 1)
        frac = coord - i0
        for j in range(lo):
            blk[i0[j], j] += 1.0 - frac[j]
            blk[i1[j], j] += frac[j]
    full = np.zeros((batch * seg, batch * lo), np.float32)
    for bb in range(batch):
        full[bb * seg:(bb + 1) * seg, bb * lo:(bb + 1) * lo] = blk
    return full


def _build_ops_slab():
    slab = np.zeros((OPS_ROWS, OPS_COLS), np.float32)
    for i in range(N_LAYERS):
        r0, rows, cols = OPS_LAYOUT[("decim", i)]
        slab[r0:r0 + rows, :cols] = _decimate_matrix(ENC_L[i], B)
    for i in range(N_LAYERS):
        r0, rows, cols = OPS_LAYOUT[("up", i)]
        slab[r0:r0 + rows, :cols] = _upsample_matrix(DEC_L[i] // 2, B)
    return slab


OPS_SLAB = _build_ops_slab()


def _cost_numbers():
    flops = 0
    for i in range(N_LAYERS):
        lanes = B * ENC_L[i]
        flops += 2 * ENC_OUT_P[i] * (ENC_K * ENC_IN_P[i]) * lanes      # encoder conv
        flops += 2 * ENC_OUT_P[i] * lanes * (lanes // 2)               # ::2 selection
    for _j, (k, _d) in enumerate(MIDDLE):
        flops += 2 * MID_P * (k * MID_P) * (B * MID_L)
    for i in range(N_LAYERS):
        lanes = B * DEC_L[i]
        flops += 2 * DEC_UP_IN_P[i] * (lanes // 2) * lanes             # x2 upsample
        flops += 2 * DEC_OUT_P[i] * (DEC_K * (DEC_UP_IN_P[i] + DEC_SK_IN_P[i])) * lanes
    flops += 2 * (CH + 1) * N_SRC * B * L                              # output 1x1 conv
    trans = N_SRC * B * L + GB_ROWS * N_BN                             # tanh + rsqrt
    byts = (PAD_C * B * L * 4 + W_ROWS * W_COLS * 2 + GB_ROWS * GB_COLS * 4
            + OPS_ROWS * OPS_COLS * 4 + N_SRC * B * L * 4)
    return int(flops), int(trans), int(byts)


_FLOPS, _TRANS, _BYTES = _cost_numbers()


# ------------------------- in-kernel building blocks -------------------------
def _make_taps(seg, K, dil):
    """Shared per-tap (offset, validity-mask) pairs for a 'same' conv over
    batch-flattened lanes (B segments of length `seg`)."""
    BL = B * seg
    pad = (K // 2) * dil
    pos = jax.lax.broadcasted_iota(jnp.int32, (1, BL), 1) % seg
    taps = []
    for k in range(K):
        off = k * dil - pad
        if off == 0:
            taps.append((0, None))
        else:
            valid = jnp.logical_and(pos + off >= 0, pos + off < seg)
            taps.append((off, valid))
    return taps


def _unfold(x, taps):
    """im2col: x (Cin_pad, BL) bf16 -> (K*Cin_pad, BL) bf16.

    Each tap is an in-bounds lane shift + zero fill (no overhang-padded copy);
    `valid` masks out values pulled across a batch-segment boundary.
    """
    cin, _BL = x.shape
    cols = []
    for off, valid in taps:
        if off == 0:
            cols.append(x)
            continue
        if off > 0:
            xs = jnp.concatenate([x[:, off:], jnp.zeros((cin, off), x.dtype)], axis=1)
        else:
            xs = jnp.concatenate([jnp.zeros((cin, -off), x.dtype), x[:, :off]], axis=1)
        cols.append(jnp.where(valid, xs, jnp.zeros_like(xs)))
    return jnp.concatenate(cols, axis=0)


def _bn_lrelu(y, gamma, beta):
    """Training-mode BatchNorm1d (biased var, eps=1e-5) + LeakyReLU(0.1).

    y: (Cout_pad, B*seg) f32 conv output (bias-free: absorbed by mean subtraction).
    Padding channels have gamma = beta = 0, so they stay exactly zero.
    """
    inv_n = 1.0 / float(y.shape[1])
    s = jnp.sum(y, axis=1, keepdims=True)
    s2 = jnp.sum(y * y, axis=1, keepdims=True)
    mean = s * inv_n
    var = jnp.maximum(s2 * inv_n - mean * mean, 0.0)
    y = (y - mean) * jax.lax.rsqrt(var + BN_EPS) * gamma + beta
    return jnp.where(y >= 0, y, 0.1 * y)


# ------------------------------ fused kernel ---------------------------------
def waveunet_kernel(x_ref, w_ref, gb_ref, ops_ref, o_ref):
    """Whole Waveunet forward.  Activations use a (C_pad, B*L) layout: batch*time
    on the 128-wide lane axis, channels (padded to 16) on sublanes."""
    f32 = jnp.float32
    bf16 = jnp.bfloat16

    x_in = x_ref[0:1, :]                           # (1, B*L) f32 original waveform
    o_bf = x_ref[...].astype(bf16)                 # (16, B*L) channel-padded input

    def conv_block(pairs, taps, bn_idx):
        """Sum of Conv1d contributions (weight-split concat) + BN + LeakyReLU."""
        y = None
        for key, xb in pairs:
            r0, cout_p, kcin = W_LAYOUT[key]
            xu = _unfold(xb, taps)                                     # (kcin, BL) bf16
            w = w_ref[r0:r0 + cout_p, 0:kcin]                          # bf16
            t = jnp.dot(w, xu, preferred_element_type=f32)             # (cout_p, BL) f32
            y = t if y is None else y + t
        cout_p = y.shape[0]
        g = gb_ref[0:cout_p, 2 * bn_idx:2 * bn_idx + 1]
        bt = gb_ref[0:cout_p, 2 * bn_idx + 1:2 * bn_idx + 2]
        return _bn_lrelu(y, g, bt)

    skips = []
    bn = 0

    # ----- encoder: DownSamplingLayer (conv k=15 + BN + LeakyReLU), then ::2 -----
    for i in range(N_LAYERS):
        taps = _make_taps(ENC_L[i], ENC_K, 1)
        o = conv_block([(("enc", i), o_bf)], taps, bn)
        bn += 1
        o_bf = o.astype(bf16)
        skips.append(o_bf)                                             # pre-decimation
        r0, rows, cols = OPS_LAYOUT[("decim", i)]
        dmat = ops_ref[r0:r0 + rows, 0:cols].astype(bf16)              # exact 0/1 entries
        o_bf = jnp.dot(o_bf, dmat, preferred_element_type=f32).astype(bf16)

    # ----- middle block -----
    o_f32 = None
    for j, (k, d) in enumerate(MIDDLE):
        taps = _make_taps(MID_L, k, d)
        o_f32 = conv_block([(("mid", j), o_bf)], taps, bn)
        bn += 1
        o_bf = o_f32.astype(bf16)
    if o_f32 is None:
        o_f32 = o_bf.astype(f32)
    # TODO(synk): lstm=True middle branch (nn.LSTM) not implemented; the module
    # default lstm=False is what is implemented here.

    # ----- decoder: x2 linear upsample, skip (weight-split), conv k=5 + BN + LReLU -----
    for i in range(N_LAYERS):
        r0, rows, cols = OPS_LAYOUT[("up", i)]
        umat = ops_ref[r0:r0 + rows, 0:cols]                           # f32 (exact interp)
        o_up = jnp.dot(o_f32, umat, preferred_element_type=f32)
        taps = _make_taps(DEC_L[i], DEC_K, 1)                          # shared by both paths
        o_f32 = conv_block([(("dec_up", i), o_up.astype(bf16)),
                            (("dec_sk", i), skips[N_LAYERS - 1 - i])],
                           taps, bn)
        bn += 1

    # ----- output: 1x1 conv on cat([o, x]) (weight-split) + bias + tanh -----
    o_dec = o_f32[0:CH, :]                                             # real decoder channels
    rows_out = []
    for s in range(N_SRC):
        col = OUT_COL + s
        wm = gb_ref[0:CH, col:col + 1]                                 # (CH, 1)
        wx = gb_ref[CH:CH + 1, col:col + 1]                            # (1, 1)
        bo = gb_ref[CH + 1:CH + 2, col:col + 1]                        # (1, 1)
        y = jnp.sum(o_dec * wm, axis=0, keepdims=True) + wx * x_in + bo
        rows_out.append(jnp.tanh(y))
    o_ref[...] = rows_out[0] if N_SRC == 1 else jnp.concatenate(rows_out, axis=0)


# --------------------------- parameter packing --------------------------------
def _pack_w(w, cout_p, cin_p):
    """(Cout, Cin, K) torch conv weight -> (cout_p, K*cin_p) f32, tap-major rows,
    zero-padded in both channel dims."""
    co, ci, k = w.shape
    w = jnp.pad(w, ((0, cout_p - co), (0, cin_p - ci), (0, 0)))
    return jnp.transpose(w, (0, 2, 1)).reshape(cout_p, k * cin_p)


def pack_params(params):
    """One-time repack of torch-layout parameters into the kernel's 3 slabs."""
    w_slab = jnp.zeros((W_ROWS, W_COLS), jnp.float32)

    def put(slab, key, w, cout_p, cin_p):
        r0, rows, cols = W_LAYOUT[key]
        return slab.at[r0:r0 + rows, 0:cols].set(_pack_w(w, cout_p, cin_p))

    for i in range(N_LAYERS):
        w_slab = put(w_slab, ("enc", i), params["enc"][i]["w"], ENC_OUT_P[i], ENC_IN_P[i])
    for j, _kd in enumerate(MIDDLE):
        w_slab = put(w_slab, ("mid", j), params["mid"][j]["w"], MID_P, MID_P)
    for i in range(N_LAYERS):
        w = params["dec"][i]["w"]
        up_ci = DEC_UP_IN[i]
        w_slab = put(w_slab, ("dec_up", i), w[:, :up_ci, :], DEC_OUT_P[i], DEC_UP_IN_P[i])
        w_slab = put(w_slab, ("dec_sk", i), w[:, up_ci:, :], DEC_OUT_P[i], DEC_SK_IN_P[i])
    w_slab = w_slab.astype(jnp.bfloat16)

    gb = jnp.zeros((GB_ROWS, GB_COLS), jnp.float32)
    bn_layers = params["enc"] + params["mid"] + params["dec"]
    for idx, p in enumerate(bn_layers):
        c = p["g"].shape[0]
        gb = gb.at[0:c, 2 * idx].set(p["g"])
        gb = gb.at[0:c, 2 * idx + 1].set(p["beta"])
    po = params["out"]
    for s in range(N_SRC):
        gb = gb.at[0:CH, OUT_COL + s].set(po["w"][s, :CH, 0])
        gb = gb.at[CH, OUT_COL + s].set(po["w"][s, CH, 0])
        gb = gb.at[CH + 1, OUT_COL + s].set(po["b"][s])

    # NOTE: conv biases of BN layers are intentionally not packed: training-mode
    # BatchNorm subtracts the per-channel batch mean, which absorbs them exactly.
    return {"w": w_slab, "gb": gb, "ops": jnp.asarray(OPS_SLAB)}


# ------------------------------ forward pass ----------------------------------
def waveunet_forward(x, packed):
    Bn, Cin, Ln = x.shape
    assert (Bn, Cin, Ln) == (B, 1, L)

    # (B, 1, L) -> (PAD_C, B*L): batch*time lane-dense; channel row 0 real, rest zero.
    x_flat = jnp.transpose(x, (1, 0, 2)).reshape(1, Bn * Ln)
    x_pad = jnp.concatenate([x_flat, jnp.zeros((PAD_C - 1, Bn * Ln), x.dtype)], axis=0)

    vmem = pl.BlockSpec(memory_space=pltpu.MemorySpace.VMEM)
    out_flat = pl.pallas_call(
        waveunet_kernel,
        out_shape=jax.ShapeDtypeStruct((N_SRC, Bn * Ln), jnp.float32),
        in_specs=[vmem, vmem, vmem, vmem],
        out_specs=vmem,
        cost_estimate=pl.CostEstimate(
            flops=_FLOPS, transcendentals=_TRANS, bytes_accessed=_BYTES),
    )(x_pad, packed["w"], packed["gb"], packed["ops"])

    # (N_SRC, B*L) -> (B, N_SRC, L)
    return jnp.transpose(out_flat.reshape(N_SRC, Bn, Ln), (1, 0, 2))


# ------------------------------ parameters -----------------------------------
def init_layer(key, cin, cout, k):
    k1, k2, k3, k4 = jax.random.split(key, 4)
    fan = float(cin * k)
    return {
        "w": jax.random.normal(k1, (cout, cin, k), jnp.float32) / jnp.sqrt(fan),
        "b": 0.01 * jax.random.normal(k2, (cout,), jnp.float32),
        "g": 1.0 + 0.1 * jax.random.normal(k3, (cout,), jnp.float32),
        "beta": 0.05 * jax.random.normal(k4, (cout,), jnp.float32),
    }


def init_params(key):
    params = {"enc": [], "mid": [], "dec": []}
    for i in range(N_LAYERS):
        key, sub = jax.random.split(key)
        params["enc"].append(init_layer(sub, ENC_IN[i], ENC_OUT[i], ENC_K))
    for (k, _d) in MIDDLE:
        key, sub = jax.random.split(key)
        params["mid"].append(init_layer(sub, MID_SIZE, MID_SIZE, k))
    dec_in = [(2 * i + 1) * CH for i in range(1, N_LAYERS)] + [2 * N_LAYERS * CH]
    dec_in = dec_in[::-1]
    for i in range(N_LAYERS):
        key, sub = jax.random.split(key)
        params["dec"].append(init_layer(sub, dec_in[i], DEC_OUT[i], DEC_K))
    key, sub = jax.random.split(key)
    params["out"] = init_layer(sub, 1 + CH, N_SRC, 1)
    return params


# -------------------------- pure-JAX f32 reference ----------------------------
def _ref_conv1d(x, w, b, dil=1):
    pad = (w.shape[2] // 2) * dil
    y = jax.lax.conv_general_dilated(
        x, w, window_strides=(1,), padding=[(pad, pad)], rhs_dilation=(dil,),
        dimension_numbers=("NCH", "OIH", "NCH"))
    return y + b[None, :, None]


def _ref_bn_lrelu(y, g, beta):
    mean = jnp.mean(y, axis=(0, 2), keepdims=True)
    var = jnp.mean((y - mean) ** 2, axis=(0, 2), keepdims=True)
    y = (y - mean) * jax.lax.rsqrt(var + BN_EPS) * g[None, :, None] + beta[None, :, None]
    return jnp.where(y >= 0, y, 0.1 * y)


def _ref_upsample2(x):
    Bn, C, Li = x.shape
    Lo = 2 * Li
    coord = jnp.arange(Lo, dtype=jnp.float32) * (Li - 1) / (Lo - 1)
    i0 = jnp.floor(coord).astype(jnp.int32)
    i1 = jnp.minimum(i0 + 1, Li - 1)
    frac = coord - i0.astype(jnp.float32)
    return x[:, :, i0] * (1.0 - frac) + x[:, :, i1] * frac


def waveunet_reference(x, params):
    """Float32 mirror of the PyTorch module (training-mode BatchNorm)."""
    o = x
    tmp = []
    for i in range(N_LAYERS):
        p = params["enc"][i]
        o = _ref_bn_lrelu(_ref_conv1d(o, p["w"], p["b"]), p["g"], p["beta"])
        tmp.append(o)
        o = o[:, :, ::2]
    for j, (k, d) in enumerate(MIDDLE):
        p = params["mid"][j]
        o = _ref_bn_lrelu(_ref_conv1d(o, p["w"], p["b"], dil=d), p["g"], p["beta"])
    for i in range(N_LAYERS):
        p = params["dec"][i]
        o = _ref_upsample2(o)
        o = jnp.concatenate([o, tmp[N_LAYERS - 1 - i]], axis=1)
        o = _ref_bn_lrelu(_ref_conv1d(o, p["w"], p["b"]), p["g"], p["beta"])
    po = params["out"]
    o = jnp.concatenate([o, x], axis=1)
    return jnp.tanh(_ref_conv1d(o, po["w"], po["b"]))


# ---------------------------------- main --------------------------------------
if __name__ == "__main__":
    key = jax.random.PRNGKey(0)
    kp, kx = jax.random.split(key)
    params = init_params(kp)
    x = jax.random.normal(kx, (B, 1, L), jnp.float32)   # mixture waveform (B, 1, L)

    packed = pack_params(params)                        # one-time weight repacking
    fwd = jax.jit(waveunet_forward)
    out = jax.block_until_ready(fwd(x, packed))

    assert out.shape == (B, N_SRC, L), out.shape
    assert bool(jnp.all(jnp.isfinite(out)))
    assert bool(jnp.all(jnp.abs(out) <= 1.0 + 1e-6))    # tanh output range

    # Compare against a pure-JAX f32 reference of the PyTorch module.  The kernel
    # runs its matmuls with bf16 operands (f32 accumulation) across ~10 cascaded
    # conv+BN layers, so use a loose absolute tolerance.
    ref = waveunet_reference(x, params)
    assert float(jnp.max(jnp.abs(out - ref))) < 0.25

    print("KERNEL_OK")
</pallas_src>

<mosaic_0001>
module attributes {stable_mosaic.version = 11 : i64} {
  func.func @waveunet_kernel(%arg0: memref<16x128xf32, #tpu.memory_space<vmem>>, %arg1: memref<320x512xbf16, #tpu.memory_space<vmem>>, %arg2: memref<32x19xf32, #tpu.memory_space<vmem>>, %arg3: memref<360x128xf32, #tpu.memory_space<vmem>>, %arg4: memref<1x128xf32, #tpu.memory_space<vmem>>) attributes {dimension_semantics = [], scalar_prefetch = 0 : i64, scratch_operands = 0 : i64, tpu.core_type = #tpu.core_type<tc>} {
    %c0 = arith.constant 0 : index
    %c0_0 = arith.constant 0 : index
    %0 = vector.load %arg0[%c0, %c0_0] : memref<16x128xf32, #tpu.memory_space<vmem>>, vector<1x128xf32>
    %c0_1 = arith.constant 0 : index
    %c0_2 = arith.constant 0 : index
    %1 = vector.load %arg0[%c0_1, %c0_2] : memref<16x128xf32, #tpu.memory_space<vmem>>, vector<16x128xf32>
    %2 = arith.truncf %1 : vector<16x128xf32> to vector<16x128xbf16>
    %3 = tpu.iota {dimensions = array<i32: 1>} : vector<1x128xi32>
    %c64_i32 = arith.constant 64 : i32
    %c0_i32 = arith.constant 0 : i32
    %4 = arith.cmpi eq, %c64_i32, %c0_i32 : i32
    %c1_i32 = arith.constant 1 : i32
    %5 = arith.select %4, %c1_i32, %c64_i32 : i32
    %6 = vector.broadcast %5 : i32 to vector<1x128xi32>
    %7 = arith.remsi %3, %6 : vector<1x128xi32>
    %c0_i32_3 = arith.constant 0 : i32
    %8 = vector.broadcast %c0_i32_3 : i32 to vector<1x128xi32>
    %9 = arith.cmpi ne, %7, %8 : vector<1x128xi32>
    %c0_i32_4 = arith.constant 0 : i32
    %10 = vector.broadcast %c0_i32_4 : i32 to vector<1x128xi32>
    %11 = arith.cmpi slt, %7, %10 : vector<1x128xi32>
    %c0_i32_5 = arith.constant 0 : i32
    %12 = arith.cmpi slt, %5, %c0_i32_5 : i32
    %13 = vector.broadcast %12 : i1 to vector<1x128xi1>
    %14 = vector.broadcast %13 : vector<1x128xi1> to vector<1x128xi1>
    %15 = arith.xori %11, %14 : vector<1x128xi1>
    %16 = arith.andi %15, %9 : vector<1x128xi1>
    %17 = vector.broadcast %5 : i32 to vector<1x128xi32>
    %18 = arith.addi %7, %17 : vector<1x128xi32>
    %19 = arith.select %16, %18, %7 : vector<1x128xi1>, vector<1x128xi32>
    %c-7_i32 = arith.constant -7 : i32
    %20 = vector.broadcast %c-7_i32 : i32 to vector<1x128xi32>
    %21 = arith.addi %19, %20 : vector<1x128xi32>
    %c0_i32_6 = arith.constant 0 : i32
    %22 = vector.broadcast %c0_i32_6 : i32 to vector<1x128xi32>
    %23 = arith.cmpi sge, %21, %22 : vector<1x128xi32>
    %c-7_i32_7 = arith.constant -7 : i32
    %24 = vector.broadcast %c-7_i32_7 : i32 to vector<1x128xi32>
    %25 = arith.addi %19, %24 : vector<1x128xi32>
    %c64_i32_8 = arith.constant 64 : i32
    %26 = vector.broadcast %c64_i32_8 : i32 to vector<1x128xi32>
    %27 = arith.cmpi slt, %25, %26 : vector<1x128xi32>
    %28 = arith.andi %23, %27 : vector<1x128xi1>
    %c-6_i32 = arith.constant -6 : i32
    %29 = vector.broadcast %c-6_i32 : i32 to vector<1x128xi32>
    %30 = arith.addi %19, %29 : vector<1x128xi32>
    %c0_i32_9 = arith.constant 0 : i32
    %31 = vector.broadcast %c0_i32_9 : i32 to vector<1x128xi32>
    %32 = arith.cmpi sge, %30, %31 : vector<1x128xi32>
    %c-6_i32_10 = arith.constant -6 : i32
    %33 = vector.broadcast %c-6_i32_10 : i32 to vector<1x128xi32>
    %34 = arith.addi %19, %33 : vector<1x128xi32>
    %c64_i32_11 = arith.constant 64 : i32
    %35 = vector.broadcast %c64_i32_11 : i32 to vector<1x128xi32>
    %36 = arith.cmpi slt, %34, %35 : vector<1x128xi32>
    %37 = arith.andi %32, %36 : vector<1x128xi1>
    %c-5_i32 = arith.constant -5 : i32
    %38 = vector.broadcast %c-5_i32 : i32 to vector<1x128xi32>
    %39 = arith.addi %19, %38 : vector<1x128xi32>
    %c0_i32_12 = arith.constant 0 : i32
    %40 = vector.broadcast %c0_i32_12 : i32 to vector<1x128xi32>
    %41 = arith.cmpi sge, %39, %40 : vector<1x128xi32>
    %c-5_i32_13 = arith.constant -5 : i32
    %42 = vector.broadcast %c-5_i32_13 : i32 to vector<1x128xi32>
    %43 = arith.addi %19, %42 : vector<1x128xi32>
    %c64_i32_14 = arith.constant 64 : i32
    %44 = vector.broadcast %c64_i32_14 : i32 to vector<1x128xi32>
    %45 = arith.cmpi slt, %43, %44 : vector<1x128xi32>
    %46 = arith.andi %41, %45 : vector<1x128xi1>
    %c-4_i32 = arith.constant -4 : i32
    %47 = vector.broadcast %c-4_i32 : i32 to vector<1x128xi32>
    %48 = arith.addi %19, %47 : vector<1x128xi32>
    %c0_i32_15 = arith.constant 0 : i32
    %49 = vector.broadcast %c0_i32_15 : i32 to vector<1x128xi32>
    %50 = arith.cmpi sge, %48, %49 : vector<1x128xi32>
    %c-4_i32_16 = arith.constant -4 : i32
    %51 = vector.broadcast %c-4_i32_16 : i32 to vector<1x128xi32>
    %52 = arith.addi %19, %51 : vector<1x128xi32>
    %c64_i32_17 = arith.constant 64 : i32
    %53 = vector.broadcast %c64_i32_17 : i32 to vector<1x128xi32>
    %54 = arith.cmpi slt, %52, %53 : vector<1x128xi32>
    %55 = arith.andi %50, %54 : vector<1x128xi1>
    %c-3_i32 = arith.constant -3 : i32
    %56 = vector.broadcast %c-3_i32 : i32 to vector<1x128xi32>
    %57 = arith.addi %19, %56 : vector<1x128xi32>
    %c0_i32_18 = arith.constant 0 : i32
    %58 = vector.broadcast %c0_i32_18 : i32 to vector<1x128xi32>
    %59 = arith.cmpi sge, %57, %58 : vector<1x128xi32>
    %c-3_i32_19 = arith.constant -3 : i32
    %60 = vector.broadcast %c-3_i32_19 : i32 to vector<1x128xi32>
    %61 = arith.addi %19, %60 : vector<1x128xi32>
    %c64_i32_20 = arith.constant 64 : i32
    %62 = vector.broadcast %c64_i32_20 : i32 to vector<1x128xi32>
    %63 = arith.cmpi slt, %61, %62 : vector<1x128xi32>
    %64 = arith.andi %59, %63 : vector<1x128xi1>
    %c-2_i32 = arith.constant -2 : i32
    %65 = vector.broadcast %c-2_i32 : i32 to vector<1x128xi32>
    %66 = arith.addi %19, %65 : vector<1x128xi32>
    %c0_i32_21 = arith.constant 0 : i32
    %67 = vector.broadcast %c0_i32_21 : i32 to vector<1x128xi32>
    %68 = arith.cmpi sge, %66, %67 : vector<1x128xi32>
    %c-2_i32_22 = arith.constant -2 : i32
    %69 = vector.broadcast %c-2_i32_22 : i32 to vector<1x128xi32>
    %70 = arith.addi %19, %69 : vector<1x128xi32>
    %c64_i32_23 = arith.constant 64 : i32
    %71 = vector.broadcast %c64_i32_23 : i32 to vector<1x128xi32>
    %72 = arith.cmpi slt, %70, %71 : vector<1x128xi32>
    %73 = arith.andi %68, %72 : vector<1x128xi1>
    %c-1_i32 = arith.constant -1 : i32
    %74 = vector.broadcast %c-1_i32 : i32 to vector<1x128xi32>
    %75 = arith.addi %19, %74 : vector<1x128xi32>
    %c0_i32_24 = arith.constant 0 : i32
    %76 = vector.broadcast %c0_i32_24 : i32 to vector<1x128xi32>
    %77 = arith.cmpi sge, %75, %76 : vector<1x128xi32>
    %c-1_i32_25 = arith.constant -1 : i32
    %78 = vector.broadcast %c-1_i32_25 : i32 to vector<1x128xi32>
    %79 = arith.addi %19, %78 : vector<1x128xi32>
    %c64_i32_26 = arith.constant 64 : i32
    %80 = vector.broadcast %c64_i32_26 : i32 to vector<1x128xi32>
    %81 = arith.cmpi slt, %79, %80 : vector<1x128xi32>
    %82 = arith.andi %77, %81 : vector<1x128xi1>
    %c1_i32_27 = arith.constant 1 : i32
    %83 = vector.broadcast %c1_i32_27 : i32 to vector<1x128xi32>
    %84 = arith.addi %19, %83 : vector<1x128xi32>
    %c0_i32_28 = arith.constant 0 : i32
    %85 = vector.broadcast %c0_i32_28 : i32 to vector<1x128xi32>
    %86 = arith.cmpi sge, %84, %85 : vector<1x128xi32>
    %c1_i32_29 = arith.constant 1 : i32
    %87 = vector.broadcast %c1_i32_29 : i32 to vector<1x128xi32>
    %88 = arith.addi %19, %87 : vector<1x128xi32>
    %c64_i32_30 = arith.constant 64 : i32
    %89 = vector.broadcast %c64_i32_30 : i32 to vector<1x128xi32>
    %90 = arith.cmpi slt, %88, %89 : vector<1x128xi32>
    %91 = arith.andi %86, %90 : vector<1x128xi1>
    %c2_i32 = arith.constant 2 : i32
    %92 = vector.broadcast %c2_i32 : i32 to vector<1x128xi32>
    %93 = arith.addi %19, %92 : vector<1x128xi32>
    %c0_i32_31 = arith.constant 0 : i32
    %94 = vector.broadcast %c0_i32_31 : i32 to vector<1x128xi32>
    %95 = arith.cmpi sge, %93, %94 : vector<1x128xi32>
    %c2_i32_32 = arith.constant 2 : i32
    %96 = vector.broadcast %c2_i32_32 : i32 to vector<1x128xi32>
    %97 = arith.addi %19, %96 : vector<1x128xi32>
    %c64_i32_33 = arith.constant 64 : i32
    %98 = vector.broadcast %c64_i32_33 : i32 to vector<1x128xi32>
    %99 = arith.cmpi slt, %97, %98 : vector<1x128xi32>
    %100 = arith.andi %95, %99 : vector<1x128xi1>
    %c3_i32 = arith.constant 3 : i32
    %101 = vector.broadcast %c3_i32 : i32 to vector<1x128xi32>
    %102 = arith.addi %19, %101 : vector<1x128xi32>
    %c0_i32_34 = arith.constant 0 : i32
    %103 = vector.broadcast %c0_i32_34 : i32 to vector<1x128xi32>
    %104 = arith.cmpi sge, %102, %103 : vector<1x128xi32>
    %c3_i32_35 = arith.constant 3 : i32
    %105 = vector.broadcast %c3_i32_35 : i32 to vector<1x128xi32>
    %106 = arith.addi %19, %105 : vector<1x128xi32>
    %c64_i32_36 = arith.constant 64 : i32
    %107 = vector.broadcast %c64_i32_36 : i32 to vector<1x128xi32>
    %108 = arith.cmpi slt, %106, %107 : vector<1x128xi32>
    %109 = arith.andi %104, %108 : vector<1x128xi1>
    %c4_i32 = arith.constant 4 : i32
    %110 = vector.broadcast %c4_i32 : i32 to vector<1x128xi32>
    %111 = arith.addi %19, %110 : vector<1x128xi32>
    %c0_i32_37 = arith.constant 0 : i32
    %112 = vector.broadcast %c0_i32_37 : i32 to vector<1x128xi32>
    %113 = arith.cmpi sge, %111, %112 : vector<1x128xi32>
    %c4_i32_38 = arith.constant 4 : i32
    %114 = vector.broadcast %c4_i32_38 : i32 to vector<1x128xi32>
    %115 = arith.addi %19, %114 : vector<1x128xi32>
    %c64_i32_39 = arith.constant 64 : i32
    %116 = vector.broadcast %c64_i32_39 : i32 to vector<1x128xi32>
    %117 = arith.cmpi slt, %115, %116 : vector<1x128xi32>
    %118 = arith.andi %113, %117 : vector<1x128xi1>
    %c5_i32 = arith.constant 5 : i32
    %119 = vector.broadcast %c5_i32 : i32 to vector<1x128xi32>
    %120 = arith.addi %19, %119 : vector<1x128xi32>
    %c0_i32_40 = arith.constant 0 : i32
    %121 = vector.broadcast %c0_i32_40 : i32 to vector<1x128xi32>
    %122 = arith.cmpi sge, %120, %121 : vector<1x128xi32>
    %c5_i32_41 = arith.constant 5 : i32
    %123 = vector.broadcast %c5_i32_41 : i32 to vector<1x128xi32>
    %124 = arith.addi %19, %123 : vector<1x128xi32>
    %c64_i32_42 = arith.constant 64 : i32
    %125 = vector.broadcast %c64_i32_42 : i32 to vector<1x128xi32>
    %126 = arith.cmpi slt, %124, %125 : vector<1x128xi32>
    %127 = arith.andi %122, %126 : vector<1x128xi1>
    %c6_i32 = arith.constant 6 : i32
    %128 = vector.broadcast %c6_i32 : i32 to vector<1x128xi32>
    %129 = arith.addi %19, %128 : vector<1x128xi32>
    %c0_i32_43 = arith.constant 0 : i32
    %130 = vector.broadcast %c0_i32_43 : i32 to vector<1x128xi32>
    %131 = arith.cmpi sge, %129, %130 : vector<1x128xi32>
    %c6_i32_44 = arith.constant 6 : i32
    %132 = vector.broadcast %c6_i32_44 : i32 to vector<1x128xi32>
    %133 = arith.addi %19, %132 : vector<1x128xi32>
    %c64_i32_45 = arith.constant 64 : i32
    %134 = vector.broadcast %c64_i32_45 : i32 to vector<1x128xi32>
    %135 = arith.cmpi slt, %133, %134 : vector<1x128xi32>
    %136 = arith.andi %131, %135 : vector<1x128xi1>
    %c7_i32 = arith.constant 7 : i32
    %137 = vector.broadcast %c7_i32 : i32 to vector<1x128xi32>
    %138 = arith.addi %19, %137 : vector<1x128xi32>
    %c0_i32_46 = arith.constant 0 : i32
    %139 = vector.broadcast %c0_i32_46 : i32 to vector<1x128xi32>
    %140 = arith.cmpi sge, %138, %139 : vector<1x128xi32>
    %c7_i32_47 = arith.constant 7 : i32
    %141 = vector.broadcast %c7_i32_47 : i32 to vector<1x128xi32>
    %142 = arith.addi %19, %141 : vector<1x128xi32>
    %c64_i32_48 = arith.constant 64 : i32
    %143 = vector.broadcast %c64_i32_48 : i32 to vector<1x128xi32>
    %144 = arith.cmpi slt, %142, %143 : vector<1x128xi32>
    %145 = arith.andi %140, %144 : vector<1x128xi1>
    %cst = arith.constant 0.000000e+00 : bf16
    %146 = vector.broadcast %cst : bf16 to vector<16x7xbf16>
    %147 = vector.extract_strided_slice %2 {offsets = [0, 0], sizes = [16, 121], strides = [1, 1]} : vector<16x128xbf16> to vector<16x121xbf16>
    %148 = tpu.concatenate %146, %147 in 1 : vector<16x7xbf16>, vector<16x121xbf16> -> vector<16x128xbf16>
    %cst_49 = arith.constant 0.000000e+00 : bf16
    %149 = vector.broadcast %cst_49 : bf16 to vector<16x128xbf16>
    %150 = vector.shape_cast %28 : vector<1x128xi1> to vector<1x128xi1>
    %151 = vector.broadcast %150 : vector<1x128xi1> to vector<16x128xi1>
    %152 = arith.select %151, %148, %149 : vector<16x128xi1>, vector<16x128xbf16>
    %cst_50 = arith.constant 0.000000e+00 : bf16
    %153 = vector.broadcast %cst_50 : bf16 to vector<16x6xbf16>
    %154 = vector.extract_strided_slice %2 {offsets = [0, 0], sizes = [16, 122], strides = [1, 1]} : vector<16x128xbf16> to vector<16x122xbf16>
    %155 = tpu.concatenate %153, %154 in 1 : vector<16x6xbf16>, vector<16x122xbf16> -> vector<16x128xbf16>
    %cst_51 = arith.constant 0.000000e+00 : bf16
    %156 = vector.broadcast %cst_51 : bf16 to vector<16x128xbf16>
    %157 = vector.shape_cast %37 : vector<1x128xi1> to vector<1x128xi1>
    %158 = vector.broadcast %157 : vector<1x128xi1> to vector<16x128xi1>
    %159 = arith.select %158, %155, %156 : vector<16x128xi1>, vector<16x128xbf16>
    %cst_52 = arith.constant 0.000000e+00 : bf16
    %160 = vector.broadcast %cst_52 : bf16 to vector<16x5xbf16>
    %161 = vector.extract_strided_slice %2 {offsets = [0, 0], sizes = [16, 123], strides = [1, 1]} : vector<16x128xbf16> to vector<16x123xbf16>
    %162 = tpu.concatenate %160, %161 in 1 : vector<16x5xbf16>, vector<16x123xbf16> -> vector<16x128xbf16>
    %cst_53 = arith.constant 0.000000e+00 : bf16
    %163 = vector.broadcast %cst_53 : bf16 to vector<16x128xbf16>
    %164 = vector.shape_cast %46 : vector<1x128xi1> to vector<1x128xi1>
    %165 = vector.broadcast %164 : vector<1x128xi1> to vector<16x128xi1>
    %166 = arith.select %165, %162, %163 : vector<16x128xi1>, vector<16x128xbf16>
    %cst_54 = arith.constant 0.000000e+00 : bf16
    %167 = vector.broadcast %cst_54 : bf16 to vector<16x4xbf16>
    %168 = vector.extract_strided_slice %2 {offsets = [0, 0], sizes = [16, 124], strides = [1, 1]} : vector<16x128xbf16> to vector<16x124xbf16>
    %169 = tpu.concatenate %167, %168 in 1 : vector<16x4xbf16>, vector<16x124xbf16> -> vector<16x128xbf16>
    %cst_55 = arith.constant 0.000000e+00 : bf16
    %170 = vector.broadcast %cst_55 : bf16 to vector<16x128xbf16>
    %171 = vector.shape_cast %55 : vector<1x128xi1> to vector<1x128xi1>
    %172 = vector.broadcast %171 : vector<1x128xi1> to vector<16x128xi1>
    %173 = arith.select %172, %169, %170 : vector<16x128xi1>, vector<16x128xbf16>
    %cst_56 = arith.constant 0.000000e+00 : bf16
    %174 = vector.broadcast %cst_56 : bf16 to vector<16x3xbf16>
    %175 = vector.extract_strided_slice %2 {offsets = [0, 0], sizes = [16, 125], strides = [1, 1]} : vector<16x128xbf16> to vector<16x125xbf16>
    %176 = tpu.concatenate %174, %175 in 1 : vector<16x3xbf16>, vector<16x125xbf16> -> vector<16x128xbf16>
    %cst_57 = arith.constant 0.000000e+00 : bf16
    %177 = vector.broadcast %cst_57 : bf16 to vector<16x128xbf16>
    %178 = vector.shape_cast %64 : vector<1x128xi1> to vector<1x128xi1>
    %179 = vector.broadcast %178 : vector<1x128xi1> to vector<16x128xi1>
    %180 = arith.select %179, %176, %177 : vector<16x128xi1>, vector<16x128xbf16>
    %cst_58 = arith.constant 0.000000e+00 : bf16
    %181 = vector.broadcast %cst_58 : bf16 to vector<16x2xbf16>
    %182 = vector.extract_strided_slice %2 {offsets = [0, 0], sizes = [16, 126], strides = [1, 1]} : vector<16x128xbf16> to vector<16x126xbf16>
    %183 = tpu.concatenate %181, %182 in 1 : vector<16x2xbf16>, vector<16x126xbf16> -> vector<16x128xbf16>
    %cst_59 = arith.constant 0.000000e+00 : bf16
    %184 = vector.broadcast %cst_59 : bf16 to vector<16x128xbf16>
    %185 = vector.shape_cast %73 : vector<1x128xi1> to vector<1x128xi1>
    %186 = vector.broadcast %185 : vector<1x128xi1> to vector<16x128xi1>
    %187 = arith.select %186, %183, %184 : vector<16x128xi1>, vector<16x128xbf16>
    %cst_60 = arith.constant 0.000000e+00 : bf16
    %188 = vector.broadcast %cst_60 : bf16 to vector<16x1xbf16>
    %189 = vector.extract_strided_slice %2 {offsets = [0, 0], sizes = [16, 127], strides = [1, 1]} : vector<16x128xbf16> to vector<16x127xbf16>
    %190 = tpu.concatenate %188, %189 in 1 : vector<16x1xbf16>, vector<16x127xbf16> -> vector<16x128xbf16>
    %cst_61 = arith.constant 0.000000e+00 : bf16
    %191 = vector.broadcast %cst_61 : bf16 to vector<16x128xbf16>
    %192 = vector.shape_cast %82 : vector<1x128xi1> to vector<1x128xi1>
    %193 = vector.broadcast %192 : vector<1x128xi1> to vector<16x128xi1>
    %194 = arith.select %193, %190, %191 : vector<16x128xi1>, vector<16x128xbf16>
    %195 = vector.extract_strided_slice %2 {offsets = [0, 1], sizes = [16, 127], strides = [1, 1]} : vector<16x128xbf16> to vector<16x127xbf16>
    %cst_62 = arith.constant 0.000000e+00 : bf16
    %196 = vector.broadcast %cst_62 : bf16 to vector<16x1xbf16>
    %197 = tpu.concatenate %195, %196 in 1 : vector<16x127xbf16>, vector<16x1xbf16> -> vector<16x128xbf16>
    %cst_63 = arith.constant 0.000000e+00 : bf16
    %198 = vector.broadcast %cst_63 : bf16 to vector<16x128xbf16>
    %199 = vector.shape_cast %91 : vector<1x128xi1> to vector<1x128xi1>
    %200 = vector.broadcast %199 : vector<1x128xi1> to vector<16x128xi1>
    %201 = arith.select %200, %197, %198 : vector<16x128xi1>, vector<16x128xbf16>
    %202 = vector.extract_strided_slice %2 {offsets = [0, 2], sizes = [16, 126], strides = [1, 1]} : vector<16x128xbf16> to vector<16x126xbf16>
    %cst_64 = arith.constant 0.000000e+00 : bf16
    %203 = vector.broadcast %cst_64 : bf16 to vector<16x2xbf16>
    %204 = tpu.concatenate %202, %203 in 1 : vector<16x126xbf16>, vector<16x2xbf16> -> vector<16x128xbf16>
    %cst_65 = arith.constant 0.000000e+00 : bf16
    %205 = vector.broadcast %cst_65 : bf16 to vector<16x128xbf16>
    %206 = vector.shape_cast %100 : vector<1x128xi1> to vector<1x128xi1>
    %207 = vector.broadcast %206 : vector<1x128xi1> to vector<16x128xi1>
    %208 = arith.select %207, %204, %205 : vector<16x128xi1>, vector<16x128xbf16>
    %209 = vector.extract_strided_slice %2 {offsets = [0, 3], sizes = [16, 125], strides = [1, 1]} : vector<16x128xbf16> to vector<16x125xbf16>
    %cst_66 = arith.constant 0.000000e+00 : bf16
    %210 = vector.broadcast %cst_66 : bf16 to vector<16x3xbf16>
    %211 = tpu.concatenate %209, %210 in 1 : vector<16x125xbf16>, vector<16x3xbf16> -> vector<16x128xbf16>
    %cst_67 = arith.constant 0.000000e+00 : bf16
    %212 = vector.broadcast %cst_67 : bf16 to vector<16x128xbf16>
    %213 = vector.shape_cast %109 : vector<1x128xi1> to vector<1x128xi1>
    %214 = vector.broadcast %213 : vector<1x128xi1> to vector<16x128xi1>
    %215 = arith.select %214, %211, %212 : vector<16x128xi1>, vector<16x128xbf16>
    %216 = vector.extract_strided_slice %2 {offsets = [0, 4], sizes = [16, 124], strides = [1, 1]} : vector<16x128xbf16> to vector<16x124xbf16>
    %cst_68 = arith.constant 0.000000e+00 : bf16
    %217 = vector.broadcast %cst_68 : bf16 to vector<16x4xbf16>
    %218 = tpu.concatenate %216, %217 in 1 : vector<16x124xbf16>, vector<16x4xbf16> -> vector<16x128xbf16>
    %cst_69 = arith.constant 0.000000e+00 : bf16
    %219 = vector.broadcast %cst_69 : bf16 to vector<16x128xbf16>
    %220 = vector.shape_cast %118 : vector<1x128xi1> to vector<1x128xi1>
    %221 = vector.broadcast %220 : vector<1x128xi1> to vector<16x128xi1>
    %222 = arith.select %221, %218, %219 : vector<16x128xi1>, vector<16x128xbf16>
    %223 = vector.extract_strided_slice %2 {offsets = [0, 5], sizes = [16, 123], strides = [1, 1]} : vector<16x128xbf16> to vector<16x123xbf16>
    %cst_70 = arith.constant 0.000000e+00 : bf16
    %224 = vector.broadcast %cst_70 : bf16 to vector<16x5xbf16>
    %225 = tpu.concatenate %223, %224 in 1 : vector<16x123xbf16>, vector<16x5xbf16> -> vector<16x128xbf16>
    %cst_71 = arith.constant 0.000000e+00 : bf16
    %226 = vector.broadcast %cst_71 : bf16 to vector<16x128xbf16>
    %227 = vector.shape_cast %127 : vector<1x128xi1> to vector<1x128xi1>
    %228 = vector.broadcast %227 : vector<1x128xi1> to vector<16x128xi1>
    %229 = arith.select %228, %225, %226 : vector<16x128xi1>, vector<16x128xbf16>
    %230 = vector.extract_strided_slice %2 {offsets = [0, 6], sizes = [16, 122], strides = [1, 1]} : vector<16x128xbf16> to vector<16x122xbf16>
    %cst_72 = arith.constant 0.000000e+00 : bf16
    %231 = vector.broadcast %cst_72 : bf16 to vector<16x6xbf16>
    %232 = tpu.concatenate %230, %231 in 1 : vector<16x122xbf16>, vector<16x6xbf16> -> vector<16x128xbf16>
    %cst_73 = arith.constant 0.000000e+00 : bf16
    %233 = vector.broadcast %cst_73 : bf16 to vector<16x128xbf16>
    %234 = vector.shape_cast %136 : vector<1x128xi1> to vector<1x128xi1>
    %235 = vector.broadcast %234 : vector<1x128xi1> to vector<16x128xi1>
    %236 = arith.select %235, %232, %233 : vector<16x128xi1>, vector<16x128xbf16>
    %237 = vector.extract_strided_slice %2 {offsets = [0, 7], sizes = [16, 121], strides = [1, 1]} : vector<16x128xbf16> to vector<16x121xbf16>
    %cst_74 = arith.constant 0.000000e+00 : bf16
    %238 = vector.broadcast %cst_74 : bf16 to vector<16x7xbf16>
    %239 = tpu.concatenate %237, %238 in 1 : vector<16x121xbf16>, vector<16x7xbf16> -> vector<16x128xbf16>
    %cst_75 = arith.constant 0.000000e+00 : bf16
    %240 = vector.broadcast %cst_75 : bf16 to vector<16x128xbf16>
    %241 = vector.shape_cast %145 : vector<1x128xi1> to vector<1x128xi1>
    %242 = vector.broadcast %241 : vector<1x128xi1> to vector<16x128xi1>
    %243 = arith.select %242, %239, %240 : vector<16x128xi1>, vector<16x128xbf16>
    %244 = tpu.concatenate %152, %159, %166, %173, %180, %187, %194, %2, %201, %208, %215, %222, %229, %236, %243 in 0 : vector<16x128xbf16>, vector<16x128xbf16>, vector<16x128xbf16>, vector<16x128xbf16>, vector<16x128xbf16>, vector<16x128xbf16>, vector<16x128xbf16>, vector<16x128xbf16>, vector<16x128xbf16>, vector<16x128xbf16>, vector<16x128xbf16>, vector<16x128xbf16>, vector<16x128xbf16>, vector<16x128xbf16>, vector<16x128xbf16> -> vector<240x128xbf16>
    %c0_76 = arith.constant 0 : index
    %c0_77 = arith.constant 0 : index
    %245 = vector.load %arg1[%c0_76, %c0_77] : memref<320x512xbf16, #tpu.memory_space<vmem>>, vector<16x240xbf16>
    %cst_78 = arith.constant dense<0.000000e+00> : vector<16x128xf32>
    %246 = tpu.matmul %245, %244, %cst_78 {dimension_numbers = #tpu.dot_dimension_numbers<[1], [0], [0], [1], [0, 0, 1, 1], [], []>} : vector<16x240xbf16>, vector<240x128xbf16>, vector<16x128xf32> -> vector<16x128xf32>
    %c0_79 = arith.constant 0 : index
    %c0_80 = arith.constant 0 : index
    %247 = vector.load %arg2[%c0_79, %c0_80] : memref<32x19xf32, #tpu.memory_space<vmem>>, vector<16x1xf32>
    %c0_81 = arith.constant 0 : index
    %c1 = arith.constant 1 : index
    %248 = vector.load %arg2[%c0_81, %c1] : memref<32x19xf32, #tpu.memory_space<vmem>>, vector<16x1xf32>
    %cst_82 = arith.constant dense<0.000000e+00> : vector<16xf32>
    %249 = vector.multi_reduction <add>, %246, %cst_82 [1] : vector<16x128xf32> to vector<16xf32>
    %250 = vector.shape_cast %249 : vector<16xf32> to vector<16x1xf32>
    %251 = arith.mulf %246, %246 : vector<16x128xf32>
    %cst_83 = arith.constant dense<0.000000e+00> : vector<16xf32>
    %252 = vector.multi_reduction <add>, %251, %cst_83 [1] : vector<16x128xf32> to vector<16xf32>
    %253 = vector.shape_cast %252 : vector<16xf32> to vector<16x1xf32>
    %cst_84 = arith.constant 7.812500e-03 : f32
    %254 = vector.broadcast %cst_84 : f32 to vector<16x1xf32>
    %255 = arith.mulf %250, %254 : vector<16x1xf32>
    %cst_85 = arith.constant 7.812500e-03 : f32
    %256 = vector.broadcast %cst_85 : f32 to vector<16x1xf32>
    %257 = arith.mulf %253, %256 : vector<16x1xf32>
    %258 = arith.mulf %255, %255 : vector<16x1xf32>
    %259 = arith.subf %257, %258 : vector<16x1xf32>
    %cst_86 = arith.constant 0.000000e+00 : f32
    %260 = vector.broadcast %cst_86 : f32 to vector<16x1xf32>
    %261 = arith.maximumf %259, %260 : vector<16x1xf32>
    %262 = vector.broadcast %255 : vector<16x1xf32> to vector<16x128xf32>
    %263 = arith.subf %246, %262 : vector<16x128xf32>
    %cst_87 = arith.constant 9.99999974E-6 : f32
    %264 = vector.broadcast %cst_87 : f32 to vector<16x1xf32>
    %265 = arith.addf %261, %264 : vector<16x1xf32>
    %266 = math.rsqrt %265 : vector<16x1xf32>
    %267 = vector.broadcast %266 : vector<16x1xf32> to vector<16x128xf32>
    %268 = arith.mulf %263, %267 : vector<16x128xf32>
    %269 = vector.broadcast %247 : vector<16x1xf32> to vector<16x128xf32>
    %270 = arith.mulf %268, %269 : vector<16x128xf32>
    %271 = vector.broadcast %248 : vector<16x1xf32> to vector<16x128xf32>
    %272 = arith.addf %270, %271 : vector<16x128xf32>
    %cst_88 = arith.constant 0.000000e+00 : f32
    %273 = vector.broadcast %cst_88 : f32 to vector<16x128xf32>
    %274 = arith.cmpf oge, %272, %273 : vector<16x128xf32>
    %cst_89 = arith.constant 1.000000e-01 : f32
    %275 = vector.broadcast %cst_89 : f32 to vector<16x128xf32>
    %276 = arith.mulf %275, %272 : vector<16x128xf32>
    %277 = arith.select %274, %272, %276 : vector<16x128xi1>, vector<16x128xf32>
    %278 = arith.truncf %277 : vector<16x128xf32> to vector<16x128xbf16>
    %c0_90 = arith.constant 0 : index
    %c0_91 = arith.constant 0 : index
    %279 = vector.load %arg3[%c0_90, %c0_91] : memref<360x128xf32, #tpu.memory_space<vmem>>, vector<128x64xf32>
    %280 = arith.truncf %279 : vector<128x64xf32> to vector<128x64xbf16>
    %cst_92 = arith.constant dense<0.000000e+00> : vector<16x64xf32>
    %281 = tpu.matmul %278, %280, %cst_92 {dimension_numbers = #tpu.dot_dimension_numbers<[1], [0], [0], [1], [0, 0, 1, 1], [], []>} : vector<16x128xbf16>, vector<128x64xbf16>, vector<16x64xf32> -> vector<16x64xf32>
    %282 = arith.truncf %281 : vector<16x64xf32> to vector<16x64xbf16>
    %283 = tpu.iota {dimensions = array<i32: 1>} : vector<1x64xi32>
    %c32_i32 = arith.constant 32 : i32
    %c0_i32_93 = arith.constant 0 : i32
    %284 = arith.cmpi eq, %c32_i32, %c0_i32_93 : i32
    %c1_i32_94 = arith.constant 1 : i32
    %285 = arith.select %284, %c1_i32_94, %c32_i32 : i32
    %286 = vector.broadcast %285 : i32 to vector<1x64xi32>
    %287 = arith.remsi %283, %286 : vector<1x64xi32>
    %c0_i32_95 = arith.constant 0 : i32
    %288 = vector.broadcast %c0_i32_95 : i32 to vector<1x64xi32>
    %289 = arith.cmpi ne, %287, %288 : vector<1x64xi32>
    %c0_i32_96 = arith.constant 0 : i32
    %290 = vector.broadcast %c0_i32_96 : i32 to vector<1x64xi32>
    %291 = arith.cmpi slt, %287, %290 : vector<1x64xi32>
    %c0_i32_97 = arith.constant 0 : i32
    %292 = arith.cmpi slt, %285, %c0_i32_97 : i32
    %293 = vector.broadcast %292 : i1 to vector<1x64xi1>
    %294 = vector.broadcast %293 : vector<1x64xi1> to vector<1x64xi1>
    %295 = arith.xori %291, %294 : vector<1x64xi1>
    %296 = arith.andi %295, %289 : vector<1x64xi1>
    %297 = vector.broadcast %285 : i32 to vector<1x64xi32>
    %298 = arith.addi %287, %297 : vector<1x64xi32>
    %299 = arith.select %296, %298, %287 : vector<1x64xi1>, vector<1x64xi32>
    %c-7_i32_98 = arith.constant -7 : i32
    %300 = vector.broadcast %c-7_i32_98 : i32 to vector<1x64xi32>
    %301 = arith.addi %299, %300 : vector<1x64xi32>
    %c0_i32_99 = arith.constant 0 : i32
    %302 = vector.broadcast %c0_i32_99 : i32 to vector<1x64xi32>
    %303 = arith.cmpi sge, %301, %302 : vector<1x64xi32>
    %c-7_i32_100 = arith.constant -7 : i32
    %304 = vector.broadcast %c-7_i32_100 : i32 to vector<1x64xi32>
    %305 = arith.addi %299, %304 : vector<1x64xi32>
    %c32_i32_101 = arith.constant 32 : i32
    %306 = vector.broadcast %c32_i32_101 : i32 to vector<1x64xi32>
    %307 = arith.cmpi slt, %305, %306 : vector<1x64xi32>
    %308 = arith.andi %303, %307 : vector<1x64xi1>
    %c-6_i32_102 = arith.constant -6 : i32
    %309 = vector.broadcast %c-6_i32_102 : i32 to vector<1x64xi32>
    %310 = arith.addi %299, %309 : vector<1x64xi32>
    %c0_i32_103 = arith.constant 0 : i32
    %311 = vector.broadcast %c0_i32_103 : i32 to vector<1x64xi32>
    %312 = arith.cmpi sge, %310, %311 : vector<1x64xi32>
    %c-6_i32_104 = arith.constant -6 : i32
    %313 = vector.broadcast %c-6_i32_104 : i32 to vector<1x64xi32>
    %314 = arith.addi %299, %313 : vector<1x64xi32>
    %c32_i32_105 = arith.constant 32 : i32
    %315 = vector.broadcast %c32_i32_105 : i32 to vector<1x64xi32>
    %316 = arith.cmpi slt, %314, %315 : vector<1x64xi32>
    %317 = arith.andi %312, %316 : vector<1x64xi1>
    %c-5_i32_106 = arith.constant -5 : i32
    %318 = vector.broadcast %c-5_i32_106 : i32 to vector<1x64xi32>
    %319 = arith.addi %299, %318 : vector<1x64xi32>
    %c0_i32_107 = arith.constant 0 : i32
    %320 = vector.broadcast %c0_i32_107 : i32 to vector<1x64xi32>
    %321 = arith.cmpi sge, %319, %320 : vector<1x64xi32>
    %c-5_i32_108 = arith.constant -5 : i32
    %322 = vector.broadcast %c-5_i32_108 : i32 to vector<1x64xi32>
    %323 = arith.addi %299, %322 : vector<1x64xi32>
    %c32_i32_109 = arith.constant 32 : i32
    %324 = vector.broadcast %c32_i32_109 : i32 to vector<1x64xi32>
    %325 = arith.cmpi slt, %323, %324 : vector<1x64xi32>
    %326 = arith.andi %321, %325 : vector<1x64xi1>
    %c-4_i32_110 = arith.constant -4 : i32
    %327 = vector.broadcast %c-4_i32_110 : i32 to vector<1x64xi32>
    %328 = arith.addi %299, %327 : vector<1x64xi32>
    %c0_i32_111 = arith.constant 0 : i32
    %329 = vector.broadcast %c0_i32_111 : i32 to vector<1x64xi32>
    %330 = arith.cmpi sge, %328, %329 : vector<1x64xi32>
    %c-4_i32_112 = arith.constant -4 : i32
    %331 = vector.broadcast %c-4_i32_112 : i32 to vector<1x64xi32>
    %332 = arith.addi %299, %331 : vector<1x64xi32>
    %c32_i32_113 = arith.constant 32 : i32
    %333 = vector.broadcast %c32_i32_113 : i32 to vector<1x64xi32>
    %334 = arith.cmpi slt, %332, %333 : vector<1x64xi32>
    %335 = arith.andi %330, %334 : vector<1x64xi1>
    %c-3_i32_114 = arith.constant -3 : i32
    %336 = vector.broadcast %c-3_i32_114 : i32 to vector<1x64xi32>
    %337 = arith.addi %299, %336 : vector<1x64xi32>
    %c0_i32_115 = arith.constant 0 : i32
    %338 = vector.broadcast %c0_i32_115 : i32 to vector<1x64xi32>
    %339 = arith.cmpi sge, %337, %338 : vector<1x64xi32>
    %c-3_i32_116 = arith.constant -3 : i32
    %340 = vector.broadcast %c-3_i32_116 : i32 to vector<1x64xi32>
    %341 = arith.addi %299, %340 : vector<1x64xi32>
    %c32_i32_117 = arith.constant 32 : i32
    %342 = vector.broadcast %c32_i32_117 : i32 to vector<1x64xi32>
    %343 = arith.cmpi slt, %341, %342 : vector<1x64xi32>
    %344 = arith.andi %339, %343 : vector<1x64xi1>
    %c-2_i32_118 = arith.constant -2 : i32
    %345 = vector.broadcast %c-2_i32_118 : i32 to vector<1x64xi32>
    %346 = arith.addi %299, %345 : vector<1x64xi32>
    %c0_i32_119 = arith.constant 0 : i32
    %347 = vector.broadcast %c0_i32_119 : i32 to vector<1x64xi32>
    %348 = arith.cmpi sge, %346, %347 : vector<1x64xi32>
    %c-2_i32_120 = arith.constant -2 : i32
    %349 = vector.broadcast %c-2_i32_120 : i32 to vector<1x64xi32>
    %350 = arith.addi %299, %349 : vector<1x64xi32>
    %c32_i32_121 = arith.constant 32 : i32
    %351 = vector.broadcast %c32_i32_121 : i32 to vector<1x64xi32>
    %352 = arith.cmpi slt, %350, %351 : vector<1x64xi32>
    %353 = arith.andi %348, %352 : vector<1x64xi1>
    %c-1_i32_122 = arith.constant -1 : i32
    %354 = vector.broadcast %c-1_i32_122 : i32 to vector<1x64xi32>
    %355 = arith.addi %299, %354 : vector<1x64xi32>
    %c0_i32_123 = arith.constant 0 : i32
    %356 = vector.broadcast %c0_i32_123 : i32 to vector<1x64xi32>
    %357 = arith.cmpi sge, %355, %356 : vector<1x64xi32>
    %c-1_i32_124 = arith.constant -1 : i32
    %358 = vector.broadcast %c-1_i32_124 : i32 to vector<1x64xi32>
    %359 = arith.addi %299, %358 : vector<1x64xi32>
    %c32_i32_125 = arith.constant 32 : i32
    %360 = vector.broadcast %c32_i32_125 : i32 to vector<1x64xi32>
    %361 = arith.cmpi slt, %359, %360 : vector<1x64xi32>
    %362 = arith.andi %357, %361 : vector<1x64xi1>
    %c1_i32_126 = arith.constant 1 : i32
    %363 = vector.broadcast %c1_i32_126 : i32 to vector<1x64xi32>
    %364 = arith.addi %299, %363 : vector<1x64xi32>
    %c0_i32_127 = arith.constant 0 : i32
    %365 = vector.broadcast %c0_i32_127 : i32 to vector<1x64xi32>
    %366 = arith.cmpi sge, %364, %365 : vector<1x64xi32>
    %c1_i32_128 = arith.constant 1 : i32
    %367 = vector.broadcast %c1_i32_128 : i32 to vector<1x64xi32>
    %368 = arith.addi %299, %367 : vector<1x64xi32>
    %c32_i32_129 = arith.constant 32 : i32
    %369 = vector.broadcast %c32_i32_129 : i32 to vector<1x64xi32>
    %370 = arith.cmpi slt, %368, %369 : vector<1x64xi32>
    %371 = arith.andi %366, %370 : vector<1x64xi1>
    %c2_i32_130 = arith.constant 2 : i32
    %372 = vector.broadcast %c2_i32_130 : i32 to vector<1x64xi32>
    %373 = arith.addi %299, %372 : vector<1x64xi32>
    %c0_i32_131 = arith.constant 0 : i32
    %374 = vector.broadcast %c0_i32_131 : i32 to vector<1x64xi32>
    %375 = arith.cmpi sge, %373, %374 : vector<1x64xi32>
    %c2_i32_132 = arith.constant 2 : i32
    %376 = vector.broadcast %c2_i32_132 : i32 to vector<1x64xi32>
    %377 = arith.addi %299, %376 : vector<1x64xi32>
    %c32_i32_133 = arith.constant 32 : i32
    %378 = vector.broadcast %c32_i32_133 : i32 to vector<1x64xi32>
    %379 = arith.cmpi slt, %377, %378 : vector<1x64xi32>
    %380 = arith.andi %375, %379 : vector<1x64xi1>
    %c3_i32_134 = arith.constant 3 : i32
    %381 = vector.broadcast %c3_i32_134 : i32 to vector<1x64xi32>
    %382 = arith.addi %299, %381 : vector<1x64xi32>
    %c0_i32_135 = arith.constant 0 : i32
    %383 = vector.broadcast %c0_i32_135 : i32 to vector<1x64xi32>
    %384 = arith.cmpi sge, %382, %383 : vector<1x64xi32>
    %c3_i32_136 = arith.constant 3 : i32
    %385 = vector.broadcast %c3_i32_136 : i32 to vector<1x64xi32>
    %386 = arith.addi %299, %385 : vector<1x64xi32>
    %c32_i32_137 = arith.constant 32 : i32
    %387 = vector.broadcast %c32_i32_137 : i32 to vector<1x64xi32>
    %388 = arith.cmpi slt, %386, %387 : vector<1x64xi32>
    %389 = arith.andi %384, %388 : vector<1x64xi1>
    %c4_i32_138 = arith.constant 4 : i32
    %390 = vector.broadcast %c4_i32_138 : i32 to vector<1x64xi32>
    %391 = arith.addi %299, %390 : vector<1x64xi32>
    %c0_i32_139 = arith.constant 0 : i32
    %392 = vector.broadcast %c0_i32_139 : i32 to vector<1x64xi32>
    %393 = arith.cmpi sge, %391, %392 : vector<1x64xi32>
    %c4_i32_140 = arith.constant 4 : i32
    %394 = vector.broadcast %c4_i32_140 : i32 to vector<1x64xi32>
    %395 = arith.addi %299, %394 : vector<1x64xi32>
    %c32_i32_141 = arith.constant 32 : i32
    %396 = vector.broadcast %c32_i32_141 : i32 to vector<1x64xi32>
    %397 = arith.cmpi slt, %395, %396 : vector<1x64xi32>
    %398 = arith.andi %393, %397 : vector<1x64xi1>
    %c5_i32_142 = arith.constant 5 : i32
    %399 = vector.broadcast %c5_i32_142 : i32 to vector<1x64xi32>
    %400 = arith.addi %299, %399 : vector<1x64xi32>
    %c0_i32_143 = arith.constant 0 : i32
    %401 = vector.broadcast %c0_i32_143 : i32 to vector<1x64xi32>
    %402 = arith.cmpi sge, %400, %401 : vector<1x64xi32>
    %c5_i32_144 = arith.constant 5 : i32
    %403 = vector.broadcast %c5_i32_144 : i32 to vector<1x64xi32>
    %404 = arith.addi %299, %403 : vector<1x64xi32>
    %c32_i32_145 = arith.constant 32 : i32
    %405 = vector.broadcast %c32_i32_145 : i32 to vector<1x64xi32>
    %406 = arith.cmpi slt, %404, %405 : vector<1x64xi32>
    %407 = arith.andi %402, %406 : vector<1x64xi1>
    %c6_i32_146 = arith.constant 6 : i32
    %408 = vector.broadcast %c6_i32_146 : i32 to vector<1x64xi32>
    %409 = arith.addi %299, %408 : vector<1x64xi32>
    %c0_i32_147 = arith.constant 0 : i32
    %410 = vector.broadcast %c0_i32_147 : i32 to vector<1x64xi32>
    %411 = arith.cmpi sge, %409, %410 : vector<1x64xi32>
    %c6_i32_148 = arith.constant 6 : i32
    %412 = vector.broadcast %c6_i32_148 : i32 to vector<1x64xi32>
    %413 = arith.addi %299, %412 : vector<1x64xi32>
    %c32_i32_149 = arith.constant 32 : i32
    %414 = vector.broadcast %c32_i32_149 : i32 to vector<1x64xi32>
    %415 = arith.cmpi slt, %413, %414 : vector<1x64xi32>
    %416 = arith.andi %411, %415 : vector<1x64xi1>
    %c7_i32_150 = arith.constant 7 : i32
    %417 = vector.broadcast %c7_i32_150 : i32 to vector<1x64xi32>
    %418 = arith.addi %299, %417 : vector<1x64xi32>
    %c0_i32_151 = arith.constant 0 : i32
    %419 = vector.broadcast %c0_i32_151 : i32 to vector<1x64xi32>
    %420 = arith.cmpi sge, %418, %419 : vector<1x64xi32>
    %c7_i32_152 = arith.constant 7 : i32
    %421 = vector.broadcast %c7_i32_152 : i32 to vector<1x64xi32>
    %422 = arith.addi %299, %421 : vector<1x64xi32>
    %c32_i32_153 = arith.constant 32 : i32
    %423 = vector.broadcast %c32_i32_153 : i32 to vector<1x64xi32>
    %424 = arith.cmpi slt, %422, %423 : vector<1x64xi32>
    %425 = arith.andi %420, %424 : vector<1x64xi1>
    %cst_154 = arith.constant 0.000000e+00 : bf16
    %426 = vector.broadcast %cst_154 : bf16 to vector<16x7xbf16>
    %427 = vector.extract_strided_slice %282 {offsets = [0, 0], sizes = [16, 57], strides = [1, 1]} : vector<16x64xbf16> to vector<16x57xbf16>
    %428 = tpu.concatenate %426, %427 in 1 : vector<16x7xbf16>, vector<16x57xbf16> -> vector<16x64xbf16>
    %cst_155 = arith.constant 0.000000e+00 : bf16
    %429 = vector.broadcast %cst_155 : bf16 to vector<16x64xbf16>
    %430 = vector.shape_cast %308 : vector<1x64xi1> to vector<1x64xi1>
    %431 = vector.broadcast %430 : vector<1x64xi1> to vector<16x64xi1>
    %432 = arith.select %431, %428, %429 : vector<16x64xi1>, vector<16x64xbf16>
    %cst_156 = arith.constant 0.000000e+00 : bf16
    %433 = vector.broadcast %cst_156 : bf16 to vector<16x6xbf16>
    %434 = vector.extract_strided_slice %282 {offsets = [0, 0], sizes = [16, 58], strides = [1, 1]} : vector<16x64xbf16> to vector<16x58xbf16>
    %435 = tpu.concatenate %433, %434 in 1 : vector<16x6xbf16>, vector<16x58xbf16> -> vector<16x64xbf16>
    %cst_157 = arith.constant 0.000000e+00 : bf16
    %436 = vector.broadcast %cst_157 : bf16 to vector<16x64xbf16>
    %437 = vector.shape_cast %317 : vector<1x64xi1> to vector<1x64xi1>
    %438 = vector.broadcast %437 : vector<1x64xi1> to vector<16x64xi1>
    %439 = arith.select %438, %435, %436 : vector<16x64xi1>, vector<16x64xbf16>
    %cst_158 = arith.constant 0.000000e+00 : bf16
    %440 = vector.broadcast %cst_158 : bf16 to vector<16x5xbf16>
    %441 = vector.extract_strided_slice %282 {offsets = [0, 0], sizes = [16, 59], strides = [1, 1]} : vector<16x64xbf16> to vector<16x59xbf16>
    %442 = tpu.concatenate %440, %441 in 1 : vector<16x5xbf16>, vector<16x59xbf16> -> vector<16x64xbf16>
    %cst_159 = arith.constant 0.000000e+00 : bf16
    %443 = vector.broadcast %cst_159 : bf16 to vector<16x64xbf16>
    %444 = vector.shape_cast %326 : vector<1x64xi1> to vector<1x64xi1>
    %445 = vector.broadcast %444 : vector<1x64xi1> to vector<16x64xi1>
    %446 = arith.select %445, %442, %443 : vector<16x64xi1>, vector<16x64xbf16>
    %cst_160 = arith.constant 0.000000e+00 : bf16
    %447 = vector.broadcast %cst_160 : bf16 to vector<16x4xbf16>
    %448 = vector.extract_strided_slice %282 {offsets = [0, 0], sizes = [16, 60], strides = [1, 1]} : vector<16x64xbf16> to vector<16x60xbf16>
    %449 = tpu.concatenate %447, %448 in 1 : vector<16x4xbf16>, vector<16x60xbf16> -> vector<16x64xbf16>
    %cst_161 = arith.constant 0.000000e+00 : bf16
    %450 = vector.broadcast %cst_161 : bf16 to vector<16x64xbf16>
    %451 = vector.shape_cast %335 : vector<1x64xi1> to vector<1x64xi1>
    %452 = vector.broadcast %451 : vector<1x64xi1> to vector<16x64xi1>
    %453 = arith.select %452, %449, %450 : vector<16x64xi1>, vector<16x64xbf16>
    %cst_162 = arith.constant 0.000000e+00 : bf16
    %454 = vector.broadcast %cst_162 : bf16 to vector<16x3xbf16>
    %455 = vector.extract_strided_slice %282 {offsets = [0, 0], sizes = [16, 61], strides = [1, 1]} : vector<16x64xbf16> to vector<16x61xbf16>
    %456 = tpu.concatenate %454, %455 in 1 : vector<16x3xbf16>, vector<16x61xbf16> -> vector<16x64xbf16>
    %cst_163 = arith.constant 0.000000e+00 : bf16
    %457 = vector.broadcast %cst_163 : bf16 to vector<16x64xbf16>
    %458 = vector.shape_cast %344 : vector<1x64xi1> to vector<1x64xi1>
    %459 = vector.broadcast %458 : vector<1x64xi1> to vector<16x64xi1>
    %460 = arith.select %459, %456, %457 : vector<16x64xi1>, vector<16x64xbf16>
    %cst_164 = arith.constant 0.000000e+00 : bf16
    %461 = vector.broadcast %cst_164 : bf16 to vector<16x2xbf16>
    %462 = vector.extract_strided_slice %282 {offsets = [0, 0], sizes = [16, 62], strides = [1, 1]} : vector<16x64xbf16> to vector<16x62xbf16>
    %463 = tpu.concatenate %461, %462 in 1 : vector<16x2xbf16>, vector<16x62xbf16> -> vector<16x64xbf16>
    %cst_165 = arith.constant 0.000000e+00 : bf16
    %464 = vector.broadcast %cst_165 : bf16 to vector<16x64xbf16>
    %465 = vector.shape_cast %353 : vector<1x64xi1> to vector<1x64xi1>
    %466 = vector.broadcast %465 : vector<1x64xi1> to vector<16x64xi1>
    %467 = arith.select %466, %463, %464 : vector<16x64xi1>, vector<16x64xbf16>
    %cst_166 = arith.constant 0.000000e+00 : bf16
    %468 = vector.broadcast %cst_166 : bf16 to vector<16x1xbf16>
    %469 = vector.extract_strided_slice %282 {offsets = [0, 0], sizes = [16, 63], strides = [1, 1]} : vector<16x64xbf16> to vector<16x63xbf16>
    %470 = tpu.concatenate %468, %469 in 1 : vector<16x1xbf16>, vector<16x63xbf16> -> vector<16x64xbf16>
    %cst_167 = arith.constant 0.000000e+00 : bf16
    %471 = vector.broadcast %cst_167 : bf16 to vector<16x64xbf16>
    %472 = vector.shape_cast %362 : vector<1x64xi1> to vector<1x64xi1>
    %473 = vector.broadcast %472 : vector<1x64xi1> to vector<16x64xi1>
    %474 = arith.select %473, %470, %471 : vector<16x64xi1>, vector<16x64xbf16>
    %475 = vector.extract_strided_slice %282 {offsets = [0, 1], sizes = [16, 63], strides = [1, 1]} : vector<16x64xbf16> to vector<16x63xbf16>
    %cst_168 = arith.constant 0.000000e+00 : bf16
    %476 = vector.broadcast %cst_168 : bf16 to vector<16x1xbf16>
    %477 = tpu.concatenate %475, %476 in 1 : vector<16x63xbf16>, vector<16x1xbf16> -> vector<16x64xbf16>
    %cst_169 = arith.constant 0.000000e+00 : bf16
    %478 = vector.broadcast %cst_169 : bf16 to vector<16x64xbf16>
    %479 = vector.shape_cast %371 : vector<1x64xi1> to vector<1x64xi1>
    %480 = vector.broadcast %479 : vector<1x64xi1> to vector<16x64xi1>
    %481 = arith.select %480, %477, %478 : vector<16x64xi1>, vector<16x64xbf16>
    %482 = vector.extract_strided_slice %282 {offsets = [0, 2], sizes = [16, 62], strides = [1, 1]} : vector<16x64xbf16> to vector<16x62xbf16>
    %cst_170 = arith.constant 0.000000e+00 : bf16
    %483 = vector.broadcast %cst_170 : bf16 to vector<16x2xbf16>
    %484 = tpu.concatenate %482, %483 in 1 : vector<16x62xbf16>, vector<16x2xbf16> -> vector<16x64xbf16>
    %cst_171 = arith.constant 0.000000e+00 : bf16
    %485 = vector.broadcast %cst_171 : bf16 to vector<16x64xbf16>
    %486 = vector.shape_cast %380 : vector<1x64xi1> to vector<1x64xi1>
    %487 = vector.broadcast %486 : vector<1x64xi1> to vector<16x64xi1>
    %488 = arith.select %487, %484, %485 : vector<16x64xi1>, vector<16x64xbf16>
    %489 = vector.extract_strided_slice %282 {offsets = [0, 3], sizes = [16, 61], strides = [1, 1]} : vector<16x64xbf16> to vector<16x61xbf16>
    %cst_172 = arith.constant 0.000000e+00 : bf16
    %490 = vector.broadcast %cst_172 : bf16 to vector<16x3xbf16>
    %491 = tpu.concatenate %489, %490 in 1 : vector<16x61xbf16>, vector<16x3xbf16> -> vector<16x64xbf16>
    %cst_173 = arith.constant 0.000000e+00 : bf16
    %492 = vector.broadcast %cst_173 : bf16 to vector<16x64xbf16>
    %493 = vector.shape_cast %389 : vector<1x64xi1> to vector<1x64xi1>
    %494 = vector.broadcast %493 : vector<1x64xi1> to vector<16x64xi1>
    %495 = arith.select %494, %491, %492 : vector<16x64xi1>, vector<16x64xbf16>
    %496 = vector.extract_strided_slice %282 {offsets = [0, 4], sizes = [16, 60], strides = [1, 1]} : vector<16x64xbf16> to vector<16x60xbf16>
    %cst_174 = arith.constant 0.000000e+00 : bf16
    %497 = vector.broadcast %cst_174 : bf16 to vector<16x4xbf16>
    %498 = tpu.concatenate %496, %497 in 1 : vector<16x60xbf16>, vector<16x4xbf16> -> vector<16x64xbf16>
    %cst_175 = arith.constant 0.000000e+00 : bf16
    %499 = vector.broadcast %cst_175 : bf16 to vector<16x64xbf16>
    %500 = vector.shape_cast %398 : vector<1x64xi1> to vector<1x64xi1>
    %501 = vector.broadcast %500 : vector<1x64xi1> to vector<16x64xi1>
    %502 = arith.select %501, %498, %499 : vector<16x64xi1>, vector<16x64xbf16>
    %503 = vector.extract_strided_slice %282 {offsets = [0, 5], sizes = [16, 59], strides = [1, 1]} : vector<16x64xbf16> to vector<16x59xbf16>
    %cst_176 = arith.constant 0.000000e+00 : bf16
    %504 = vector.broadcast %cst_176 : bf16 to vector<16x5xbf16>
    %505 = tpu.concatenate %503, %504 in 1 : vector<16x59xbf16>, vector<16x5xbf16> -> vector<16x64xbf16>
    %cst_177 = arith.constant 0.000000e+00 : bf16
    %506 = vector.broadcast %cst_177 : bf16 to vector<16x64xbf16>
    %507 = vector.shape_cast %407 : vector<1x64xi1> to vector<1x64xi1>
    %508 = vector.broadcast %507 : vector<1x64xi1> to vector<16x64xi1>
    %509 = arith.select %508, %505, %506 : vector<16x64xi1>, vector<16x64xbf16>
    %510 = vector.extract_strided_slice %282 {offsets = [0, 6], sizes = [16, 58], strides = [1, 1]} : vector<16x64xbf16> to vector<16x58xbf16>
    %cst_178 = arith.constant 0.000000e+00 : bf16
    %511 = vector.broadcast %cst_178 : bf16 to vector<16x6xbf16>
    %512 = tpu.concatenate %510, %511 in 1 : vector<16x58xbf16>, vector<16x6xbf16> -> vector<16x64xbf16>
    %cst_179 = arith.constant 0.000000e+00 : bf16
    %513 = vector.broadcast %cst_179 : bf16 to vector<16x64xbf16>
    %514 = vector.shape_cast %416 : vector<1x64xi1> to vector<1x64xi1>
    %515 = vector.broadcast %514 : vector<1x64xi1> to vector<16x64xi1>
    %516 = arith.select %515, %512, %513 : vector<16x64xi1>, vector<16x64xbf16>
    %517 = vector.extract_strided_slice %282 {offsets = [0, 7], sizes = [16, 57], strides = [1, 1]} : vector<16x64xbf16> to vector<16x57xbf16>
    %cst_180 = arith.constant 0.000000e+00 : bf16
    %518 = vector.broadcast %cst_180 : bf16 to vector<16x7xbf16>
    %519 = tpu.concatenate %517, %518 in 1 : vector<16x57xbf16>, vector<16x7xbf16> -> vector<16x64xbf16>
    %cst_181 = arith.constant 0.000000e+00 : bf16
    %520 = vector.broadcast %cst_181 : bf16 to vector<16x64xbf16>
    %521 = vector.shape_cast %425 : vector<1x64xi1> to vector<1x64xi1>
    %522 = vector.broadcast %521 : vector<1x64xi1> to vector<16x64xi1>
    %523 = arith.select %522, %519, %520 : vector<16x64xi1>, vector<16x64xbf16>
    %524 = tpu.concatenate %432, %439, %446, %453, %460, %467, %474, %282, %481, %488, %495, %502, %509, %516, %523 in 0 : vector<16x64xbf16>, vector<16x64xbf16>, vector<16x64xbf16>, vector<16x64xbf16>, vector<16x64xbf16>, vector<16x64xbf16>, vector<16x64xbf16>, vector<16x64xbf16>, vector<16x64xbf16>, vector<16x64xbf16>, vector<16x64xbf16>, vector<16x64xbf16>, vector<16x64xbf16>, vector<16x64xbf16>, vector<16x64xbf16> -> vector<240x64xbf16>
    %c16 = arith.constant 16 : index
    %c0_182 = arith.constant 0 : index
    %525 = vector.load %arg1[%c16, %c0_182] : memref<320x512xbf16, #tpu.memory_space<vmem>>, vector<16x240xbf16>
    %cst_183 = arith.constant dense<0.000000e+00> : vector<16x64xf32>
    %526 = tpu.matmul %525, %524, %cst_183 {dimension_numbers = #tpu.dot_dimension_numbers<[1], [0], [0], [1], [0, 0, 1, 1], [], []>} : vector<16x240xbf16>, vector<240x64xbf16>, vector<16x64xf32> -> vector<16x64xf32>
    %c0_184 = arith.constant 0 : index
    %c2 = arith.constant 2 : index
    %527 = vector.load %arg2[%c0_184, %c2] : memref<32x19xf32, #tpu.memory_space<vmem>>, vector<16x1xf32>
    %c0_185 = arith.constant 0 : index
    %c3 = arith.constant 3 : index
    %528 = vector.load %arg2[%c0_185, %c3] : memref<32x19xf32, #tpu.memory_space<vmem>>, vector<16x1xf32>
    %cst_186 = arith.constant dense<0.000000e+00> : vector<16xf32>
    %529 = vector.multi_reduction <add>, %526, %cst_186 [1] : vector<16x64xf32> to vector<16xf32>
    %530 = vector.shape_cast %529 : vector<16xf32> to vector<16x1xf32>
    %531 = arith.mulf %526, %526 : vector<16x64xf32>
    %cst_187 = arith.constant dense<0.000000e+00> : vector<16xf32>
    %532 = vector.multi_reduction <add>, %531, %cst_187 [1] : vector<16x64xf32> to vector<16xf32>
    %533 = vector.shape_cast %532 : vector<16xf32> to vector<16x1xf32>
    %cst_188 = arith.constant 1.562500e-02 : f32
    %534 = vector.broadcast %cst_188 : f32 to vector<16x1xf32>
    %535 = arith.mulf %530, %534 : vector<16x1xf32>
    %cst_189 = arith.constant 1.562500e-02 : f32
    %536 = vector.broadcast %cst_189 : f32 to vector<16x1xf32>
    %537 = arith.mulf %533, %536 : vector<16x1xf32>
    %538 = arith.mulf %535, %535 : vector<16x1xf32>
    %539 = arith.subf %537, %538 : vector<16x1xf32>
    %cst_190 = arith.constant 0.000000e+00 : f32
    %540 = vector.broadcast %cst_190 : f32 to vector<16x1xf32>
    %541 = arith.maximumf %539, %540 : vector<16x1xf32>
    %542 = vector.broadcast %535 : vector<16x1xf32> to vector<16x64xf32>
    %543 = arith.subf %526, %542 : vector<16x64xf32>
    %cst_191 = arith.constant 9.99999974E-6 : f32
    %544 = vector.broadcast %cst_191 : f32 to vector<16x1xf32>
    %545 = arith.addf %541, %544 : vector<16x1xf32>
    %546 = math.rsqrt %545 : vector<16x1xf32>
    %547 = vector.broadcast %546 : vector<16x1xf32> to vector<16x64xf32>
    %548 = arith.mulf %543, %547 : vector<16x64xf32>
    %549 = vector.broadcast %527 : vector<16x1xf32> to vector<16x64xf32>
    %550 = arith.mulf %548, %549 : vector<16x64xf32>
    %551 = vector.broadcast %528 : vector<16x1xf32> to vector<16x64xf32>
    %552 = arith.addf %550, %551 : vector<16x64xf32>
    %cst_192 = arith.constant 0.000000e+00 : f32
    %553 = vector.broadcast %cst_192 : f32 to vector<16x64xf32>
    %554 = arith.cmpf oge, %552, %553 : vector<16x64xf32>
    %cst_193 = arith.constant 1.000000e-01 : f32
    %555 = vector.broadcast %cst_193 : f32 to vector<16x64xf32>
    %556 = arith.mulf %555, %552 : vector<16x64xf32>
    %557 = arith.select %554, %552, %556 : vector<16x64xi1>, vector<16x64xf32>
    %558 = arith.truncf %557 : vector<16x64xf32> to vector<16x64xbf16>
    %c128 = arith.constant 128 : index
    %c0_194 = arith.constant 0 : index
    %559 = vector.load %arg3[%c128, %c0_194] : memref<360x128xf32, #tpu.memory_space<vmem>>, vector<64x32xf32>
    %560 = arith.truncf %559 : vector<64x32xf32> to vector<64x32xbf16>
    %cst_195 = arith.constant dense<0.000000e+00> : vector<16x32xf32>
    %561 = tpu.matmul %558, %560, %cst_195 {dimension_numbers = #tpu.dot_dimension_numbers<[1], [0], [0], [1], [0, 0, 1, 1], [], []>} : vector<16x64xbf16>, vector<64x32xbf16>, vector<16x32xf32> -> vector<16x32xf32>
    %562 = arith.truncf %561 : vector<16x32xf32> to vector<16x32xbf16>
    %563 = tpu.iota {dimensions = array<i32: 1>} : vector<1x32xi32>
    %c16_i32 = arith.constant 16 : i32
    %c0_i32_196 = arith.constant 0 : i32
    %564 = arith.cmpi eq, %c16_i32, %c0_i32_196 : i32
    %c1_i32_197 = arith.constant 1 : i32
    %565 = arith.select %564, %c1_i32_197, %c16_i32 : i32
    %566 = vector.broadcast %565 : i32 to vector<1x32xi32>
    %567 = arith.remsi %563, %566 : vector<1x32xi32>
    %c0_i32_198 = arith.constant 0 : i32
    %568 = vector.broadcast %c0_i32_198 : i32 to vector<1x32xi32>
    %569 = arith.cmpi ne, %567, %568 : vector<1x32xi32>
    %c0_i32_199 = arith.constant 0 : i32
    %570 = vector.broadcast %c0_i32_199 : i32 to vector<1x32xi32>
    %571 = arith.cmpi slt, %567, %570 : vector<1x32xi32>
    %c0_i32_200 = arith.constant 0 : i32
    %572 = arith.cmpi slt, %565, %c0_i32_200 : i32
    %573 = vector.broadcast %572 : i1 to vector<1x32xi1>
    %574 = vector.broadcast %573 : vector<1x32xi1> to vector<1x32xi1>
    %575 = arith.xori %571, %574 : vector<1x32xi1>
    %576 = arith.andi %575, %569 : vector<1x32xi1>
    %577 = vector.broadcast %565 : i32 to vector<1x32xi32>
    %578 = arith.addi %567, %577 : vector<1x32xi32>
    %579 = arith.select %576, %578, %567 : vector<1x32xi1>, vector<1x32xi32>
    %c-7_i32_201 = arith.constant -7 : i32
    %580 = vector.broadcast %c-7_i32_201 : i32 to vector<1x32xi32>
    %581 = arith.addi %579, %580 : vector<1x32xi32>
    %c0_i32_202 = arith.constant 0 : i32
    %582 = vector.broadcast %c0_i32_202 : i32 to vector<1x32xi32>
    %583 = arith.cmpi sge, %581, %582 : vector<1x32xi32>
    %c-7_i32_203 = arith.constant -7 : i32
    %584 = vector.broadcast %c-7_i32_203 : i32 to vector<1x32xi32>
    %585 = arith.addi %579, %584 : vector<1x32xi32>
    %c16_i32_204 = arith.constant 16 : i32
    %586 = vector.broadcast %c16_i32_204 : i32 to vector<1x32xi32>
    %587 = arith.cmpi slt, %585, %586 : vector<1x32xi32>
    %588 = arith.andi %583, %587 : vector<1x32xi1>
    %c-6_i32_205 = arith.constant -6 : i32
    %589 = vector.broadcast %c-6_i32_205 : i32 to vector<1x32xi32>
    %590 = arith.addi %579, %589 : vector<1x32xi32>
    %c0_i32_206 = arith.constant 0 : i32
    %591 = vector.broadcast %c0_i32_206 : i32 to vector<1x32xi32>
    %592 = arith.cmpi sge, %590, %591 : vector<1x32xi32>
    %c-6_i32_207 = arith.constant -6 : i32
    %593 = vector.broadcast %c-6_i32_207 : i32 to vector<1x32xi32>
    %594 = arith.addi %579, %593 : vector<1x32xi32>
    %c16_i32_208 = arith.constant 16 : i32
    %595 = vector.broadcast %c16_i32_208 : i32 to vector<1x32xi32>
    %596 = arith.cmpi slt, %594, %595 : vector<1x32xi32>
    %597 = arith.andi %592, %596 : vector<1x32xi1>
    %c-5_i32_209 = arith.constant -5 : i32
    %598 = vector.broadcast %c-5_i32_209 : i32 to vector<1x32xi32>
    %599 = arith.addi %579, %598 : vector<1x32xi32>
    %c0_i32_210 = arith.constant 0 : i32
    %600 = vector.broadcast %c0_i32_210 : i32 to vector<1x32xi32>
    %601 = arith.cmpi sge, %599, %600 : vector<1x32xi32>
    %c-5_i32_211 = arith.constant -5 : i32
    %602 = vector.broadcast %c-5_i32_211 : i32 to vector<1x32xi32>
    %603 = arith.addi %579, %602 : vector<1x32xi32>
    %c16_i32_212 = arith.constant 16 : i32
    %604 = vector.broadcast %c16_i32_212 : i32 to vector<1x32xi32>
    %605 = arith.cmpi slt, %603, %604 : vector<1x32xi32>
    %606 = arith.andi %601, %605 : vector<1x32xi1>
    %c-4_i32_213 = arith.constant -4 : i32
    %607 = vector.broadcast %c-4_i32_213 : i32 to vector<1x32xi32>
    %608 = arith.addi %579, %607 : vector<1x32xi32>
    %c0_i32_214 = arith.constant 0 : i32
    %609 = vector.broadcast %c0_i32_214 : i32 to vector<1x32xi32>
    %610 = arith.cmpi sge, %608, %609 : vector<1x32xi32>
    %c-4_i32_215 = arith.constant -4 : i32
    %611 = vector.broadcast %c-4_i32_215 : i32 to vector<1x32xi32>
    %612 = arith.addi %579, %611 : vector<1x32xi32>
    %c16_i32_216 = arith.constant 16 : i32
    %613 = vector.broadcast %c16_i32_216 : i32 to vector<1x32xi32>
    %614 = arith.cmpi slt, %612, %613 : vector<1x32xi32>
    %615 = arith.andi %610, %614 : vector<1x32xi1>
    %c-3_i32_217 = arith.constant -3 : i32
    %616 = vector.broadcast %c-3_i32_217 : i32 to vector<1x32xi32>
    %617 = arith.addi %579, %616 : vector<1x32xi32>
    %c0_i32_218 = arith.constant 0 : i32
    %618 = vector.broadcast %c0_i32_218 : i32 to vector<1x32xi32>
    %619 = arith.cmpi sge, %617, %618 : vector<1x32xi32>
    %c-3_i32_219 = arith.constant -3 : i32
    %620 = vector.broadcast %c-3_i32_219 : i32 to vector<1x32xi32>
    %621 = arith.addi %579, %620 : vector<1x32xi32>
    %c16_i32_220 = arith.constant 16 : i32
    %622 = vector.broadcast %c16_i32_220 : i32 to vector<1x32xi32>
    %623 = arith.cmpi slt, %621, %622 : vector<1x32xi32>
    %624 = arith.andi %619, %623 : vector<1x32xi1>
    %c-2_i32_221 = arith.constant -2 : i32
    %625 = vector.broadcast %c-2_i32_221 : i32 to vector<1x32xi32>
    %626 = arith.addi %579, %625 : vector<1x32xi32>
    %c0_i32_222 = arith.constant 0 : i32
    %627 = vector.broadcast %c0_i32_222 : i32 to vector<1x32xi32>
    %628 = arith.cmpi sge, %626, %627 : vector<1x32xi32>
    %c-2_i32_223 = arith.constant -2 : i32
    %629 = vector.broadcast %c-2_i32_223 : i32 to vector<1x32xi32>
    %630 = arith.addi %579, %629 : vector<1x32xi32>
    %c16_i32_224 = arith.constant 16 : i32
    %631 = vector.broadcast %c16_i32_224 : i32 to vector<1x32xi32>
    %632 = arith.cmpi slt, %630, %631 : vector<1x32xi32>
    %633 = arith.andi %628, %632 : vector<1x32xi1>
    %c-1_i32_225 = arith.constant -1 : i32
    %634 = vector.broadcast %c-1_i32_225 : i32 to vector<1x32xi32>
    %635 = arith.addi %579, %634 : vector<1x32xi32>
    %c0_i32_226 = arith.constant 0 : i32
    %636 = vector.broadcast %c0_i32_226 : i32 to vector<1x32xi32>
    %637 = arith.cmpi sge, %635, %636 : vector<1x32xi32>
    %c-1_i32_227 = arith.constant -1 : i32
    %638 = vector.broadcast %c-1_i32_227 : i32 to vector<1x32xi32>
    %639 = arith.addi %579, %638 : vector<1x32xi32>
    %c16_i32_228 = arith.constant 16 : i32
    %640 = vector.broadcast %c16_i32_228 : i32 to vector<1x32xi32>
    %641 = arith.cmpi slt, %639, %640 : vector<1x32xi32>
    %642 = arith.andi %637, %641 : vector<1x32xi1>
    %c1_i32_229 = arith.constant 1 : i32
    %643 = vector.broadcast %c1_i32_229 : i32 to vector<1x32xi32>
    %644 = arith.addi %579, %643 : vector<1x32xi32>
    %c0_i32_230 = arith.constant 0 : i32
    %645 = vector.broadcast %c0_i32_230 : i32 to vector<1x32xi32>
    %646 = arith.cmpi sge, %644, %645 : vector<1x32xi32>
    %c1_i32_231 = arith.constant 1 : i32
    %647 = vector.broadcast %c1_i32_231 : i32 to vector<1x32xi32>
    %648 = arith.addi %579, %647 : vector<1x32xi32>
    %c16_i32_232 = arith.constant 16 : i32
    %649 = vector.broadcast %c16_i32_232 : i32 to vector<1x32xi32>
    %650 = arith.cmpi slt, %648, %649 : vector<1x32xi32>
    %651 = arith.andi %646, %650 : vector<1x32xi1>
    %c2_i32_233 = arith.constant 2 : i32
    %652 = vector.broadcast %c2_i32_233 : i32 to vector<1x32xi32>
    %653 = arith.addi %579, %652 : vector<1x32xi32>
    %c0_i32_234 = arith.constant 0 : i32
    %654 = vector.broadcast %c0_i32_234 : i32 to vector<1x32xi32>
    %655 = arith.cmpi sge, %653, %654 : vector<1x32xi32>
    %c2_i32_235 = arith.constant 2 : i32
    %656 = vector.broadcast %c2_i32_235 : i32 to vector<1x32xi32>
    %657 = arith.addi %579, %656 : vector<1x32xi32>
    %c16_i32_236 = arith.constant 16 : i32
    %658 = vector.broadcast %c16_i32_236 : i32 to vector<1x32xi32>
    %659 = arith.cmpi slt, %657, %658 : vector<1x32xi32>
    %660 = arith.andi %655, %659 : vector<1x32xi1>
    %c3_i32_237 = arith.constant 3 : i32
    %661 = vector.broadcast %c3_i32_237 : i32 to vector<1x32xi32>
    %662 = arith.addi %579, %661 : vector<1x32xi32>
    %c0_i32_238 = arith.constant 0 : i32
    %663 = vector.broadcast %c0_i32_238 : i32 to vector<1x32xi32>
    %664 = arith.cmpi sge, %662, %663 : vector<1x32xi32>
    %c3_i32_239 = arith.constant 3 : i32
    %665 = vector.broadcast %c3_i32_239 : i32 to vector<1x32xi32>
    %666 = arith.addi %579, %665 : vector<1x32xi32>
    %c16_i32_240 = arith.constant 16 : i32
    %667 = vector.broadcast %c16_i32_240 : i32 to vector<1x32xi32>
    %668 = arith.cmpi slt, %666, %667 : vector<1x32xi32>
    %669 = arith.andi %664, %668 : vector<1x32xi1>
    %c4_i32_241 = arith.constant 4 : i32
    %670 = vector.broadcast %c4_i32_241 : i32 to vector<1x32xi32>
    %671 = arith.addi %579, %670 : vector<1x32xi32>
    %c0_i32_242 = arith.constant 0 : i32
    %672 = vector.broadcast %c0_i32_242 : i32 to vector<1x32xi32>
    %673 = arith.cmpi sge, %671, %672 : vector<1x32xi32>
    %c4_i32_243 = arith.constant 4 : i32
    %674 = vector.broadcast %c4_i32_243 : i32 to vector<1x32xi32>
    %675 = arith.addi %579, %674 : vector<1x32xi32>
    %c16_i32_244 = arith.constant 16 : i32
    %676 = vector.broadcast %c16_i32_244 : i32 to vector<1x32xi32>
    %677 = arith.cmpi slt, %675, %676 : vector<1x32xi32>
    %678 = arith.andi %673, %677 : vector<1x32xi1>
    %c5_i32_245 = arith.constant 5 : i32
    %679 = vector.broadcast %c5_i32_245 : i32 to vector<1x32xi32>
    %680 = arith.addi %579, %679 : vector<1x32xi32>
    %c0_i32_246 = arith.constant 0 : i32
    %681 = vector.broadcast %c0_i32_246 : i32 to vector<1x32xi32>
    %682 = arith.cmpi sge, %680, %681 : vector<1x32xi32>
    %c5_i32_247 = arith.constant 5 : i32
    %683 = vector.broadcast %c5_i32_247 : i32 to vector<1x32xi32>
    %684 = arith.addi %579, %683 : vector<1x32xi32>
    %c16_i32_248 = arith.constant 16 : i32
    %685 = vector.broadcast %c16_i32_248 : i32 to vector<1x32xi32>
    %686 = arith.cmpi slt, %684, %685 : vector<1x32xi32>
    %687 = arith.andi %682, %686 : vector<1x32xi1>
    %c6_i32_249 = arith.constant 6 : i32
    %688 = vector.broadcast %c6_i32_249 : i32 to vector<1x32xi32>
    %689 = arith.addi %579, %688 : vector<1x32xi32>
    %c0_i32_250 = arith.constant 0 : i32
    %690 = vector.broadcast %c0_i32_250 : i32 to vector<1x32xi32>
    %691 = arith.cmpi sge, %689, %690 : vector<1x32xi32>
    %c6_i32_251 = arith.constant 6 : i32
    %692 = vector.broadcast %c6_i32_251 : i32 to vector<1x32xi32>
    %693 = arith.addi %579, %692 : vector<1x32xi32>
    %c16_i32_252 = arith.constant 16 : i32
    %694 = vector.broadcast %c16_i32_252 : i32 to vector<1x32xi32>
    %695 = arith.cmpi slt, %693, %694 : vector<1x32xi32>
    %696 = arith.andi %691, %695 : vector<1x32xi1>
    %c7_i32_253 = arith.constant 7 : i32
    %697 = vector.broadcast %c7_i32_253 : i32 to vector<1x32xi32>
    %698 = arith.addi %579, %697 : vector<1x32xi32>
    %c0_i32_254 = arith.constant 0 : i32
    %699 = vector.broadcast %c0_i32_254 : i32 to vector<1x32xi32>
    %700 = arith.cmpi sge, %698, %699 : vector<1x32xi32>
    %c7_i32_255 = arith.constant 7 : i32
    %701 = vector.broadcast %c7_i32_255 : i32 to vector<1x32xi32>
    %702 = arith.addi %579, %701 : vector<1x32xi32>
    %c16_i32_256 = arith.constant 16 : i32
    %703 = vector.broadcast %c16_i32_256 : i32 to vector<1x32xi32>
    %704 = arith.cmpi slt, %702, %703 : vector<1x32xi32>
    %705 = arith.andi %700, %704 : vector<1x32xi1>
    %cst_257 = arith.constant 0.000000e+00 : bf16
    %706 = vector.broadcast %cst_257 : bf16 to vector<16x7xbf16>
    %707 = vector.extract_strided_slice %562 {offsets = [0, 0], sizes = [16, 25], strides = [1, 1]} : vector<16x32xbf16> to vector<16x25xbf16>
    %708 = tpu.concatenate %706, %707 in 1 : vector<16x7xbf16>, vector<16x25xbf16> -> vector<16x32xbf16>
    %cst_258 = arith.constant 0.000000e+00 : bf16
    %709 = vector.broadcast %cst_258 : bf16 to vector<16x32xbf16>
    %710 = vector.shape_cast %588 : vector<1x32xi1> to vector<1x32xi1>
    %711 = vector.broadcast %710 : vector<1x32xi1> to vector<16x32xi1>
    %712 = arith.select %711, %708, %709 : vector<16x32xi1>, vector<16x32xbf16>
    %cst_259 = arith.constant 0.000000e+00 : bf16
    %713 = vector.broadcast %cst_259 : bf16 to vector<16x6xbf16>
    %714 = vector.extract_strided_slice %562 {offsets = [0, 0], sizes = [16, 26], strides = [1, 1]} : vector<16x32xbf16> to vector<16x26xbf16>
    %715 = tpu.concatenate %713, %714 in 1 : vector<16x6xbf16>, vector<16x26xbf16> -> vector<16x32xbf16>
    %cst_260 = arith.constant 0.000000e+00 : bf16
    %716 = vector.broadcast %cst_260 : bf16 to vector<16x32xbf16>
    %717 = vector.shape_cast %597 : vector<1x32xi1> to vector<1x32xi1>
    %718 = vector.broadcast %717 : vector<1x32xi1> to vector<16x32xi1>
    %719 = arith.select %718, %715, %716 : vector<16x32xi1>, vector<16x32xbf16>
    %cst_261 = arith.constant 0.000000e+00 : bf16
    %720 = vector.broadcast %cst_261 : bf16 to vector<16x5xbf16>
    %721 = vector.extract_strided_slice %562 {offsets = [0, 0], sizes = [16, 27], strides = [1, 1]} : vector<16x32xbf16> to vector<16x27xbf16>
    %722 = tpu.concatenate %720, %721 in 1 : vector<16x5xbf16>, vector<16x27xbf16> -> vector<16x32xbf16>
    %cst_262 = arith.constant 0.000000e+00 : bf16
    %723 = vector.broadcast %cst_262 : bf16 to vector<16x32xbf16>
    %724 = vector.shape_cast %606 : vector<1x32xi1> to vector<1x32xi1>
    %725 = vector.broadcast %724 : vector<1x32xi1> to vector<16x32xi1>
    %726 = arith.select %725, %722, %723 : vector<16x32xi1>, vector<16x32xbf16>
    %cst_263 = arith.constant 0.000000e+00 : bf16
    %727 = vector.broadcast %cst_263 : bf16 to vector<16x4xbf16>
    %728 = vector.extract_strided_slice %562 {offsets = [0, 0], sizes = [16, 28], strides = [1, 1]} : vector<16x32xbf16> to vector<16x28xbf16>
    %729 = tpu.concatenate %727, %728 in 1 : vector<16x4xbf16>, vector<16x28xbf16> -> vector<16x32xbf16>
    %cst_264 = arith.constant 0.000000e+00 : bf16
    %730 = vector.broadcast %cst_264 : bf16 to vector<16x32xbf16>
    %731 = vector.shape_cast %615 : vector<1x32xi1> to vector<1x32xi1>
    %732 = vector.broadcast %731 : vector<1x32xi1> to vector<16x32xi1>
    %733 = arith.select %732, %729, %730 : vector<16x32xi1>, vector<16x32xbf16>
    %cst_265 = arith.constant 0.000000e+00 : bf16
    %734 = vector.broadcast %cst_265 : bf16 to vector<16x3xbf16>
    %735 = vector.extract_strided_slice %562 {offsets = [0, 0], sizes = [16, 29], strides = [1, 1]} : vector<16x32xbf16> to vector<16x29xbf16>
    %736 = tpu.concatenate %734, %735 in 1 : vector<16x3xbf16>, vector<16x29xbf16> -> vector<16x32xbf16>
    %cst_266 = arith.constant 0.000000e+00 : bf16
    %737 = vector.broadcast %cst_266 : bf16 to vector<16x32xbf16>
    %738 = vector.shape_cast %624 : vector<1x32xi1> to vector<1x32xi1>
    %739 = vector.broadcast %738 : vector<1x32xi1> to vector<16x32xi1>
    %740 = arith.select %739, %736, %737 : vector<16x32xi1>, vector<16x32xbf16>
    %cst_267 = arith.constant 0.000000e+00 : bf16
    %741 = vector.broadcast %cst_267 : bf16 to vector<16x2xbf16>
    %742 = vector.extract_strided_slice %562 {offsets = [0, 0], sizes = [16, 30], strides = [1, 1]} : vector<16x32xbf16> to vector<16x30xbf16>
    %743 = tpu.concatenate %741, %742 in 1 : vector<16x2xbf16>, vector<16x30xbf16> -> vector<16x32xbf16>
    %cst_268 = arith.constant 0.000000e+00 : bf16
    %744 = vector.broadcast %cst_268 : bf16 to vector<16x32xbf16>
    %745 = vector.shape_cast %633 : vector<1x32xi1> to vector<1x32xi1>
    %746 = vector.broadcast %745 : vector<1x32xi1> to vector<16x32xi1>
    %747 = arith.select %746, %743, %744 : vector<16x32xi1>, vector<16x32xbf16>
    %cst_269 = arith.constant 0.000000e+00 : bf16
    %748 = vector.broadcast %cst_269 : bf16 to vector<16x1xbf16>
    %749 = vector.extract_strided_slice %562 {offsets = [0, 0], sizes = [16, 31], strides = [1, 1]} : vector<16x32xbf16> to vector<16x31xbf16>
    %750 = tpu.concatenate %748, %749 in 1 : vector<16x1xbf16>, vector<16x31xbf16> -> vector<16x32xbf16>
    %cst_270 = arith.constant 0.000000e+00 : bf16
    %751 = vector.broadcast %cst_270 : bf16 to vector<16x32xbf16>
    %752 = vector.shape_cast %642 : vector<1x32xi1> to vector<1x32xi1>
    %753 = vector.broadcast %752 : vector<1x32xi1> to vector<16x32xi1>
    %754 = arith.select %753, %750, %751 : vector<16x32xi1>, vector<16x32xbf16>
    %755 = vector.extract_strided_slice %562 {offsets = [0, 1], sizes = [16, 31], strides = [1, 1]} : vector<16x32xbf16> to vector<16x31xbf16>
    %cst_271 = arith.constant 0.000000e+00 : bf16
    %756 = vector.broadcast %cst_271 : bf16 to vector<16x1xbf16>
    %757 = tpu.concatenate %755, %756 in 1 : vector<16x31xbf16>, vector<16x1xbf16> -> vector<16x32xbf16>
    %cst_272 = arith.constant 0.000000e+00 : bf16
    %758 = vector.broadcast %cst_272 : bf16 to vector<16x32xbf16>
    %759 = vector.shape_cast %651 : vector<1x32xi1> to vector<1x32xi1>
    %760 = vector.broadcast %759 : vector<1x32xi1> to vector<16x32xi1>
    %761 = arith.select %760, %757, %758 : vector<16x32xi1>, vector<16x32xbf16>
    %762 = vector.extract_strided_slice %562 {offsets = [0, 2], sizes = [16, 30], strides = [1, 1]} : vector<16x32xbf16> to vector<16x30xbf16>
    %cst_273 = arith.constant 0.000000e+00 : bf16
    %763 = vector.broadcast %cst_273 : bf16 to vector<16x2xbf16>
    %764 = tpu.concatenate %762, %763 in 1 : vector<16x30xbf16>, vector<16x2xbf16> -> vector<16x32xbf16>
    %cst_274 = arith.constant 0.000000e+00 : bf16
    %765 = vector.broadcast %cst_274 : bf16 to vector<16x32xbf16>
    %766 = vector.shape_cast %660 : vector<1x32xi1> to vector<1x32xi1>
    %767 = vector.broadcast %766 : vector<1x32xi1> to vector<16x32xi1>
    %768 = arith.select %767, %764, %765 : vector<16x32xi1>, vector<16x32xbf16>
    %769 = vector.extract_strided_slice %562 {offsets = [0, 3], sizes = [16, 29], strides = [1, 1]} : vector<16x32xbf16> to vector<16x29xbf16>
    %cst_275 = arith.constant 0.000000e+00 : bf16
    %770 = vector.broadcast %cst_275 : bf16 to vector<16x3xbf16>
    %771 = tpu.concatenate %769, %770 in 1 : vector<16x29xbf16>, vector<16x3xbf16> -> vector<16x32xbf16>
    %cst_276 = arith.constant 0.000000e+00 : bf16
    %772 = vector.broadcast %cst_276 : bf16 to vector<16x32xbf16>
    %773 = vector.shape_cast %669 : vector<1x32xi1> to vector<1x32xi1>
    %774 = vector.broadcast %773 : vector<1x32xi1> to vector<16x32xi1>
    %775 = arith.select %774, %771, %772 : vector<16x32xi1>, vector<16x32xbf16>
    %776 = vector.extract_strided_slice %562 {offsets = [0, 4], sizes = [16, 28], strides = [1, 1]} : vector<16x32xbf16> to vector<16x28xbf16>
    %cst_277 = arith.constant 0.000000e+00 : bf16
    %777 = vector.broadcast %cst_277 : bf16 to vector<16x4xbf16>
    %778 = tpu.concatenate %776, %777 in 1 : vector<16x28xbf16>, vector<16x4xbf16> -> vector<16x32xbf16>
    %cst_278 = arith.constant 0.000000e+00 : bf16
    %779 = vector.broadcast %cst_278 : bf16 to vector<16x32xbf16>
    %780 = vector.shape_cast %678 : vector<1x32xi1> to vector<1x32xi1>
    %781 = vector.broadcast %780 : vector<1x32xi1> to vector<16x32xi1>
    %782 = arith.select %781, %778, %779 : vector<16x32xi1>, vector<16x32xbf16>
    %783 = vector.extract_strided_slice %562 {offsets = [0, 5], sizes = [16, 27], strides = [1, 1]} : vector<16x32xbf16> to vector<16x27xbf16>
    %cst_279 = arith.constant 0.000000e+00 : bf16
    %784 = vector.broadcast %cst_279 : bf16 to vector<16x5xbf16>
    %785 = tpu.concatenate %783, %784 in 1 : vector<16x27xbf16>, vector<16x5xbf16> -> vector<16x32xbf16>
    %cst_280 = arith.constant 0.000000e+00 : bf16
    %786 = vector.broadcast %cst_280 : bf16 to vector<16x32xbf16>
    %787 = vector.shape_cast %687 : vector<1x32xi1> to vector<1x32xi1>
    %788 = vector.broadcast %787 : vector<1x32xi1> to vector<16x32xi1>
    %789 = arith.select %788, %785, %786 : vector<16x32xi1>, vector<16x32xbf16>
    %790 = vector.extract_strided_slice %562 {offsets = [0, 6], sizes = [16, 26], strides = [1, 1]} : vector<16x32xbf16> to vector<16x26xbf16>
    %cst_281 = arith.constant 0.000000e+00 : bf16
    %791 = vector.broadcast %cst_281 : bf16 to vector<16x6xbf16>
    %792 = tpu.concatenate %790, %791 in 1 : vector<16x26xbf16>, vector<16x6xbf16> -> vector<16x32xbf16>
    %cst_282 = arith.constant 0.000000e+00 : bf16
    %793 = vector.broadcast %cst_282 : bf16 to vector<16x32xbf16>
    %794 = vector.shape_cast %696 : vector<1x32xi1> to vector<1x32xi1>
    %795 = vector.broadcast %794 : vector<1x32xi1> to vector<16x32xi1>
    %796 = arith.select %795, %792, %793 : vector<16x32xi1>, vector<16x32xbf16>
    %797 = vector.extract_strided_slice %562 {offsets = [0, 7], sizes = [16, 25], strides = [1, 1]} : vector<16x32xbf16> to vector<16x25xbf16>
    %cst_283 = arith.constant 0.000000e+00 : bf16
    %798 = vector.broadcast %cst_283 : bf16 to vector<16x7xbf16>
    %799 = tpu.concatenate %797, %798 in 1 : vector<16x25xbf16>, vector<16x7xbf16> -> vector<16x32xbf16>
    %cst_284 = arith.constant 0.000000e+00 : bf16
    %800 = vector.broadcast %cst_284 : bf16 to vector<16x32xbf16>
    %801 = vector.shape_cast %705 : vector<1x32xi1> to vector<1x32xi1>
    %802 = vector.broadcast %801 : vector<1x32xi1> to vector<16x32xi1>
    %803 = arith.select %802, %799, %800 : vector<16x32xi1>, vector<16x32xbf16>
    %804 = tpu.concatenate %712, %719, %726, %733, %740, %747, %754, %562, %761, %768, %775, %782, %789, %796, %803 in 0 : vector<16x32xbf16>, vector<16x32xbf16>, vector<16x32xbf16>, vector<16x32xbf16>, vector<16x32xbf16>, vector<16x32xbf16>, vector<16x32xbf16>, vector<16x32xbf16>, vector<16x32xbf16>, vector<16x32xbf16>, vector<16x32xbf16>, vector<16x32xbf16>, vector<16x32xbf16>, vector<16x32xbf16>, vector<16x32xbf16> -> vector<240x32xbf16>
    %c32 = arith.constant 32 : index
    %c0_285 = arith.constant 0 : index
    %805 = vector.load %arg1[%c32, %c0_285] : memref<320x512xbf16, #tpu.memory_space<vmem>>, vector<32x240xbf16>
    %cst_286 = arith.constant dense<0.000000e+00> : vector<32x32xf32>
    %806 = tpu.matmul %805, %804, %cst_286 {dimension_numbers = #tpu.dot_dimension_numbers<[1], [0], [0], [1], [0, 0, 1, 1], [], []>} : vector<32x240xbf16>, vector<240x32xbf16>, vector<32x32xf32> -> vector<32x32xf32>
    %c0_287 = arith.constant 0 : index
    %c4 = arith.constant 4 : index
    %807 = vector.load %arg2[%c0_287, %c4] : memref<32x19xf32, #tpu.memory_space<vmem>>, vector<32x1xf32>
    %c0_288 = arith.constant 0 : index
    %c5 = arith.constant 5 : index
    %808 = vector.load %arg2[%c0_288, %c5] : memref<32x19xf32, #tpu.memory_space<vmem>>, vector<32x1xf32>
    %cst_289 = arith.constant dense<0.000000e+00> : vector<32xf32>
    %809 = vector.multi_reduction <add>, %806, %cst_289 [1] : vector<32x32xf32> to vector<32xf32>
    %810 = vector.shape_cast %809 : vector<32xf32> to vector<32x1xf32>
    %811 = arith.mulf %806, %806 : vector<32x32xf32>
    %cst_290 = arith.constant dense<0.000000e+00> : vector<32xf32>
    %812 = vector.multi_reduction <add>, %811, %cst_290 [1] : vector<32x32xf32> to vector<32xf32>
    %813 = vector.shape_cast %812 : vector<32xf32> to vector<32x1xf32>
    %cst_291 = arith.constant 3.125000e-02 : f32
    %814 = vector.broadcast %cst_291 : f32 to vector<32x1xf32>
    %815 = arith.mulf %810, %814 : vector<32x1xf32>
    %cst_292 = arith.constant 3.125000e-02 : f32
    %816 = vector.broadcast %cst_292 : f32 to vector<32x1xf32>
    %817 = arith.mulf %813, %816 : vector<32x1xf32>
    %818 = arith.mulf %815, %815 : vector<32x1xf32>
    %819 = arith.subf %817, %818 : vector<32x1xf32>
    %cst_293 = arith.constant 0.000000e+00 : f32
    %820 = vector.broadcast %cst_293 : f32 to vector<32x1xf32>
    %821 = arith.maximumf %819, %820 : vector<32x1xf32>
    %822 = vector.broadcast %815 : vector<32x1xf32> to vector<32x32xf32>
    %823 = arith.subf %806, %822 : vector<32x32xf32>
    %cst_294 = arith.constant 9.99999974E-6 : f32
    %824 = vector.broadcast %cst_294 : f32 to vector<32x1xf32>
    %825 = arith.addf %821, %824 : vector<32x1xf32>
    %826 = math.rsqrt %825 : vector<32x1xf32>
    %827 = vector.broadcast %826 : vector<32x1xf32> to vector<32x32xf32>
    %828 = arith.mulf %823, %827 : vector<32x32xf32>
    %829 = vector.broadcast %807 : vector<32x1xf32> to vector<32x32xf32>
    %830 = arith.mulf %828, %829 : vector<32x32xf32>
    %831 = vector.broadcast %808 : vector<32x1xf32> to vector<32x32xf32>
    %832 = arith.addf %830, %831 : vector<32x32xf32>
    %cst_295 = arith.constant 0.000000e+00 : f32
    %833 = vector.broadcast %cst_295 : f32 to vector<32x32xf32>
    %834 = arith.cmpf oge, %832, %833 : vector<32x32xf32>
    %cst_296 = arith.constant 1.000000e-01 : f32
    %835 = vector.broadcast %cst_296 : f32 to vector<32x32xf32>
    %836 = arith.mulf %835, %832 : vector<32x32xf32>
    %837 = arith.select %834, %832, %836 : vector<32x32xi1>, vector<32x32xf32>
    %838 = arith.truncf %837 : vector<32x32xf32> to vector<32x32xbf16>
    %c192 = arith.constant 192 : index
    %c0_297 = arith.constant 0 : index
    %839 = vector.load %arg3[%c192, %c0_297] : memref<360x128xf32, #tpu.memory_space<vmem>>, vector<32x16xf32>
    %840 = arith.truncf %839 : vector<32x16xf32> to vector<32x16xbf16>
    %cst_298 = arith.constant dense<0.000000e+00> : vector<32x16xf32>
    %841 = tpu.matmul %838, %840, %cst_298 {dimension_numbers = #tpu.dot_dimension_numbers<[1], [0], [0], [1], [0, 0, 1, 1], [], []>} : vector<32x32xbf16>, vector<32x16xbf16>, vector<32x16xf32> -> vector<32x16xf32>
    %842 = arith.truncf %841 : vector<32x16xf32> to vector<32x16xbf16>
    %843 = tpu.iota {dimensions = array<i32: 1>} : vector<1x16xi32>
    %c8_i32 = arith.constant 8 : i32
    %c0_i32_299 = arith.constant 0 : i32
    %844 = arith.cmpi eq, %c8_i32, %c0_i32_299 : i32
    %c1_i32_300 = arith.constant 1 : i32
    %845 = arith.select %844, %c1_i32_300, %c8_i32 : i32
    %846 = vector.broadcast %845 : i32 to vector<1x16xi32>
    %847 = arith.remsi %843, %846 : vector<1x16xi32>
    %c0_i32_301 = arith.constant 0 : i32
    %848 = vector.broadcast %c0_i32_301 : i32 to vector<1x16xi32>
    %849 = arith.cmpi ne, %847, %848 : vector<1x16xi32>
    %c0_i32_302 = arith.constant 0 : i32
    %850 = vector.broadcast %c0_i32_302 : i32 to vector<1x16xi32>
    %851 = arith.cmpi slt, %847, %850 : vector<1x16xi32>
    %c0_i32_303 = arith.constant 0 : i32
    %852 = arith.cmpi slt, %845, %c0_i32_303 : i32
    %853 = vector.broadcast %852 : i1 to vector<1x16xi1>
    %854 = vector.broadcast %853 : vector<1x16xi1> to vector<1x16xi1>
    %855 = arith.xori %851, %854 : vector<1x16xi1>
    %856 = arith.andi %855, %849 : vector<1x16xi1>
    %857 = vector.broadcast %845 : i32 to vector<1x16xi32>
    %858 = arith.addi %847, %857 : vector<1x16xi32>
    %859 = arith.select %856, %858, %847 : vector<1x16xi1>, vector<1x16xi32>
    %c-7_i32_304 = arith.constant -7 : i32
    %860 = vector.broadcast %c-7_i32_304 : i32 to vector<1x16xi32>
    %861 = arith.addi %859, %860 : vector<1x16xi32>
    %c0_i32_305 = arith.constant 0 : i32
    %862 = vector.broadcast %c0_i32_305 : i32 to vector<1x16xi32>
    %863 = arith.cmpi sge, %861, %862 : vector<1x16xi32>
    %c-7_i32_306 = arith.constant -7 : i32
    %864 = vector.broadcast %c-7_i32_306 : i32 to vector<1x16xi32>
    %865 = arith.addi %859, %864 : vector<1x16xi32>
    %c8_i32_307 = arith.constant 8 : i32
    %866 = vector.broadcast %c8_i32_307 : i32 to vector<1x16xi32>
    %867 = arith.cmpi slt, %865, %866 : vector<1x16xi32>
    %868 = arith.andi %863, %867 : vector<1x16xi1>
    %c-6_i32_308 = arith.constant -6 : i32
    %869 = vector.broadcast %c-6_i32_308 : i32 to vector<1x16xi32>
    %870 = arith.addi %859, %869 : vector<1x16xi32>
    %c0_i32_309 = arith.constant 0 : i32
    %871 = vector.broadcast %c0_i32_309 : i32 to vector<1x16xi32>
    %872 = arith.cmpi sge, %870, %871 : vector<1x16xi32>
    %c-6_i32_310 = arith.constant -6 : i32
    %873 = vector.broadcast %c-6_i32_310 : i32 to vector<1x16xi32>
    %874 = arith.addi %859, %873 : vector<1x16xi32>
    %c8_i32_311 = arith.constant 8 : i32
    %875 = vector.broadcast %c8_i32_311 : i32 to vector<1x16xi32>
    %876 = arith.cmpi slt, %874, %875 : vector<1x16xi32>
    %877 = arith.andi %872, %876 : vector<1x16xi1>
    %c-5_i32_312 = arith.constant -5 : i32
    %878 = vector.broadcast %c-5_i32_312 : i32 to vector<1x16xi32>
    %879 = arith.addi %859, %878 : vector<1x16xi32>
    %c0_i32_313 = arith.constant 0 : i32
    %880 = vector.broadcast %c0_i32_313 : i32 to vector<1x16xi32>
    %881 = arith.cmpi sge, %879, %880 : vector<1x16xi32>
    %c-5_i32_314 = arith.constant -5 : i32
    %882 = vector.broadcast %c-5_i32_314 : i32 to vector<1x16xi32>
    %883 = arith.addi %859, %882 : vector<1x16xi32>
    %c8_i32_315 = arith.constant 8 : i32
    %884 = vector.broadcast %c8_i32_315 : i32 to vector<1x16xi32>
    %885 = arith.cmpi slt, %883, %884 : vector<1x16xi32>
    %886 = arith.andi %881, %885 : vector<1x16xi1>
    %c-4_i32_316 = arith.constant -4 : i32
    %887 = vector.broadcast %c-4_i32_316 : i32 to vector<1x16xi32>
    %888 = arith.addi %859, %887 : vector<1x16xi32>
    %c0_i32_317 = arith.constant 0 : i32
    %889 = vector.broadcast %c0_i32_317 : i32 to vector<1x16xi32>
    %890 = arith.cmpi sge, %888, %889 : vector<1x16xi32>
    %c-4_i32_318 = arith.constant -4 : i32
    %891 = vector.broadcast %c-4_i32_318 : i32 to vector<1x16xi32>
    %892 = arith.addi %859, %891 : vector<1x16xi32>
    %c8_i32_319 = arith.constant 8 : i32
    %893 = vector.broadcast %c8_i32_319 : i32 to vector<1x16xi32>
    %894 = arith.cmpi slt, %892, %893 : vector<1x16xi32>
    %895 = arith.andi %890, %894 : vector<1x16xi1>
    %c-3_i32_320 = arith.constant -3 : i32
    %896 = vector.broadcast %c-3_i32_320 : i32 to vector<1x16xi32>
    %897 = arith.addi %859, %896 : vector<1x16xi32>
    %c0_i32_321 = arith.constant 0 : i32
    %898 = vector.broadcast %c0_i32_321 : i32 to vector<1x16xi32>
    %899 = arith.cmpi sge, %897, %898 : vector<1x16xi32>
    %c-3_i32_322 = arith.constant -3 : i32
    %900 = vector.broadcast %c-3_i32_322 : i32 to vector<1x16xi32>
    %901 = arith.addi %859, %900 : vector<1x16xi32>
    %c8_i32_323 = arith.constant 8 : i32
    %902 = vector.broadcast %c8_i32_323 : i32 to vector<1x16xi32>
    %903 = arith.cmpi slt, %901, %902 : vector<1x16xi32>
    %904 = arith.andi %899, %903 : vector<1x16xi1>
    %c-2_i32_324 = arith.constant -2 : i32
    %905 = vector.broadcast %c-2_i32_324 : i32 to vector<1x16xi32>
    %906 = arith.addi %859, %905 : vector<1x16xi32>
    %c0_i32_325 = arith.constant 0 : i32
    %907 = vector.broadcast %c0_i32_325 : i32 to vector<1x16xi32>
    %908 = arith.cmpi sge, %906, %907 : vector<1x16xi32>
    %c-2_i32_326 = arith.constant -2 : i32
    %909 = vector.broadcast %c-2_i32_326 : i32 to vector<1x16xi32>
    %910 = arith.addi %859, %909 : vector<1x16xi32>
    %c8_i32_327 = arith.constant 8 : i32
    %911 = vector.broadcast %c8_i32_327 : i32 to vector<1x16xi32>
    %912 = arith.cmpi slt, %910, %911 : vector<1x16xi32>
    %913 = arith.andi %908, %912 : vector<1x16xi1>
    %c-1_i32_328 = arith.constant -1 : i32
    %914 = vector.broadcast %c-1_i32_328 : i32 to vector<1x16xi32>
    %915 = arith.addi %859, %914 : vector<1x16xi32>
    %c0_i32_329 = arith.constant 0 : i32
    %916 = vector.broadcast %c0_i32_329 : i32 to vector<1x16xi32>
    %917 = arith.cmpi sge, %915, %916 : vector<1x16xi32>
    %c-1_i32_330 = arith.constant -1 : i32
    %918 = vector.broadcast %c-1_i32_330 : i32 to vector<1x16xi32>
    %919 = arith.addi %859, %918 : vector<1x16xi32>
    %c8_i32_331 = arith.constant 8 : i32
    %920 = vector.broadcast %c8_i32_331 : i32 to vector<1x16xi32>
    %921 = arith.cmpi slt, %919, %920 : vector<1x16xi32>
    %922 = arith.andi %917, %921 : vector<1x16xi1>
    %c1_i32_332 = arith.constant 1 : i32
    %923 = vector.broadcast %c1_i32_332 : i32 to vector<1x16xi32>
    %924 = arith.addi %859, %923 : vector<1x16xi32>
    %c0_i32_333 = arith.constant 0 : i32
    %925 = vector.broadcast %c0_i32_333 : i32 to vector<1x16xi32>
    %926 = arith.cmpi sge, %924, %925 : vector<1x16xi32>
    %c1_i32_334 = arith.constant 1 : i32
    %927 = vector.broadcast %c1_i32_334 : i32 to vector<1x16xi32>
    %928 = arith.addi %859, %927 : vector<1x16xi32>
    %c8_i32_335 = arith.constant 8 : i32
    %929 = vector.broadcast %c8_i32_335 : i32 to vector<1x16xi32>
    %930 = arith.cmpi slt, %928, %929 : vector<1x16xi32>
    %931 = arith.andi %926, %930 : vector<1x16xi1>
    %c2_i32_336 = arith.constant 2 : i32
    %932 = vector.broadcast %c2_i32_336 : i32 to vector<1x16xi32>
    %933 = arith.addi %859, %932 : vector<1x16xi32>
    %c0_i32_337 = arith.constant 0 : i32
    %934 = vector.broadcast %c0_i32_337 : i32 to vector<1x16xi32>
    %935 = arith.cmpi sge, %933, %934 : vector<1x16xi32>
    %c2_i32_338 = arith.constant 2 : i32
    %936 = vector.broadcast %c2_i32_338 : i32 to vector<1x16xi32>
    %937 = arith.addi %859, %936 : vector<1x16xi32>
    %c8_i32_339 = arith.constant 8 : i32
    %938 = vector.broadcast %c8_i32_339 : i32 to vector<1x16xi32>
    %939 = arith.cmpi slt, %937, %938 : vector<1x16xi32>
    %940 = arith.andi %935, %939 : vector<1x16xi1>
    %c3_i32_340 = arith.constant 3 : i32
    %941 = vector.broadcast %c3_i32_340 : i32 to vector<1x16xi32>
    %942 = arith.addi %859, %941 : vector<1x16xi32>
    %c0_i32_341 = arith.constant 0 : i32
    %943 = vector.broadcast %c0_i32_341 : i32 to vector<1x16xi32>
    %944 = arith.cmpi sge, %942, %943 : vector<1x16xi32>
    %c3_i32_342 = arith.constant 3 : i32
    %945 = vector.broadcast %c3_i32_342 : i32 to vector<1x16xi32>
    %946 = arith.addi %859, %945 : vector<1x16xi32>
    %c8_i32_343 = arith.constant 8 : i32
    %947 = vector.broadcast %c8_i32_343 : i32 to vector<1x16xi32>
    %948 = arith.cmpi slt, %946, %947 : vector<1x16xi32>
    %949 = arith.andi %944, %948 : vector<1x16xi1>
    %c4_i32_344 = arith.constant 4 : i32
    %950 = vector.broadcast %c4_i32_344 : i32 to vector<1x16xi32>
    %951 = arith.addi %859, %950 : vector<1x16xi32>
    %c0_i32_345 = arith.constant 0 : i32
    %952 = vector.broadcast %c0_i32_345 : i32 to vector<1x16xi32>
    %953 = arith.cmpi sge, %951, %952 : vector<1x16xi32>
    %c4_i32_346 = arith.constant 4 : i32
    %954 = vector.broadcast %c4_i32_346 : i32 to vector<1x16xi32>
    %955 = arith.addi %859, %954 : vector<1x16xi32>
    %c8_i32_347 = arith.constant 8 : i32
    %956 = vector.broadcast %c8_i32_347 : i32 to vector<1x16xi32>
    %957 = arith.cmpi slt, %955, %956 : vector<1x16xi32>
    %958 = arith.andi %953, %957 : vector<1x16xi1>
    %c5_i32_348 = arith.constant 5 : i32
    %959 = vector.broadcast %c5_i32_348 : i32 to vector<1x16xi32>
    %960 = arith.addi %859, %959 : vector<1x16xi32>
    %c0_i32_349 = arith.constant 0 : i32
    %961 = vector.broadcast %c0_i32_349 : i32 to vector<1x16xi32>
    %962 = arith.cmpi sge, %960, %961 : vector<1x16xi32>
    %c5_i32_350 = arith.constant 5 : i32
    %963 = vector.broadcast %c5_i32_350 : i32 to vector<1x16xi32>
    %964 = arith.addi %859, %963 : vector<1x16xi32>
    %c8_i32_351 = arith.constant 8 : i32
    %965 = vector.broadcast %c8_i32_351 : i32 to vector<1x16xi32>
    %966 = arith.cmpi slt, %964, %965 : vector<1x16xi32>
    %967 = arith.andi %962, %966 : vector<1x16xi1>
    %c6_i32_352 = arith.constant 6 : i32
    %968 = vector.broadcast %c6_i32_352 : i32 to vector<1x16xi32>
    %969 = arith.addi %859, %968 : vector<1x16xi32>
    %c0_i32_353 = arith.constant 0 : i32
    %970 = vector.broadcast %c0_i32_353 : i32 to vector<1x16xi32>
    %971 = arith.cmpi sge, %969, %970 : vector<1x16xi32>
    %c6_i32_354 = arith.constant 6 : i32
    %972 = vector.broadcast %c6_i32_354 : i32 to vector<1x16xi32>
    %973 = arith.addi %859, %972 : vector<1x16xi32>
    %c8_i32_355 = arith.constant 8 : i32
    %974 = vector.broadcast %c8_i32_355 : i32 to vector<1x16xi32>
    %975 = arith.cmpi slt, %973, %974 : vector<1x16xi32>
    %976 = arith.andi %971, %975 : vector<1x16xi1>
    %c7_i32_356 = arith.constant 7 : i32
    %977 = vector.broadcast %c7_i32_356 : i32 to vector<1x16xi32>
    %978 = arith.addi %859, %977 : vector<1x16xi32>
    %c0_i32_357 = arith.constant 0 : i32
    %979 = vector.broadcast %c0_i32_357 : i32 to vector<1x16xi32>
    %980 = arith.cmpi sge, %978, %979 : vector<1x16xi32>
    %c7_i32_358 = arith.constant 7 : i32
    %981 = vector.broadcast %c7_i32_358 : i32 to vector<1x16xi32>
    %982 = arith.addi %859, %981 : vector<1x16xi32>
    %c8_i32_359 = arith.constant 8 : i32
    %983 = vector.broadcast %c8_i32_359 : i32 to vector<1x16xi32>
    %984 = arith.cmpi slt, %982, %983 : vector<1x16xi32>
    %985 = arith.andi %980, %984 : vector<1x16xi1>
    %cst_360 = arith.constant 0.000000e+00 : bf16
    %986 = vector.broadcast %cst_360 : bf16 to vector<32x7xbf16>
    %987 = vector.extract_strided_slice %842 {offsets = [0, 0], sizes = [32, 9], strides = [1, 1]} : vector<32x16xbf16> to vector<32x9xbf16>
    %988 = tpu.concatenate %986, %987 in 1 : vector<32x7xbf16>, vector<32x9xbf16> -> vector<32x16xbf16>
    %cst_361 = arith.constant 0.000000e+00 : bf16
    %989 = vector.broadcast %cst_361 : bf16 to vector<32x16xbf16>
    %990 = vector.shape_cast %868 : vector<1x16xi1> to vector<1x16xi1>
    %991 = vector.broadcast %990 : vector<1x16xi1> to vector<32x16xi1>
    %992 = arith.select %991, %988, %989 : vector<32x16xi1>, vector<32x16xbf16>
    %cst_362 = arith.constant 0.000000e+00 : bf16
    %993 = vector.broadcast %cst_362 : bf16 to vector<32x6xbf16>
    %994 = vector.extract_strided_slice %842 {offsets = [0, 0], sizes = [32, 10], strides = [1, 1]} : vector<32x16xbf16> to vector<32x10xbf16>
    %995 = tpu.concatenate %993, %994 in 1 : vector<32x6xbf16>, vector<32x10xbf16> -> vector<32x16xbf16>
    %cst_363 = arith.constant 0.000000e+00 : bf16
    %996 = vector.broadcast %cst_363 : bf16 to vector<32x16xbf16>
    %997 = vector.shape_cast %877 : vector<1x16xi1> to vector<1x16xi1>
    %998 = vector.broadcast %997 : vector<1x16xi1> to vector<32x16xi1>
    %999 = arith.select %998, %995, %996 : vector<32x16xi1>, vector<32x16xbf16>
    %cst_364 = arith.constant 0.000000e+00 : bf16
    %1000 = vector.broadcast %cst_364 : bf16 to vector<32x5xbf16>
    %1001 = vector.extract_strided_slice %842 {offsets = [0, 0], sizes = [32, 11], strides = [1, 1]} : vector<32x16xbf16> to vector<32x11xbf16>
    %1002 = tpu.concatenate %1000, %1001 in 1 : vector<32x5xbf16>, vector<32x11xbf16> -> vector<32x16xbf16>
    %cst_365 = arith.constant 0.000000e+00 : bf16
    %1003 = vector.broadcast %cst_365 : bf16 to vector<32x16xbf16>
    %1004 = vector.shape_cast %886 : vector<1x16xi1> to vector<1x16xi1>
    %1005 = vector.broadcast %1004 : vector<1x16xi1> to vector<32x16xi1>
    %1006 = arith.select %1005, %1002, %1003 : vector<32x16xi1>, vector<32x16xbf16>
    %cst_366 = arith.constant 0.000000e+00 : bf16
    %1007 = vector.broadcast %cst_366 : bf16 to vector<32x4xbf16>
    %1008 = vector.extract_strided_slice %842 {offsets = [0, 0], sizes = [32, 12], strides = [1, 1]} : vector<32x16xbf16> to vector<32x12xbf16>
    %1009 = tpu.concatenate %1007, %1008 in 1 : vector<32x4xbf16>, vector<32x12xbf16> -> vector<32x16xbf16>
    %cst_367 = arith.constant 0.000000e+00 : bf16
    %1010 = vector.broadcast %cst_367 : bf16 to vector<32x16xbf16>
    %1011 = vector.shape_cast %895 : vector<1x16xi1> to vector<1x16xi1>
    %1012 = vector.broadcast %1011 : vector<1x16xi1> to vector<32x16xi1>
    %1013 = arith.select %1012, %1009, %1010 : vector<32x16xi1>, vector<32x16xbf16>
    %cst_368 = arith.constant 0.000000e+00 : bf16
    %1014 = vector.broadcast %cst_368 : bf16 to vector<32x3xbf16>
    %1015 = vector.extract_strided_slice %842 {offsets = [0, 0], sizes = [32, 13], strides = [1, 1]} : vector<32x16xbf16> to vector<32x13xbf16>
    %1016 = tpu.concatenate %1014, %1015 in 1 : vector<32x3xbf16>, vector<32x13xbf16> -> vector<32x16xbf16>
    %cst_369 = arith.constant 0.000000e+00 : bf16
    %1017 = vector.broadcast %cst_369 : bf16 to vector<32x16xbf16>
    %1018 = vector.shape_cast %904 : vector<1x16xi1> to vector<1x16xi1>
    %1019 = vector.broadcast %1018 : vector<1x16xi1> to vector<32x16xi1>
    %1020 = arith.select %1019, %1016, %1017 : vector<32x16xi1>, vector<32x16xbf16>
    %cst_370 = arith.constant 0.000000e+00 : bf16
    %1021 = vector.broadcast %cst_370 : bf16 to vector<32x2xbf16>
    %1022 = vector.extract_strided_slice %842 {offsets = [0, 0], sizes = [32, 14], strides = [1, 1]} : vector<32x16xbf16> to vector<32x14xbf16>
    %1023 = tpu.concatenate %1021, %1022 in 1 : vector<32x2xbf16>, vector<32x14xbf16> -> vector<32x16xbf16>
    %cst_371 = arith.constant 0.000000e+00 : bf16
    %1024 = vector.broadcast %cst_371 : bf16 to vector<32x16xbf16>
    %1025 = vector.shape_cast %913 : vector<1x16xi1> to vector<1x16xi1>
    %1026 = vector.broadcast %1025 : vector<1x16xi1> to vector<32x16xi1>
    %1027 = arith.select %1026, %1023, %1024 : vector<32x16xi1>, vector<32x16xbf16>
    %cst_372 = arith.constant 0.000000e+00 : bf16
    %1028 = vector.broadcast %cst_372 : bf16 to vector<32x1xbf16>
    %1029 = vector.extract_strided_slice %842 {offsets = [0, 0], sizes = [32, 15], strides = [1, 1]} : vector<32x16xbf16> to vector<32x15xbf16>
    %1030 = tpu.concatenate %1028, %1029 in 1 : vector<32x1xbf16>, vector<32x15xbf16> -> vector<32x16xbf16>
    %cst_373 = arith.constant 0.000000e+00 : bf16
    %1031 = vector.broadcast %cst_373 : bf16 to vector<32x16xbf16>
    %1032 = vector.shape_cast %922 : vector<1x16xi1> to vector<1x16xi1>
    %1033 = vector.broadcast %1032 : vector<1x16xi1> to vector<32x16xi1>
    %1034 = arith.select %1033, %1030, %1031 : vector<32x16xi1>, vector<32x16xbf16>
    %1035 = vector.extract_strided_slice %842 {offsets = [0, 1], sizes = [32, 15], strides = [1, 1]} : vector<32x16xbf16> to vector<32x15xbf16>
    %cst_374 = arith.constant 0.000000e+00 : bf16
    %1036 = vector.broadcast %cst_374 : bf16 to vector<32x1xbf16>
    %1037 = tpu.concatenate %1035, %1036 in 1 : vector<32x15xbf16>, vector<32x1xbf16> -> vector<32x16xbf16>
    %cst_375 = arith.constant 0.000000e+00 : bf16
    %1038 = vector.broadcast %cst_375 : bf16 to vector<32x16xbf16>
    %1039 = vector.shape_cast %931 : vector<1x16xi1> to vector<1x16xi1>
    %1040 = vector.broadcast %1039 : vector<1x16xi1> to vector<32x16xi1>
    %1041 = arith.select %1040, %1037, %1038 : vector<32x16xi1>, vector<32x16xbf16>
    %1042 = vector.extract_strided_slice %842 {offsets = [0, 2], sizes = [32, 14], strides = [1, 1]} : vector<32x16xbf16> to vector<32x14xbf16>
    %cst_376 = arith.constant 0.000000e+00 : bf16
    %1043 = vector.broadcast %cst_376 : bf16 to vector<32x2xbf16>
    %1044 = tpu.concatenate %1042, %1043 in 1 : vector<32x14xbf16>, vector<32x2xbf16> -> vector<32x16xbf16>
    %cst_377 = arith.constant 0.000000e+00 : bf16
    %1045 = vector.broadcast %cst_377 : bf16 to vector<32x16xbf16>
    %1046 = vector.shape_cast %940 : vector<1x16xi1> to vector<1x16xi1>
    %1047 = vector.broadcast %1046 : vector<1x16xi1> to vector<32x16xi1>
    %1048 = arith.select %1047, %1044, %1045 : vector<32x16xi1>, vector<32x16xbf16>
    %1049 = vector.extract_strided_slice %842 {offsets = [0, 3], sizes = [32, 13], strides = [1, 1]} : vector<32x16xbf16> to vector<32x13xbf16>
    %cst_378 = arith.constant 0.000000e+00 : bf16
    %1050 = vector.broadcast %cst_378 : bf16 to vector<32x3xbf16>
    %1051 = tpu.concatenate %1049, %1050 in 1 : vector<32x13xbf16>, vector<32x3xbf16> -> vector<32x16xbf16>
    %cst_379 = arith.constant 0.000000e+00 : bf16
    %1052 = vector.broadcast %cst_379 : bf16 to vector<32x16xbf16>
    %1053 = vector.shape_cast %949 : vector<1x16xi1> to vector<1x16xi1>
    %1054 = vector.broadcast %1053 : vector<1x16xi1> to vector<32x16xi1>
    %1055 = arith.select %1054, %1051, %1052 : vector<32x16xi1>, vector<32x16xbf16>
    %1056 = vector.extract_strided_slice %842 {offsets = [0, 4], sizes = [32, 12], strides = [1, 1]} : vector<32x16xbf16> to vector<32x12xbf16>
    %cst_380 = arith.constant 0.000000e+00 : bf16
    %1057 = vector.broadcast %cst_380 : bf16 to vector<32x4xbf16>
    %1058 = tpu.concatenate %1056, %1057 in 1 : vector<32x12xbf16>, vector<32x4xbf16> -> vector<32x16xbf16>
    %cst_381 = arith.constant 0.000000e+00 : bf16
    %1059 = vector.broadcast %cst_381 : bf16 to vector<32x16xbf16>
    %1060 = vector.shape_cast %958 : vector<1x16xi1> to vector<1x16xi1>
    %1061 = vector.broadcast %1060 : vector<1x16xi1> to vector<32x16xi1>
    %1062 = arith.select %1061, %1058, %1059 : vector<32x16xi1>, vector<32x16xbf16>
    %1063 = vector.extract_strided_slice %842 {offsets = [0, 5], sizes = [32, 11], strides = [1, 1]} : vector<32x16xbf16> to vector<32x11xbf16>
    %cst_382 = arith.constant 0.000000e+00 : bf16
    %1064 = vector.broadcast %cst_382 : bf16 to vector<32x5xbf16>
    %1065 = tpu.concatenate %1063, %1064 in 1 : vector<32x11xbf16>, vector<32x5xbf16> -> vector<32x16xbf16>
    %cst_383 = arith.constant 0.000000e+00 : bf16
    %1066 = vector.broadcast %cst_383 : bf16 to vector<32x16xbf16>
    %1067 = vector.shape_cast %967 : vector<1x16xi1> to vector<1x16xi1>
    %1068 = vector.broadcast %1067 : vector<1x16xi1> to vector<32x16xi1>
    %1069 = arith.select %1068, %1065, %1066 : vector<32x16xi1>, vector<32x16xbf16>
    %1070 = vector.extract_strided_slice %842 {offsets = [0, 6], sizes = [32, 10], strides = [1, 1]} : vector<32x16xbf16> to vector<32x10xbf16>
    %cst_384 = arith.constant 0.000000e+00 : bf16
    %1071 = vector.broadcast %cst_384 : bf16 to vector<32x6xbf16>
    %1072 = tpu.concatenate %1070, %1071 in 1 : vector<32x10xbf16>, vector<32x6xbf16> -> vector<32x16xbf16>
    %cst_385 = arith.constant 0.000000e+00 : bf16
    %1073 = vector.broadcast %cst_385 : bf16 to vector<32x16xbf16>
    %1074 = vector.shape_cast %976 : vector<1x16xi1> to vector<1x16xi1>
    %1075 = vector.broadcast %1074 : vector<1x16xi1> to vector<32x16xi1>
    %1076 = arith.select %1075, %1072, %1073 : vector<32x16xi1>, vector<32x16xbf16>
    %1077 = vector.extract_strided_slice %842 {offsets = [0, 7], sizes = [32, 9], strides = [1, 1]} : vector<32x16xbf16> to vector<32x9xbf16>
    %cst_386 = arith.constant 0.000000e+00 : bf16
    %1078 = vector.broadcast %cst_386 : bf16 to vector<32x7xbf16>
    %1079 = tpu.concatenate %1077, %1078 in 1 : vector<32x9xbf16>, vector<32x7xbf16> -> vector<32x16xbf16>
    %cst_387 = arith.constant 0.000000e+00 : bf16
    %1080 = vector.broadcast %cst_387 : bf16 to vector<32x16xbf16>
    %1081 = vector.shape_cast %985 : vector<1x16xi1> to vector<1x16xi1>
    %1082 = vector.broadcast %1081 : vector<1x16xi1> to vector<32x16xi1>
    %1083 = arith.select %1082, %1079, %1080 : vector<32x16xi1>, vector<32x16xbf16>
    %1084 = tpu.concatenate %992, %999, %1006, %1013, %1020, %1027, %1034, %842, %1041, %1048, %1055, %1062, %1069, %1076, %1083 in 0 : vector<32x16xbf16>, vector<32x16xbf16>, vector<32x16xbf16>, vector<32x16xbf16>, vector<32x16xbf16>, vector<32x16xbf16>, vector<32x16xbf16>, vector<32x16xbf16>, vector<32x16xbf16>, vector<32x16xbf16>, vector<32x16xbf16>, vector<32x16xbf16>, vector<32x16xbf16>, vector<32x16xbf16>, vector<32x16xbf16> -> vector<480x16xbf16>
    %c64 = arith.constant 64 : index
    %c0_388 = arith.constant 0 : index
    %1085 = vector.load %arg1[%c64, %c0_388] : memref<320x512xbf16, #tpu.memory_space<vmem>>, vector<32x480xbf16>
    %cst_389 = arith.constant dense<0.000000e+00> : vector<32x16xf32>
    %1086 = tpu.matmul %1085, %1084, %cst_389 {dimension_numbers = #tpu.dot_dimension_numbers<[1], [0], [0], [1], [0, 0, 1, 1], [], []>} : vector<32x480xbf16>, vector<480x16xbf16>, vector<32x16xf32> -> vector<32x16xf32>
    %c0_390 = arith.constant 0 : index
    %c6 = arith.constant 6 : index
    %1087 = vector.load %arg2[%c0_390, %c6] : memref<32x19xf32, #tpu.memory_space<vmem>>, vector<32x1xf32>
    %c0_391 = arith.constant 0 : index
    %c7 = arith.constant 7 : index
    %1088 = vector.load %arg2[%c0_391, %c7] : memref<32x19xf32, #tpu.memory_space<vmem>>, vector<32x1xf32>
    %cst_392 = arith.constant dense<0.000000e+00> : vector<32xf32>
    %1089 = vector.multi_reduction <add>, %1086, %cst_392 [1] : vector<32x16xf32> to vector<32xf32>
    %1090 = vector.shape_cast %1089 : vector<32xf32> to vector<32x1xf32>
    %1091 = arith.mulf %1086, %1086 : vector<32x16xf32>
    %cst_393 = arith.constant dense<0.000000e+00> : vector<32xf32>
    %1092 = vector.multi_reduction <add>, %1091, %cst_393 [1] : vector<32x16xf32> to vector<32xf32>
    %1093 = vector.shape_cast %1092 : vector<32xf32> to vector<32x1xf32>
    %cst_394 = arith.constant 6.250000e-02 : f32
    %1094 = vector.broadcast %cst_394 : f32 to vector<32x1xf32>
    %1095 = arith.mulf %1090, %1094 : vector<32x1xf32>
    %cst_395 = arith.constant 6.250000e-02 : f32
    %1096 = vector.broadcast %cst_395 : f32 to vector<32x1xf32>
    %1097 = arith.mulf %1093, %1096 : vector<32x1xf32>
    %1098 = arith.mulf %1095, %1095 : vector<32x1xf32>
    %1099 = arith.subf %1097, %1098 : vector<32x1xf32>
    %cst_396 = arith.constant 0.000000e+00 : f32
    %1100 = vector.broadcast %cst_396 : f32 to vector<32x1xf32>
    %1101 = arith.maximumf %1099, %1100 : vector<32x1xf32>
    %1102 = vector.broadcast %1095 : vector<32x1xf32> to vector<32x16xf32>
    %1103 = arith.subf %1086, %1102 : vector<32x16xf32>
    %cst_397 = arith.constant 9.99999974E-6 : f32
    %1104 = vector.broadcast %cst_397 : f32 to vector<32x1xf32>
    %1105 = arith.addf %1101, %1104 : vector<32x1xf32>
    %1106 = math.rsqrt %1105 : vector<32x1xf32>
    %1107 = vector.broadcast %1106 : vector<32x1xf32> to vector<32x16xf32>
    %1108 = arith.mulf %1103, %1107 : vector<32x16xf32>
    %1109 = vector.broadcast %1087 : vector<32x1xf32> to vector<32x16xf32>
    %1110 = arith.mulf %1108, %1109 : vector<32x16xf32>
    %1111 = vector.broadcast %1088 : vector<32x1xf32> to vector<32x16xf32>
    %1112 = arith.addf %1110, %1111 : vector<32x16xf32>
    %cst_398 = arith.constant 0.000000e+00 : f32
    %1113 = vector.broadcast %cst_398 : f32 to vector<32x16xf32>
    %1114 = arith.cmpf oge, %1112, %1113 : vector<32x16xf32>
    %cst_399 = arith.constant 1.000000e-01 : f32
    %1115 = vector.broadcast %cst_399 : f32 to vector<32x16xf32>
    %1116 = arith.mulf %1115, %1112 : vector<32x16xf32>
    %1117 = arith.select %1114, %1112, %1116 : vector<32x16xi1>, vector<32x16xf32>
    %1118 = arith.truncf %1117 : vector<32x16xf32> to vector<32x16xbf16>
    %c224 = arith.constant 224 : index
    %c0_400 = arith.constant 0 : index
    %1119 = vector.load %arg3[%c224, %c0_400] : memref<360x128xf32, #tpu.memory_space<vmem>>, vector<16x8xf32>
    %1120 = arith.truncf %1119 : vector<16x8xf32> to vector<16x8xbf16>
    %cst_401 = arith.constant dense<0.000000e+00> : vector<32x8xf32>
    %1121 = tpu.matmul %1118, %1120, %cst_401 {dimension_numbers = #tpu.dot_dimension_numbers<[1], [0], [0], [1], [0, 0, 1, 1], [], []>} : vector<32x16xbf16>, vector<16x8xbf16>, vector<32x8xf32> -> vector<32x8xf32>
    %1122 = arith.truncf %1121 : vector<32x8xf32> to vector<32x8xbf16>
    %1123 = tpu.iota {dimensions = array<i32: 1>} : vector<1x8xi32>
    %c4_i32_402 = arith.constant 4 : i32
    %c0_i32_403 = arith.constant 0 : i32
    %1124 = arith.cmpi eq, %c4_i32_402, %c0_i32_403 : i32
    %c1_i32_404 = arith.constant 1 : i32
    %1125 = arith.select %1124, %c1_i32_404, %c4_i32_402 : i32
    %1126 = vector.broadcast %1125 : i32 to vector<1x8xi32>
    %1127 = arith.remsi %1123, %1126 : vector<1x8xi32>
    %c0_i32_405 = arith.constant 0 : i32
    %1128 = vector.broadcast %c0_i32_405 : i32 to vector<1x8xi32>
    %1129 = arith.cmpi ne, %1127, %1128 : vector<1x8xi32>
    %c0_i32_406 = arith.constant 0 : i32
    %1130 = vector.broadcast %c0_i32_406 : i32 to vector<1x8xi32>
    %1131 = arith.cmpi slt, %1127, %1130 : vector<1x8xi32>
    %c0_i32_407 = arith.constant 0 : i32
    %1132 = arith.cmpi slt, %1125, %c0_i32_407 : i32
    %1133 = vector.broadcast %1132 : i1 to vector<1x8xi1>
    %1134 = vector.broadcast %1133 : vector<1x8xi1> to vector<1x8xi1>
    %1135 = arith.xori %1131, %1134 : vector<1x8xi1>
    %1136 = arith.andi %1135, %1129 : vector<1x8xi1>
    %1137 = vector.broadcast %1125 : i32 to vector<1x8xi32>
    %1138 = arith.addi %1127, %1137 : vector<1x8xi32>
    %1139 = arith.select %1136, %1138, %1127 : vector<1x8xi1>, vector<1x8xi32>
    %c-7_i32_408 = arith.constant -7 : i32
    %1140 = vector.broadcast %c-7_i32_408 : i32 to vector<1x8xi32>
    %1141 = arith.addi %1139, %1140 : vector<1x8xi32>
    %c0_i32_409 = arith.constant 0 : i32
    %1142 = vector.broadcast %c0_i32_409 : i32 to vector<1x8xi32>
    %1143 = arith.cmpi sge, %1141, %1142 : vector<1x8xi32>
    %c-7_i32_410 = arith.constant -7 : i32
    %1144 = vector.broadcast %c-7_i32_410 : i32 to vector<1x8xi32>
    %1145 = arith.addi %1139, %1144 : vector<1x8xi32>
    %c4_i32_411 = arith.constant 4 : i32
    %1146 = vector.broadcast %c4_i32_411 : i32 to vector<1x8xi32>
    %1147 = arith.cmpi slt, %1145, %1146 : vector<1x8xi32>
    %1148 = arith.andi %1143, %1147 : vector<1x8xi1>
    %c-6_i32_412 = arith.constant -6 : i32
    %1149 = vector.broadcast %c-6_i32_412 : i32 to vector<1x8xi32>
    %1150 = arith.addi %1139, %1149 : vector<1x8xi32>
    %c0_i32_413 = arith.constant 0 : i32
    %1151 = vector.broadcast %c0_i32_413 : i32 to vector<1x8xi32>
    %1152 = arith.cmpi sge, %1150, %1151 : vector<1x8xi32>
    %c-6_i32_414 = arith.constant -6 : i32
    %1153 = vector.broadcast %c-6_i32_414 : i32 to vector<1x8xi32>
    %1154 = arith.addi %1139, %1153 : vector<1x8xi32>
    %c4_i32_415 = arith.constant 4 : i32
    %1155 = vector.broadcast %c4_i32_415 : i32 to vector<1x8xi32>
    %1156 = arith.cmpi slt, %1154, %1155 : vector<1x8xi32>
    %1157 = arith.andi %1152, %1156 : vector<1x8xi1>
    %c-5_i32_416 = arith.constant -5 : i32
    %1158 = vector.broadcast %c-5_i32_416 : i32 to vector<1x8xi32>
    %1159 = arith.addi %1139, %1158 : vector<1x8xi32>
    %c0_i32_417 = arith.constant 0 : i32
    %1160 = vector.broadcast %c0_i32_417 : i32 to vector<1x8xi32>
    %1161 = arith.cmpi sge, %1159, %1160 : vector<1x8xi32>
    %c-5_i32_418 = arith.constant -5 : i32
    %1162 = vector.broadcast %c-5_i32_418 : i32 to vector<1x8xi32>
    %1163 = arith.addi %1139, %1162 : vector<1x8xi32>
    %c4_i32_419 = arith.constant 4 : i32
    %1164 = vector.broadcast %c4_i32_419 : i32 to vector<1x8xi32>
    %1165 = arith.cmpi slt, %1163, %1164 : vector<1x8xi32>
    %1166 = arith.andi %1161, %1165 : vector<1x8xi1>
    %c-4_i32_420 = arith.constant -4 : i32
    %1167 = vector.broadcast %c-4_i32_420 : i32 to vector<1x8xi32>
    %1168 = arith.addi %1139, %1167 : vector<1x8xi32>
    %c0_i32_421 = arith.constant 0 : i32
    %1169 = vector.broadcast %c0_i32_421 : i32 to vector<1x8xi32>
    %1170 = arith.cmpi sge, %1168, %1169 : vector<1x8xi32>
    %c-4_i32_422 = arith.constant -4 : i32
    %1171 = vector.broadcast %c-4_i32_422 : i32 to vector<1x8xi32>
    %1172 = arith.addi %1139, %1171 : vector<1x8xi32>
    %c4_i32_423 = arith.constant 4 : i32
    %1173 = vector.broadcast %c4_i32_423 : i32 to vector<1x8xi32>
    %1174 = arith.cmpi slt, %1172, %1173 : vector<1x8xi32>
    %1175 = arith.andi %1170, %1174 : vector<1x8xi1>
    %c-3_i32_424 = arith.constant -3 : i32
    %1176 = vector.broadcast %c-3_i32_424 : i32 to vector<1x8xi32>
    %1177 = arith.addi %1139, %1176 : vector<1x8xi32>
    %c0_i32_425 = arith.constant 0 : i32
    %1178 = vector.broadcast %c0_i32_425 : i32 to vector<1x8xi32>
    %1179 = arith.cmpi sge, %1177, %1178 : vector<1x8xi32>
    %c-3_i32_426 = arith.constant -3 : i32
    %1180 = vector.broadcast %c-3_i32_426 : i32 to vector<1x8xi32>
    %1181 = arith.addi %1139, %1180 : vector<1x8xi32>
    %c4_i32_427 = arith.constant 4 : i32
    %1182 = vector.broadcast %c4_i32_427 : i32 to vector<1x8xi32>
    %1183 = arith.cmpi slt, %1181, %1182 : vector<1x8xi32>
    %1184 = arith.andi %1179, %1183 : vector<1x8xi1>
    %c-2_i32_428 = arith.constant -2 : i32
    %1185 = vector.broadcast %c-2_i32_428 : i32 to vector<1x8xi32>
    %1186 = arith.addi %1139, %1185 : vector<1x8xi32>
    %c0_i32_429 = arith.constant 0 : i32
    %1187 = vector.broadcast %c0_i32_429 : i32 to vector<1x8xi32>
    %1188 = arith.cmpi sge, %1186, %1187 : vector<1x8xi32>
    %c-2_i32_430 = arith.constant -2 : i32
    %1189 = vector.broadcast %c-2_i32_430 : i32 to vector<1x8xi32>
    %1190 = arith.addi %1139, %1189 : vector<1x8xi32>
    %c4_i32_431 = arith.constant 4 : i32
    %1191 = vector.broadcast %c4_i32_431 : i32 to vector<1x8xi32>
    %1192 = arith.cmpi slt, %1190, %1191 : vector<1x8xi32>
    %1193 = arith.andi %1188, %1192 : vector<1x8xi1>
    %c-1_i32_432 = arith.constant -1 : i32
    %1194 = vector.broadcast %c-1_i32_432 : i32 to vector<1x8xi32>
    %1195 = arith.addi %1139, %1194 : vector<1x8xi32>
    %c0_i32_433 = arith.constant 0 : i32
    %1196 = vector.broadcast %c0_i32_433 : i32 to vector<1x8xi32>
    %1197 = arith.cmpi sge, %1195, %1196 : vector<1x8xi32>
    %c-1_i32_434 = arith.constant -1 : i32
    %1198 = vector.broadcast %c-1_i32_434 : i32 to vector<1x8xi32>
    %1199 = arith.addi %1139, %1198 : vector<1x8xi32>
    %c4_i32_435 = arith.constant 4 : i32
    %1200 = vector.broadcast %c4_i32_435 : i32 to vector<1x8xi32>
    %1201 = arith.cmpi slt, %1199, %1200 : vector<1x8xi32>
    %1202 = arith.andi %1197, %1201 : vector<1x8xi1>
    %c1_i32_436 = arith.constant 1 : i32
    %1203 = vector.broadcast %c1_i32_436 : i32 to vector<1x8xi32>
    %1204 = arith.addi %1139, %1203 : vector<1x8xi32>
    %c0_i32_437 = arith.constant 0 : i32
    %1205 = vector.broadcast %c0_i32_437 : i32 to vector<1x8xi32>
    %1206 = arith.cmpi sge, %1204, %1205 : vector<1x8xi32>
    %c1_i32_438 = arith.constant 1 : i32
    %1207 = vector.broadcast %c1_i32_438 : i32 to vector<1x8xi32>
    %1208 = arith.addi %1139, %1207 : vector<1x8xi32>
    %c4_i32_439 = arith.constant 4 : i32
    %1209 = vector.broadcast %c4_i32_439 : i32 to vector<1x8xi32>
    %1210 = arith.cmpi slt, %1208, %1209 : vector<1x8xi32>
    %1211 = arith.andi %1206, %1210 : vector<1x8xi1>
    %c2_i32_440 = arith.constant 2 : i32
    %1212 = vector.broadcast %c2_i32_440 : i32 to vector<1x8xi32>
    %1213 = arith.addi %1139, %1212 : vector<1x8xi32>
    %c0_i32_441 = arith.constant 0 : i32
    %1214 = vector.broadcast %c0_i32_441 : i32 to vector<1x8xi32>
    %1215 = arith.cmpi sge, %1213, %1214 : vector<1x8xi32>
    %c2_i32_442 = arith.constant 2 : i32
    %1216 = vector.broadcast %c2_i32_442 : i32 to vector<1x8xi32>
    %1217 = arith.addi %1139, %1216 : vector<1x8xi32>
    %c4_i32_443 = arith.constant 4 : i32
    %1218 = vector.broadcast %c4_i32_443 : i32 to vector<1x8xi32>
    %1219 = arith.cmpi slt, %1217, %1218 : vector<1x8xi32>
    %1220 = arith.andi %1215, %1219 : vector<1x8xi1>
    %c3_i32_444 = arith.constant 3 : i32
    %1221 = vector.broadcast %c3_i32_444 : i32 to vector<1x8xi32>
    %1222 = arith.addi %1139, %1221 : vector<1x8xi32>
    %c0_i32_445 = arith.constant 0 : i32
    %1223 = vector.broadcast %c0_i32_445 : i32 to vector<1x8xi32>
    %1224 = arith.cmpi sge, %1222, %1223 : vector<1x8xi32>
    %c3_i32_446 = arith.constant 3 : i32
    %1225 = vector.broadcast %c3_i32_446 : i32 to vector<1x8xi32>
    %1226 = arith.addi %1139, %1225 : vector<1x8xi32>
    %c4_i32_447 = arith.constant 4 : i32
    %1227 = vector.broadcast %c4_i32_447 : i32 to vector<1x8xi32>
    %1228 = arith.cmpi slt, %1226, %1227 : vector<1x8xi32>
    %1229 = arith.andi %1224, %1228 : vector<1x8xi1>
    %c4_i32_448 = arith.constant 4 : i32
    %1230 = vector.broadcast %c4_i32_448 : i32 to vector<1x8xi32>
    %1231 = arith.addi %1139, %1230 : vector<1x8xi32>
    %c0_i32_449 = arith.constant 0 : i32
    %1232 = vector.broadcast %c0_i32_449 : i32 to vector<1x8xi32>
    %1233 = arith.cmpi sge, %1231, %1232 : vector<1x8xi32>
    %c4_i32_450 = arith.constant 4 : i32
    %1234 = vector.broadcast %c4_i32_450 : i32 to vector<1x8xi32>
    %1235 = arith.addi %1139, %1234 : vector<1x8xi32>
    %c4_i32_451 = arith.constant 4 : i32
    %1236 = vector.broadcast %c4_i32_451 : i32 to vector<1x8xi32>
    %1237 = arith.cmpi slt, %1235, %1236 : vector<1x8xi32>
    %1238 = arith.andi %1233, %1237 : vector<1x8xi1>
    %c5_i32_452 = arith.constant 5 : i32
    %1239 = vector.broadcast %c5_i32_452 : i32 to vector<1x8xi32>
    %1240 = arith.addi %1139, %1239 : vector<1x8xi32>
    %c0_i32_453 = arith.constant 0 : i32
    %1241 = vector.broadcast %c0_i32_453 : i32 to vector<1x8xi32>
    %1242 = arith.cmpi sge, %1240, %1241 : vector<1x8xi32>
    %c5_i32_454 = arith.constant 5 : i32
    %1243 = vector.broadcast %c5_i32_454 : i32 to vector<1x8xi32>
    %1244 = arith.addi %1139, %1243 : vector<1x8xi32>
    %c4_i32_455 = arith.constant 4 : i32
    %1245 = vector.broadcast %c4_i32_455 : i32 to vector<1x8xi32>
    %1246 = arith.cmpi slt, %1244, %1245 : vector<1x8xi32>
    %1247 = arith.andi %1242, %1246 : vector<1x8xi1>
    %c6_i32_456 = arith.constant 6 : i32
    %1248 = vector.broadcast %c6_i32_456 : i32 to vector<1x8xi32>
    %1249 = arith.addi %1139, %1248 : vector<1x8xi32>
    %c0_i32_457 = arith.constant 0 : i32
    %1250 = vector.broadcast %c0_i32_457 : i32 to vector<1x8xi32>
    %1251 = arith.cmpi sge, %1249, %1250 : vector<1x8xi32>
    %c6_i32_458 = arith.constant 6 : i32
    %1252 = vector.broadcast %c6_i32_458 : i32 to vector<1x8xi32>
    %1253 = arith.addi %1139, %1252 : vector<1x8xi32>
    %c4_i32_459 = arith.constant 4 : i32
    %1254 = vector.broadcast %c4_i32_459 : i32 to vector<1x8xi32>
    %1255 = arith.cmpi slt, %1253, %1254 : vector<1x8xi32>
    %1256 = arith.andi %1251, %1255 : vector<1x8xi1>
    %c7_i32_460 = arith.constant 7 : i32
    %1257 = vector.broadcast %c7_i32_460 : i32 to vector<1x8xi32>
    %1258 = arith.addi %1139, %1257 : vector<1x8xi32>
    %c0_i32_461 = arith.constant 0 : i32
    %1259 = vector.broadcast %c0_i32_461 : i32 to vector<1x8xi32>
    %1260 = arith.cmpi sge, %1258, %1259 : vector<1x8xi32>
    %c7_i32_462 = arith.constant 7 : i32
    %1261 = vector.broadcast %c7_i32_462 : i32 to vector<1x8xi32>
    %1262 = arith.addi %1139, %1261 : vector<1x8xi32>
    %c4_i32_463 = arith.constant 4 : i32
    %1263 = vector.broadcast %c4_i32_463 : i32 to vector<1x8xi32>
    %1264 = arith.cmpi slt, %1262, %1263 : vector<1x8xi32>
    %1265 = arith.andi %1260, %1264 : vector<1x8xi1>
    %cst_464 = arith.constant 0.000000e+00 : bf16
    %1266 = vector.broadcast %cst_464 : bf16 to vector<32x7xbf16>
    %1267 = vector.extract_strided_slice %1122 {offsets = [0, 0], sizes = [32, 1], strides = [1, 1]} : vector<32x8xbf16> to vector<32x1xbf16>
    %1268 = tpu.concatenate %1266, %1267 in 1 : vector<32x7xbf16>, vector<32x1xbf16> -> vector<32x8xbf16>
    %cst_465 = arith.constant 0.000000e+00 : bf16
    %1269 = vector.broadcast %cst_465 : bf16 to vector<32x8xbf16>
    %1270 = vector.shape_cast %1148 : vector<1x8xi1> to vector<1x8xi1>
    %1271 = vector.broadcast %1270 : vector<1x8xi1> to vector<32x8xi1>
    %1272 = arith.select %1271, %1268, %1269 : vector<32x8xi1>, vector<32x8xbf16>
    %cst_466 = arith.constant 0.000000e+00 : bf16
    %1273 = vector.broadcast %cst_466 : bf16 to vector<32x6xbf16>
    %1274 = vector.extract_strided_slice %1122 {offsets = [0, 0], sizes = [32, 2], strides = [1, 1]} : vector<32x8xbf16> to vector<32x2xbf16>
    %1275 = tpu.concatenate %1273, %1274 in 1 : vector<32x6xbf16>, vector<32x2xbf16> -> vector<32x8xbf16>
    %cst_467 = arith.constant 0.000000e+00 : bf16
    %1276 = vector.broadcast %cst_467 : bf16 to vector<32x8xbf16>
    %1277 = vector.shape_cast %1157 : vector<1x8xi1> to vector<1x8xi1>
    %1278 = vector.broadcast %1277 : vector<1x8xi1> to vector<32x8xi1>
    %1279 = arith.select %1278, %1275, %1276 : vector<32x8xi1>, vector<32x8xbf16>
    %cst_468 = arith.constant 0.000000e+00 : bf16
    %1280 = vector.broadcast %cst_468 : bf16 to vector<32x5xbf16>
    %1281 = vector.extract_strided_slice %1122 {offsets = [0, 0], sizes = [32, 3], strides = [1, 1]} : vector<32x8xbf16> to vector<32x3xbf16>
    %1282 = tpu.concatenate %1280, %1281 in 1 : vector<32x5xbf16>, vector<32x3xbf16> -> vector<32x8xbf16>
    %cst_469 = arith.constant 0.000000e+00 : bf16
    %1283 = vector.broadcast %cst_469 : bf16 to vector<32x8xbf16>
    %1284 = vector.shape_cast %1166 : vector<1x8xi1> to vector<1x8xi1>
    %1285 = vector.broadcast %1284 : vector<1x8xi1> to vector<32x8xi1>
    %1286 = arith.select %1285, %1282, %1283 : vector<32x8xi1>, vector<32x8xbf16>
    %cst_470 = arith.constant 0.000000e+00 : bf16
    %1287 = vector.broadcast %cst_470 : bf16 to vector<32x4xbf16>
    %1288 = vector.extract_strided_slice %1122 {offsets = [0, 0], sizes = [32, 4], strides = [1, 1]} : vector<32x8xbf16> to vector<32x4xbf16>
    %1289 = tpu.concatenate %1287, %1288 in 1 : vector<32x4xbf16>, vector<32x4xbf16> -> vector<32x8xbf16>
    %cst_471 = arith.constant 0.000000e+00 : bf16
    %1290 = vector.broadcast %cst_471 : bf16 to vector<32x8xbf16>
    %1291 = vector.shape_cast %1175 : vector<1x8xi1> to vector<1x8xi1>
    %1292 = vector.broadcast %1291 : vector<1x8xi1> to vector<32x8xi1>
    %1293 = arith.select %1292, %1289, %1290 : vector<32x8xi1>, vector<32x8xbf16>
    %cst_472 = arith.constant 0.000000e+00 : bf16
    %1294 = vector.broadcast %cst_472 : bf16 to vector<32x3xbf16>
    %1295 = vector.extract_strided_slice %1122 {offsets = [0, 0], sizes = [32, 5], strides = [1, 1]} : vector<32x8xbf16> to vector<32x5xbf16>
    %1296 = tpu.concatenate %1294, %1295 in 1 : vector<32x3xbf16>, vector<32x5xbf16> -> vector<32x8xbf16>
    %cst_473 = arith.constant 0.000000e+00 : bf16
    %1297 = vector.broadcast %cst_473 : bf16 to vector<32x8xbf16>
    %1298 = vector.shape_cast %1184 : vector<1x8xi1> to vector<1x8xi1>
    %1299 = vector.broadcast %1298 : vector<1x8xi1> to vector<32x8xi1>
    %1300 = arith.select %1299, %1296, %1297 : vector<32x8xi1>, vector<32x8xbf16>
    %cst_474 = arith.constant 0.000000e+00 : bf16
    %1301 = vector.broadcast %cst_474 : bf16 to vector<32x2xbf16>
    %1302 = vector.extract_strided_slice %1122 {offsets = [0, 0], sizes = [32, 6], strides = [1, 1]} : vector<32x8xbf16> to vector<32x6xbf16>
    %1303 = tpu.concatenate %1301, %1302 in 1 : vector<32x2xbf16>, vector<32x6xbf16> -> vector<32x8xbf16>
    %cst_475 = arith.constant 0.000000e+00 : bf16
    %1304 = vector.broadcast %cst_475 : bf16 to vector<32x8xbf16>
    %1305 = vector.shape_cast %1193 : vector<1x8xi1> to vector<1x8xi1>
    %1306 = vector.broadcast %1305 : vector<1x8xi1> to vector<32x8xi1>
    %1307 = arith.select %1306, %1303, %1304 : vector<32x8xi1>, vector<32x8xbf16>
    %cst_476 = arith.constant 0.000000e+00 : bf16
    %1308 = vector.broadcast %cst_476 : bf16 to vector<32x1xbf16>
    %1309 = vector.extract_strided_slice %1122 {offsets = [0, 0], sizes = [32, 7], strides = [1, 1]} : vector<32x8xbf16> to vector<32x7xbf16>
    %1310 = tpu.concatenate %1308, %1309 in 1 : vector<32x1xbf16>, vector<32x7xbf16> -> vector<32x8xbf16>
    %cst_477 = arith.constant 0.000000e+00 : bf16
    %1311 = vector.broadcast %cst_477 : bf16 to vector<32x8xbf16>
    %1312 = vector.shape_cast %1202 : vector<1x8xi1> to vector<1x8xi1>
    %1313 = vector.broadcast %1312 : vector<1x8xi1> to vector<32x8xi1>
    %1314 = arith.select %1313, %1310, %1311 : vector<32x8xi1>, vector<32x8xbf16>
    %1315 = vector.extract_strided_slice %1122 {offsets = [0, 1], sizes = [32, 7], strides = [1, 1]} : vector<32x8xbf16> to vector<32x7xbf16>
    %cst_478 = arith.constant 0.000000e+00 : bf16
    %1316 = vector.broadcast %cst_478 : bf16 to vector<32x1xbf16>
    %1317 = tpu.concatenate %1315, %1316 in 1 : vector<32x7xbf16>, vector<32x1xbf16> -> vector<32x8xbf16>
    %cst_479 = arith.constant 0.000000e+00 : bf16
    %1318 = vector.broadcast %cst_479 : bf16 to vector<32x8xbf16>
    %1319 = vector.shape_cast %1211 : vector<1x8xi1> to vector<1x8xi1>
    %1320 = vector.broadcast %1319 : vector<1x8xi1> to vector<32x8xi1>
    %1321 = arith.select %1320, %1317, %1318 : vector<32x8xi1>, vector<32x8xbf16>
    %1322 = vector.extract_strided_slice %1122 {offsets = [0, 2], sizes = [32, 6], strides = [1, 1]} : vector<32x8xbf16> to vector<32x6xbf16>
    %cst_480 = arith.constant 0.000000e+00 : bf16
    %1323 = vector.broadcast %cst_480 : bf16 to vector<32x2xbf16>
    %1324 = tpu.concatenate %1322, %1323 in 1 : vector<32x6xbf16>, vector<32x2xbf16> -> vector<32x8xbf16>
    %cst_481 = arith.constant 0.000000e+00 : bf16
    %1325 = vector.broadcast %cst_481 : bf16 to vector<32x8xbf16>
    %1326 = vector.shape_cast %1220 : vector<1x8xi1> to vector<1x8xi1>
    %1327 = vector.broadcast %1326 : vector<1x8xi1> to vector<32x8xi1>
    %1328 = arith.select %1327, %1324, %1325 : vector<32x8xi1>, vector<32x8xbf16>
    %1329 = vector.extract_strided_slice %1122 {offsets = [0, 3], sizes = [32, 5], strides = [1, 1]} : vector<32x8xbf16> to vector<32x5xbf16>
    %cst_482 = arith.constant 0.000000e+00 : bf16
    %1330 = vector.broadcast %cst_482 : bf16 to vector<32x3xbf16>
    %1331 = tpu.concatenate %1329, %1330 in 1 : vector<32x5xbf16>, vector<32x3xbf16> -> vector<32x8xbf16>
    %cst_483 = arith.constant 0.000000e+00 : bf16
    %1332 = vector.broadcast %cst_483 : bf16 to vector<32x8xbf16>
    %1333 = vector.shape_cast %1229 : vector<1x8xi1> to vector<1x8xi1>
    %1334 = vector.broadcast %1333 : vector<1x8xi1> to vector<32x8xi1>
    %1335 = arith.select %1334, %1331, %1332 : vector<32x8xi1>, vector<32x8xbf16>
    %1336 = vector.extract_strided_slice %1122 {offsets = [0, 4], sizes = [32, 4], strides = [1, 1]} : vector<32x8xbf16> to vector<32x4xbf16>
    %cst_484 = arith.constant 0.000000e+00 : bf16
    %1337 = vector.broadcast %cst_484 : bf16 to vector<32x4xbf16>
    %1338 = tpu.concatenate %1336, %1337 in 1 : vector<32x4xbf16>, vector<32x4xbf16> -> vector<32x8xbf16>
    %cst_485 = arith.constant 0.000000e+00 : bf16
    %1339 = vector.broadcast %cst_485 : bf16 to vector<32x8xbf16>
    %1340 = vector.shape_cast %1238 : vector<1x8xi1> to vector<1x8xi1>
    %1341 = vector.broadcast %1340 : vector<1x8xi1> to vector<32x8xi1>
    %1342 = arith.select %1341, %1338, %1339 : vector<32x8xi1>, vector<32x8xbf16>
    %1343 = vector.extract_strided_slice %1122 {offsets = [0, 5], sizes = [32, 3], strides = [1, 1]} : vector<32x8xbf16> to vector<32x3xbf16>
    %cst_486 = arith.constant 0.000000e+00 : bf16
    %1344 = vector.broadcast %cst_486 : bf16 to vector<32x5xbf16>
    %1345 = tpu.concatenate %1343, %1344 in 1 : vector<32x3xbf16>, vector<32x5xbf16> -> vector<32x8xbf16>
    %cst_487 = arith.constant 0.000000e+00 : bf16
    %1346 = vector.broadcast %cst_487 : bf16 to vector<32x8xbf16>
    %1347 = vector.shape_cast %1247 : vector<1x8xi1> to vector<1x8xi1>
    %1348 = vector.broadcast %1347 : vector<1x8xi1> to vector<32x8xi1>
    %1349 = arith.select %1348, %1345, %1346 : vector<32x8xi1>, vector<32x8xbf16>
    %1350 = vector.extract_strided_slice %1122 {offsets = [0, 6], sizes = [32, 2], strides = [1, 1]} : vector<32x8xbf16> to vector<32x2xbf16>
    %cst_488 = arith.constant 0.000000e+00 : bf16
    %1351 = vector.broadcast %cst_488 : bf16 to vector<32x6xbf16>
    %1352 = tpu.concatenate %1350, %1351 in 1 : vector<32x2xbf16>, vector<32x6xbf16> -> vector<32x8xbf16>
    %cst_489 = arith.constant 0.000000e+00 : bf16
    %1353 = vector.broadcast %cst_489 : bf16 to vector<32x8xbf16>
    %1354 = vector.shape_cast %1256 : vector<1x8xi1> to vector<1x8xi1>
    %1355 = vector.broadcast %1354 : vector<1x8xi1> to vector<32x8xi1>
    %1356 = arith.select %1355, %1352, %1353 : vector<32x8xi1>, vector<32x8xbf16>
    %1357 = vector.extract_strided_slice %1122 {offsets = [0, 7], sizes = [32, 1], strides = [1, 1]} : vector<32x8xbf16> to vector<32x1xbf16>
    %cst_490 = arith.constant 0.000000e+00 : bf16
    %1358 = vector.broadcast %cst_490 : bf16 to vector<32x7xbf16>
    %1359 = tpu.concatenate %1357, %1358 in 1 : vector<32x1xbf16>, vector<32x7xbf16> -> vector<32x8xbf16>
    %cst_491 = arith.constant 0.000000e+00 : bf16
    %1360 = vector.broadcast %cst_491 : bf16 to vector<32x8xbf16>
    %1361 = vector.shape_cast %1265 : vector<1x8xi1> to vector<1x8xi1>
    %1362 = vector.broadcast %1361 : vector<1x8xi1> to vector<32x8xi1>
    %1363 = arith.select %1362, %1359, %1360 : vector<32x8xi1>, vector<32x8xbf16>
    %1364 = tpu.concatenate %1272, %1279, %1286, %1293, %1300, %1307, %1314, %1122, %1321, %1328, %1335, %1342, %1349, %1356, %1363 in 0 : vector<32x8xbf16>, vector<32x8xbf16>, vector<32x8xbf16>, vector<32x8xbf16>, vector<32x8xbf16>, vector<32x8xbf16>, vector<32x8xbf16>, vector<32x8xbf16>, vector<32x8xbf16>, vector<32x8xbf16>, vector<32x8xbf16>, vector<32x8xbf16>, vector<32x8xbf16>, vector<32x8xbf16>, vector<32x8xbf16> -> vector<480x8xbf16>
    %c96 = arith.constant 96 : index
    %c0_492 = arith.constant 0 : index
    %1365 = vector.load %arg1[%c96, %c0_492] : memref<320x512xbf16, #tpu.memory_space<vmem>>, vector<32x480xbf16>
    %cst_493 = arith.constant dense<0.000000e+00> : vector<32x8xf32>
    %1366 = tpu.matmul %1365, %1364, %cst_493 {dimension_numbers = #tpu.dot_dimension_numbers<[1], [0], [0], [1], [0, 0, 1, 1], [], []>} : vector<32x480xbf16>, vector<480x8xbf16>, vector<32x8xf32> -> vector<32x8xf32>
    %c0_494 = arith.constant 0 : index
    %c8 = arith.constant 8 : index
    %1367 = vector.load %arg2[%c0_494, %c8] : memref<32x19xf32, #tpu.memory_space<vmem>>, vector<32x1xf32>
    %c0_495 = arith.constant 0 : index
    %c9 = arith.constant 9 : index
    %1368 = vector.load %arg2[%c0_495, %c9] : memref<32x19xf32, #tpu.memory_space<vmem>>, vector<32x1xf32>
    %cst_496 = arith.constant dense<0.000000e+00> : vector<32xf32>
    %1369 = vector.multi_reduction <add>, %1366, %cst_496 [1] : vector<32x8xf32> to vector<32xf32>
    %1370 = vector.shape_cast %1369 : vector<32xf32> to vector<32x1xf32>
    %1371 = arith.mulf %1366, %1366 : vector<32x8xf32>
    %cst_497 = arith.constant dense<0.000000e+00> : vector<32xf32>
    %1372 = vector.multi_reduction <add>, %1371, %cst_497 [1] : vector<32x8xf32> to vector<32xf32>
    %1373 = vector.shape_cast %1372 : vector<32xf32> to vector<32x1xf32>
    %cst_498 = arith.constant 1.250000e-01 : f32
    %1374 = vector.broadcast %cst_498 : f32 to vector<32x1xf32>
    %1375 = arith.mulf %1370, %1374 : vector<32x1xf32>
    %cst_499 = arith.constant 1.250000e-01 : f32
    %1376 = vector.broadcast %cst_499 : f32 to vector<32x1xf32>
    %1377 = arith.mulf %1373, %1376 : vector<32x1xf32>
    %1378 = arith.mulf %1375, %1375 : vector<32x1xf32>
    %1379 = arith.subf %1377, %1378 : vector<32x1xf32>
    %cst_500 = arith.constant 0.000000e+00 : f32
    %1380 = vector.broadcast %cst_500 : f32 to vector<32x1xf32>
    %1381 = arith.maximumf %1379, %1380 : vector<32x1xf32>
    %1382 = vector.broadcast %1375 : vector<32x1xf32> to vector<32x8xf32>
    %1383 = arith.subf %1366, %1382 : vector<32x8xf32>
    %cst_501 = arith.constant 9.99999974E-6 : f32
    %1384 = vector.broadcast %cst_501 : f32 to vector<32x1xf32>
    %1385 = arith.addf %1381, %1384 : vector<32x1xf32>
    %1386 = math.rsqrt %1385 : vector<32x1xf32>
    %1387 = vector.broadcast %1386 : vector<32x1xf32> to vector<32x8xf32>
    %1388 = arith.mulf %1383, %1387 : vector<32x8xf32>
    %1389 = vector.broadcast %1367 : vector<32x1xf32> to vector<32x8xf32>
    %1390 = arith.mulf %1388, %1389 : vector<32x8xf32>
    %1391 = vector.broadcast %1368 : vector<32x1xf32> to vector<32x8xf32>
    %1392 = arith.addf %1390, %1391 : vector<32x8xf32>
    %cst_502 = arith.constant 0.000000e+00 : f32
    %1393 = vector.broadcast %cst_502 : f32 to vector<32x8xf32>
    %1394 = arith.cmpf oge, %1392, %1393 : vector<32x8xf32>
    %cst_503 = arith.constant 1.000000e-01 : f32
    %1395 = vector.broadcast %cst_503 : f32 to vector<32x8xf32>
    %1396 = arith.mulf %1395, %1392 : vector<32x8xf32>
    %1397 = arith.select %1394, %1392, %1396 : vector<32x8xi1>, vector<32x8xf32>
    %c240 = arith.constant 240 : index
    %c0_504 = arith.constant 0 : index
    %1398 = vector.load %arg3[%c240, %c0_504] : memref<360x128xf32, #tpu.memory_space<vmem>>, vector<8x16xf32>
    %cst_505 = arith.constant dense<0.000000e+00> : vector<32x16xf32>
    %1399 = tpu.matmul %1397, %1398, %cst_505 {dimension_numbers = #tpu.dot_dimension_numbers<[1], [0], [0], [1], [0, 0, 1, 1], [], []>} : vector<32x8xf32>, vector<8x16xf32>, vector<32x16xf32> -> vector<32x16xf32>
    %1400 = tpu.iota {dimensions = array<i32: 1>} : vector<1x16xi32>
    %c8_i32_506 = arith.constant 8 : i32
    %c0_i32_507 = arith.constant 0 : i32
    %1401 = arith.cmpi eq, %c8_i32_506, %c0_i32_507 : i32
    %c1_i32_508 = arith.constant 1 : i32
    %1402 = arith.select %1401, %c1_i32_508, %c8_i32_506 : i32
    %1403 = vector.broadcast %1402 : i32 to vector<1x16xi32>
    %1404 = arith.remsi %1400, %1403 : vector<1x16xi32>
    %c0_i32_509 = arith.constant 0 : i32
    %1405 = vector.broadcast %c0_i32_509 : i32 to vector<1x16xi32>
    %1406 = arith.cmpi ne, %1404, %1405 : vector<1x16xi32>
    %c0_i32_510 = arith.constant 0 : i32
    %1407 = vector.broadcast %c0_i32_510 : i32 to vector<1x16xi32>
    %1408 = arith.cmpi slt, %1404, %1407 : vector<1x16xi32>
    %c0_i32_511 = arith.constant 0 : i32
    %1409 = arith.cmpi slt, %1402, %c0_i32_511 : i32
    %1410 = vector.broadcast %1409 : i1 to vector<1x16xi1>
    %1411 = vector.broadcast %1410 : vector<1x16xi1> to vector<1x16xi1>
    %1412 = arith.xori %1408, %1411 : vector<1x16xi1>
    %1413 = arith.andi %1412, %1406 : vector<1x16xi1>
    %1414 = vector.broadcast %1402 : i32 to vector<1x16xi32>
    %1415 = arith.addi %1404, %1414 : vector<1x16xi32>
    %1416 = arith.select %1413, %1415, %1404 : vector<1x16xi1>, vector<1x16xi32>
    %c-2_i32_512 = arith.constant -2 : i32
    %1417 = vector.broadcast %c-2_i32_512 : i32 to vector<1x16xi32>
    %1418 = arith.addi %1416, %1417 : vector<1x16xi32>
    %c0_i32_513 = arith.constant 0 : i32
    %1419 = vector.broadcast %c0_i32_513 : i32 to vector<1x16xi32>
    %1420 = arith.cmpi sge, %1418, %1419 : vector<1x16xi32>
    %c-2_i32_514 = arith.constant -2 : i32
    %1421 = vector.broadcast %c-2_i32_514 : i32 to vector<1x16xi32>
    %1422 = arith.addi %1416, %1421 : vector<1x16xi32>
    %c8_i32_515 = arith.constant 8 : i32
    %1423 = vector.broadcast %c8_i32_515 : i32 to vector<1x16xi32>
    %1424 = arith.cmpi slt, %1422, %1423 : vector<1x16xi32>
    %1425 = arith.andi %1420, %1424 : vector<1x16xi1>
    %c-1_i32_516 = arith.constant -1 : i32
    %1426 = vector.broadcast %c-1_i32_516 : i32 to vector<1x16xi32>
    %1427 = arith.addi %1416, %1426 : vector<1x16xi32>
    %c0_i32_517 = arith.constant 0 : i32
    %1428 = vector.broadcast %c0_i32_517 : i32 to vector<1x16xi32>
    %1429 = arith.cmpi sge, %1427, %1428 : vector<1x16xi32>
    %c-1_i32_518 = arith.constant -1 : i32
    %1430 = vector.broadcast %c-1_i32_518 : i32 to vector<1x16xi32>
    %1431 = arith.addi %1416, %1430 : vector<1x16xi32>
    %c8_i32_519 = arith.constant 8 : i32
    %1432 = vector.broadcast %c8_i32_519 : i32 to vector<1x16xi32>
    %1433 = arith.cmpi slt, %1431, %1432 : vector<1x16xi32>
    %1434 = arith.andi %1429, %1433 : vector<1x16xi1>
    %c1_i32_520 = arith.constant 1 : i32
    %1435 = vector.broadcast %c1_i32_520 : i32 to vector<1x16xi32>
    %1436 = arith.addi %1416, %1435 : vector<1x16xi32>
    %c0_i32_521 = arith.constant 0 : i32
    %1437 = vector.broadcast %c0_i32_521 : i32 to vector<1x16xi32>
    %1438 = arith.cmpi sge, %1436, %1437 : vector<1x16xi32>
    %c1_i32_522 = arith.constant 1 : i32
    %1439 = vector.broadcast %c1_i32_522 : i32 to vector<1x16xi32>
    %1440 = arith.addi %1416, %1439 : vector<1x16xi32>
    %c8_i32_523 = arith.constant 8 : i32
    %1441 = vector.broadcast %c8_i32_523 : i32 to vector<1x16xi32>
    %1442 = arith.cmpi slt, %1440, %1441 : vector<1x16xi32>
    %1443 = arith.andi %1438, %1442 : vector<1x16xi1>
    %c2_i32_524 = arith.constant 2 : i32
    %1444 = vector.broadcast %c2_i32_524 : i32 to vector<1x16xi32>
    %1445 = arith.addi %1416, %1444 : vector<1x16xi32>
    %c0_i32_525 = arith.constant 0 : i32
    %1446 = vector.broadcast %c0_i32_525 : i32 to vector<1x16xi32>
    %1447 = arith.cmpi sge, %1445, %1446 : vector<1x16xi32>
    %c2_i32_526 = arith.constant 2 : i32
    %1448 = vector.broadcast %c2_i32_526 : i32 to vector<1x16xi32>
    %1449 = arith.addi %1416, %1448 : vector<1x16xi32>
    %c8_i32_527 = arith.constant 8 : i32
    %1450 = vector.broadcast %c8_i32_527 : i32 to vector<1x16xi32>
    %1451 = arith.cmpi slt, %1449, %1450 : vector<1x16xi32>
    %1452 = arith.andi %1447, %1451 : vector<1x16xi1>
    %1453 = arith.truncf %1399 : vector<32x16xf32> to vector<32x16xbf16>
    %cst_528 = arith.constant 0.000000e+00 : bf16
    %1454 = vector.broadcast %cst_528 : bf16 to vector<32x2xbf16>
    %1455 = vector.extract_strided_slice %1453 {offsets = [0, 0], sizes = [32, 14], strides = [1, 1]} : vector<32x16xbf16> to vector<32x14xbf16>
    %1456 = tpu.concatenate %1454, %1455 in 1 : vector<32x2xbf16>, vector<32x14xbf16> -> vector<32x16xbf16>
    %cst_529 = arith.constant 0.000000e+00 : bf16
    %1457 = vector.broadcast %cst_529 : bf16 to vector<32x16xbf16>
    %1458 = vector.shape_cast %1425 : vector<1x16xi1> to vector<1x16xi1>
    %1459 = vector.broadcast %1458 : vector<1x16xi1> to vector<32x16xi1>
    %1460 = arith.select %1459, %1456, %1457 : vector<32x16xi1>, vector<32x16xbf16>
    %cst_530 = arith.constant 0.000000e+00 : bf16
    %1461 = vector.broadcast %cst_530 : bf16 to vector<32x1xbf16>
    %1462 = vector.extract_strided_slice %1453 {offsets = [0, 0], sizes = [32, 15], strides = [1, 1]} : vector<32x16xbf16> to vector<32x15xbf16>
    %1463 = tpu.concatenate %1461, %1462 in 1 : vector<32x1xbf16>, vector<32x15xbf16> -> vector<32x16xbf16>
    %cst_531 = arith.constant 0.000000e+00 : bf16
    %1464 = vector.broadcast %cst_531 : bf16 to vector<32x16xbf16>
    %1465 = vector.shape_cast %1434 : vector<1x16xi1> to vector<1x16xi1>
    %1466 = vector.broadcast %1465 : vector<1x16xi1> to vector<32x16xi1>
    %1467 = arith.select %1466, %1463, %1464 : vector<32x16xi1>, vector<32x16xbf16>
    %1468 = vector.extract_strided_slice %1453 {offsets = [0, 1], sizes = [32, 15], strides = [1, 1]} : vector<32x16xbf16> to vector<32x15xbf16>
    %cst_532 = arith.constant 0.000000e+00 : bf16
    %1469 = vector.broadcast %cst_532 : bf16 to vector<32x1xbf16>
    %1470 = tpu.concatenate %1468, %1469 in 1 : vector<32x15xbf16>, vector<32x1xbf16> -> vector<32x16xbf16>
    %cst_533 = arith.constant 0.000000e+00 : bf16
    %1471 = vector.broadcast %cst_533 : bf16 to vector<32x16xbf16>
    %1472 = vector.shape_cast %1443 : vector<1x16xi1> to vector<1x16xi1>
    %1473 = vector.broadcast %1472 : vector<1x16xi1> to vector<32x16xi1>
    %1474 = arith.select %1473, %1470, %1471 : vector<32x16xi1>, vector<32x16xbf16>
    %1475 = vector.extract_strided_slice %1453 {offsets = [0, 2], sizes = [32, 14], strides = [1, 1]} : vector<32x16xbf16> to vector<32x14xbf16>
    %cst_534 = arith.constant 0.000000e+00 : bf16
    %1476 = vector.broadcast %cst_534 : bf16 to vector<32x2xbf16>
    %1477 = tpu.concatenate %1475, %1476 in 1 : vector<32x14xbf16>, vector<32x2xbf16> -> vector<32x16xbf16>
    %cst_535 = arith.constant 0.000000e+00 : bf16
    %1478 = vector.broadcast %cst_535 : bf16 to vector<32x16xbf16>
    %1479 = vector.shape_cast %1452 : vector<1x16xi1> to vector<1x16xi1>
    %1480 = vector.broadcast %1479 : vector<1x16xi1> to vector<32x16xi1>
    %1481 = arith.select %1480, %1477, %1478 : vector<32x16xi1>, vector<32x16xbf16>
    %1482 = tpu.concatenate %1460, %1467, %1453, %1474, %1481 in 0 : vector<32x16xbf16>, vector<32x16xbf16>, vector<32x16xbf16>, vector<32x16xbf16>, vector<32x16xbf16> -> vector<160x16xbf16>
    %c128_536 = arith.constant 128 : index
    %c0_537 = arith.constant 0 : index
    %1483 = vector.load %arg1[%c128_536, %c0_537] : memref<320x512xbf16, #tpu.memory_space<vmem>>, vector<32x160xbf16>
    %cst_538 = arith.constant dense<0.000000e+00> : vector<32x16xf32>
    %1484 = tpu.matmul %1483, %1482, %cst_538 {dimension_numbers = #tpu.dot_dimension_numbers<[1], [0], [0], [1], [0, 0, 1, 1], [], []>} : vector<32x160xbf16>, vector<160x16xbf16>, vector<32x16xf32> -> vector<32x16xf32>
    %cst_539 = arith.constant 0.000000e+00 : bf16
    %1485 = vector.broadcast %cst_539 : bf16 to vector<32x2xbf16>
    %1486 = vector.extract_strided_slice %1118 {offsets = [0, 0], sizes = [32, 14], strides = [1, 1]} : vector<32x16xbf16> to vector<32x14xbf16>
    %1487 = tpu.concatenate %1485, %1486 in 1 : vector<32x2xbf16>, vector<32x14xbf16> -> vector<32x16xbf16>
    %cst_540 = arith.constant 0.000000e+00 : bf16
    %1488 = vector.broadcast %cst_540 : bf16 to vector<32x16xbf16>
    %1489 = vector.shape_cast %1425 : vector<1x16xi1> to vector<1x16xi1>
    %1490 = vector.broadcast %1489 : vector<1x16xi1> to vector<32x16xi1>
    %1491 = arith.select %1490, %1487, %1488 : vector<32x16xi1>, vector<32x16xbf16>
    %cst_541 = arith.constant 0.000000e+00 : bf16
    %1492 = vector.broadcast %cst_541 : bf16 to vector<32x1xbf16>
    %1493 = vector.extract_strided_slice %1118 {offsets = [0, 0], sizes = [32, 15], strides = [1, 1]} : vector<32x16xbf16> to vector<32x15xbf16>
    %1494 = tpu.concatenate %1492, %1493 in 1 : vector<32x1xbf16>, vector<32x15xbf16> -> vector<32x16xbf16>
    %cst_542 = arith.constant 0.000000e+00 : bf16
    %1495 = vector.broadcast %cst_542 : bf16 to vector<32x16xbf16>
    %1496 = vector.shape_cast %1434 : vector<1x16xi1> to vector<1x16xi1>
    %1497 = vector.broadcast %1496 : vector<1x16xi1> to vector<32x16xi1>
    %1498 = arith.select %1497, %1494, %1495 : vector<32x16xi1>, vector<32x16xbf16>
    %1499 = vector.extract_strided_slice %1118 {offsets = [0, 1], sizes = [32, 15], strides = [1, 1]} : vector<32x16xbf16> to vector<32x15xbf16>
    %cst_543 = arith.constant 0.000000e+00 : bf16
    %1500 = vector.broadcast %cst_543 : bf16 to vector<32x1xbf16>
    %1501 = tpu.concatenate %1499, %1500 in 1 : vector<32x15xbf16>, vector<32x1xbf16> -> vector<32x16xbf16>
    %cst_544 = arith.constant 0.000000e+00 : bf16
    %1502 = vector.broadcast %cst_544 : bf16 to vector<32x16xbf16>
    %1503 = vector.shape_cast %1443 : vector<1x16xi1> to vector<1x16xi1>
    %1504 = vector.broadcast %1503 : vector<1x16xi1> to vector<32x16xi1>
    %1505 = arith.select %1504, %1501, %1502 : vector<32x16xi1>, vector<32x16xbf16>
    %1506 = vector.extract_strided_slice %1118 {offsets = [0, 2], sizes = [32, 14], strides = [1, 1]} : vector<32x16xbf16> to vector<32x14xbf16>
    %cst_545 = arith.constant 0.000000e+00 : bf16
    %1507 = vector.broadcast %cst_545 : bf16 to vector<32x2xbf16>
    %1508 = tpu.concatenate %1506, %1507 in 1 : vector<32x14xbf16>, vector<32x2xbf16> -> vector<32x16xbf16>
    %cst_546 = arith.constant 0.000000e+00 : bf16
    %1509 = vector.broadcast %cst_546 : bf16 to vector<32x16xbf16>
    %1510 = vector.shape_cast %1452 : vector<1x16xi1> to vector<1x16xi1>
    %1511 = vector.broadcast %1510 : vector<1x16xi1> to vector<32x16xi1>
    %1512 = arith.select %1511, %1508, %1509 : vector<32x16xi1>, vector<32x16xbf16>
    %1513 = tpu.concatenate %1491, %1498, %1118, %1505, %1512 in 0 : vector<32x16xbf16>, vector<32x16xbf16>, vector<32x16xbf16>, vector<32x16xbf16>, vector<32x16xbf16> -> vector<160x16xbf16>
    %c160 = arith.constant 160 : index
    %c0_547 = arith.constant 0 : index
    %1514 = vector.load %arg1[%c160, %c0_547] : memref<320x512xbf16, #tpu.memory_space<vmem>>, vector<32x160xbf16>
    %cst_548 = arith.constant dense<0.000000e+00> : vector<32x16xf32>
    %1515 = tpu.matmul %1514, %1513, %cst_548 {dimension_numbers = #tpu.dot_dimension_numbers<[1], [0], [0], [1], [0, 0, 1, 1], [], []>} : vector<32x160xbf16>, vector<160x16xbf16>, vector<32x16xf32> -> vector<32x16xf32>
    %1516 = arith.addf %1484, %1515 : vector<32x16xf32>
    %c0_549 = arith.constant 0 : index
    %c10 = arith.constant 10 : index
    %1517 = vector.load %arg2[%c0_549, %c10] : memref<32x19xf32, #tpu.memory_space<vmem>>, vector<32x1xf32>
    %c0_550 = arith.constant 0 : index
    %c11 = arith.constant 11 : index
    %1518 = vector.load %arg2[%c0_550, %c11] : memref<32x19xf32, #tpu.memory_space<vmem>>, vector<32x1xf32>
    %cst_551 = arith.constant dense<0.000000e+00> : vector<32xf32>
    %1519 = vector.multi_reduction <add>, %1516, %cst_551 [1] : vector<32x16xf32> to vector<32xf32>
    %1520 = vector.shape_cast %1519 : vector<32xf32> to vector<32x1xf32>
    %1521 = arith.mulf %1516, %1516 : vector<32x16xf32>
    %cst_552 = arith.constant dense<0.000000e+00> : vector<32xf32>
    %1522 = vector.multi_reduction <add>, %1521, %cst_552 [1] : vector<32x16xf32> to vector<32xf32>
    %1523 = vector.shape_cast %1522 : vector<32xf32> to vector<32x1xf32>
    %cst_553 = arith.constant 6.250000e-02 : f32
    %1524 = vector.broadcast %cst_553 : f32 to vector<32x1xf32>
    %1525 = arith.mulf %1520, %1524 : vector<32x1xf32>
    %cst_554 = arith.constant 6.250000e-02 : f32
    %1526 = vector.broadcast %cst_554 : f32 to vector<32x1xf32>
    %1527 = arith.mulf %1523, %1526 : vector<32x1xf32>
    %1528 = arith.mulf %1525, %1525 : vector<32x1xf32>
    %1529 = arith.subf %1527, %1528 : vector<32x1xf32>
    %cst_555 = arith.constant 0.000000e+00 : f32
    %1530 = vector.broadcast %cst_555 : f32 to vector<32x1xf32>
    %1531 = arith.maximumf %1529, %1530 : vector<32x1xf32>
    %1532 = vector.broadcast %1525 : vector<32x1xf32> to vector<32x16xf32>
    %1533 = arith.subf %1516, %1532 : vector<32x16xf32>
    %cst_556 = arith.constant 9.99999974E-6 : f32
    %1534 = vector.broadcast %cst_556 : f32 to vector<32x1xf32>
    %1535 = arith.addf %1531, %1534 : vector<32x1xf32>
    %1536 = math.rsqrt %1535 : vector<32x1xf32>
    %1537 = vector.broadcast %1536 : vector<32x1xf32> to vector<32x16xf32>
    %1538 = arith.mulf %1533, %1537 : vector<32x16xf32>
    %1539 = vector.broadcast %1517 : vector<32x1xf32> to vector<32x16xf32>
    %1540 = arith.mulf %1538, %1539 : vector<32x16xf32>
    %1541 = vector.broadcast %1518 : vector<32x1xf32> to vector<32x16xf32>
    %1542 = arith.addf %1540, %1541 : vector<32x16xf32>
    %cst_557 = arith.constant 0.000000e+00 : f32
    %1543 = vector.broadcast %cst_557 : f32 to vector<32x16xf32>
    %1544 = arith.cmpf oge, %1542, %1543 : vector<32x16xf32>
    %cst_558 = arith.constant 1.000000e-01 : f32
    %1545 = vector.broadcast %cst_558 : f32 to vector<32x16xf32>
    %1546 = arith.mulf %1545, %1542 : vector<32x16xf32>
    %1547 = arith.select %1544, %1542, %1546 : vector<32x16xi1>, vector<32x16xf32>
    %c248 = arith.constant 248 : index
    %c0_559 = arith.constant 0 : index
    %1548 = vector.load %arg3[%c248, %c0_559] : memref<360x128xf32, #tpu.memory_space<vmem>>, vector<16x32xf32>
    %cst_560 = arith.constant dense<0.000000e+00> : vector<32x32xf32>
    %1549 = tpu.matmul %1547, %1548, %cst_560 {dimension_numbers = #tpu.dot_dimension_numbers<[1], [0], [0], [1], [0, 0, 1, 1], [], []>} : vector<32x16xf32>, vector<16x32xf32>, vector<32x32xf32> -> vector<32x32xf32>
    %1550 = tpu.iota {dimensions = array<i32: 1>} : vector<1x32xi32>
    %c16_i32_561 = arith.constant 16 : i32
    %c0_i32_562 = arith.constant 0 : i32
    %1551 = arith.cmpi eq, %c16_i32_561, %c0_i32_562 : i32
    %c1_i32_563 = arith.constant 1 : i32
    %1552 = arith.select %1551, %c1_i32_563, %c16_i32_561 : i32
    %1553 = vector.broadcast %1552 : i32 to vector<1x32xi32>
    %1554 = arith.remsi %1550, %1553 : vector<1x32xi32>
    %c0_i32_564 = arith.constant 0 : i32
    %1555 = vector.broadcast %c0_i32_564 : i32 to vector<1x32xi32>
    %1556 = arith.cmpi ne, %1554, %1555 : vector<1x32xi32>
    %c0_i32_565 = arith.constant 0 : i32
    %1557 = vector.broadcast %c0_i32_565 : i32 to vector<1x32xi32>
    %1558 = arith.cmpi slt, %1554, %1557 : vector<1x32xi32>
    %c0_i32_566 = arith.constant 0 : i32
    %1559 = arith.cmpi slt, %1552, %c0_i32_566 : i32
    %1560 = vector.broadcast %1559 : i1 to vector<1x32xi1>
    %1561 = vector.broadcast %1560 : vector<1x32xi1> to vector<1x32xi1>
    %1562 = arith.xori %1558, %1561 : vector<1x32xi1>
    %1563 = arith.andi %1562, %1556 : vector<1x32xi1>
    %1564 = vector.broadcast %1552 : i32 to vector<1x32xi32>
    %1565 = arith.addi %1554, %1564 : vector<1x32xi32>
    %1566 = arith.select %1563, %1565, %1554 : vector<1x32xi1>, vector<1x32xi32>
    %c-2_i32_567 = arith.constant -2 : i32
    %1567 = vector.broadcast %c-2_i32_567 : i32 to vector<1x32xi32>
    %1568 = arith.addi %1566, %1567 : vector<1x32xi32>
    %c0_i32_568 = arith.constant 0 : i32
    %1569 = vector.broadcast %c0_i32_568 : i32 to vector<1x32xi32>
    %1570 = arith.cmpi sge, %1568, %1569 : vector<1x32xi32>
    %c-2_i32_569 = arith.constant -2 : i32
    %1571 = vector.broadcast %c-2_i32_569 : i32 to vector<1x32xi32>
    %1572 = arith.addi %1566, %1571 : vector<1x32xi32>
    %c16_i32_570 = arith.constant 16 : i32
    %1573 = vector.broadcast %c16_i32_570 : i32 to vector<1x32xi32>
    %1574 = arith.cmpi slt, %1572, %1573 : vector<1x32xi32>
    %1575 = arith.andi %1570, %1574 : vector<1x32xi1>
    %c-1_i32_571 = arith.constant -1 : i32
    %1576 = vector.broadcast %c-1_i32_571 : i32 to vector<1x32xi32>
    %1577 = arith.addi %1566, %1576 : vector<1x32xi32>
    %c0_i32_572 = arith.constant 0 : i32
    %1578 = vector.broadcast %c0_i32_572 : i32 to vector<1x32xi32>
    %1579 = arith.cmpi sge, %1577, %1578 : vector<1x32xi32>
    %c-1_i32_573 = arith.constant -1 : i32
    %1580 = vector.broadcast %c-1_i32_573 : i32 to vector<1x32xi32>
    %1581 = arith.addi %1566, %1580 : vector<1x32xi32>
    %c16_i32_574 = arith.constant 16 : i32
    %1582 = vector.broadcast %c16_i32_574 : i32 to vector<1x32xi32>
    %1583 = arith.cmpi slt, %1581, %1582 : vector<1x32xi32>
    %1584 = arith.andi %1579, %1583 : vector<1x32xi1>
    %c1_i32_575 = arith.constant 1 : i32
    %1585 = vector.broadcast %c1_i32_575 : i32 to vector<1x32xi32>
    %1586 = arith.addi %1566, %1585 : vector<1x32xi32>
    %c0_i32_576 = arith.constant 0 : i32
    %1587 = vector.broadcast %c0_i32_576 : i32 to vector<1x32xi32>
    %1588 = arith.cmpi sge, %1586, %1587 : vector<1x32xi32>
    %c1_i32_577 = arith.constant 1 : i32
    %1589 = vector.broadcast %c1_i32_577 : i32 to vector<1x32xi32>
    %1590 = arith.addi %1566, %1589 : vector<1x32xi32>
    %c16_i32_578 = arith.constant 16 : i32
    %1591 = vector.broadcast %c16_i32_578 : i32 to vector<1x32xi32>
    %1592 = arith.cmpi slt, %1590, %1591 : vector<1x32xi32>
    %1593 = arith.andi %1588, %1592 : vector<1x32xi1>
    %c2_i32_579 = arith.constant 2 : i32
    %1594 = vector.broadcast %c2_i32_579 : i32 to vector<1x32xi32>
    %1595 = arith.addi %1566, %1594 : vector<1x32xi32>
    %c0_i32_580 = arith.constant 0 : i32
    %1596 = vector.broadcast %c0_i32_580 : i32 to vector<1x32xi32>
    %1597 = arith.cmpi sge, %1595, %1596 : vector<1x32xi32>
    %c2_i32_581 = arith.constant 2 : i32
    %1598 = vector.broadcast %c2_i32_581 : i32 to vector<1x32xi32>
    %1599 = arith.addi %1566, %1598 : vector<1x32xi32>
    %c16_i32_582 = arith.constant 16 : i32
    %1600 = vector.broadcast %c16_i32_582 : i32 to vector<1x32xi32>
    %1601 = arith.cmpi slt, %1599, %1600 : vector<1x32xi32>
    %1602 = arith.andi %1597, %1601 : vector<1x32xi1>
    %1603 = arith.truncf %1549 : vector<32x32xf32> to vector<32x32xbf16>
    %cst_583 = arith.constant 0.000000e+00 : bf16
    %1604 = vector.broadcast %cst_583 : bf16 to vector<32x2xbf16>
    %1605 = vector.extract_strided_slice %1603 {offsets = [0, 0], sizes = [32, 30], strides = [1, 1]} : vector<32x32xbf16> to vector<32x30xbf16>
    %1606 = tpu.concatenate %1604, %1605 in 1 : vector<32x2xbf16>, vector<32x30xbf16> -> vector<32x32xbf16>
    %cst_584 = arith.constant 0.000000e+00 : bf16
    %1607 = vector.broadcast %cst_584 : bf16 to vector<32x32xbf16>
    %1608 = vector.shape_cast %1575 : vector<1x32xi1> to vector<1x32xi1>
    %1609 = vector.broadcast %1608 : vector<1x32xi1> to vector<32x32xi1>
    %1610 = arith.select %1609, %1606, %1607 : vector<32x32xi1>, vector<32x32xbf16>
    %cst_585 = arith.constant 0.000000e+00 : bf16
    %1611 = vector.broadcast %cst_585 : bf16 to vector<32x1xbf16>
    %1612 = vector.extract_strided_slice %1603 {offsets = [0, 0], sizes = [32, 31], strides = [1, 1]} : vector<32x32xbf16> to vector<32x31xbf16>
    %1613 = tpu.concatenate %1611, %1612 in 1 : vector<32x1xbf16>, vector<32x31xbf16> -> vector<32x32xbf16>
    %cst_586 = arith.constant 0.000000e+00 : bf16
    %1614 = vector.broadcast %cst_586 : bf16 to vector<32x32xbf16>
    %1615 = vector.shape_cast %1584 : vector<1x32xi1> to vector<1x32xi1>
    %1616 = vector.broadcast %1615 : vector<1x32xi1> to vector<32x32xi1>
    %1617 = arith.select %1616, %1613, %1614 : vector<32x32xi1>, vector<32x32xbf16>
    %1618 = vector.extract_strided_slice %1603 {offsets = [0, 1], sizes = [32, 31], strides = [1, 1]} : vector<32x32xbf16> to vector<32x31xbf16>
    %cst_587 = arith.constant 0.000000e+00 : bf16
    %1619 = vector.broadcast %cst_587 : bf16 to vector<32x1xbf16>
    %1620 = tpu.concatenate %1618, %1619 in 1 : vector<32x31xbf16>, vector<32x1xbf16> -> vector<32x32xbf16>
    %cst_588 = arith.constant 0.000000e+00 : bf16
    %1621 = vector.broadcast %cst_588 : bf16 to vector<32x32xbf16>
    %1622 = vector.shape_cast %1593 : vector<1x32xi1> to vector<1x32xi1>
    %1623 = vector.broadcast %1622 : vector<1x32xi1> to vector<32x32xi1>
    %1624 = arith.select %1623, %1620, %1621 : vector<32x32xi1>, vector<32x32xbf16>
    %1625 = vector.extract_strided_slice %1603 {offsets = [0, 2], sizes = [32, 30], strides = [1, 1]} : vector<32x32xbf16> to vector<32x30xbf16>
    %cst_589 = arith.constant 0.000000e+00 : bf16
    %1626 = vector.broadcast %cst_589 : bf16 to vector<32x2xbf16>
    %1627 = tpu.concatenate %1625, %1626 in 1 : vector<32x30xbf16>, vector<32x2xbf16> -> vector<32x32xbf16>
    %cst_590 = arith.constant 0.000000e+00 : bf16
    %1628 = vector.broadcast %cst_590 : bf16 to vector<32x32xbf16>
    %1629 = vector.shape_cast %1602 : vector<1x32xi1> to vector<1x32xi1>
    %1630 = vector.broadcast %1629 : vector<1x32xi1> to vector<32x32xi1>
    %1631 = arith.select %1630, %1627, %1628 : vector<32x32xi1>, vector<32x32xbf16>
    %1632 = tpu.concatenate %1610, %1617, %1603, %1624, %1631 in 0 : vector<32x32xbf16>, vector<32x32xbf16>, vector<32x32xbf16>, vector<32x32xbf16>, vector<32x32xbf16> -> vector<160x32xbf16>
    %c192_591 = arith.constant 192 : index
    %c0_592 = arith.constant 0 : index
    %1633 = vector.load %arg1[%c192_591, %c0_592] : memref<320x512xbf16, #tpu.memory_space<vmem>>, vector<32x160xbf16>
    %cst_593 = arith.constant dense<0.000000e+00> : vector<32x32xf32>
    %1634 = tpu.matmul %1633, %1632, %cst_593 {dimension_numbers = #tpu.dot_dimension_numbers<[1], [0], [0], [1], [0, 0, 1, 1], [], []>} : vector<32x160xbf16>, vector<160x32xbf16>, vector<32x32xf32> -> vector<32x32xf32>
    %cst_594 = arith.constant 0.000000e+00 : bf16
    %1635 = vector.broadcast %cst_594 : bf16 to vector<32x2xbf16>
    %1636 = vector.extract_strided_slice %838 {offsets = [0, 0], sizes = [32, 30], strides = [1, 1]} : vector<32x32xbf16> to vector<32x30xbf16>
    %1637 = tpu.concatenate %1635, %1636 in 1 : vector<32x2xbf16>, vector<32x30xbf16> -> vector<32x32xbf16>
    %cst_595 = arith.constant 0.000000e+00 : bf16
    %1638 = vector.broadcast %cst_595 : bf16 to vector<32x32xbf16>
    %1639 = vector.shape_cast %1575 : vector<1x32xi1> to vector<1x32xi1>
    %1640 = vector.broadcast %1639 : vector<1x32xi1> to vector<32x32xi1>
    %1641 = arith.select %1640, %1637, %1638 : vector<32x32xi1>, vector<32x32xbf16>
    %cst_596 = arith.constant 0.000000e+00 : bf16
    %1642 = vector.broadcast %cst_596 : bf16 to vector<32x1xbf16>
    %1643 = vector.extract_strided_slice %838 {offsets = [0, 0], sizes = [32, 31], strides = [1, 1]} : vector<32x32xbf16> to vector<32x31xbf16>
    %1644 = tpu.concatenate %1642, %1643 in 1 : vector<32x1xbf16>, vector<32x31xbf16> -> vector<32x32xbf16>
    %cst_597 = arith.constant 0.000000e+00 : bf16
    %1645 = vector.broadcast %cst_597 : bf16 to vector<32x32xbf16>
    %1646 = vector.shape_cast %1584 : vector<1x32xi1> to vector<1x32xi1>
    %1647 = vector.broadcast %1646 : vector<1x32xi1> to vector<32x32xi1>
    %1648 = arith.select %1647, %1644, %1645 : vector<32x32xi1>, vector<32x32xbf16>
    %1649 = vector.extract_strided_slice %838 {offsets = [0, 1], sizes = [32, 31], strides = [1, 1]} : vector<32x32xbf16> to vector<32x31xbf16>
    %cst_598 = arith.constant 0.000000e+00 : bf16
    %1650 = vector.broadcast %cst_598 : bf16 to vector<32x1xbf16>
    %1651 = tpu.concatenate %1649, %1650 in 1 : vector<32x31xbf16>, vector<32x1xbf16> -> vector<32x32xbf16>
    %cst_599 = arith.constant 0.000000e+00 : bf16
    %1652 = vector.broadcast %cst_599 : bf16 to vector<32x32xbf16>
    %1653 = vector.shape_cast %1593 : vector<1x32xi1> to vector<1x32xi1>
    %1654 = vector.broadcast %1653 : vector<1x32xi1> to vector<32x32xi1>
    %1655 = arith.select %1654, %1651, %1652 : vector<32x32xi1>, vector<32x32xbf16>
    %1656 = vector.extract_strided_slice %838 {offsets = [0, 2], sizes = [32, 30], strides = [1, 1]} : vector<32x32xbf16> to vector<32x30xbf16>
    %cst_600 = arith.constant 0.000000e+00 : bf16
    %1657 = vector.broadcast %cst_600 : bf16 to vector<32x2xbf16>
    %1658 = tpu.concatenate %1656, %1657 in 1 : vector<32x30xbf16>, vector<32x2xbf16> -> vector<32x32xbf16>
    %cst_601 = arith.constant 0.000000e+00 : bf16
    %1659 = vector.broadcast %cst_601 : bf16 to vector<32x32xbf16>
    %1660 = vector.shape_cast %1602 : vector<1x32xi1> to vector<1x32xi1>
    %1661 = vector.broadcast %1660 : vector<1x32xi1> to vector<32x32xi1>
    %1662 = arith.select %1661, %1658, %1659 : vector<32x32xi1>, vector<32x32xbf16>
    %1663 = tpu.concatenate %1641, %1648, %838, %1655, %1662 in 0 : vector<32x32xbf16>, vector<32x32xbf16>, vector<32x32xbf16>, vector<32x32xbf16>, vector<32x32xbf16> -> vector<160x32xbf16>
    %c224_602 = arith.constant 224 : index
    %c0_603 = arith.constant 0 : index
    %1664 = vector.load %arg1[%c224_602, %c0_603] : memref<320x512xbf16, #tpu.memory_space<vmem>>, vector<32x160xbf16>
    %cst_604 = arith.constant dense<0.000000e+00> : vector<32x32xf32>
    %1665 = tpu.matmul %1664, %1663, %cst_604 {dimension_numbers = #tpu.dot_dimension_numbers<[1], [0], [0], [1], [0, 0, 1, 1], [], []>} : vector<32x160xbf16>, vector<160x32xbf16>, vector<32x32xf32> -> vector<32x32xf32>
    %1666 = arith.addf %1634, %1665 : vector<32x32xf32>
    %c0_605 = arith.constant 0 : index
    %c12 = arith.constant 12 : index
    %1667 = vector.load %arg2[%c0_605, %c12] : memref<32x19xf32, #tpu.memory_space<vmem>>, vector<32x1xf32>
    %c0_606 = arith.constant 0 : index
    %c13 = arith.constant 13 : index
    %1668 = vector.load %arg2[%c0_606, %c13] : memref<32x19xf32, #tpu.memory_space<vmem>>, vector<32x1xf32>
    %cst_607 = arith.constant dense<0.000000e+00> : vector<32xf32>
    %1669 = vector.multi_reduction <add>, %1666, %cst_607 [1] : vector<32x32xf32> to vector<32xf32>
    %1670 = vector.shape_cast %1669 : vector<32xf32> to vector<32x1xf32>
    %1671 = arith.mulf %1666, %1666 : vector<32x32xf32>
    %cst_608 = arith.constant dense<0.000000e+00> : vector<32xf32>
    %1672 = vector.multi_reduction <add>, %1671, %cst_608 [1] : vector<32x32xf32> to vector<32xf32>
    %1673 = vector.shape_cast %1672 : vector<32xf32> to vector<32x1xf32>
    %cst_609 = arith.constant 3.125000e-02 : f32
    %1674 = vector.broadcast %cst_609 : f32 to vector<32x1xf32>
    %1675 = arith.mulf %1670, %1674 : vector<32x1xf32>
    %cst_610 = arith.constant 3.125000e-02 : f32
    %1676 = vector.broadcast %cst_610 : f32 to vector<32x1xf32>
    %1677 = arith.mulf %1673, %1676 : vector<32x1xf32>
    %1678 = arith.mulf %1675, %1675 : vector<32x1xf32>
    %1679 = arith.subf %1677, %1678 : vector<32x1xf32>
    %cst_611 = arith.constant 0.000000e+00 : f32
    %1680 = vector.broadcast %cst_611 : f32 to vector<32x1xf32>
    %1681 = arith.maximumf %1679, %1680 : vector<32x1xf32>
    %1682 = vector.broadcast %1675 : vector<32x1xf32> to vector<32x32xf32>
    %1683 = arith.subf %1666, %1682 : vector<32x32xf32>
    %cst_612 = arith.constant 9.99999974E-6 : f32
    %1684 = vector.broadcast %cst_612 : f32 to vector<32x1xf32>
    %1685 = arith.addf %1681, %1684 : vector<32x1xf32>
    %1686 = math.rsqrt %1685 : vector<32x1xf32>
    %1687 = vector.broadcast %1686 : vector<32x1xf32> to vector<32x32xf32>
    %1688 = arith.mulf %1683, %1687 : vector<32x32xf32>
    %1689 = vector.broadcast %1667 : vector<32x1xf32> to vector<32x32xf32>
    %1690 = arith.mulf %1688, %1689 : vector<32x32xf32>
    %1691 = vector.broadcast %1668 : vector<32x1xf32> to vector<32x32xf32>
    %1692 = arith.addf %1690, %1691 : vector<32x32xf32>
    %cst_613 = arith.constant 0.000000e+00 : f32
    %1693 = vector.broadcast %cst_613 : f32 to vector<32x32xf32>
    %1694 = arith.cmpf oge, %1692, %1693 : vector<32x32xf32>
    %cst_614 = arith.constant 1.000000e-01 : f32
    %1695 = vector.broadcast %cst_614 : f32 to vector<32x32xf32>
    %1696 = arith.mulf %1695, %1692 : vector<32x32xf32>
    %1697 = arith.select %1694, %1692, %1696 : vector<32x32xi1>, vector<32x32xf32>
    %c264 = arith.constant 264 : index
    %c0_615 = arith.constant 0 : index
    %1698 = vector.load %arg3[%c264, %c0_615] : memref<360x128xf32, #tpu.memory_space<vmem>>, vector<32x64xf32>
    %cst_616 = arith.constant dense<0.000000e+00> : vector<32x64xf32>
    %1699 = tpu.matmul %1697, %1698, %cst_616 {dimension_numbers = #tpu.dot_dimension_numbers<[1], [0], [0], [1], [0, 0, 1, 1], [], []>} : vector<32x32xf32>, vector<32x64xf32>, vector<32x64xf32> -> vector<32x64xf32>
    %1700 = tpu.iota {dimensions = array<i32: 1>} : vector<1x64xi32>
    %c32_i32_617 = arith.constant 32 : i32
    %c0_i32_618 = arith.constant 0 : i32
    %1701 = arith.cmpi eq, %c32_i32_617, %c0_i32_618 : i32
    %c1_i32_619 = arith.constant 1 : i32
    %1702 = arith.select %1701, %c1_i32_619, %c32_i32_617 : i32
    %1703 = vector.broadcast %1702 : i32 to vector<1x64xi32>
    %1704 = arith.remsi %1700, %1703 : vector<1x64xi32>
    %c0_i32_620 = arith.constant 0 : i32
    %1705 = vector.broadcast %c0_i32_620 : i32 to vector<1x64xi32>
    %1706 = arith.cmpi ne, %1704, %1705 : vector<1x64xi32>
    %c0_i32_621 = arith.constant 0 : i32
    %1707 = vector.broadcast %c0_i32_621 : i32 to vector<1x64xi32>
    %1708 = arith.cmpi slt, %1704, %1707 : vector<1x64xi32>
    %c0_i32_622 = arith.constant 0 : i32
    %1709 = arith.cmpi slt, %1702, %c0_i32_622 : i32
    %1710 = vector.broadcast %1709 : i1 to vector<1x64xi1>
    %1711 = vector.broadcast %1710 : vector<1x64xi1> to vector<1x64xi1>
    %1712 = arith.xori %1708, %1711 : vector<1x64xi1>
    %1713 = arith.andi %1712, %1706 : vector<1x64xi1>
    %1714 = vector.broadcast %1702 : i32 to vector<1x64xi32>
    %1715 = arith.addi %1704, %1714 : vector<1x64xi32>
    %1716 = arith.select %1713, %1715, %1704 : vector<1x64xi1>, vector<1x64xi32>
    %c-2_i32_623 = arith.constant -2 : i32
    %1717 = vector.broadcast %c-2_i32_623 : i32 to vector<1x64xi32>
    %1718 = arith.addi %1716, %1717 : vector<1x64xi32>
    %c0_i32_624 = arith.constant 0 : i32
    %1719 = vector.broadcast %c0_i32_624 : i32 to vector<1x64xi32>
    %1720 = arith.cmpi sge, %1718, %1719 : vector<1x64xi32>
    %c-2_i32_625 = arith.constant -2 : i32
    %1721 = vector.broadcast %c-2_i32_625 : i32 to vector<1x64xi32>
    %1722 = arith.addi %1716, %1721 : vector<1x64xi32>
    %c32_i32_626 = arith.constant 32 : i32
    %1723 = vector.broadcast %c32_i32_626 : i32 to vector<1x64xi32>
    %1724 = arith.cmpi slt, %1722, %1723 : vector<1x64xi32>
    %1725 = arith.andi %1720, %1724 : vector<1x64xi1>
    %c-1_i32_627 = arith.constant -1 : i32
    %1726 = vector.broadcast %c-1_i32_627 : i32 to vector<1x64xi32>
    %1727 = arith.addi %1716, %1726 : vector<1x64xi32>
    %c0_i32_628 = arith.constant 0 : i32
    %1728 = vector.broadcast %c0_i32_628 : i32 to vector<1x64xi32>
    %1729 = arith.cmpi sge, %1727, %1728 : vector<1x64xi32>
    %c-1_i32_629 = arith.constant -1 : i32
    %1730 = vector.broadcast %c-1_i32_629 : i32 to vector<1x64xi32>
    %1731 = arith.addi %1716, %1730 : vector<1x64xi32>
    %c32_i32_630 = arith.constant 32 : i32
    %1732 = vector.broadcast %c32_i32_630 : i32 to vector<1x64xi32>
    %1733 = arith.cmpi slt, %1731, %1732 : vector<1x64xi32>
    %1734 = arith.andi %1729, %1733 : vector<1x64xi1>
    %c1_i32_631 = arith.constant 1 : i32
    %1735 = vector.broadcast %c1_i32_631 : i32 to vector<1x64xi32>
    %1736 = arith.addi %1716, %1735 : vector<1x64xi32>
    %c0_i32_632 = arith.constant 0 : i32
    %1737 = vector.broadcast %c0_i32_632 : i32 to vector<1x64xi32>
    %1738 = arith.cmpi sge, %1736, %1737 : vector<1x64xi32>
    %c1_i32_633 = arith.constant 1 : i32
    %1739 = vector.broadcast %c1_i32_633 : i32 to vector<1x64xi32>
    %1740 = arith.addi %1716, %1739 : vector<1x64xi32>
    %c32_i32_634 = arith.constant 32 : i32
    %1741 = vector.broadcast %c32_i32_634 : i32 to vector<1x64xi32>
    %1742 = arith.cmpi slt, %1740, %1741 : vector<1x64xi32>
    %1743 = arith.andi %1738, %1742 : vector<1x64xi1>
    %c2_i32_635 = arith.constant 2 : i32
    %1744 = vector.broadcast %c2_i32_635 : i32 to vector<1x64xi32>
    %1745 = arith.addi %1716, %1744 : vector<1x64xi32>
    %c0_i32_636 = arith.constant 0 : i32
    %1746 = vector.broadcast %c0_i32_636 : i32 to vector<1x64xi32>
    %1747 = arith.cmpi sge, %1745, %1746 : vector<1x64xi32>
    %c2_i32_637 = arith.constant 2 : i32
    %1748 = vector.broadcast %c2_i32_637 : i32 to vector<1x64xi32>
    %1749 = arith.addi %1716, %1748 : vector<1x64xi32>
    %c32_i32_638 = arith.constant 32 : i32
    %1750 = vector.broadcast %c32_i32_638 : i32 to vector<1x64xi32>
    %1751 = arith.cmpi slt, %1749, %1750 : vector<1x64xi32>
    %1752 = arith.andi %1747, %1751 : vector<1x64xi1>
    %1753 = arith.truncf %1699 : vector<32x64xf32> to vector<32x64xbf16>
    %cst_639 = arith.constant 0.000000e+00 : bf16
    %1754 = vector.broadcast %cst_639 : bf16 to vector<32x2xbf16>
    %1755 = vector.extract_strided_slice %1753 {offsets = [0, 0], sizes = [32, 62], strides = [1, 1]} : vector<32x64xbf16> to vector<32x62xbf16>
    %1756 = tpu.concatenate %1754, %1755 in 1 : vector<32x2xbf16>, vector<32x62xbf16> -> vector<32x64xbf16>
    %cst_640 = arith.constant 0.000000e+00 : bf16
    %1757 = vector.broadcast %cst_640 : bf16 to vector<32x64xbf16>
    %1758 = vector.shape_cast %1725 : vector<1x64xi1> to vector<1x64xi1>
    %1759 = vector.broadcast %1758 : vector<1x64xi1> to vector<32x64xi1>
    %1760 = arith.select %1759, %1756, %1757 : vector<32x64xi1>, vector<32x64xbf16>
    %cst_641 = arith.constant 0.000000e+00 : bf16
    %1761 = vector.broadcast %cst_641 : bf16 to vector<32x1xbf16>
    %1762 = vector.extract_strided_slice %1753 {offsets = [0, 0], sizes = [32, 63], strides = [1, 1]} : vector<32x64xbf16> to vector<32x63xbf16>
    %1763 = tpu.concatenate %1761, %1762 in 1 : vector<32x1xbf16>, vector<32x63xbf16> -> vector<32x64xbf16>
    %cst_642 = arith.constant 0.000000e+00 : bf16
    %1764 = vector.broadcast %cst_642 : bf16 to vector<32x64xbf16>
    %1765 = vector.shape_cast %1734 : vector<1x64xi1> to vector<1x64xi1>
    %1766 = vector.broadcast %1765 : vector<1x64xi1> to vector<32x64xi1>
    %1767 = arith.select %1766, %1763, %1764 : vector<32x64xi1>, vector<32x64xbf16>
    %1768 = vector.extract_strided_slice %1753 {offsets = [0, 1], sizes = [32, 63], strides = [1, 1]} : vector<32x64xbf16> to vector<32x63xbf16>
    %cst_643 = arith.constant 0.000000e+00 : bf16
    %1769 = vector.broadcast %cst_643 : bf16 to vector<32x1xbf16>
    %1770 = tpu.concatenate %1768, %1769 in 1 : vector<32x63xbf16>, vector<32x1xbf16> -> vector<32x64xbf16>
    %cst_644 = arith.constant 0.000000e+00 : bf16
    %1771 = vector.broadcast %cst_644 : bf16 to vector<32x64xbf16>
    %1772 = vector.shape_cast %1743 : vector<1x64xi1> to vector<1x64xi1>
    %1773 = vector.broadcast %1772 : vector<1x64xi1> to vector<32x64xi1>
    %1774 = arith.select %1773, %1770, %1771 : vector<32x64xi1>, vector<32x64xbf16>
    %1775 = vector.extract_strided_slice %1753 {offsets = [0, 2], sizes = [32, 62], strides = [1, 1]} : vector<32x64xbf16> to vector<32x62xbf16>
    %cst_645 = arith.constant 0.000000e+00 : bf16
    %1776 = vector.broadcast %cst_645 : bf16 to vector<32x2xbf16>
    %1777 = tpu.concatenate %1775, %1776 in 1 : vector<32x62xbf16>, vector<32x2xbf16> -> vector<32x64xbf16>
    %cst_646 = arith.constant 0.000000e+00 : bf16
    %1778 = vector.broadcast %cst_646 : bf16 to vector<32x64xbf16>
    %1779 = vector.shape_cast %1752 : vector<1x64xi1> to vector<1x64xi1>
    %1780 = vector.broadcast %1779 : vector<1x64xi1> to vector<32x64xi1>
    %1781 = arith.select %1780, %1777, %1778 : vector<32x64xi1>, vector<32x64xbf16>
    %1782 = tpu.concatenate %1760, %1767, %1753, %1774, %1781 in 0 : vector<32x64xbf16>, vector<32x64xbf16>, vector<32x64xbf16>, vector<32x64xbf16>, vector<32x64xbf16> -> vector<160x64xbf16>
    %c256 = arith.constant 256 : index
    %c0_647 = arith.constant 0 : index
    %1783 = vector.load %arg1[%c256, %c0_647] : memref<320x512xbf16, #tpu.memory_space<vmem>>, vector<16x160xbf16>
    %cst_648 = arith.constant dense<0.000000e+00> : vector<16x64xf32>
    %1784 = tpu.matmul %1783, %1782, %cst_648 {dimension_numbers = #tpu.dot_dimension_numbers<[1], [0], [0], [1], [0, 0, 1, 1], [], []>} : vector<16x160xbf16>, vector<160x64xbf16>, vector<16x64xf32> -> vector<16x64xf32>
    %cst_649 = arith.constant 0.000000e+00 : bf16
    %1785 = vector.broadcast %cst_649 : bf16 to vector<16x2xbf16>
    %1786 = vector.extract_strided_slice %558 {offsets = [0, 0], sizes = [16, 62], strides = [1, 1]} : vector<16x64xbf16> to vector<16x62xbf16>
    %1787 = tpu.concatenate %1785, %1786 in 1 : vector<16x2xbf16>, vector<16x62xbf16> -> vector<16x64xbf16>
    %cst_650 = arith.constant 0.000000e+00 : bf16
    %1788 = vector.broadcast %cst_650 : bf16 to vector<16x64xbf16>
    %1789 = vector.shape_cast %1725 : vector<1x64xi1> to vector<1x64xi1>
    %1790 = vector.broadcast %1789 : vector<1x64xi1> to vector<16x64xi1>
    %1791 = arith.select %1790, %1787, %1788 : vector<16x64xi1>, vector<16x64xbf16>
    %cst_651 = arith.constant 0.000000e+00 : bf16
    %1792 = vector.broadcast %cst_651 : bf16 to vector<16x1xbf16>
    %1793 = vector.extract_strided_slice %558 {offsets = [0, 0], sizes = [16, 63], strides = [1, 1]} : vector<16x64xbf16> to vector<16x63xbf16>
    %1794 = tpu.concatenate %1792, %1793 in 1 : vector<16x1xbf16>, vector<16x63xbf16> -> vector<16x64xbf16>
    %cst_652 = arith.constant 0.000000e+00 : bf16
    %1795 = vector.broadcast %cst_652 : bf16 to vector<16x64xbf16>
    %1796 = vector.shape_cast %1734 : vector<1x64xi1> to vector<1x64xi1>
    %1797 = vector.broadcast %1796 : vector<1x64xi1> to vector<16x64xi1>
    %1798 = arith.select %1797, %1794, %1795 : vector<16x64xi1>, vector<16x64xbf16>
    %1799 = vector.extract_strided_slice %558 {offsets = [0, 1], sizes = [16, 63], strides = [1, 1]} : vector<16x64xbf16> to vector<16x63xbf16>
    %cst_653 = arith.constant 0.000000e+00 : bf16
    %1800 = vector.broadcast %cst_653 : bf16 to vector<16x1xbf16>
    %1801 = tpu.concatenate %1799, %1800 in 1 : vector<16x63xbf16>, vector<16x1xbf16> -> vector<16x64xbf16>
    %cst_654 = arith.constant 0.000000e+00 : bf16
    %1802 = vector.broadcast %cst_654 : bf16 to vector<16x64xbf16>
    %1803 = vector.shape_cast %1743 : vector<1x64xi1> to vector<1x64xi1>
    %1804 = vector.broadcast %1803 : vector<1x64xi1> to vector<16x64xi1>
    %1805 = arith.select %1804, %1801, %1802 : vector<16x64xi1>, vector<16x64xbf16>
    %1806 = vector.extract_strided_slice %558 {offsets = [0, 2], sizes = [16, 62], strides = [1, 1]} : vector<16x64xbf16> to vector<16x62xbf16>
    %cst_655 = arith.constant 0.000000e+00 : bf16
    %1807 = vector.broadcast %cst_655 : bf16 to vector<16x2xbf16>
    %1808 = tpu.concatenate %1806, %1807 in 1 : vector<16x62xbf16>, vector<16x2xbf16> -> vector<16x64xbf16>
    %cst_656 = arith.constant 0.000000e+00 : bf16
    %1809 = vector.broadcast %cst_656 : bf16 to vector<16x64xbf16>
    %1810 = vector.shape_cast %1752 : vector<1x64xi1> to vector<1x64xi1>
    %1811 = vector.broadcast %1810 : vector<1x64xi1> to vector<16x64xi1>
    %1812 = arith.select %1811, %1808, %1809 : vector<16x64xi1>, vector<16x64xbf16>
    %1813 = tpu.concatenate %1791, %1798, %558, %1805, %1812 in 0 : vector<16x64xbf16>, vector<16x64xbf16>, vector<16x64xbf16>, vector<16x64xbf16>, vector<16x64xbf16> -> vector<80x64xbf16>
    %c272 = arith.constant 272 : index
    %c0_657 = arith.constant 0 : index
    %1814 = vector.load %arg1[%c272, %c0_657] : memref<320x512xbf16, #tpu.memory_space<vmem>>, vector<16x80xbf16>
    %cst_658 = arith.constant dense<0.000000e+00> : vector<16x64xf32>
    %1815 = tpu.matmul %1814, %1813, %cst_658 {dimension_numbers = #tpu.dot_dimension_numbers<[1], [0], [0], [1], [0, 0, 1, 1], [], []>} : vector<16x80xbf16>, vector<80x64xbf16>, vector<16x64xf32> -> vector<16x64xf32>
    %1816 = arith.addf %1784, %1815 : vector<16x64xf32>
    %c0_659 = arith.constant 0 : index
    %c14 = arith.constant 14 : index
    %1817 = vector.load %arg2[%c0_659, %c14] : memref<32x19xf32, #tpu.memory_space<vmem>>, vector<16x1xf32>
    %c0_660 = arith.constant 0 : index
    %c15 = arith.constant 15 : index
    %1818 = vector.load %arg2[%c0_660, %c15] : memref<32x19xf32, #tpu.memory_space<vmem>>, vector<16x1xf32>
    %cst_661 = arith.constant dense<0.000000e+00> : vector<16xf32>
    %1819 = vector.multi_reduction <add>, %1816, %cst_661 [1] : vector<16x64xf32> to vector<16xf32>
    %1820 = vector.shape_cast %1819 : vector<16xf32> to vector<16x1xf32>
    %1821 = arith.mulf %1816, %1816 : vector<16x64xf32>
    %cst_662 = arith.constant dense<0.000000e+00> : vector<16xf32>
    %1822 = vector.multi_reduction <add>, %1821, %cst_662 [1] : vector<16x64xf32> to vector<16xf32>
    %1823 = vector.shape_cast %1822 : vector<16xf32> to vector<16x1xf32>
    %cst_663 = arith.constant 1.562500e-02 : f32
    %1824 = vector.broadcast %cst_663 : f32 to vector<16x1xf32>
    %1825 = arith.mulf %1820, %1824 : vector<16x1xf32>
    %cst_664 = arith.constant 1.562500e-02 : f32
    %1826 = vector.broadcast %cst_664 : f32 to vector<16x1xf32>
    %1827 = arith.mulf %1823, %1826 : vector<16x1xf32>
    %1828 = arith.mulf %1825, %1825 : vector<16x1xf32>
    %1829 = arith.subf %1827, %1828 : vector<16x1xf32>
    %cst_665 = arith.constant 0.000000e+00 : f32
    %1830 = vector.broadcast %cst_665 : f32 to vector<16x1xf32>
    %1831 = arith.maximumf %1829, %1830 : vector<16x1xf32>
    %1832 = vector.broadcast %1825 : vector<16x1xf32> to vector<16x64xf32>
    %1833 = arith.subf %1816, %1832 : vector<16x64xf32>
    %cst_666 = arith.constant 9.99999974E-6 : f32
    %1834 = vector.broadcast %cst_666 : f32 to vector<16x1xf32>
    %1835 = arith.addf %1831, %1834 : vector<16x1xf32>
    %1836 = math.rsqrt %1835 : vector<16x1xf32>
    %1837 = vector.broadcast %1836 : vector<16x1xf32> to vector<16x64xf32>
    %1838 = arith.mulf %1833, %1837 : vector<16x64xf32>
    %1839 = vector.broadcast %1817 : vector<16x1xf32> to vector<16x64xf32>
    %1840 = arith.mulf %1838, %1839 : vector<16x64xf32>
    %1841 = vector.broadcast %1818 : vector<16x1xf32> to vector<16x64xf32>
    %1842 = arith.addf %1840, %1841 : vector<16x64xf32>
    %cst_667 = arith.constant 0.000000e+00 : f32
    %1843 = vector.broadcast %cst_667 : f32 to vector<16x64xf32>
    %1844 = arith.cmpf oge, %1842, %1843 : vector<16x64xf32>
    %cst_668 = arith.constant 1.000000e-01 : f32
    %1845 = vector.broadcast %cst_668 : f32 to vector<16x64xf32>
    %1846 = arith.mulf %1845, %1842 : vector<16x64xf32>
    %1847 = arith.select %1844, %1842, %1846 : vector<16x64xi1>, vector<16x64xf32>
    %c296 = arith.constant 296 : index
    %c0_669 = arith.constant 0 : index
    %1848 = vector.load %arg3[%c296, %c0_669] : memref<360x128xf32, #tpu.memory_space<vmem>>, vector<64x128xf32>
    %cst_670 = arith.constant dense<0.000000e+00> : vector<16x128xf32>
    %1849 = tpu.matmul %1847, %1848, %cst_670 {dimension_numbers = #tpu.dot_dimension_numbers<[1], [0], [0], [1], [0, 0, 1, 1], [], []>} : vector<16x64xf32>, vector<64x128xf32>, vector<16x128xf32> -> vector<16x128xf32>
    %1850 = tpu.iota {dimensions = array<i32: 1>} : vector<1x128xi32>
    %c64_i32_671 = arith.constant 64 : i32
    %c0_i32_672 = arith.constant 0 : i32
    %1851 = arith.cmpi eq, %c64_i32_671, %c0_i32_672 : i32
    %c1_i32_673 = arith.constant 1 : i32
    %1852 = arith.select %1851, %c1_i32_673, %c64_i32_671 : i32
    %1853 = vector.broadcast %1852 : i32 to vector<1x128xi32>
    %1854 = arith.remsi %1850, %1853 : vector<1x128xi32>
    %c0_i32_674 = arith.constant 0 : i32
    %1855 = vector.broadcast %c0_i32_674 : i32 to vector<1x128xi32>
    %1856 = arith.cmpi ne, %1854, %1855 : vector<1x128xi32>
    %c0_i32_675 = arith.constant 0 : i32
    %1857 = vector.broadcast %c0_i32_675 : i32 to vector<1x128xi32>
    %1858 = arith.cmpi slt, %1854, %1857 : vector<1x128xi32>
    %c0_i32_676 = arith.constant 0 : i32
    %1859 = arith.cmpi slt, %1852, %c0_i32_676 : i32
    %1860 = vector.broadcast %1859 : i1 to vector<1x128xi1>
    %1861 = vector.broadcast %1860 : vector<1x128xi1> to vector<1x128xi1>
    %1862 = arith.xori %1858, %1861 : vector<1x128xi1>
    %1863 = arith.andi %1862, %1856 : vector<1x128xi1>
    %1864 = vector.broadcast %1852 : i32 to vector<1x128xi32>
    %1865 = arith.addi %1854, %1864 : vector<1x128xi32>
    %1866 = arith.select %1863, %1865, %1854 : vector<1x128xi1>, vector<1x128xi32>
    %c-2_i32_677 = arith.constant -2 : i32
    %1867 = vector.broadcast %c-2_i32_677 : i32 to vector<1x128xi32>
    %1868 = arith.addi %1866, %1867 : vector<1x128xi32>
    %c0_i32_678 = arith.constant 0 : i32
    %1869 = vector.broadcast %c0_i32_678 : i32 to vector<1x128xi32>
    %1870 = arith.cmpi sge, %1868, %1869 : vector<1x128xi32>
    %c-2_i32_679 = arith.constant -2 : i32
    %1871 = vector.broadcast %c-2_i32_679 : i32 to vector<1x128xi32>
    %1872 = arith.addi %1866, %1871 : vector<1x128xi32>
    %c64_i32_680 = arith.constant 64 : i32
    %1873 = vector.broadcast %c64_i32_680 : i32 to vector<1x128xi32>
    %1874 = arith.cmpi slt, %1872, %1873 : vector<1x128xi32>
    %1875 = arith.andi %1870, %1874 : vector<1x128xi1>
    %c-1_i32_681 = arith.constant -1 : i32
    %1876 = vector.broadcast %c-1_i32_681 : i32 to vector<1x128xi32>
    %1877 = arith.addi %1866, %1876 : vector<1x128xi32>
    %c0_i32_682 = arith.constant 0 : i32
    %1878 = vector.broadcast %c0_i32_682 : i32 to vector<1x128xi32>
    %1879 = arith.cmpi sge, %1877, %1878 : vector<1x128xi32>
    %c-1_i32_683 = arith.constant -1 : i32
    %1880 = vector.broadcast %c-1_i32_683 : i32 to vector<1x128xi32>
    %1881 = arith.addi %1866, %1880 : vector<1x128xi32>
    %c64_i32_684 = arith.constant 64 : i32
    %1882 = vector.broadcast %c64_i32_684 : i32 to vector<1x128xi32>
    %1883 = arith.cmpi slt, %1881, %1882 : vector<1x128xi32>
    %1884 = arith.andi %1879, %1883 : vector<1x128xi1>
    %c1_i32_685 = arith.constant 1 : i32
    %1885 = vector.broadcast %c1_i32_685 : i32 to vector<1x128xi32>
    %1886 = arith.addi %1866, %1885 : vector<1x128xi32>
    %c0_i32_686 = arith.constant 0 : i32
    %1887 = vector.broadcast %c0_i32_686 : i32 to vector<1x128xi32>
    %1888 = arith.cmpi sge, %1886, %1887 : vector<1x128xi32>
    %c1_i32_687 = arith.constant 1 : i32
    %1889 = vector.broadcast %c1_i32_687 : i32 to vector<1x128xi32>
    %1890 = arith.addi %1866, %1889 : vector<1x128xi32>
    %c64_i32_688 = arith.constant 64 : i32
    %1891 = vector.broadcast %c64_i32_688 : i32 to vector<1x128xi32>
    %1892 = arith.cmpi slt, %1890, %1891 : vector<1x128xi32>
    %1893 = arith.andi %1888, %1892 : vector<1x128xi1>
    %c2_i32_689 = arith.constant 2 : i32
    %1894 = vector.broadcast %c2_i32_689 : i32 to vector<1x128xi32>
    %1895 = arith.addi %1866, %1894 : vector<1x128xi32>
    %c0_i32_690 = arith.constant 0 : i32
    %1896 = vector.broadcast %c0_i32_690 : i32 to vector<1x128xi32>
    %1897 = arith.cmpi sge, %1895, %1896 : vector<1x128xi32>
    %c2_i32_691 = arith.constant 2 : i32
    %1898 = vector.broadcast %c2_i32_691 : i32 to vector<1x128xi32>
    %1899 = arith.addi %1866, %1898 : vector<1x128xi32>
    %c64_i32_692 = arith.constant 64 : i32
    %1900 = vector.broadcast %c64_i32_692 : i32 to vector<1x128xi32>
    %1901 = arith.cmpi slt, %1899, %1900 : vector<1x128xi32>
    %1902 = arith.andi %1897, %1901 : vector<1x128xi1>
    %1903 = arith.truncf %1849 : vector<16x128xf32> to vector<16x128xbf16>
    %cst_693 = arith.constant 0.000000e+00 : bf16
    %1904 = vector.broadcast %cst_693 : bf16 to vector<16x2xbf16>
    %1905 = vector.extract_strided_slice %1903 {offsets = [0, 0], sizes = [16, 126], strides = [1, 1]} : vector<16x128xbf16> to vector<16x126xbf16>
    %1906 = tpu.concatenate %1904, %1905 in 1 : vector<16x2xbf16>, vector<16x126xbf16> -> vector<16x128xbf16>
    %cst_694 = arith.constant 0.000000e+00 : bf16
    %1907 = vector.broadcast %cst_694 : bf16 to vector<16x128xbf16>
    %1908 = vector.shape_cast %1875 : vector<1x128xi1> to vector<1x128xi1>
    %1909 = vector.broadcast %1908 : vector<1x128xi1> to vector<16x128xi1>
    %1910 = arith.select %1909, %1906, %1907 : vector<16x128xi1>, vector<16x128xbf16>
    %cst_695 = arith.constant 0.000000e+00 : bf16
    %1911 = vector.broadcast %cst_695 : bf16 to vector<16x1xbf16>
    %1912 = vector.extract_strided_slice %1903 {offsets = [0, 0], sizes = [16, 127], strides = [1, 1]} : vector<16x128xbf16> to vector<16x127xbf16>
    %1913 = tpu.concatenate %1911, %1912 in 1 : vector<16x1xbf16>, vector<16x127xbf16> -> vector<16x128xbf16>
    %cst_696 = arith.constant 0.000000e+00 : bf16
    %1914 = vector.broadcast %cst_696 : bf16 to vector<16x128xbf16>
    %1915 = vector.shape_cast %1884 : vector<1x128xi1> to vector<1x128xi1>
    %1916 = vector.broadcast %1915 : vector<1x128xi1> to vector<16x128xi1>
    %1917 = arith.select %1916, %1913, %1914 : vector<16x128xi1>, vector<16x128xbf16>
    %1918 = vector.extract_strided_slice %1903 {offsets = [0, 1], sizes = [16, 127], strides = [1, 1]} : vector<16x128xbf16> to vector<16x127xbf16>
    %cst_697 = arith.constant 0.000000e+00 : bf16
    %1919 = vector.broadcast %cst_697 : bf16 to vector<16x1xbf16>
    %1920 = tpu.concatenate %1918, %1919 in 1 : vector<16x127xbf16>, vector<16x1xbf16> -> vector<16x128xbf16>
    %cst_698 = arith.constant 0.000000e+00 : bf16
    %1921 = vector.broadcast %cst_698 : bf16 to vector<16x128xbf16>
    %1922 = vector.shape_cast %1893 : vector<1x128xi1> to vector<1x128xi1>
    %1923 = vector.broadcast %1922 : vector<1x128xi1> to vector<16x128xi1>
    %1924 = arith.select %1923, %1920, %1921 : vector<16x128xi1>, vector<16x128xbf16>
    %1925 = vector.extract_strided_slice %1903 {offsets = [0, 2], sizes = [16, 126], strides = [1, 1]} : vector<16x128xbf16> to vector<16x126xbf16>
    %cst_699 = arith.constant 0.000000e+00 : bf16
    %1926 = vector.broadcast %cst_699 : bf16 to vector<16x2xbf16>
    %1927 = tpu.concatenate %1925, %1926 in 1 : vector<16x126xbf16>, vector<16x2xbf16> -> vector<16x128xbf16>
    %cst_700 = arith.constant 0.000000e+00 : bf16
    %1928 = vector.broadcast %cst_700 : bf16 to vector<16x128xbf16>
    %1929 = vector.shape_cast %1902 : vector<1x128xi1> to vector<1x128xi1>
    %1930 = vector.broadcast %1929 : vector<1x128xi1> to vector<16x128xi1>
    %1931 = arith.select %1930, %1927, %1928 : vector<16x128xi1>, vector<16x128xbf16>
    %1932 = tpu.concatenate %1910, %1917, %1903, %1924, %1931 in 0 : vector<16x128xbf16>, vector<16x128xbf16>, vector<16x128xbf16>, vector<16x128xbf16>, vector<16x128xbf16> -> vector<80x128xbf16>
    %c288 = arith.constant 288 : index
    %c0_701 = arith.constant 0 : index
    %1933 = vector.load %arg1[%c288, %c0_701] : memref<320x512xbf16, #tpu.memory_space<vmem>>, vector<16x80xbf16>
    %cst_702 = arith.constant dense<0.000000e+00> : vector<16x128xf32>
    %1934 = tpu.matmul %1933, %1932, %cst_702 {dimension_numbers = #tpu.dot_dimension_numbers<[1], [0], [0], [1], [0, 0, 1, 1], [], []>} : vector<16x80xbf16>, vector<80x128xbf16>, vector<16x128xf32> -> vector<16x128xf32>
    %cst_703 = arith.constant 0.000000e+00 : bf16
    %1935 = vector.broadcast %cst_703 : bf16 to vector<16x2xbf16>
    %1936 = vector.extract_strided_slice %278 {offsets = [0, 0], sizes = [16, 126], strides = [1, 1]} : vector<16x128xbf16> to vector<16x126xbf16>
    %1937 = tpu.concatenate %1935, %1936 in 1 : vector<16x2xbf16>, vector<16x126xbf16> -> vector<16x128xbf16>
    %cst_704 = arith.constant 0.000000e+00 : bf16
    %1938 = vector.broadcast %cst_704 : bf16 to vector<16x128xbf16>
    %1939 = vector.shape_cast %1875 : vector<1x128xi1> to vector<1x128xi1>
    %1940 = vector.broadcast %1939 : vector<1x128xi1> to vector<16x128xi1>
    %1941 = arith.select %1940, %1937, %1938 : vector<16x128xi1>, vector<16x128xbf16>
    %cst_705 = arith.constant 0.000000e+00 : bf16
    %1942 = vector.broadcast %cst_705 : bf16 to vector<16x1xbf16>
    %1943 = vector.extract_strided_slice %278 {offsets = [0, 0], sizes = [16, 127], strides = [1, 1]} : vector<16x128xbf16> to vector<16x127xbf16>
    %1944 = tpu.concatenate %1942, %1943 in 1 : vector<16x1xbf16>, vector<16x127xbf16> -> vector<16x128xbf16>
    %cst_706 = arith.constant 0.000000e+00 : bf16
    %1945 = vector.broadcast %cst_706 : bf16 to vector<16x128xbf16>
    %1946 = vector.shape_cast %1884 : vector<1x128xi1> to vector<1x128xi1>
    %1947 = vector.broadcast %1946 : vector<1x128xi1> to vector<16x128xi1>
    %1948 = arith.select %1947, %1944, %1945 : vector<16x128xi1>, vector<16x128xbf16>
    %1949 = vector.extract_strided_slice %278 {offsets = [0, 1], sizes = [16, 127], strides = [1, 1]} : vector<16x128xbf16> to vector<16x127xbf16>
    %cst_707 = arith.constant 0.000000e+00 : bf16
    %1950 = vector.broadcast %cst_707 : bf16 to vector<16x1xbf16>
    %1951 = tpu.concatenate %1949, %1950 in 1 : vector<16x127xbf16>, vector<16x1xbf16> -> vector<16x128xbf16>
    %cst_708 = arith.constant 0.000000e+00 : bf16
    %1952 = vector.broadcast %cst_708 : bf16 to vector<16x128xbf16>
    %1953 = vector.shape_cast %1893 : vector<1x128xi1> to vector<1x128xi1>
    %1954 = vector.broadcast %1953 : vector<1x128xi1> to vector<16x128xi1>
    %1955 = arith.select %1954, %1951, %1952 : vector<16x128xi1>, vector<16x128xbf16>
    %1956 = vector.extract_strided_slice %278 {offsets = [0, 2], sizes = [16, 126], strides = [1, 1]} : vector<16x128xbf16> to vector<16x126xbf16>
    %cst_709 = arith.constant 0.000000e+00 : bf16
    %1957 = vector.broadcast %cst_709 : bf16 to vector<16x2xbf16>
    %1958 = tpu.concatenate %1956, %1957 in 1 : vector<16x126xbf16>, vector<16x2xbf16> -> vector<16x128xbf16>
    %cst_710 = arith.constant 0.000000e+00 : bf16
    %1959 = vector.broadcast %cst_710 : bf16 to vector<16x128xbf16>
    %1960 = vector.shape_cast %1902 : vector<1x128xi1> to vector<1x128xi1>
    %1961 = vector.broadcast %1960 : vector<1x128xi1> to vector<16x128xi1>
    %1962 = arith.select %1961, %1958, %1959 : vector<16x128xi1>, vector<16x128xbf16>
    %1963 = tpu.concatenate %1941, %1948, %278, %1955, %1962 in 0 : vector<16x128xbf16>, vector<16x128xbf16>, vector<16x128xbf16>, vector<16x128xbf16>, vector<16x128xbf16> -> vector<80x128xbf16>
    %c304 = arith.constant 304 : index
    %c0_711 = arith.constant 0 : index
    %1964 = vector.load %arg1[%c304, %c0_711] : memref<320x512xbf16, #tpu.memory_space<vmem>>, vector<16x80xbf16>
    %cst_712 = arith.constant dense<0.000000e+00> : vector<16x128xf32>
    %1965 = tpu.matmul %1964, %1963, %cst_712 {dimension_numbers = #tpu.dot_dimension_numbers<[1], [0], [0], [1], [0, 0, 1, 1], [], []>} : vector<16x80xbf16>, vector<80x128xbf16>, vector<16x128xf32> -> vector<16x128xf32>
    %1966 = arith.addf %1934, %1965 : vector<16x128xf32>
    %c0_713 = arith.constant 0 : index
    %c16_714 = arith.constant 16 : index
    %1967 = vector.load %arg2[%c0_713, %c16_714] : memref<32x19xf32, #tpu.memory_space<vmem>>, vector<16x1xf32>
    %c0_715 = arith.constant 0 : index
    %c17 = arith.constant 17 : index
    %1968 = vector.load %arg2[%c0_715, %c17] : memref<32x19xf32, #tpu.memory_space<vmem>>, vector<16x1xf32>
    %cst_716 = arith.constant dense<0.000000e+00> : vector<16xf32>
    %1969 = vector.multi_reduction <add>, %1966, %cst_716 [1] : vector<16x128xf32> to vector<16xf32>
    %1970 = vector.shape_cast %1969 : vector<16xf32> to vector<16x1xf32>
    %1971 = arith.mulf %1966, %1966 : vector<16x128xf32>
    %cst_717 = arith.constant dense<0.000000e+00> : vector<16xf32>
    %1972 = vector.multi_reduction <add>, %1971, %cst_717 [1] : vector<16x128xf32> to vector<16xf32>
    %1973 = vector.shape_cast %1972 : vector<16xf32> to vector<16x1xf32>
    %cst_718 = arith.constant 7.812500e-03 : f32
    %1974 = vector.broadcast %cst_718 : f32 to vector<16x1xf32>
    %1975 = arith.mulf %1970, %1974 : vector<16x1xf32>
    %cst_719 = arith.constant 7.812500e-03 : f32
    %1976 = vector.broadcast %cst_719 : f32 to vector<16x1xf32>
    %1977 = arith.mulf %1973, %1976 : vector<16x1xf32>
    %1978 = arith.mulf %1975, %1975 : vector<16x1xf32>
    %1979 = arith.subf %1977, %1978 : vector<16x1xf32>
    %cst_720 = arith.constant 0.000000e+00 : f32
    %1980 = vector.broadcast %cst_720 : f32 to vector<16x1xf32>
    %1981 = arith.maximumf %1979, %1980 : vector<16x1xf32>
    %1982 = vector.broadcast %1975 : vector<16x1xf32> to vector<16x128xf32>
    %1983 = arith.subf %1966, %1982 : vector<16x128xf32>
    %cst_721 = arith.constant 9.99999974E-6 : f32
    %1984 = vector.broadcast %cst_721 : f32 to vector<16x1xf32>
    %1985 = arith.addf %1981, %1984 : vector<16x1xf32>
    %1986 = math.rsqrt %1985 : vector<16x1xf32>
    %1987 = vector.broadcast %1986 : vector<16x1xf32> to vector<16x128xf32>
    %1988 = arith.mulf %1983, %1987 : vector<16x128xf32>
    %1989 = vector.broadcast %1967 : vector<16x1xf32> to vector<16x128xf32>
    %1990 = arith.mulf %1988, %1989 : vector<16x128xf32>
    %1991 = vector.broadcast %1968 : vector<16x1xf32> to vector<16x128xf32>
    %1992 = arith.addf %1990, %1991 : vector<16x128xf32>
    %cst_722 = arith.constant 0.000000e+00 : f32
    %1993 = vector.broadcast %cst_722 : f32 to vector<16x128xf32>
    %1994 = arith.cmpf oge, %1992, %1993 : vector<16x128xf32>
    %cst_723 = arith.constant 1.000000e-01 : f32
    %1995 = vector.broadcast %cst_723 : f32 to vector<16x128xf32>
    %1996 = arith.mulf %1995, %1992 : vector<16x128xf32>
    %1997 = arith.select %1994, %1992, %1996 : vector<16x128xi1>, vector<16x128xf32>
    %1998 = vector.extract_strided_slice %1997 {offsets = [0, 0], sizes = [8, 128], strides = [1, 1]} : vector<16x128xf32> to vector<8x128xf32>
    %c0_724 = arith.constant 0 : index
    %c18 = arith.constant 18 : index
    %1999 = vector.load %arg2[%c0_724, %c18] : memref<32x19xf32, #tpu.memory_space<vmem>>, vector<8x1xf32>
    %c8_725 = arith.constant 8 : index
    %c18_726 = arith.constant 18 : index
    %2000 = vector.load %arg2[%c8_725, %c18_726] : memref<32x19xf32, #tpu.memory_space<vmem>>, vector<1x1xf32>
    %c9_727 = arith.constant 9 : index
    %c18_728 = arith.constant 18 : index
    %2001 = vector.load %arg2[%c9_727, %c18_728] : memref<32x19xf32, #tpu.memory_space<vmem>>, vector<1x1xf32>
    %2002 = vector.broadcast %1999 : vector<8x1xf32> to vector<8x128xf32>
    %2003 = arith.mulf %1998, %2002 : vector<8x128xf32>
    %cst_729 = arith.constant dense<0.000000e+00> : vector<128xf32>
    %2004 = vector.multi_reduction <add>, %2003, %cst_729 [0] : vector<8x128xf32> to vector<128xf32>
    %2005 = vector.shape_cast %2004 : vector<128xf32> to vector<1x128xf32>
    %2006 = vector.broadcast %2000 : vector<1x1xf32> to vector<1x128xf32>
    %2007 = arith.mulf %2006, %0 : vector<1x128xf32>
    %2008 = arith.addf %2005, %2007 : vector<1x128xf32>
    %2009 = vector.broadcast %2001 : vector<1x1xf32> to vector<1x128xf32>
    %2010 = arith.addf %2008, %2009 : vector<1x128xf32>
    %2011 = math.tanh %2010 : vector<1x128xf32>
    %c0_730 = arith.constant 0 : index
    %c0_731 = arith.constant 0 : index
    %2012 = vector.load %arg4[%c0_730, %c0_731] : memref<1x128xf32, #tpu.memory_space<vmem>>, vector<1x128xf32>
    tpu.vector_store %arg4[%c0_730, %c0_731], %2011 {strides = array<i32>} : memref<1x128xf32, #tpu.memory_space<vmem>>, vector<1x128xf32>,
    return
  }
}

</mosaic_0001>

<bundles_post_ra>
// kernel: waveunet_forward.1
= control target key start
LH: loop header
LB: loop body
LE: loop exit
PB: predicated region body
PF: predicated region fallthrough
CT: control target
= control target key end

     0   :  { %9 = vsyncpa [#allocation3], 0  ;;  %s6756_s0 = inlined_call_operand.vmem [shape: f32[16,128], index: 0, kind: input, shape index: {}]   ;;  %s6757_s1 = inlined_call_operand.hbm [shape: bf16[320,512], index: 1, kind: input, shape index: {}]   ;;  %s6758_s2 = inlined_call_operand.vmem [shape: f32[32,19], index: 2, kind: input, shape index: {}]   ;;  %s6759_s3 = inlined_call_operand.hbm [shape: f32[360,128], index: 3, kind: input, shape index: {}]   ;;  %s6760_s4 = inlined_call_operand.vmem [shape: f32[1,128], index: 4, kind: output, shape index: {}]  }
   0x1   :  { %10 = vsyncpa [#allocation5], 0  ;;  %s5124_s15 = smov [#allocation2]   ;;  %s5076_s19 = scalar_lea.hbm %s6757_s1, 10240 }
   0x2   :  { %s18_s16 = sshll.u32 %s5124_s15, 4  ;;  %p5077_p0 = scmp.ne.s32.totalorder %s6757_s1, %s5076_s19  ;;  %s19_s16 = int_to_ptr.vmem [resolvable:$true] %s18_s16 }
   0x3   :  { %p5080_p1 = scmp.lt.u32.totalorder %s5076_s19, %s6757_s1 }
   0x5   :  { %p5082_p2 = pnand %p5080_p1, %p5077_p0 }
   0x7   :  { %5085 = shalt.err (!%p5082_p2)
}
   0x8   :  { %s5086_s24 = scalar_lea.vmem %s19_s16, 10240  ;;  %p5091_p4 = scmp.lt.s32.totalorder %s19_s16, %s19_s16 }
   0x9   :  { %p5087_p3 = scmp.ne.s32.totalorder %s19_s16, %s5086_s24  ;;  %p5092_p5 = scmp.lt.s32.totalorder %s5086_s24, %s5086_s24 }
   0xb   :  { %p5093_p6 = por %p5092_p5, %p5091_p4 }
   0xd   :  { %p5094_p7 = pnand %p5093_p6, %p5087_p3 }
   0xf   :  { %5097 = shalt.err (!%p5094_p7)
}
  0x10   :  { %s5125_s25 = smov 256   ;;  %s5126_s26 = smov 16  }
  0x11   :  { %24 = dma.hbm_to_vmem [thread:$0]  %s6757_s1, 10240, %s19_s16, [#allocation3], %s5125_s25, %s5125_s25, %s5126_s26  }
  0x12   :  { %s5127_s29 = smov [#allocation4]   ;;  %s5098_s7 = scalar_lea.hbm %s6759_s3, 5760 }
  0x13   :  { %s32_s30 = sshll.u32 %s5127_s29, 4  ;;  %p5099_p8 = scmp.ne.s32.totalorder %s6759_s3, %s5098_s7  ;;  %s33_s30 = int_to_ptr.vmem [resolvable:$true] %s32_s30 }
  0x14   :  { %p5102_p9 = scmp.lt.u32.totalorder %s5098_s7, %s6759_s3 }
  0x16   :  { %p5104_p10 = pnand %p5102_p9, %p5099_p8 }
  0x18   :  { %5107 = shalt.err (!%p5104_p10)
}
  0x19   :  { %s5108_s12 = scalar_lea.vmem %s33_s30, 5760  ;;  %p5113_p12 = scmp.lt.s32.totalorder %s33_s30, %s33_s30 }
  0x1a   :  { %p5109_p11 = scmp.ne.s32.totalorder %s33_s30, %s5108_s12  ;;  %p5114_p13 = scmp.lt.s32.totalorder %s5108_s12, %s5108_s12 }
  0x1c   :  { %p5115_p0 = por %p5114_p13, %p5113_p12 }
  0x1e   :  { %p5116_p1 = pnand %p5115_p0, %p5109_p11 }
  0x20   :  { %5119 = shalt.err (!%p5116_p1)
}
  0x21   :  { %s5128_s1 = smov 128   ;;  %s5129_s13 = smov 8  }
  0x22   :  { %38 = dma.hbm_to_vmem [thread:$0]  %s6759_s3, 5760, %s33_s30, [#allocation5], %s5128_s1, %s5128_s1, %s5129_s13  }
  0x23   :  { %5120 = dma.done.wait [#allocation3], 10240  }
  0x24   :  { %5121 = vsyncadd [#allocation3], 4294957056 }
  0x25   :  { %5122 = dma.done.wait [#allocation5], 5760  }
  0x26   :  { %5123 = vsyncadd [#allocation5], 4294961536  ;;  %v5130_v0 = vmov 0   ;;  %v49_v1 = vld [vmem:[%s6756_s0] sm:$0xff]  ;;  %v50_v2 = vld [vmem:[%s6756_s0 + $0x8] sm:$0xff]  ;;  %s5131_s3 = smov 7   ;;  %v52_v6 = vlaneseq }
  0x27   :  { %363 = vmatprep.subr.bf16.mxu0 %v5130_v0  ;;  %4911 = vset.pattern.permute.xlu1 %v5130_v0  ;;  %v5223_v3 = vpack.c.bf16 %v50_v2, %v49_v1  ;;  %s5132_s20 = smov 5   ;;  %s5133_s21 = smov 6   ;;  %v4947_v4 = vld [vmem:[#allocation2 + $0x4] ss:$16 sps:$4 sm:$0xff]   ;;  %vm6771_vm0 = vcmask 916480   ;;  %vm6769_vm8 = vcmask 56320  }
  0x28   :  { %4912 = vset.pattern.permute.xlu0 %v5130_v0  ;;  %s5134_s22 = smov 4   ;;  %s5135_s23 = smov 3   ;;  %4461 = vmatprep.mubr.msk.bf16.mxu0 %vm6771_vm0, %v4947_v4  ;;  %v5257_v5 = vld [vmem:[%s6758_s2] sm:$0xff]  ;;  %v5260_v7 = vand.u32 127, %v52_v6  ;;  %v135_v11 = vshrl.u32 %v52_v6, 7  ;;  %vm6768_vm12 = vcmask 48128  }
  0x29   :  { %123 = vrot.lane.b32.xlu0 %v5223_v3, %s5131_s3  ;;  %156 = vrot.lane.b32.xlu1 %v5223_v3, %s5132_s20  ;;  %s5136_s24 = smov 2   ;;  %s5137_s25 = smov 1   ;;  %vm6767_vm13 = vcmask 39936   ;;  %v6806_v52 = vmov 0  ;;  %v6808_v58 = vmov 0  ;;  %v6810_v6 = vmov 0 }
  0x2a   :  { %s5138_s26 = smov 127   ;;  %s5139_s27 = smov 126   ;;  %v5263_v8 = vand.u32 63, %v5260_v7  ;;  %v5268_v13 = vsub.s32 0, %v135_v11 }
  0x2b   :  { %s5140_s28 = smov 125   ;;  %s5141_s29 = smov 124  }
  0x2c   :  { %s5142_s30 = smov 123   ;;  %s5143_s5 = smov 122   ;;  %v66_v9 = vadd.s32 4294967289, %v5263_v8  ;;  %v70_v10 = vadd.s32 4294967290, %v5263_v8  ;;  %v74_v12 = vadd.s32 4294967291, %v5263_v8  ;;  %v78_v15 = vadd.s32 4294967292, %v5263_v8 }
  0x2d   :  { %140 = vrot.lane.b32.xlu0 %v5223_v3, %s5133_s21  ;;  %172 = vrot.lane.b32.xlu1 %v5223_v3, %s5134_s22  ;;  %s5144_s6 = smov 121   ;;  %v82_v18 = vadd.s32 4294967293, %v5263_v8  ;;  %v86_v23 = vadd.s32 4294967294, %v5263_v8  ;;  %v90_v29 = vadd.s32 4294967295, %v5263_v8  ;;  %v94_v44 = vadd.s32 1, %v5263_v8 }
  0x2e   :  { %vm67_vm1 = vcmp.ge.s32.totalorder %v66_v9, 0  ;;  %vm71_vm3 = vcmp.ge.s32.totalorder %v70_v10, 0  ;;  %vm75_vm4 = vcmp.ge.s32.totalorder %v74_v12, 0  ;;  %vm79_vm7 = vcmp.ge.s32.totalorder %v78_v15, 0 }
  0x2f   :  { %vm132_vm2 = vmpackc.low %vm67_vm1, %vm67_vm1  ;;  %vm83_vm11 = vcmp.ge.s32.totalorder %v82_v18, 0  ;;  %vm87_vm1 = vcmp.ge.s32.totalorder %v86_v23, 0  ;;  %v98_v50 = vadd.s32 2, %v5263_v8  ;;  %v102_v56 = vadd.s32 3, %v5263_v8 }
  0x30   :  { %v133_v14 = vsel %vm132_vm2, 65537, %v5130_v0  ;;  %vm148_vm5 = vmpackc.low %vm71_vm3, %vm71_vm3  ;;  %vm6766_vm3 = vcmask 31744   ;;  %v106_v61 = vadd.s32 4, %v5263_v8  ;;  %v110_v2 = vadd.s32 5, %v5263_v8 }
  0x31   :  { %188 = vrot.lane.b32.xlu0 %v5223_v3, %s5135_s23  ;;  %204 = vrot.lane.b32.xlu1 %v5223_v3, %s5136_s24  ;;  %v137_v16 = vrot.slane %v133_v14, %v5268_v13  ;;  %vm164_vm6 = vmpackc.low %vm75_vm4, %vm75_vm4  ;;  %v149_v17 = vsel %vm148_vm5, 65537, %v5130_v0  ;;  %vm91_vm5 = vcmp.ge.s32.totalorder %v90_v29, 0  ;;  %v114_v14 = vadd.s32 6, %v5263_v8 }
  0x32   :  { %v165_v19 = vsel %vm164_vm6, 65537, %v5130_v0  ;;  %v153_v20 = vrot.slane %v149_v17, %v5268_v13  ;;  %vm180_vm10 = vmpackc.low %vm79_vm7, %vm79_vm7  ;;  %vm6765_vm7 = vcmask 23552  }
  0x33   :  { %vm138_vm9 = vcmp.ne.s16.totalorder %v137_v16, 0  ;;  %v169_v25 = vrot.slane %v165_v19, %v5268_v13  ;;  %v181_v27 = vsel %vm180_vm10, 65537, %v5130_v0  ;;  %vm196_vm15 = vmpackc.low %vm83_vm11, %vm83_vm11  ;;  %vm6763_vm11 = vcmask 15360  }
  0x34   :  { %vm154_vm14 = vcmp.ne.s16.totalorder %v153_v20, 0  ;;  %v185_v33 = vrot.slane %v181_v27, %v5268_v13  ;;  %v197_v36 = vsel %vm196_vm15, 65537, %v5130_v0  ;;  %vm212_vm4 = vmpackc.low %vm87_vm1, %vm87_vm1  ;;  %vm6761_vm1 = vcmask 7168  }
  0x35   :  { %220 = vrot.lane.b32.xlu0 %v5223_v3, %s5137_s25  ;;  %236 = vrot.lane.b32.xlu1 %v5223_v3, %s5138_s26  ;;  %vm5285_vm2 = vcmp.ne.s16.totalorder %v169_v25, 0  ;;  %v201_v40 = vrot.slane %v197_v36, %v5268_v13  ;;  %v213_v42 = vsel %vm212_vm4, 65537, %v5130_v0  ;;  %vm100_vm4 = vcmp.lt.s32.totalorder %v98_v50, 64  ;;  %v463_v50 = vld [vmem:[#allocation4] sm:$0xff] }
  0x36   :  { %vm5295_vm6 = vcmp.ne.s16.totalorder %v185_v33, 0  ;;  %v217_v46 = vrot.slane %v213_v42, %v5268_v13  ;;  %v6812_v16 = vmov 0  ;;  %v118_v20 = vadd.s32 7, %v5263_v8  ;;  %v4945_v42 = vld [vmem:[#allocation2] ss:$16 sps:$4 sm:$0xff]  }
  0x37   :  { %vm202_vm10 = vcmp.ne.s16.totalorder %v201_v40, 0 }
  0x38   :  { %vm5311_vm15 = vcmp.ne.s16.totalorder %v217_v46, 0 }
  0x39   :  { %252 = vrot.lane.b32.xlu0 %v5223_v3, %s5139_s27  ;;  %268 = vrot.lane.b32.xlu1 %v5223_v3, %s5140_s28  ;;  %v6807_v52 = vsel %vm5311_vm15, 4294967295, %v6806_v52 }
  0x3d   :  { %284 = vrot.lane.b32.xlu0 %v5223_v3, %s5141_s29  ;;  %300 = vrot.lane.b32.xlu1 %v5223_v3, %s5142_s30 }
  0x41   :  { %316 = vrot.lane.b32.xlu0 %v5223_v3, %s5143_s5  ;;  %332 = vrot.lane.b32.xlu1 %v5223_v3, %s5144_s6 }
  0x45   :  { %436 = vperm.xlu1 %4911, %v5257_v5  }
  0x9b   :  { %v124_v21 = vpop.permute.xlu0 %123  ;;  %v157_v22 = vpop.permute.xlu1 %156 }
  0x9c   :  { %v128_v24 = vsel %vm6769_vm8, 0, %v124_v21  ;;  %v160_v31 = vsel %vm6767_vm13, 0, %v157_v22 }
  0x9d   :  { %v139_v26 = vsel %vm138_vm9, %v128_v24, 0  ;;  %v171_v37 = vsel %vm5285_vm2, %v160_v31, 0  ;;  %vm228_vm9 = vmpackc.low %vm91_vm5, %vm91_vm5 }
  0x9e   :  { %364 = vmatpush1.bf16.msra.mxu0 %v139_v26  ;;  %v229_v48 = vsel %vm228_vm9, 65537, %v5130_v0  ;;  %vm104_vm9 = vcmp.lt.s32.totalorder %v102_v56, 64  ;;  %v465_v56 = vld [vmem:[#allocation4 + $0x10] sm:$0xff] }
  0x9f   :  { %v141_v28 = vpop.permute.xlu0 %140  ;;  %365 = vmatprep.subr.bf16.mxu0 %v5130_v0  ;;  %v173_v35 = vpop.permute.xlu1 %172  ;;  %v233_v53 = vrot.slane %v229_v48, %v5268_v13 }
  0xa0   :  { %v144_v30 = vsel %vm6768_vm12, 0, %v141_v28  ;;  %v176_v38 = vsel %vm6766_vm3, 0, %v173_v35  ;;  %vm302_vm3 = vcmask 1006592  }
  0xa1   :  { %v155_v34 = vsel %vm154_vm14, %v144_v30, 0  ;;  %v187_v43 = vsel %vm5295_vm6, %v176_v38, 0  ;;  %vm96_vm14 = vcmp.lt.s32.totalorder %v94_v44, 64  ;;  %vm5321_vm5 = vcmp.ne.s16.totalorder %v233_v53, 0  ;;  %vm260_vm6 = vmpackc.low %vm100_vm4, %vm100_vm4 }
  0xa2   :  { %366 = vmatpush1.bf16.msra.mxu0 %v155_v34  ;;  %vm244_vm2 = vmpackc.low %vm96_vm14, %vm96_vm14  ;;  %v6809_v58 = vsel %vm5321_vm5, 4294967295, %v6808_v58  ;;  %v261_v1 = vsel %vm260_vm6, 65537, %v5130_v0 }
  0xa3   :  { %367 = vmatprep.subr.bf16.mxu0 %v5130_v0  ;;  %v189_v41 = vpop.permute.xlu0 %188  ;;  %v205_v47 = vpop.permute.xlu1 %204  ;;  %v245_v59 = vsel %vm244_vm2, 65537, %v5130_v0  ;;  %vm276_vm14 = vmpackc.low %vm104_vm9, %vm104_vm9  ;;  %vm108_vm2 = vcmp.lt.s32.totalorder %v106_v61, 64  ;;  %v265_v9 = vrot.slane %v261_v1, %v5268_v13  ;;  %vm112_vm9 = vcmp.lt.s32.totalorder %v110_v2, 64  ;;  %v468_v61 = vld [vmem:[#allocation4 + $0x28] sm:$0xff]  ;;  %v470_v1 = vld [vmem:[#allocation4 + $0x38] sm:$0xff] }
  0xa4   :  { %v192_v45 = vsel %vm6765_vm7, 0, %v189_v41  ;;  %v208_v51 = vsel %vm6763_vm11, 0, %v205_v47  ;;  %v249_v62 = vrot.slane %v245_v59, %v5268_v13  ;;  %v277_v11 = vsel %vm276_vm14, 65537, %v5130_v0  ;;  %vm292_vm6 = vmpackc.low %vm108_vm2, %vm108_vm2 }
  0xa5   :  { %v203_v49 = vsel %vm202_vm10, %v192_v45, 0  ;;  %v219_v55 = vsel %vm5311_vm15, %v208_v51, 0  ;;  %vm6762_vm10 = vcmask 1039360   ;;  %v281_v17 = vrot.slane %v277_v11, %v5268_v13  ;;  %vm308_vm2 = vmpackc.low %vm112_vm9, %vm112_vm9  ;;  %v464_v51 = vld [vmem:[#allocation4 + $0x8] sm:$0xff]  ;;  %v473_v11 = vld [vmem:[#allocation4 + $0x50] sm:$0xff] }
  0xa6   :  { %368 = vmatpush1.bf16.msra.mxu0 %v171_v37  ;;  %vm5335_vm4 = vcmp.ne.s16.totalorder %v249_v62, 0  ;;  %vm270_vm14 = vcmask 1022976   ;;  %vm116_vm11 = vcmp.lt.s32.totalorder %v114_v14, 64  ;;  %vm286_vm7 = vcmask 1014784  }
  0xa7   :  { %369 = vmatprep.subr.bf16.mxu0 %v5130_v0  ;;  %v221_v54 = vpop.permute.xlu0 %220  ;;  %v237_v63 = vpop.permute.xlu1 %236  ;;  %v6811_v6 = vsel %vm5335_vm4, 4294967295, %v6810_v6  ;;  %v309_v25 = vsel %vm308_vm2, 65537, %v5130_v0  ;;  %vm120_vm9 = vcmp.lt.s32.totalorder %v118_v20, 64  ;;  %vm318_vm2 = vcmask 998400  }
  0xa8   :  { %v224_v57 = vsel %vm6761_vm1, 0, %v221_v54  ;;  %v240_v4 = vsel %vm6762_vm10, %v237_v63, 0  ;;  %vm6764_vm1 = vcmask 1031168   ;;  %vm5347_vm10 = vcmp.ne.s16.totalorder %v265_v9, 0  ;;  %vm340_vm13 = vmpackc.low %vm120_vm9, %vm120_vm9  ;;  %v5390_v54 = vld [vmem:[%s6758_s2 + $0x8] sm:$0xff]  ;;  %v469_v63 = vld [vmem:[#allocation4 + $0x30] sm:$0xff] }
  0xa9   :  { %v235_v60 = vsel %vm5321_vm5, %v224_v57, 0  ;;  %v251_v12 = vsel %vm5335_vm4, %v240_v4, 0  ;;  %v6813_v16 = vsel %vm5347_vm10, 4294967295, %v6812_v16  ;;  %v313_v27 = vrot.slane %v309_v25, %v5268_v13  ;;  %v466_v57 = vld [vmem:[#allocation4 + $0x18] sm:$0xff]  ;;  %v471_v4 = vld [vmem:[#allocation4 + $0x40] sm:$0xff]  ;;  %v472_v9 = vld [vmem:[#allocation4 + $0x48] sm:$0xff] }
  0xaa   :  { %370 = vmatpush1.bf16.msra.mxu0 %v187_v43  ;;  %v341_v34 = vsel %vm340_vm13, 65537, %v5130_v0  ;;  %v5145_v43 = vmov 1   ;;  %v479_v53 = vpack.c.bf16 %v464_v51, %v463_v50  ;;  %v480_v59 = vpack.c.bf16 %v466_v57, %v465_v56 }
  0xab   :  { %371 = vmatprep.subr.bf16.mxu0 %v5130_v0  ;;  %v253_v10 = vpop.permute.xlu0 %252  ;;  %v269_v18 = vpop.permute.xlu1 %268  ;;  %v345_v37 = vrot.slane %v341_v34, %v5268_v13  ;;  %4913 = vset.pattern.permute.xlu1 %v5145_v43  ;;  %v482_v2 = vpack.c.bf16 %v470_v1, %v469_v63  ;;  %vm6773_vm13 = vmmov 0   ;;  %v4948_v1 = vld [vmem:[#allocation2 + $0x24] ss:$16 sps:$4 sm:$0xff]  }
  0xac   :  { %v256_v15 = vsel %vm6764_vm1, %v253_v10, 0  ;;  %v272_v21 = vsel %vm270_vm14, %v269_v18, 0  ;;  %vm5357_vm1 = vcmp.ne.s16.totalorder %v281_v17, 0  ;;  %v483_v10 = vpack.c.bf16 %v472_v9, %v471_v4  ;;  %v476_v17 = vld [vmem:[#allocation4 + $0x68] sm:$0xff] }
  0xad   :  { %v267_v19 = vsel %vm5347_vm10, %v256_v15, 0  ;;  %v283_v26 = vsel %vm5357_vm1, %v272_v21, 0  ;;  %vm334_vm1 = vcmask 990208   ;;  %v475_v15 = vld [vmem:[#allocation4 + $0x60] sm:$0xff]  ;;  %v5443_v4 = vand.u32 31, %v5260_v7 }
  0xae   :  { %372 = vmatpush1.bf16.msra.mxu0 %v203_v49  ;;  %v485_v18 = vpack.c.bf16 %v476_v17, %v475_v15  ;;  %vm769_vm10 = vcmask 482304  }
  0xaf   :  { %373 = vmatprep.subr.bf16.mxu0 %v5130_v0  ;;  %v285_v24 = vpop.permute.xlu0 %284  ;;  %v301_v28 = vpop.permute.xlu1 %300  ;;  %v541_v9 = vadd.s32 4294967289, %v5443_v4 }
  0xb0   :  { %v288_v8 = vsel %vm286_vm7, %v285_v24, 0  ;;  %v304_v31 = vsel %vm302_vm3, %v301_v28, 0  ;;  %vm346_vm3 = vcmp.ne.s16.totalorder %v345_v37, 0 }
  0xb2   :  { %374 = vmatpush1.bf16.msra.mxu0 %v219_v55  ;;  %v5146_v55 = vmov 0.0  }
  0xb3   :  { %375 = vmatprep.subr.bf16.mxu0 %v5130_v0  ;;  %v317_v33 = vpop.permute.xlu0 %316  ;;  %v333_v38 = vpop.permute.xlu1 %332  ;;  %4667 = vmatprep.subr.bf16.mxu1 %v5146_v55 }
  0xb4   :  { %v320_v36 = vsel %vm318_vm2, %v317_v33, 0  ;;  %v336_v40 = vsel %vm334_vm1, %v333_v38, 0  ;;  %4668 = vmatpush3.bf16.msra.mxu1 %v479_v53  ;;  %4683 = vmatprep.mubr.msk.bf16.mxu1 %vm6773_vm13, %v5146_v55 }
  0xb5   :  { %v347_v41 = vsel %vm346_vm3, %v336_v40, 0  ;;  %4669 = vmatprep.subr.bf16.mxu1 %v5146_v55 }
  0xb6   :  { %376 = vmatpush1.bf16.msra.mxu0 %v235_v60  ;;  %v467_v60 = vld [vmem:[#allocation4 + $0x20] sm:$0xff] }
  0xb7   :  { %377 = vmatprep.subr.bf16.mxu0 %v5130_v0  ;;  %v481_v62 = vpack.c.bf16 %v468_v61, %v467_v60 }
  0xb8   :  { %4670 = vmatpush3.bf16.msra.mxu1 %v480_v59 }
  0xb9   :  { %4671 = vmatprep.subr.bf16.mxu1 %v5146_v55 }
  0xba   :  { %378 = vmatpush1.bf16.msra.mxu0 %v5223_v3  ;;  %v293_v3 = vsel %vm292_vm6, 65537, %v5130_v0  ;;  %vm324_vm6 = vmpackc.low %vm116_vm11, %vm116_vm11  ;;  %vm314_vm11 = vcmp.ne.s16.totalorder %v313_v27, 0 }
  0xbb   :  { %379 = vmatprep.subr.bf16.mxu0 %v5130_v0  ;;  %v297_v23 = vrot.slane %v293_v3, %v5268_v13  ;;  %v325_v29 = vsel %vm324_vm6, 65537, %v5130_v0  ;;  %v315_v35 = vsel %vm314_vm11, %v304_v31, 0  ;;  %v477_v3 = vld [vmem:[#allocation4 + $0x70] sm:$0xff] }
  0xbc   :  { %v329_v32 = vrot.slane %v325_v29, %v5268_v13  ;;  %4672 = vmatpush3.bf16.msra.mxu1 %v481_v62 }
  0xbd   :  { %vm298_vm14 = vcmp.ne.s16.totalorder %v297_v23, 0  ;;  %4673 = vmatprep.subr.bf16.mxu1 %v5146_v55 }
  0xbe   :  { %380 = vmatpush1.bf16.msra.mxu0 %v251_v12  ;;  %v299_v30 = vsel %vm298_vm14, %v288_v8, 0  ;;  %vm330_vm7 = vcmp.ne.s16.totalorder %v329_v32, 0  ;;  %v474_v12 = vld [vmem:[#allocation4 + $0x58] sm:$0xff]  ;;  %vm542_vm14 = vcmp.ge.s32.totalorder %v541_v9, 0 }
  0xbf   :  { %381 = vmatprep.subr.bf16.mxu0 %v5130_v0  ;;  %v331_v39 = vsel %vm330_vm7, %v320_v36, 0  ;;  %v484_v14 = vpack.c.bf16 %v474_v12, %v473_v11  ;;  %vm605_vm11 = vmpackc.low %vm542_vm14, %vm542_vm14  ;;  %v549_v11 = vadd.s32 4294967291, %v5443_v4 }
  0xc0   :  { %4674 = vmatpush3.bf16.msra.mxu1 %v482_v2  ;;  %v5148_v2 = vmov 2   ;;  %v606_v12 = vsel %vm605_vm11, 65537, %v5130_v0 }
  0xc1   :  { %4675 = vmatprep.subr.bf16.mxu1 %v5146_v55  ;;  %vm550_vm1 = vcmp.ge.s32.totalorder %v549_v11, 0  ;;  %v610_v15 = vrot.slane %v606_v12, %v5268_v13  ;;  %v6825_v12 = vmov 0 }
  0xc2   :  { %382 = vmatpush1.bf16.msra.mxu0 %v267_v19  ;;  %v478_v19 = vld [vmem:[#allocation4 + $0x78] sm:$0xff]  ;;  %vm635_vm3 = vmpackc.low %vm550_vm1, %vm550_vm1 }
  0xc3   :  { %383 = vmatprep.subr.bf16.mxu0 %v5130_v0  ;;  %v486_v20 = vpack.c.bf16 %v478_v19, %v477_v3 }
  0xc4   :  { %4676 = vmatpush3.bf16.msra.mxu1 %v483_v10  ;;  %v437_v21 = vpop.permute.xlu1 %436  ;;  %v545_v10 = vadd.s32 4294967290, %v5443_v4 }
  0xc5   :  { %4677 = vmatprep.subr.bf16.mxu1 %v5146_v55 }
  0xc6   :  { %384 = vmatpush1.bf16.msra.mxu0 %v283_v26  ;;  %vm546_vm2 = vcmp.ge.s32.totalorder %v545_v10, 0  ;;  %v585_v10 = vadd.s32 5, %v5443_v4 }
  0xc7   :  { %385 = vmatprep.subr.bf16.mxu0 %v5130_v0  ;;  %vm620_vm7 = vmpackc.low %vm546_vm2, %vm546_vm2 }
  0xc8   :  { %4678 = vmatpush3.bf16.msra.mxu1 %v484_v14  ;;  %v553_v14 = vadd.s32 4294967292, %v5443_v4  ;;  %v621_v17 = vsel %vm620_vm7, 65537, %v5130_v0 }
  0xc9   :  { %4679 = vmatprep.subr.bf16.mxu1 %v5146_v55  ;;  %v625_v3 = vrot.slane %v621_v17, %v5268_v13 }
  0xca   :  { %386 = vmatpush1.bf16.msra.mxu0 %v299_v30 }
  0xcb   :  { %387 = vmatprep.subr.bf16.mxu0 %v5130_v0  ;;  %vm626_vm2 = vcmp.ne.s16.totalorder %v625_v3, 0 }
  0xcc   :  { %4680 = vmatpush3.bf16.msra.mxu1 %v485_v18  ;;  %v557_v18 = vadd.s32 4294967293, %v5443_v4 }
  0xcd   :  { %4681 = vmatprep.subr.bf16.mxu1 %v5146_v55 }
  0xce   :  { %388 = vmatpush1.bf16.msra.mxu0 %v315_v35  ;;  %vm558_vm11 = vcmp.ge.s32.totalorder %v557_v18, 0  ;;  %v589_v18 = vadd.s32 6, %v5443_v4 }
  0xcf   :  { %389 = vmatprep.subr.bf16.mxu0 %v5130_v0  ;;  %vm665_vm7 = vmpackc.low %vm558_vm11, %vm558_vm11 }
  0xd0   :  { %4682 = vmatpush3.bf16.msra.mxu1 %v486_v20  ;;  %v636_v20 = vsel %vm635_vm3, 65537, %v5130_v0 }
  0xd1   :  { %829 = vmatprep.subr.bf16.mxu1 %v5130_v0 }
  0xd2   :  { %390 = vmatpush1.bf16.msra.mxu0 %v331_v39 }
  0xd3   :  { %391 = vmatprep.subr.bf16.mxu0 %v5130_v0 }
  0xd6   :  { %392 = vmatpush1.bf16.msra.mxu0 %v347_v41 }
  0xd7   :  { %1301 = vmatprep.subr.bf16.mxu0 %v5130_v0 }
  0xd9   :  { %396 = vmatmul.mubr.bf16.vlgmr.msra.gmra.mrb[0].mxu0 %v4945_v42 }
 0x1ac   :  { %v5376_v44 = vpop.f32.mrb[0].mxu0 }
 0x1ad   :  { %406 = vadd.xlane.f32.xlu0 %v5376_v44  ;;  %v399_v45 = vpop.f32.mrb[1].mxu0  ;;  %v410_v48 = vmul.f32 %v5376_v44, %v5376_v44 }
 0x1ae   :  { %v5379_v46 = vpop.f32.mrb[2].mxu0 }
 0x1af   :  { %408 = vadd.xlane.f32.xlu1 %v5379_v46  ;;  %v402_v47 = vpop.f32.mrb[3].mxu0  ;;  %v411_v49 = vmul.f32 %v5379_v46, %v5379_v46 }
 0x1b1   :  { %412 = vadd.xlane.f32.xlu0 %v410_v48 }
 0x1b5   :  { %414 = vadd.xlane.f32.xlu0 %v411_v49 }
 0x1c0   :  { %447 = vperm.xlu1 %4913, %v5257_v5  }
 0x1c4   :  { %451 = vperm.xlu1 %4913, %v5390_v54  }
 0x1c8   :  { %4914 = vset.pattern.permute.xlu1 %v5148_v2 }
 0x1cb   :  { %441 = vperm.xlu0 %4912, %v5390_v54  }
 0x1cf   :  { %4915 = vset.pattern.permute.xlu0 %v5148_v2 }
 0x23a   :  { %v407_v22 = vpop.xlane.xlu0 %406 }
 0x23b   :  { %v416_v23 = vmul.f32 0.0078125, %v407_v22 }
 0x23c   :  { %v409_v24 = vpop.xlane.xlu1 %408 }
 0x23d   :  { %v420_v26 = vmul.f32 %v416_v23, %v416_v23  ;;  %v417_v8 = vmul.f32 0.0078125, %v409_v24  ;;  %v426_v37 = vsub.f32 %v5376_v44, %v416_v23  ;;  %v561_v23 = vadd.s32 4294967294, %v5443_v4 }
 0x23e   :  { %v413_v25 = vpop.xlane.xlu0 %412  ;;  %v640_v24 = vrot.slane %v636_v20, %v5268_v13 }
 0x23f   :  { %v418_v27 = vmul.f32 0.0078125, %v413_v25  ;;  %v421_v30 = vmul.f32 %v417_v8, %v417_v8  ;;  %v427_v41 = vsub.f32 %v5379_v46, %v417_v8  ;;  %vm562_vm1 = vcmp.ge.s32.totalorder %v561_v23, 0 }
 0x240   :  { %v448_v40 = vpop.permute.xlu1 %447  ;;  %vm641_vm3 = vcmp.ne.s16.totalorder %v640_v24, 0  ;;  %v593_v24 = vadd.s32 7, %v5443_v4 }
 0x241   :  { %v422_v28 = vsub.f32 %v418_v27, %v420_v26  ;;  %v565_v27 = vadd.s32 4294967295, %v5443_v4 }
 0x242   :  { %v415_v29 = vpop.xlane.xlu0 %414 }
 0x243   :  { %v424_v31 = vmax.f32 %v422_v28, 0.0  ;;  %v419_v32 = vmul.f32 0.0078125, %v415_v29 }
 0x244   :  { %v452_v50 = vpop.permute.xlu1 %451 }
 0x245   :  { %v428_v33 = vadd.f32 1e-05, %v424_v31  ;;  %v423_v34 = vsub.f32 %v419_v32, %v421_v30  ;;  %v666_v31 = vsel %vm665_vm7, 65537, %v5130_v0 }
 0x247   :  { %5011 = vrsqrt.f32 %v428_v33  ;;  %v425_v35 = vmax.f32 %v423_v34, 0.0  ;;  %v670_v34 = vrot.slane %v666_v31, %v5268_v13 }
 0x249   :  { %v429_v36 = vadd.f32 1e-05, %v425_v35  ;;  %vm671_vm7 = vcmp.ne.s16.totalorder %v670_v34, 0 }
 0x24a   :  { %v442_v45 = vpop.permute.xlu0 %441 }
 0x24b   :  { %5013 = vrsqrt.f32 %v429_v36 }
 0x251   :  { %v5012_v38 = vpop.eup %5011 }
 0x252   :  { %v432_v39 = vmul.f32 %v5012_v38, %v426_v37 }
 0x254   :  { %v444_v42 = vmul.f32 %v437_v21, %v432_v39  ;;  %v569_v39 = vadd.s32 1, %v5443_v4 }
 0x255   :  { %v5014_v43 = vpop.eup %5013 }
 0x256   :  { %v454_v47 = vadd.f32 %v448_v40, %v444_v42  ;;  %v433_v48 = vmul.f32 %v5014_v43, %v427_v41 }
 0x258   :  { %v445_v49 = vmul.f32 %v442_v45, %v433_v48  ;;  %v458_v51 = vmul.f32 0.1, %v454_v47  ;;  %vm456_vm6 = vcmp.ge.f32.partialorder %v454_v47, 0.0  ;;  %v573_v45 = vadd.s32 2, %v5443_v4 }
 0x25a   :  { %v455_v53 = vadd.f32 %v452_v50, %v445_v49  ;;  %v460_v57 = vsel %vm456_vm6, %v454_v47, %v458_v51  ;;  %vm554_vm6 = vcmp.ge.s32.totalorder %v553_v14, 0  ;;  %v6819_v49 = vmov 0 }
 0x25b   :  { %vm650_vm14 = vmpackc.low %vm554_vm6, %vm554_vm6  ;;  %vm6816_vm6 = vcmask 39936  }
 0x25c   :  { %vm457_vm9 = vcmp.ge.f32.partialorder %v455_v53, 0.0  ;;  %v459_v56 = vmul.f32 0.1, %v455_v53  ;;  %v651_v26 = vsel %vm650_vm14, 65537, %v5130_v0  ;;  %vm566_vm14 = vcmp.ge.s32.totalorder %v565_v27, 0 }
 0x25d   :  { %v655_v29 = vrot.slane %v651_v26, %v5268_v13 }
 0x25e   :  { %v461_v59 = vsel %vm457_vm9, %v455_v53, %v459_v56  ;;  %vm611_vm9 = vcmp.ne.s16.totalorder %v610_v15, 0 }
 0x25f   :  { %v5407_v44 = vpack.c.bf16 %v461_v59, %v460_v57  ;;  %vm656_vm11 = vcmp.ne.s16.totalorder %v655_v29, 0  ;;  %v577_v57 = vadd.s32 3, %v5443_v4  ;;  %v6822_v59 = vmov 0 }
 0x261   :  { %4684 = vmatmul.mubr.bf16.vlgmr.msra.gmra.mrb[0].mxu1 %v5407_v44 }
 0x262   :  { %4464 = vmatprep.mubr.msk.bf16.mxu1 %vm6771_vm0, %v4948_v1 }
 0x334   :  { %v521_v60 = vpop.f32.mrb[0].mxu1 }
 0x335   :  { %v4685_v46 = vpop.f32.mrb[1].mxu1 }
 0x336   :  { %v524_v61 = vpop.f32.mrb[2].mxu1 }
 0x337   :  { %v5410_v62 = vpack.c.bf16 %v524_v61, %v521_v60  ;;  %v4686_v63 = vpop.f32.mrb[3].mxu1 }
 0x338   :  { %v581_v63 = vadd.s32 4, %v5443_v4 }
 0x339   :  { %688 = vrot.lane.b32.xlu0 %v5410_v62, %s5137_s25  ;;  %598 = vrot.lane.b32.xlu1 %v5410_v62, %s5131_s3 }
 0x33d   :  { %719 = vrot.lane.b32.xlu0 %v5410_v62, %s5139_s27  ;;  %613 = vrot.lane.b32.xlu1 %v5410_v62, %s5133_s21 }
 0x341   :  { %751 = vrot.lane.b32.xlu0 %v5410_v62, %s5141_s29  ;;  %628 = vrot.lane.b32.xlu1 %v5410_v62, %s5132_s20 }
 0x345   :  { %783 = vrot.lane.b32.xlu0 %v5410_v62, %s5143_s5  ;;  %643 = vrot.lane.b32.xlu1 %v5410_v62, %s5134_s22 }
 0x349   :  { %658 = vrot.lane.b32.xlu1 %v5410_v62, %s5135_s23 }
 0x34d   :  { %673 = vrot.lane.b32.xlu1 %v5410_v62, %s5136_s24 }
 0x351   :  { %703 = vrot.lane.b32.xlu1 %v5410_v62, %s5138_s26 }
 0x355   :  { %735 = vrot.lane.b32.xlu1 %v5410_v62, %s5140_s28 }
 0x359   :  { %767 = vrot.lane.b32.xlu1 %v5410_v62, %s5142_s30 }
 0x35d   :  { %799 = vrot.lane.b32.xlu1 %v5410_v62, %s5144_s6 }
 0x361   :  { %904 = vperm.xlu1 %4914, %v5257_v5  }
 0x3ab   :  { %v599_v19 = vpop.permute.xlu1 %598  ;;  %v689_v50 = vpop.permute.xlu0 %688 }
 0x3ac   :  { %v601_v21 = vsel %vm6769_vm8, 0, %v599_v19  ;;  %v6827_v19 = vmov 0 }
 0x3ad   :  { %v612_v22 = vsel %vm611_vm9, %v601_v21, 0  ;;  %vm680_vm9 = vmpackc.low %vm562_vm1, %vm562_vm1  ;;  %vm6818_vm1 = vcmask 23552  }
 0x3ae   :  { %830 = vmatpush1.bf16.msra.mxu1 %v612_v22  ;;  %v681_v36 = vsel %vm680_vm9, 65537, %v5130_v0 }
 0x3af   :  { %v614_v25 = vpop.permute.xlu1 %613  ;;  %831 = vmatprep.subr.bf16.mxu1 %v5130_v0  ;;  %v685_v40 = vrot.slane %v681_v36, %v5268_v13  ;;  %v720_v15 = vpop.permute.xlu0 %719 }
 0x3b0   :  { %v616_v8 = vsel %vm6768_vm12, 0, %v614_v25  ;;  %vm6817_vm12 = vcmask 31744  }
 0x3b1   :  { %v627_v28 = vsel %vm626_vm2, %v616_v8, 0  ;;  %vm695_vm2 = vmpackc.low %vm566_vm14, %vm566_vm14  ;;  %vm575_vm14 = vcmp.lt.s32.totalorder %v573_v45, 32  ;;  %v4950_v45 = vld [vmem:[#allocation2 + $0x20] ss:$16 sps:$4 sm:$0xff]  }
 0x3b2   :  { %832 = vmatpush1.bf16.msra.mxu1 %v627_v28  ;;  %v696_v41 = vsel %vm695_vm2, 65537, %v5130_v0  ;;  %vm6824_vm2 = vcmask 7168  }
 0x3b3   :  { %v629_v30 = vpop.permute.xlu1 %628  ;;  %833 = vmatprep.subr.bf16.mxu1 %v5130_v0  ;;  %v700_v48 = vrot.slane %v696_v41, %v5268_v13  ;;  %v691_v60 = vsel %vm6824_vm2, 0, %v689_v50  ;;  %vm6772_vm2 = vcmask 506880   ;;  %v752_v8 = vpop.permute.xlu0 %751 }
 0x3b4   :  { %v631_v32 = vsel %vm6816_vm6, 0, %v629_v30  ;;  %vm6821_vm6 = vcmask 15360   ;;  %v723_v20 = vsel %vm6772_vm2, %v720_v15, 0  ;;  %vm753_vm2 = vcmask 490496   ;;  %v934_v15 = vld [vmem:[#allocation4 + $0xa0] sm:$0xff] }
 0x3b5   :  { %v642_v33 = vsel %vm641_vm3, %v631_v32, 0  ;;  %vm571_vm3 = vcmp.lt.s32.totalorder %v569_v39, 32  ;;  %v755_v29 = vsel %vm753_vm2, %v752_v8, 0  ;;  %vm801_vm2 = vcmask 465920  }
 0x3b6   :  { %834 = vmatpush1.bf16.msra.mxu1 %v642_v33  ;;  %vm711_vm9 = vmpackc.low %vm571_vm3, %vm571_vm3  ;;  %vm6770_vm3 = vcmask 515072  }
 0x3b7   :  { %v644_v35 = vpop.permute.xlu1 %643  ;;  %835 = vmatprep.subr.bf16.mxu1 %v5130_v0  ;;  %v712_v46 = vsel %vm711_vm9, 65537, %v5130_v0  ;;  %vm583_vm9 = vcmp.lt.s32.totalorder %v581_v63, 32 }
 0x3b8   :  { %v646_v37 = vsel %vm6817_vm12, 0, %v644_v35  ;;  %vm5477_vm12 = vcmp.ne.s16.totalorder %v685_v40, 0  ;;  %v716_v1 = vrot.slane %v712_v46, %v5268_v13  ;;  %v784_v35 = vpop.permute.xlu0 %783 }
 0x3b9   :  { %v657_v38 = vsel %vm656_vm11, %v646_v37, 0  ;;  %v6820_v49 = vsel %vm5477_vm12, 4294967295, %v6819_v49  ;;  %vm5486_vm11 = vcmp.ne.s16.totalorder %v700_v48, 0 }
 0x3ba   :  { %836 = vmatpush1.bf16.msra.mxu1 %v657_v38  ;;  %v6823_v59 = vsel %vm5486_vm11, 4294967295, %v6822_v59  ;;  %v702_v61 = vsel %vm5486_vm11, %v691_v60, 0 }
 0x3bb   :  { %v659_v42 = vpop.permute.xlu1 %658  ;;  %837 = vmatprep.subr.bf16.mxu1 %v5130_v0 }
 0x3bc   :  { %v661_v43 = vsel %vm6818_vm1, 0, %v659_v42  ;;  %vm579_vm1 = vcmp.lt.s32.totalorder %v577_v57, 32 }
 0x3bd   :  { %v672_v47 = vsel %vm671_vm7, %v661_v43, 0  ;;  %vm727_vm7 = vmpackc.low %vm575_vm14, %vm575_vm14  ;;  %vm5501_vm14 = vcmp.ne.s16.totalorder %v716_v1, 0  ;;  %v930_v1 = vld [vmem:[#allocation4 + $0x80] sm:$0xff] }
 0x3be   :  { %838 = vmatpush1.bf16.msra.mxu1 %v672_v47  ;;  %v728_v2 = vsel %vm727_vm7, 65537, %v5130_v0  ;;  %v6826_v12 = vsel %vm5501_vm14, 4294967295, %v6825_v12  ;;  %vm759_vm7 = vmpackc.low %vm583_vm9, %vm583_vm9  ;;  %v5149_v47 = vmov 3  }
 0x3bf   :  { %v674_v51 = vpop.permute.xlu1 %673  ;;  %839 = vmatprep.subr.bf16.mxu1 %v5130_v0  ;;  %v732_v11 = vrot.slane %v728_v2, %v5268_v13  ;;  %v760_v21 = vsel %vm759_vm7, 65537, %v5130_v0  ;;  %4916 = vset.pattern.permute.xlu1 %v5149_v47  ;;  %v931_v2 = vld [vmem:[#allocation4 + $0x88] sm:$0xff] }
 0x3c0   :  { %v676_v53 = vsel %vm6821_vm6, 0, %v674_v51  ;;  %vm743_vm6 = vmpackc.low %vm579_vm1, %vm579_vm1  ;;  %vm587_vm1 = vcmp.lt.s32.totalorder %v585_v10, 32  ;;  %v764_v25 = vrot.slane %v760_v21, %v5268_v13  ;;  %v932_v10 = vld [vmem:[#allocation4 + $0x90] sm:$0xff] }
 0x3c1   :  { %v687_v56 = vsel %vm5477_vm12, %v676_v53, 0  ;;  %v744_v17 = vsel %vm743_vm6, 65537, %v5130_v0  ;;  %vm5512_vm8 = vcmp.ne.s16.totalorder %v732_v11, 0  ;;  %vm737_vm6 = vcmask 498688   ;;  %vm775_vm9 = vmpackc.low %vm587_vm1, %vm587_vm1  ;;  %v933_v11 = vld [vmem:[#allocation4 + $0x98] sm:$0xff] }
 0x3c2   :  { %840 = vmatpush1.bf16.msra.mxu1 %v687_v56  ;;  %v6828_v19 = vsel %vm5512_vm8, 4294967295, %v6827_v19  ;;  %v734_v23 = vsel %vm5512_vm8, %v723_v20, 0  ;;  %v776_v27 = vsel %vm775_vm9, 65537, %v5130_v0  ;;  %vm595_vm1 = vcmp.lt.s32.totalorder %v593_v24, 32 }
 0x3c3   :  { %841 = vmatprep.subr.bf16.mxu1 %v5130_v0  ;;  %v704_v9 = vpop.permute.xlu1 %703  ;;  %vm765_vm13 = vcmp.ne.s16.totalorder %v764_v25, 0  ;;  %v780_v30 = vrot.slane %v776_v27, %v5268_v13 }
 0x3c4   :  { %v707_v14 = vsel %vm6770_vm3, %v704_v9, 0  ;;  %vm591_vm3 = vcmp.lt.s32.totalorder %v589_v18, 32  ;;  %v766_v32 = vsel %vm765_vm13, %v755_v29, 0  ;;  %v938_v9 = vpack.c.bf16 %v931_v2, %v930_v1  ;;  %v4951_v2 = vld [vmem:[#allocation2 + $0x44] ss:$16 sps:$4 sm:$0xff]  }
 0x3c5   :  { %v718_v3 = vsel %vm5501_vm14, %v707_v14, 0  ;;  %vm791_vm7 = vmpackc.low %vm591_vm3, %vm591_vm3  ;;  %vm781_vm9 = vcmp.ne.s16.totalorder %v780_v30, 0  ;;  %v939_v14 = vpack.c.bf16 %v933_v11, %v932_v10  ;;  %vm1227_vm14 = vcmask 220160  }
 0x3c6   :  { %842 = vmatpush1.bf16.msra.mxu1 %v702_v61  ;;  %v792_v4 = vsel %vm791_vm7, 65537, %v5130_v0  ;;  %vm6777_vm7 = vcmask 523264  }
 0x3c7   :  { %843 = vmatprep.subr.bf16.mxu1 %v5130_v0  ;;  %v736_v22 = vpop.permute.xlu1 %735  ;;  %v796_v33 = vrot.slane %v792_v4, %v5268_v13 }
 0x3c8   :  { %v739_v26 = vsel %vm737_vm6, %v736_v22, 0  ;;  %vm807_vm6 = vmpackc.low %vm595_vm1, %vm595_vm1 }
 0x3c9   :  { %v808_v36 = vsel %vm807_vm6, 65537, %v5130_v0  ;;  %vm797_vm3 = vcmp.ne.s16.totalorder %v796_v33, 0 }
 0x3ca   :  { %844 = vmatpush1.bf16.msra.mxu1 %v5410_v62  ;;  %v748_v62 = vrot.slane %v744_v17, %v5268_v13  ;;  %v812_v39 = vrot.slane %v808_v36, %v5268_v13  ;;  %v935_v17 = vld [vmem:[#allocation4 + $0xa8] sm:$0xff] }
 0x3cb   :  { %845 = vmatprep.subr.bf16.mxu1 %v5130_v0  ;;  %v768_v31 = vpop.permute.xlu1 %767  ;;  %v940_v18 = vpack.c.bf16 %v935_v17, %v934_v15 }
 0x3cc   :  { %vm749_vm0 = vcmp.ne.s16.totalorder %v748_v62, 0  ;;  %v771_v34 = vsel %vm769_vm10, %v768_v31, 0  ;;  %vm813_vm13 = vcmp.ne.s16.totalorder %v812_v39, 0  ;;  %vm6829_vm10 = vmmov 0  }
 0x3cd   :  { %v750_v28 = vsel %vm749_vm0, %v739_v26, 0  ;;  %vm785_vm0 = vcmask 474112   ;;  %v782_v37 = vsel %vm781_vm9, %v771_v34, 0  ;;  %vm6830_vm9 = vcmask 916480  }
 0x3ce   :  { %846 = vmatpush1.bf16.msra.mxu1 %v718_v3  ;;  %v787_v38 = vsel %vm785_vm0, %v784_v35, 0  ;;  %4470 = vmatprep.mubr.msk.bf16.mxu0 %vm6830_vm9, %v4951_v2 }
 0x3cf   :  { %847 = vmatprep.subr.bf16.mxu1 %v5130_v0  ;;  %v800_v40 = vpop.permute.xlu1 %799  ;;  %v798_v41 = vsel %vm797_vm3, %v787_v38, 0 }
 0x3d0   :  { %v803_v42 = vsel %vm801_vm2, %v800_v40, 0 }
 0x3d1   :  { %v814_v43 = vsel %vm813_vm13, %v803_v42, 0 }
 0x3d2   :  { %848 = vmatpush1.bf16.msra.mxu1 %v734_v23 }
 0x3d3   :  { %849 = vmatprep.subr.bf16.mxu1 %v5130_v0 }
 0x3d6   :  { %850 = vmatpush1.bf16.msra.mxu1 %v750_v28 }
 0x3d7   :  { %851 = vmatprep.subr.bf16.mxu1 %v5130_v0 }
 0x3da   :  { %852 = vmatpush1.bf16.msra.mxu1 %v766_v32 }
 0x3db   :  { %853 = vmatprep.subr.bf16.mxu1 %v5130_v0 }
 0x3de   :  { %854 = vmatpush1.bf16.msra.mxu1 %v782_v37 }
 0x3df   :  { %855 = vmatprep.subr.bf16.mxu1 %v5130_v0 }
 0x3e0   :  { %v905_v20 = vpop.permute.xlu1 %904 }
 0x3e2   :  { %856 = vmatpush1.bf16.msra.mxu1 %v798_v41 }
 0x3e3   :  { %857 = vmatprep.subr.bf16.mxu1 %v5130_v0 }
 0x3e6   :  { %858 = vmatpush1.bf16.msra.mxu1 %v814_v43 }
 0x3e7   :  { %4687 = vmatprep.subr.bf16.mxu1 %v5146_v55 }
 0x3e9   :  { %862 = vmatmul.mubr.bf16.vlgmr.msra.gmra.mrb[4].mxu1 %v4950_v45 }
 0x3ea   :  { %4695 = vmatprep.mubr.msk.bf16.mxu1 %vm6829_vm10, %v5146_v55  ;;  %4688 = vmatpush3.bf16.msra.mxu1 %v938_v9  ;;  %v5584_v9 = vand.u32 15, %v5260_v7 }
 0x3eb   :  { %4689 = vmatprep.subr.bf16.mxu1 %v5146_v55 }
 0x3ec   :  { %v999_v10 = vadd.s32 4294967289, %v5584_v9  ;;  %v1003_v11 = vadd.s32 4294967290, %v5584_v9  ;;  %v1011_v17 = vadd.s32 4294967292, %v5584_v9 }
 0x3ee   :  { %4690 = vmatpush3.bf16.msra.mxu1 %v939_v14  ;;  %vm1000_vm0 = vcmp.ge.s32.totalorder %v999_v10, 0  ;;  %vm1004_vm2 = vcmp.ge.s32.totalorder %v1003_v11, 0  ;;  %v1007_v14 = vadd.s32 4294967291, %v5584_v9  ;;  %vm1012_vm9 = vcmp.ge.s32.totalorder %v1011_v17, 0 }
 0x3ef   :  { %4691 = vmatprep.subr.bf16.mxu1 %v5146_v55  ;;  %vm1063_vm3 = vmpackc.low %vm1000_vm0, %vm1000_vm0  ;;  %vm6831_vm0 = vcmask 56320   ;;  %v1039_v10 = vadd.s32 4, %v5584_v9  ;;  %v1043_v17 = vadd.s32 5, %v5584_v9 }
 0x3f0   :  { %v1064_v15 = vsel %vm1063_vm3, 65537, %v5130_v0  ;;  %vm1078_vm13 = vmpackc.low %vm1004_vm2, %vm1004_vm2 }
 0x3f1   :  { %vm1108_vm3 = vmpackc.low %vm1012_vm9, %vm1012_vm9 }
 0x3f2   :  { %4692 = vmatpush3.bf16.msra.mxu1 %v940_v18  ;;  %v1068_v18 = vrot.slane %v1064_v15, %v5268_v13 }
 0x3f3   :  { %4693 = vmatprep.subr.bf16.mxu1 %v5146_v55 }
 0x4bc   :  { %v863_v48 = vpop.f32.mrb[4].mxu1 }
 0x4bd   :  { %v865_v50 = vpop.f32.mrb[5].mxu1  ;;  %v871_v51 = vsel %vm6777_vm7, %v863_v48, 0.0  ;;  %v877_v53 = vmul.f32 %v863_v48, %v863_v48 }
 0x4be   :  { %872 = vadd.xlane.f32.xlu0 %v871_v51  ;;  %v866_v56 = vpop.f32.mrb[6].mxu1 }
 0x4bf   :  { %v868_v57 = vpop.f32.mrb[7].mxu1  ;;  %v874_v60 = vsel %vm6777_vm7, %v866_v56, 0.0  ;;  %v879_v46 = vsel %vm6777_vm7, %v877_v53, 0.0  ;;  %v878_v61 = vmul.f32 %v866_v56, %v866_v56 }
 0x4c0   :  { %875 = vadd.xlane.f32.xlu1 %v874_v60 }
 0x4c1   :  { %v882_v63 = vsel %vm6777_vm7, %v878_v61, 0.0 }
 0x4c2   :  { %880 = vadd.xlane.f32.xlu0 %v879_v46 }
 0x4c6   :  { %883 = vadd.xlane.f32.xlu0 %v882_v63 }
 0x4d1   :  { %914 = vperm.xlu1 %4916, %v5257_v5   ;;  %v936_v5 = vld [vmem:[#allocation4 + $0xb0] sm:$0xff] }
 0x4d5   :  { %918 = vperm.xlu1 %4916, %v5390_v54  }
 0x4dc   :  { %908 = vperm.xlu0 %4915, %v5390_v54   ;;  %v937_v54 = vld [vmem:[#allocation4 + $0xb8] sm:$0xff] }
 0x4dd   :  { %v941_v3 = vpack.c.bf16 %v937_v54, %v936_v5  ;;  %v1079_v5 = vsel %vm1078_vm13, 65537, %v5130_v0  ;;  %v1015_v54 = vadd.s32 4294967293, %v5584_v9  ;;  %vm6832_vm13 = vcmask 48128  }
 0x4df   :  { %4694 = vmatpush3.bf16.msra.mxu1 %v941_v3  ;;  %v1083_v3 = vrot.slane %v1079_v5, %v5268_v13  ;;  %vm1016_vm2 = vcmp.ge.s32.totalorder %v1015_v54, 0 }
 0x4e1   :  { %vm1084_vm4 = vcmp.ne.s16.totalorder %v1083_v3, 0 }
 0x54b   :  { %v873_v62 = vpop.xlane.xlu0 %872 }
 0x54c   :  { %v885_v21 = vmul.f32 0.015625, %v873_v62 }
 0x54d   :  { %v876_v22 = vpop.xlane.xlu1 %875 }
 0x54e   :  { %v889_v24 = vmul.f32 %v885_v21, %v885_v21  ;;  %v886_v25 = vmul.f32 0.015625, %v876_v22  ;;  %v895_v34 = vsub.f32 %v863_v48, %v885_v21  ;;  %v1019_v22 = vadd.s32 4294967294, %v5584_v9 }
 0x54f   :  { %v881_v23 = vpop.xlane.xlu0 %880 }
 0x550   :  { %v887_v26 = vmul.f32 0.015625, %v881_v23  ;;  %v890_v28 = vmul.f32 %v886_v25, %v886_v25  ;;  %v896_v38 = vsub.f32 %v866_v56, %v886_v25 }
 0x551   :  { %v915_v37 = vpop.permute.xlu1 %914 }
 0x552   :  { %v891_v8 = vsub.f32 %v887_v26, %v889_v24  ;;  %v1109_v26 = vsel %vm1108_vm3, 65537, %v5130_v0 }
 0x553   :  { %v884_v27 = vpop.xlane.xlu0 %883 }
 0x554   :  { %v893_v29 = vmax.f32 %v891_v8, 0.0  ;;  %v888_v30 = vmul.f32 0.015625, %v884_v27 }
 0x555   :  { %v919_v47 = vpop.permute.xlu1 %918 }
 0x556   :  { %v897_v4 = vadd.f32 1e-05, %v893_v29  ;;  %v892_v31 = vsub.f32 %v888_v30, %v890_v28  ;;  %v1023_v28 = vadd.s32 4294967295, %v5584_v9  ;;  %v1113_v29 = vrot.slane %v1109_v26, %v5268_v13 }
 0x557   :  { %v1051_v26 = vadd.s32 7, %v5584_v9 }
 0x558   :  { %5015 = vrsqrt.f32 %v897_v4  ;;  %v894_v32 = vmax.f32 %v892_v31, 0.0  ;;  %vm1024_vm3 = vcmp.ge.s32.totalorder %v1023_v28, 0 }
 0x55a   :  { %v898_v33 = vadd.f32 1e-05, %v894_v32 }
 0x55b   :  { %v909_v41 = vpop.permute.xlu0 %908 }
 0x55c   :  { %5017 = vrsqrt.f32 %v898_v33 }
 0x562   :  { %v5016_v35 = vpop.eup %5015 }
 0x563   :  { %v901_v36 = vmul.f32 %v5016_v35, %v895_v34 }
 0x565   :  { %v911_v39 = vmul.f32 %v905_v20, %v901_v36 }
 0x566   :  { %v5018_v40 = vpop.eup %5017 }
 0x567   :  { %v921_v42 = vadd.f32 %v915_v37, %v911_v39  ;;  %v902_v43 = vmul.f32 %v5018_v40, %v896_v38  ;;  %v1027_v37 = vadd.s32 1, %v5584_v9 }
 0x569   :  { %v912_v45 = vmul.f32 %v909_v41, %v902_v43  ;;  %v925_v50 = vmul.f32 0.1, %v921_v42  ;;  %vm923_vm1 = vcmp.ge.f32.partialorder %v921_v42, 0.0 }
 0x56b   :  { %v922_v51 = vadd.f32 %v919_v47, %v912_v45  ;;  %v927_v57 = vsel %vm923_vm1, %v921_v42, %v925_v50  ;;  %vm1008_vm1 = vcmp.ge.s32.totalorder %v1007_v14, 0  ;;  %v1031_v47 = vadd.s32 2, %v5584_v9 }
 0x56d   :  { %vm924_vm6 = vcmp.ge.f32.partialorder %v922_v51, 0.0  ;;  %v926_v53 = vmul.f32 0.1, %v922_v51 }
 0x56f   :  { %v928_v60 = vsel %vm924_vm6, %v922_v51, %v926_v53  ;;  %vm1093_vm6 = vmpackc.low %vm1008_vm1, %vm1008_vm1 }
 0x570   :  { %v5548_v46 = vpack.c.bf16 %v928_v60, %v927_v57  ;;  %v1094_v62 = vsel %vm1093_vm6, 65537, %v5130_v0  ;;  %vm1123_vm1 = vmpackc.low %vm1016_vm2, %vm1016_vm2  ;;  %vm1020_vm6 = vcmp.ge.s32.totalorder %v1019_v22, 0  ;;  %vm1114_vm2 = vcmp.ne.s16.totalorder %v1113_v29, 0 }
 0x571   :  { %v1098_v24 = vrot.slane %v1094_v62, %v5268_v13  ;;  %v1124_v4 = vsel %vm1123_vm1, 65537, %v5130_v0 }
 0x572   :  { %4696 = vmatmul.mubr.msk.bf16.vlgmr.msra.gmra.mrb[8].mxu1 %vm6777_vm7, %v5548_v46  ;;  %vm1069_vm7 = vcmp.ne.s16.totalorder %v1068_v18, 0  ;;  %v1128_v33 = vrot.slane %v1124_v4, %v5268_v13  ;;  %v5002_v18 = vld [vmem:[#allocation2 + $0x1a4] ss:$16 sps:$4 sm:$0xff]  }
 0x573   :  { %vm1099_vm9 = vcmp.ne.s16.totalorder %v1098_v24, 0 }
 0x574   :  { %vm1129_vm1 = vcmp.ne.s16.totalorder %v1128_v33, 0 }
 0x645   :  { %v979_v48 = vpop.f32.mrb[8].mxu1 }
 0x646   :  { %v4697_v56 = vpop.f32.mrb[9].mxu1 }
 0x647   :  { %v982_v61 = vpop.f32.mrb[10].mxu1 }
 0x648   :  { %v5552_v63 = vpack.c.bf16 %v982_v61, %v979_v48  ;;  %v4698_v1 = vpop.f32.mrb[11].mxu1  ;;  %v1035_v48 = vadd.s32 3, %v5584_v9 }
 0x64a   :  { %1131 = vrot.lane.b32.xlu0 %v5552_v63, %s5136_s24  ;;  %1056 = vrot.lane.b32.xlu1 %v5552_v63, %s5131_s3 }
 0x64e   :  { %1161 = vrot.lane.b32.xlu0 %v5552_v63, %s5138_s26  ;;  %1071 = vrot.lane.b32.xlu1 %v5552_v63, %s5133_s21 }
 0x652   :  { %1193 = vrot.lane.b32.xlu0 %v5552_v63, %s5140_s28  ;;  %1086 = vrot.lane.b32.xlu1 %v5552_v63, %s5132_s20 }
 0x656   :  { %1225 = vrot.lane.b32.xlu0 %v5552_v63, %s5142_s30  ;;  %1101 = vrot.lane.b32.xlu1 %v5552_v63, %s5134_s22 }
 0x65a   :  { %1257 = vrot.lane.b32.xlu0 %v5552_v63, %s5144_s6  ;;  %1116 = vrot.lane.b32.xlu1 %v5552_v63, %s5135_s23 }
 0x65e   :  { %1146 = vrot.lane.b32.xlu1 %v5552_v63, %s5137_s25 }
 0x662   :  { %1177 = vrot.lane.b32.xlu1 %v5552_v63, %s5139_s27 }
 0x666   :  { %1209 = vrot.lane.b32.xlu1 %v5552_v63, %s5141_s29 }
 0x66a   :  { %1241 = vrot.lane.b32.xlu1 %v5552_v63, %s5143_s5 }
 0x6bc   :  { %v1057_v20 = vpop.permute.xlu1 %1056  ;;  %v1132_v40 = vpop.permute.xlu0 %1131 }
 0x6bd   :  { %v1059_v21 = vsel %vm6831_vm0, 0, %v1057_v20  ;;  %vm6833_vm0 = vcmask 39936  }
 0x6be   :  { %v1070_v23 = vsel %vm1069_vm7, %v1059_v21, 0  ;;  %vm1138_vm7 = vmpackc.low %vm1020_vm6, %vm1020_vm6  ;;  %vm6835_vm6 = vcmask 23552   ;;  %v1047_v21 = vadd.s32 6, %v5584_v9 }
 0x6bf   :  { %1302 = vmatpush1.bf16.msra.mxu0 %v1070_v23  ;;  %v1139_v34 = vsel %vm1138_vm7, 65537, %v5130_v0  ;;  %v6844_v23 = vmov 0 }
 0x6c0   :  { %v1072_v25 = vpop.permute.xlu1 %1071  ;;  %1303 = vmatprep.subr.bf16.mxu0 %v5130_v0  ;;  %v1143_v39 = vrot.slane %v1139_v34, %v5268_v13  ;;  %v1162_v14 = vpop.permute.xlu0 %1161  ;;  %vm1049_vm5 = vcmp.lt.s32.totalorder %v1047_v21, 16 }
 0x6c1   :  { %v1074_v8 = vsel %vm6832_vm13, 0, %v1072_v25  ;;  %vm1153_vm13 = vmpackc.low %vm1024_vm3, %vm1024_vm3 }
 0x6c2   :  { %v1085_v27 = vsel %vm1084_vm4, %v1074_v8, 0  ;;  %vm6834_vm4 = vcmask 31744   ;;  %v1154_v42 = vsel %vm1153_vm13, 65537, %v5130_v0  ;;  %vm5617_vm7 = vcmp.ne.s16.totalorder %v1143_v39, 0 }
 0x6c3   :  { %1304 = vmatpush1.bf16.msra.mxu0 %v1085_v27  ;;  %v1158_v53 = vrot.slane %v1154_v42, %v5268_v13  ;;  %vm6841_vm13 = vcmask 7168  }
 0x6c4   :  { %v1087_v30 = vpop.permute.xlu1 %1086  ;;  %1305 = vmatprep.subr.bf16.mxu0 %v5130_v0  ;;  %v1194_v24 = vpop.permute.xlu0 %1193 }
 0x6c5   :  { %v1089_v31 = vsel %vm6833_vm0, 0, %v1087_v30  ;;  %vm6838_vm0 = vcmask 15360  }
 0x6c6   :  { %v1100_v32 = vsel %vm1099_vm9, %v1089_v31, 0  ;;  %vm1029_vm9 = vcmp.lt.s32.totalorder %v1027_v37, 16  ;;  %v1134_v51 = vsel %vm6838_vm0, 0, %v1132_v40 }
 0x6c7   :  { %1306 = vmatpush1.bf16.msra.mxu0 %v1100_v32  ;;  %vm1169_vm3 = vmpackc.low %vm1029_vm9, %vm1029_vm9  ;;  %v1145_v60 = vsel %vm5617_vm7, %v1134_v51, 0  ;;  %vm6780_vm9 = vcmask 252928   ;;  %v4953_v51 = vld [vmem:[#allocation2 + $0x40] ss:$16 sps:$4 sm:$0xff]  }
 0x6c8   :  { %v1102_v35 = vpop.permute.xlu1 %1101  ;;  %1307 = vmatprep.subr.bf16.mxu0 %v5130_v0  ;;  %v1170_v1 = vsel %vm1169_vm3, 65537, %v5130_v0  ;;  %vm1041_vm3 = vcmp.lt.s32.totalorder %v1039_v10, 16  ;;  %v1165_v5 = vsel %vm6780_vm9, %v1162_v14, 0  ;;  %v1226_v32 = vpop.permute.xlu0 %1225 }
 0x6c9   :  { %v1104_v36 = vsel %vm6834_vm4, 0, %v1102_v35  ;;  %vm5627_vm4 = vcmp.ne.s16.totalorder %v1158_v53, 0  ;;  %v1174_v11 = vrot.slane %v1170_v1, %v5268_v13  ;;  %v1229_v35 = vsel %vm1227_vm14, %v1226_v32, 0  ;;  %v4954_v53 = vld [vmem:[#allocation2 + $0x64] ss:$16 sps:$4 sm:$0xff]  }
 0x6ca   :  { %v1115_v38 = vsel %vm1114_vm2, %v1104_v36, 0  ;;  %vm1033_vm2 = vcmp.lt.s32.totalorder %v1031_v47, 16  ;;  %vm6846_vm14 = vcmask 916480   ;;  %v1479_v32 = vld [vmem:[#allocation4 + $0xd0] sm:$0xff] }
 0x6cb   :  { %1308 = vmatpush1.bf16.msra.mxu0 %v1115_v38 }
 0x6cc   :  { %v1117_v41 = vpop.permute.xlu1 %1116  ;;  %1309 = vmatprep.subr.bf16.mxu0 %v5130_v0  ;;  %v1258_v42 = vpop.permute.xlu0 %1257 }
 0x6cd   :  { %v1119_v43 = vsel %vm6835_vm6, 0, %v1117_v41  ;;  %vm1037_vm6 = vcmp.lt.s32.totalorder %v1035_v48, 16 }
 0x6ce   :  { %v1130_v45 = vsel %vm1129_vm1, %v1119_v43, 0  ;;  %vm1185_vm1 = vmpackc.low %vm1033_vm2, %vm1033_vm2  ;;  %vm5641_vm2 = vcmp.ne.s16.totalorder %v1174_v11, 0 }
 0x6cf   :  { %1310 = vmatpush1.bf16.msra.mxu0 %v1130_v45  ;;  %v1186_v15 = vsel %vm1185_vm1, 65537, %v5130_v0  ;;  %vm1201_vm0 = vmpackc.low %vm1037_vm6, %vm1037_vm6  ;;  %v1176_v62 = vsel %vm5641_vm2, %v1165_v5, 0  ;;  %vm1045_vm6 = vcmp.lt.s32.totalorder %v1043_v17, 16 }
 0x6d0   :  { %v1147_v57 = vpop.permute.xlu1 %1146  ;;  %1311 = vmatprep.subr.bf16.mxu0 %v5130_v0  ;;  %v1190_v54 = vrot.slane %v1186_v15, %v5268_v13  ;;  %v1202_v3 = vsel %vm1201_vm0, 65537, %v5130_v0  ;;  %vm1217_vm1 = vmpackc.low %vm1041_vm3, %vm1041_vm3  ;;  %vm1195_vm0 = vcmask 236544  }
 0x6d1   :  { %v1149_v61 = vsel %vm6841_vm13, 0, %v1147_v57  ;;  %vm6785_vm13 = vcmask 244736   ;;  %v1206_v22 = vrot.slane %v1202_v3, %v5268_v13  ;;  %v1218_v25 = vsel %vm1217_vm1, 65537, %v5130_v0  ;;  %vm1233_vm3 = vmpackc.low %vm1045_vm6, %vm1045_vm6  ;;  %v4956_v57 = vld [vmem:[#allocation2 + $0x60] ss:$16 sps:$4 sm:$0xff]  }
 0x6d2   :  { %v1160_v2 = vsel %vm5627_vm4, %v1149_v61, 0  ;;  %vm5654_vm9 = vcmp.ne.s16.totalorder %v1190_v54, 0  ;;  %v1197_v27 = vsel %vm1195_vm0, %v1194_v24, 0  ;;  %v1222_v28 = vrot.slane %v1218_v25, %v5268_v13  ;;  %vm1249_vm1 = vmpackc.low %vm1049_vm5, %vm1049_vm5  ;;  %v5705_v25 = vld [vmem:[%s6758_s2 + $0x8] sm:$0xff] }
 0x6d3   :  { %1312 = vmatpush1.bf16.msra.mxu0 %v1145_v60  ;;  %v6845_v23 = vsel %vm5654_vm9, 4294967295, %v6844_v23  ;;  %vm1207_vm15 = vcmp.ne.s16.totalorder %v1206_v22, 0  ;;  %v1234_v29 = vsel %vm1233_vm3, 65537, %v5130_v0  ;;  %vm1053_vm6 = vcmp.lt.s32.totalorder %v1051_v26, 16  ;;  %v5711_v26 = vld [vmem:[%s6758_s2 + $0x10] sm:$0xff] }
 0x6d4   :  { %1313 = vmatprep.subr.bf16.mxu0 %v5130_v0  ;;  %v1178_v20 = vpop.permute.xlu1 %1177  ;;  %v1208_v4 = vsel %vm1207_vm15, %v1197_v27, 0  ;;  %v1238_v9 = vrot.slane %v1234_v29, %v5268_v13  ;;  %vm1223_vm8 = vcmp.ne.s16.totalorder %v1222_v28, 0  ;;  %v1250_v33 = vsel %vm1249_vm1, 65537, %v5130_v0  ;;  %vm1265_vm0 = vmpackc.low %vm1053_vm6, %vm1053_vm6  ;;  %v5722_v27 = vld [vmem:[%s6758_s2] sm:$0xff] }
 0x6d5   :  { %v1254_v36 = vrot.slane %v1250_v33, %v5268_v13  ;;  %v1266_v37 = vsel %vm1265_vm0, 65537, %v5130_v0  ;;  %vm1243_vm15 = vcmask 211968   ;;  %v5150_v60 = vmov 4   ;;  %v1480_v33 = vld [vmem:[#allocation4 + $0xd8] sm:$0xff] }
 0x6d6   :  { %vm1239_vm3 = vcmp.ne.s16.totalorder %v1238_v9, 0  ;;  %v1270_v40 = vrot.slane %v1266_v37, %v5268_v13  ;;  %4918 = vset.pattern.permute.xlu1 %v5150_v60  ;;  %4917 = vset.pattern.permute.xlu0 %v5150_v60  ;;  %vm6790_vm1 = vcmask 261120   ;;  %v5151_v28 = vmov 5   ;;  %v1478_v9 = vld [vmem:[#allocation4 + $0xc8] sm:$0xff] }
 0x6d7   :  { %1314 = vmatpush1.bf16.msra.mxu0 %v1160_v2  ;;  %v1240_v39 = vsel %vm1239_vm3, %v1229_v35, 0  ;;  %vm1255_vm5 = vcmp.ne.s16.totalorder %v1254_v36, 0 }
 0x6d8   :  { %1315 = vmatprep.subr.bf16.mxu0 %v5130_v0  ;;  %v1210_v30 = vpop.permute.xlu1 %1209 }
 0x6db   :  { %1316 = vmatpush1.bf16.msra.mxu0 %v5552_v63  ;;  %v1181_v63 = vsel %vm6785_vm13, %v1178_v20, 0  ;;  %vm1211_vm13 = vcmask 228352  }
 0x6dc   :  { %1317 = vmatprep.subr.bf16.mxu0 %v5130_v0  ;;  %v1192_v8 = vsel %vm5654_vm9, %v1181_v63, 0  ;;  %v1213_v31 = vsel %vm1211_vm13, %v1210_v30, 0  ;;  %v1242_v38 = vpop.permute.xlu1 %1241  ;;  %vm1259_vm13 = vcmask 203776   ;;  %vm6897_vm9 = vcmask 48128  }
 0x6dd   :  { %v1224_v34 = vsel %vm1223_vm8, %v1213_v31, 0  ;;  %v1245_v41 = vsel %vm1243_vm15, %v1242_v38, 0  ;;  %vm1271_vm8 = vcmp.ne.s16.totalorder %v1270_v40, 0  ;;  %v1261_v45 = vsel %vm1259_vm13, %v1258_v42, 0 }
 0x6de   :  { %v1256_v43 = vsel %vm1255_vm5, %v1245_v41, 0  ;;  %v1272_v47 = vsel %vm1271_vm8, %v1261_v45, 0 }
 0x6df   :  { %1318 = vmatpush1.bf16.msra.mxu0 %v1176_v62 }
 0x6e0   :  { %1319 = vmatprep.subr.bf16.mxu0 %v5130_v0 }
 0x6e3   :  { %1320 = vmatpush1.bf16.msra.mxu0 %v1192_v8  ;;  %v5717_v8 = vld [vmem:[%s6758_s2 + $0x18] sm:$0xff] }
 0x6e4   :  { %1321 = vmatprep.subr.bf16.mxu0 %v5130_v0 }
 0x6e7   :  { %1322 = vmatpush1.bf16.msra.mxu0 %v1208_v4  ;;  %v1477_v4 = vld [vmem:[#allocation4 + $0xc0] sm:$0xff] }
 0x6e8   :  { %1323 = vmatprep.subr.bf16.mxu0 %v5130_v0  ;;  %v1481_v31 = vpack.c.bf16 %v1478_v9, %v1477_v4 }
 0x6ea   :  { %4699 = vmatprep.subr.bf16.mxu1 %v1481_v31 }
 0x6eb   :  { %1324 = vmatpush1.bf16.msra.mxu0 %v1224_v34  ;;  %4700 = vmatpush3.bf16.msra.mxu1 %v1481_v31  ;;  %v1482_v34 = vpack.c.bf16 %v1480_v33, %v1479_v32 }
 0x6ec   :  { %1325 = vmatprep.subr.bf16.mxu0 %v5130_v0 }
 0x6ed   :  { %4701 = vmatprep.subr.bf16.mxu1 %v1482_v34 }
 0x6ef   :  { %1326 = vmatpush1.bf16.msra.mxu0 %v1240_v39  ;;  %4702 = vmatpush3.bf16.msra.mxu1 %v1482_v34 }
 0x6f0   :  { %1327 = vmatprep.subr.bf16.mxu0 %v5130_v0 }
 0x6f3   :  { %1328 = vmatpush1.bf16.msra.mxu0 %v1256_v43 }
 0x6f4   :  { %1329 = vmatprep.subr.bf16.mxu0 %v5130_v0 }
 0x6f7   :  { %1330 = vmatpush1.bf16.msra.mxu0 %v1272_v47 }
 0x6fa   :  { %1334 = vmatmul.mubr.bf16.vlgmr.msra.gmra.mrb[4].mxu0 %v4953_v51 }
 0x6fb   :  { %4471 = vmatprep.mubr.msk.bf16.mxu0 %vm6846_vm14, %v4954_v53 }
 0x702   :  { %1342 = vmatmul.mubr.bf16.gmra.mrb[8].mxu0 %v4956_v57 }
 0x7cd   :  { %v5677_v48 = vpop.f32.mrb[4].mxu0 }
 0x7ce   :  { %v1337_v61 = vpop.f32.mrb[5].mxu0  ;;  %v1355_v1 = vsel %vm6790_vm1, %v5677_v48, 0.0  ;;  %v1367_v15 = vmul.f32 %v5677_v48, %v5677_v48 }
 0x7cf   :  { %1356 = vadd.xlane.f32.xlu1 %v1355_v1  ;;  %v5681_v2 = vpop.f32.mrb[6].mxu0 }
 0x7d0   :  { %v1340_v10 = vpop.f32.mrb[7].mxu0  ;;  %v1358_v11 = vsel %vm6790_vm1, %v5681_v2, 0.0  ;;  %v1368_v14 = vmul.f32 %v5681_v2, %v5681_v2  ;;  %v1371_v5 = vsel %vm6790_vm1, %v1367_v15, 0.0 }
 0x7d1   :  { %1359 = vadd.xlane.f32.xlu0 %v1358_v11 }
 0x7d2   :  { %v1374_v17 = vsel %vm6790_vm1, %v1368_v14, 0.0 }
 0x7d3   :  { %1375 = vadd.xlane.f32.xlu1 %v1374_v17 }
 0x7d5   :  { %1372 = vadd.xlane.f32.xlu0 %v1371_v5  ;;  %v5691_v54 = vpop.f32.mrb[8].mxu0 }
 0x7d6   :  { %v1345_v3 = vpop.f32.mrb[9].mxu0  ;;  %v1361_v21 = vsel %vm6790_vm1, %v5691_v54, 0.0  ;;  %v1369_v63 = vmul.f32 %v5691_v54, %v5691_v54 }
 0x7d7   :  { %v5693_v20 = vpop.f32.mrb[10].mxu0 }
 0x7d8   :  { %v1348_v62 = vpop.f32.mrb[11].mxu0  ;;  %v1364_v22 = vsel %vm6790_vm1, %v5693_v20, 0.0  ;;  %v1377_v24 = vsel %vm6790_vm1, %v1369_v63, 0.0  ;;  %v1370_v29 = vmul.f32 %v5693_v20, %v5693_v20 }
 0x7d9   :  { %1362 = vadd.xlane.f32.xlu0 %v1361_v21  ;;  %1365 = vadd.xlane.f32.xlu1 %v1364_v22 }
 0x7da   :  { %v1380_v30 = vsel %vm6790_vm1, %v1370_v29, 0.0 }
 0x7dd   :  { %1378 = vadd.xlane.f32.xlu0 %v1377_v24 }
 0x7ea   :  { %1426 = vperm.xlu1 %4918, %v5705_v25  }
 0x7ee   :  { %1431 = vperm.xlu1 %4918, %v5711_v26  }
 0x7f2   :  { %1436 = vperm.xlu1 %4918, %v5717_v8  }
 0x7f3   :  { %1421 = vperm.xlu0 %4917, %v5722_v27  }
 0x7f6   :  { %4919 = vset.pattern.permute.xlu1 %v5151_v28 }
 0x7f7   :  { %1444 = vperm.xlu1 %4919, %v5722_v27  }
 0x7fb   :  { %1448 = vperm.xlu1 %4919, %v5705_v25  }
 0x7ff   :  { %1452 = vperm.xlu1 %4919, %v5711_v26  }
 0x823   :  { %1381 = vadd.xlane.f32.xlu1 %v1380_v30 }
 0x834   :  { %1456 = vperm.xlu1 %4919, %v5717_v8  }
 0x85c   :  { %v1357_v35 = vpop.xlane.xlu1 %1356 }
 0x85d   :  { %v1383_v37 = vmul.f32 0.03125, %v1357_v35 }
 0x85e   :  { %v1360_v36 = vpop.xlane.xlu0 %1359 }
 0x85f   :  { %v1384_v38 = vmul.f32 0.03125, %v1360_v36  ;;  %v1391_v43 = vmul.f32 %v1383_v37, %v1383_v37  ;;  %v1403_v62 = vsub.f32 %v5677_v48, %v1383_v37 }
 0x860   :  { %v1376_v39 = vpop.xlane.xlu1 %1375 }
 0x861   :  { %v1392_v40 = vmul.f32 %v1384_v38, %v1384_v38  ;;  %v1388_v41 = vmul.f32 0.03125, %v1376_v39  ;;  %v1404_v3 = vsub.f32 %v5681_v2, %v1384_v38 }
 0x862   :  { %v1373_v42 = vpop.xlane.xlu0 %1372 }
 0x863   :  { %v1396_v45 = vsub.f32 %v1388_v41, %v1392_v40  ;;  %v1387_v47 = vmul.f32 0.03125, %v1373_v42 }
 0x865   :  { %v1400_v51 = vmax.f32 %v1396_v45, 0.0  ;;  %v1395_v53 = vsub.f32 %v1387_v47, %v1391_v43 }
 0x866   :  { %v1366_v57 = vpop.xlane.xlu1 %1365  ;;  %v1363_v11 = vpop.xlane.xlu0 %1362 }
 0x867   :  { %v1408_v60 = vadd.f32 1e-05, %v1400_v51  ;;  %v1399_v61 = vmax.f32 %v1395_v53, 0.0  ;;  %v1385_v48 = vmul.f32 0.03125, %v1363_v11  ;;  %v1386_v42 = vmul.f32 0.03125, %v1366_v57 }
 0x869   :  { %5019 = vrsqrt.f32 %v1408_v60  ;;  %v1407_v1 = vadd.f32 1e-05, %v1399_v61  ;;  %v1393_v37 = vmul.f32 %v1385_v48, %v1385_v48  ;;  %v1394_v45 = vmul.f32 %v1386_v42, %v1386_v42 }
 0x86a   :  { %v1427_v10 = vpop.permute.xlu1 %1426  ;;  %v1379_v15 = vpop.xlane.xlu0 %1378 }
 0x86b   :  { %5021 = vrsqrt.f32 %v1407_v1  ;;  %v1389_v2 = vmul.f32 0.03125, %v1379_v15  ;;  %v1405_v1 = vsub.f32 %v5691_v54, %v1385_v48  ;;  %v1406_v15 = vsub.f32 %v5693_v20, %v1386_v42 }
 0x86d   :  { %v1397_v38 = vsub.f32 %v1389_v2, %v1393_v37 }
 0x86e   :  { %v1432_v14 = vpop.permute.xlu1 %1431 }
 0x86f   :  { %v1401_v39 = vmax.f32 %v1397_v38, 0.0 }
 0x871   :  { %v1409_v40 = vadd.f32 1e-05, %v1401_v39 }
 0x872   :  { %v1437_v17 = vpop.permute.xlu1 %1436  ;;  %v1422_v63 = vpop.permute.xlu0 %1421 }
 0x873   :  { %v5020_v5 = vpop.eup %5019  ;;  %5023 = vrsqrt.f32 %v1409_v40 }
 0x874   :  { %v1416_v22 = vmul.f32 %v5020_v5, %v1404_v3 }
 0x875   :  { %v5022_v21 = vpop.eup %5021 }
 0x876   :  { %v1445_v24 = vpop.permute.xlu1 %1444  ;;  %v1415_v28 = vmul.f32 %v5022_v21, %v1403_v62  ;;  %v1440_v30 = vmul.f32 %v1427_v10, %v1416_v22 }
 0x878   :  { %v1439_v29 = vmul.f32 %v1422_v63, %v1415_v28 }
 0x87a   :  { %v1459_v4 = vadd.f32 %v1445_v24, %v1439_v29  ;;  %v1449_v9 = vpop.permute.xlu1 %1448 }
 0x87b   :  { %v1460_v31 = vadd.f32 %v1449_v9, %v1440_v30 }
 0x87c   :  { %vm1463_vm6 = vcmp.ge.f32.partialorder %v1459_v4, 0.0  ;;  %v1467_v32 = vmul.f32 0.1, %v1459_v4 }
 0x87d   :  { %vm1464_vm0 = vcmp.ge.f32.partialorder %v1460_v31, 0.0  ;;  %v1468_v33 = vmul.f32 0.1, %v1460_v31  ;;  %v5024_v61 = vpop.eup %5023 }
 0x87e   :  { %v1471_v34 = vsel %vm1463_vm6, %v1459_v4, %v1467_v32  ;;  %v1453_v41 = vpop.permute.xlu1 %1452  ;;  %v1417_v10 = vmul.f32 %v5024_v61, %v1405_v1  ;;  %v5806_v32 = vand.u32 7, %v5260_v7 }
 0x87f   :  { %v1472_v35 = vsel %vm1464_vm0, %v1460_v31, %v1468_v33  ;;  %v4959_v31 = vld [vmem:[#allocation2 + $0x84] ss:$16 sps:$4 sm:$0xff]  }
 0x880   :  { %v5735_v36 = vpack.c.bf16 %v1472_v35, %v1471_v34  ;;  %v1441_v11 = vmul.f32 %v1432_v14, %v1417_v10  ;;  %v1552_v33 = vadd.s32 4294967289, %v5806_v32  ;;  %v1568_v34 = vadd.s32 4294967293, %v5806_v32 }
 0x881   :  { %v1556_v35 = vadd.s32 4294967290, %v5806_v32  ;;  %v1572_v48 = vadd.s32 4294967294, %v5806_v32  ;;  %v1560_v40 = vadd.s32 4294967291, %v5806_v32 }
 0x882   :  { %4703 = vmatprep.mubr.msk.bf16.mxu1 %vm6790_vm1, %v5735_v36  ;;  %v1461_v3 = vadd.f32 %v1453_v41, %v1441_v11  ;;  %vm1553_vm5 = vcmp.ge.s32.totalorder %v1552_v33, 0  ;;  %vm1569_vm13 = vcmp.ge.s32.totalorder %v1568_v34, 0  ;;  %v1576_v41 = vadd.s32 4294967295, %v5806_v32 }
 0x883   :  { %vm1622_vm8 = vmpackc.low %vm1553_vm5, %vm1553_vm5  ;;  %vm1557_vm6 = vcmp.ge.s32.totalorder %v1556_v35, 0  ;;  %vm1573_vm0 = vcmp.ge.s32.totalorder %v1572_v48, 0 }
 0x884   :  { %v1469_v22 = vmul.f32 0.1, %v1461_v3  ;;  %vm1465_vm3 = vcmp.ge.f32.partialorder %v1461_v3, 0.0  ;;  %vm1706_vm14 = vmpackc.low %vm1569_vm13, %vm1569_vm13  ;;  %v1623_v2 = vsel %vm1622_vm8, 65537, %v5130_v0  ;;  %vm6851_vm8 = vcmask 23552  }
 0x885   :  { %v1707_v37 = vsel %vm1706_vm14, 65537, %v5130_v0  ;;  %v1627_v38 = vrot.slane %v1623_v2, %v5268_v13  ;;  %vm6852_vm14 = vcmask 56320  }
 0x886   :  { %v1473_v28 = vsel %vm1465_vm3, %v1461_v3, %v1469_v22  ;;  %v1711_v39 = vrot.slane %v1707_v37, %v5268_v13  ;;  %vm1643_vm3 = vmpackc.low %vm1557_vm6, %vm1557_vm6  ;;  %vm1561_vm6 = vcmp.ge.s32.totalorder %v1560_v40, 0 }
 0x887   :  { %vm5818_vm5 = vcmp.ne.s16.totalorder %v1627_v38, 0  ;;  %v1580_v38 = vadd.s32 1, %v5806_v32 }
 0x888   :  { %vm5822_vm13 = vcmp.ne.s16.totalorder %v1711_v39, 0  ;;  %v4962_v39 = vld [vmem:[#allocation2 + $0xa0] ss:$16 sps:$4 sm:$0xff]  }
 0x8b0   :  { %v1382_v43 = vpop.xlane.xlu1 %1381 }
 0x8b1   :  { %v1390_v47 = vmul.f32 0.03125, %v1382_v43 }
 0x8b3   :  { %v1398_v51 = vsub.f32 %v1390_v47, %v1394_v45 }
 0x8b4   :  { %v1457_v57 = vpop.permute.xlu1 %1456 }
 0x8b5   :  { %v1402_v53 = vmax.f32 %v1398_v51, 0.0  ;;  %v1644_v51 = vsel %vm1643_vm3, 65537, %v5130_v0  ;;  %vm1664_vm3 = vmpackc.low %vm1561_vm6, %vm1561_vm6 }
 0x8b6   :  { %v1648_v10 = vrot.slane %v1644_v51, %v5268_v13 }
 0x8b7   :  { %v1410_v60 = vadd.f32 1e-05, %v1402_v53 }
 0x8b9   :  { %5025 = vrsqrt.f32 %v1410_v60 }
 0x8c3   :  { %v5026_v5 = vpop.eup %5025 }
 0x8c4   :  { %v1418_v62 = vmul.f32 %v5026_v5, %v1406_v15 }
 0x8c6   :  { %v1442_v21 = vmul.f32 %v1437_v17, %v1418_v62 }
 0x8c8   :  { %v1462_v63 = vadd.f32 %v1457_v57, %v1442_v21  ;;  %v1564_v57 = vadd.s32 4294967292, %v5806_v32 }
 0x8ca   :  { %vm1466_vm15 = vcmp.ge.f32.partialorder %v1462_v63, 0.0  ;;  %v1470_v24 = vmul.f32 0.1, %v1462_v63  ;;  %vm1565_vm6 = vcmp.ge.s32.totalorder %v1564_v57, 0 }
 0x8cc   :  { %v1474_v29 = vsel %vm1466_vm15, %v1462_v63, %v1470_v24  ;;  %vm1727_vm15 = vmpackc.low %vm1573_vm0, %vm1573_vm0  ;;  %vm1577_vm0 = vcmp.ge.s32.totalorder %v1576_v41, 0 }
 0x8cd   :  { %v5741_v30 = vpack.c.bf16 %v1474_v29, %v1473_v28  ;;  %v1728_v53 = vsel %vm1727_vm15, 65537, %v5130_v0  ;;  %vm6853_vm15 = vmmov %vm6851_vm8  ;;  %v1665_v29 = vsel %vm1664_vm3, 65537, %v5130_v0 }
 0x8ce   :  { %v1732_v11 = vrot.slane %v1728_v53, %v5268_v13 }
 0x8cf   :  { %4704 = vmatmul.mubr.msk.bf16.vlgmr.msra.gmra.mrb[12].mxu1 %vm6790_vm1, %v5741_v30  ;;  %vm5843_vm1 = vcmp.ne.s16.totalorder %v1648_v10, 0 }
 0x8d0   :  { %1996 = vmatprep.mubr.bf16.mxu1 %v4959_v31  ;;  %vm5847_vm11 = vcmp.ne.s16.totalorder %v1732_v11, 0  ;;  %v1669_v31 = vrot.slane %v1665_v29, %v5268_v13 }
 0x9a2   :  { %v4705_v54 = vpop.f32.mrb[12].mxu1 }
 0x9a3   :  { %v1523_v14 = vpop.f32.mrb[13].mxu1 }
 0x9a4   :  { %v4706_v20 = vpop.f32.mrb[14].mxu1 }
 0x9a5   :  { %v5745_v4 = vpack.c.bf16 %v4706_v20, %v4705_v54  ;;  %v1526_v9 = vpop.f32.mrb[15].mxu1 }
 0x9a6   :  { %v5747_v17 = vpack.c.bf16 %v1526_v9, %v1523_v14 }
 0x9a8   :  { %1694 = vrot.lane.b32.xlu0 %v5747_v17, %s5135_s23  ;;  %1610 = vrot.lane.b32.xlu1 %v5747_v17, %s5131_s3 }
 0x9ac   :  { %1696 = vrot.lane.b32.xlu0 %v5745_v4, %s5135_s23  ;;  %1612 = vrot.lane.b32.xlu1 %v5745_v4, %s5131_s3 }
 0x9b0   :  { %1715 = vrot.lane.b32.xlu0 %v5747_v17, %s5136_s24  ;;  %1631 = vrot.lane.b32.xlu1 %v5747_v17, %s5133_s21 }
 0x9b4   :  { %1717 = vrot.lane.b32.xlu0 %v5745_v4, %s5136_s24  ;;  %1633 = vrot.lane.b32.xlu1 %v5745_v4, %s5133_s21 }
 0x9b8   :  { %1736 = vrot.lane.b32.xlu0 %v5747_v17, %s5137_s25  ;;  %1652 = vrot.lane.b32.xlu1 %v5747_v17, %s5132_s20 }
 0x9bc   :  { %1738 = vrot.lane.b32.xlu0 %v5745_v4, %s5137_s25  ;;  %1654 = vrot.lane.b32.xlu1 %v5745_v4, %s5132_s20 }
 0x9c0   :  { %1675 = vrot.lane.b32.xlu0 %v5745_v4, %s5134_s22  ;;  %1673 = vrot.lane.b32.xlu1 %v5747_v17, %s5134_s22 }
 0x9c4   :  { %1759 = vrot.lane.b32.xlu0 %v5745_v4, %s5138_s26  ;;  %1757 = vrot.lane.b32.xlu1 %v5747_v17, %s5138_s26 }
 0x9c8   :  { %1781 = vrot.lane.b32.xlu0 %v5745_v4, %s5139_s27  ;;  %1779 = vrot.lane.b32.xlu1 %v5747_v17, %s5139_s27 }
 0x9cc   :  { %1803 = vrot.lane.b32.xlu0 %v5745_v4, %s5140_s28  ;;  %1801 = vrot.lane.b32.xlu1 %v5747_v17, %s5140_s28 }
 0x9d0   :  { %1825 = vrot.lane.b32.xlu0 %v5745_v4, %s5141_s29  ;;  %1823 = vrot.lane.b32.xlu1 %v5747_v17, %s5141_s29 }
 0x9d4   :  { %1847 = vrot.lane.b32.xlu0 %v5745_v4, %s5142_s30  ;;  %1845 = vrot.lane.b32.xlu1 %v5747_v17, %s5142_s30 }
 0x9d8   :  { %1869 = vrot.lane.b32.xlu0 %v5745_v4, %s5143_s5  ;;  %1867 = vrot.lane.b32.xlu1 %v5747_v17, %s5143_s5 }
 0x9dc   :  { %1891 = vrot.lane.b32.xlu0 %v5745_v4, %s5144_s6  ;;  %1889 = vrot.lane.b32.xlu1 %v5747_v17, %s5144_s6 }
 0xa1a   :  { %v1695_v45 = vpop.permute.xlu0 %1694  ;;  %v1611_v47 = vpop.permute.xlu1 %1610 }
 0xa1b   :  { %v1699_v60 = vsel %vm6851_vm8, 0, %v1695_v45  ;;  %v1615_v61 = vsel %vm6852_vm14, 0, %v1611_v47  ;;  %vm6854_vm8 = vmmov %vm6852_vm14 }
 0xa1c   :  { %v1629_v1 = vsel %vm5818_vm5, %v1615_v61, 0  ;;  %4858 = vmatprep.subr.msk.bf16.mxu1 %vm5822_vm13, %v1699_v60  ;;  %vm1748_vm14 = vmpackc.low %vm1577_vm0, %vm1577_vm0 }
 0xa1d   :  { %4562 = vmatpush3.bf16.msra.mxu1 %v1629_v1  ;;  %v1749_v54 = vsel %vm1748_vm14, 65537, %v5130_v0 }
 0xa1e   :  { %v1697_v15 = vpop.permute.xlu0 %1696  ;;  %v1613_v5 = vpop.permute.xlu1 %1612  ;;  %v1753_v33 = vrot.slane %v1749_v54, %v5268_v13  ;;  %v4957_v54 = vld [vmem:[#allocation2 + $0x80] ss:$16 sps:$4 sm:$0xff]  }
 0xa1f   :  { %v1702_v3 = vsel %vm6853_vm15, 0, %v1697_v15  ;;  %v1618_v62 = vsel %vm6854_vm8, 0, %v1613_v5  ;;  %vm1685_vm15 = vmpackc.low %vm1565_vm6, %vm1565_vm6  ;;  %vm5868_vm8 = vcmp.ne.s16.totalorder %v1669_v31, 0  ;;  %v1584_v15 = vadd.s32 2, %v5806_v32  ;;  %v4960_v31 = vld [vmem:[#allocation2 + $0xa4] ss:$16 sps:$4 sm:$0xff]  }
 0xa20   :  { %v1630_v21 = vsel %vm5818_vm5, %v1618_v62, 0  ;;  %4859 = vmatprep.subr.msk.bf16.mxu1 %vm5822_vm13, %v1702_v3  ;;  %vm6859_vm5 = vcmask 15360   ;;  %vm6860_vm13 = vcmask 48128   ;;  %vm5872_vm14 = vcmp.ne.s16.totalorder %v1753_v33, 0 }
 0xa21   :  { %4564 = vmatpush3.bf16.msra.mxu1 %v1630_v21  ;;  %vm6861_vm0 = vmmov %vm6859_vm5  ;;  %v1686_v43 = vsel %vm1685_vm15, 65537, %v5130_v0 }
 0xa22   :  { %v1716_v24 = vpop.permute.xlu0 %1715  ;;  %v1632_v28 = vpop.permute.xlu1 %1631  ;;  %vm6862_vm3 = vmmov %vm6860_vm13  ;;  %v1690_v53 = vrot.slane %v1686_v43, %v5268_v13  ;;  %v4965_v43 = vld [vmem:[#allocation2 + $0x8c] ss:$16 sps:$4 sm:$0xff]  }
 0xa23   :  { %v1720_v14 = vsel %vm6859_vm5, 0, %v1716_v24  ;;  %v1636_v20 = vsel %vm6860_vm13, 0, %v1632_v28  ;;  %vm6867_vm5 = vcmask 7168   ;;  %vm1582_vm13 = vcmp.lt.s32.totalorder %v1580_v38, 8 }
 0xa24   :  { %v1650_v9 = vsel %vm5843_vm1, %v1636_v20, 0  ;;  %4860 = vmatprep.subr.msk.bf16.mxu1 %vm5847_vm11, %v1720_v14  ;;  %vm6869_vm6 = vmmov %vm6867_vm5  ;;  %vm5891_vm15 = vcmp.ne.s16.totalorder %v1690_v53, 0  ;;  %v1588_v14 = vadd.s32 3, %v5806_v32  ;;  %v1592_v38 = vadd.s32 4, %v5806_v32  ;;  %v4990_v20 = vld [vmem:[#allocation2 + $0x124] ss:$16 sps:$4 sm:$0xff]  }
 0xa25   :  { %4566 = vmatpush3.bf16.msra.mxu1 %v1650_v9 }
 0xa26   :  { %v1718_v34 = vpop.permute.xlu0 %1717  ;;  %v1634_v35 = vpop.permute.xlu1 %1633 }
 0xa27   :  { %v1723_v48 = vsel %vm6861_vm0, 0, %v1718_v34  ;;  %v1639_v2 = vsel %vm6862_vm3, 0, %v1634_v35  ;;  %vm1770_vm3 = vmpackc.low %vm1582_vm13, %vm1582_vm13  ;;  %vm6793_vm13 = vcmask 121856  }
 0xa28   :  { %v1651_v37 = vsel %vm5843_vm1, %v1639_v2, 0  ;;  %4861 = vmatprep.subr.msk.bf16.mxu1 %vm5847_vm11, %v1723_v48  ;;  %vm6868_vm1 = vcmask 39936   ;;  %v1771_v21 = vsel %vm1770_vm3, 65537, %v5130_v0  ;;  %vm1590_vm3 = vcmp.lt.s32.totalorder %v1588_v14, 8 }
 0xa29   :  { %4568 = vmatpush3.bf16.msra.mxu1 %v1651_v37  ;;  %vm6870_vm0 = vmmov %vm6868_vm1  ;;  %v1775_v28 = vrot.slane %v1771_v21, %v5268_v13 }
 0xa2a   :  { %v1737_v41 = vpop.permute.xlu0 %1736  ;;  %v1653_v42 = vpop.permute.xlu1 %1652 }
 0xa2b   :  { %v1741_v45 = vsel %vm6867_vm5, 0, %v1737_v41  ;;  %v1657_v47 = vsel %vm6868_vm1, 0, %v1653_v42  ;;  %vm6873_vm5 = vcmask 31744  }
 0xa2c   :  { %v1671_v51 = vsel %vm5868_vm8, %v1657_v47, 0  ;;  %4862 = vmatprep.subr.msk.bf16.mxu1 %vm5872_vm14, %v1741_v45  ;;  %vm6874_vm1 = vmmov %vm6873_vm5 }
 0xa2d   :  { %4570 = vmatpush3.bf16.msra.mxu1 %v1671_v51 }
 0xa2e   :  { %v1739_v60 = vpop.permute.xlu0 %1738  ;;  %v1655_v61 = vpop.permute.xlu1 %1654 }
 0xa2f   :  { %v1744_v1 = vsel %vm6869_vm6, 0, %v1739_v60  ;;  %v1660_v10 = vsel %vm6870_vm0, 0, %v1655_v61  ;;  %vm5906_vm0 = vcmp.ne.s16.totalorder %v1775_v28, 0  ;;  %v1600_v28 = vadd.s32 6, %v5806_v32 }
 0xa30   :  { %v1672_v11 = vsel %vm5868_vm8, %v1660_v10, 0  ;;  %4863 = vmatprep.subr.msk.bf16.mxu1 %vm5872_vm14, %v1744_v1  ;;  %vm1586_vm8 = vcmp.lt.s32.totalorder %v1584_v15, 8  ;;  %v1596_v10 = vadd.s32 5, %v5806_v32 }
 0xa31   :  { %4572 = vmatpush3.bf16.msra.mxu1 %v1672_v11  ;;  %vm1792_vm6 = vmpackc.low %vm1586_vm8, %vm1586_vm8 }
 0xa32   :  { %v1676_v3 = vpop.permute.xlu0 %1675  ;;  %4573 = vmatprep.subr.bf16.mxu1 %v5747_v17  ;;  %v1674_v62 = vpop.permute.xlu1 %1673  ;;  %v1793_v34 = vsel %vm1792_vm6, 65537, %v5130_v0  ;;  %vm1594_vm6 = vcmp.lt.s32.totalorder %v1592_v38, 8 }
 0xa33   :  { %v1678_v57 = vsel %vm6873_vm5, 0, %v1674_v62  ;;  %v1681_v24 = vsel %vm6874_vm1, 0, %v1676_v3  ;;  %v1797_v48 = vrot.slane %v1793_v34, %v5268_v13  ;;  %vm1814_vm5 = vmpackc.low %vm1590_vm3, %vm1590_vm3  ;;  %vm6795_vm1 = vcmask 785408  }
 0xa34   :  { %v1692_v22 = vsel %vm5891_vm15, %v1678_v57, 0  ;;  %v1693_v17 = vsel %vm5891_vm15, %v1681_v24, 0  ;;  %vm6794_vm15 = vcmask 113664   ;;  %v1815_v47 = vsel %vm1814_vm5, 65537, %v5130_v0  ;;  %vm1836_vm5 = vmpackc.low %vm1594_vm6, %vm1594_vm6 }
 0xa35   :  { %4574 = vmatpush3.bf16.msra.mxu1 %v1692_v22  ;;  %vm5921_vm8 = vcmp.ne.s16.totalorder %v1797_v48, 0  ;;  %v1819_v60 = vrot.slane %v1815_v47, %v5268_v13  ;;  %vm1805_vm3 = vcmask 105472   ;;  %v1837_v3 = vsel %vm1836_vm5, 65537, %v5130_v0 }
 0xa36   :  { %4575 = vmatprep.subr.bf16.mxu1 %v5745_v4  ;;  %v1758_v29 = vpop.permute.xlu1 %1757  ;;  %v1760_v33 = vpop.permute.xlu0 %1759  ;;  %vm1598_vm6 = vcmp.lt.s32.totalorder %v1596_v10, 8  ;;  %v1841_v57 = vrot.slane %v1837_v3, %v5268_v13 }
 0xa37   :  { %v1763_v9 = vsel %vm6793_vm13, %v1758_v29, 0  ;;  %v1766_v35 = vsel %vm6793_vm13, %v1760_v33, 0  ;;  %vm5937_vm13 = vcmp.ne.s16.totalorder %v1819_v60, 0  ;;  %v5152_v29 = vmov 6  }
 0xa38   :  { %v1777_v4 = vsel %vm5906_vm0, %v1763_v9, 0  ;;  %v1778_v37 = vsel %vm5906_vm0, %v1766_v35, 0  ;;  %vm5950_vm5 = vcmp.ne.s16.totalorder %v1841_v57, 0  ;;  %v1604_v35 = vadd.s32 7, %v5806_v32  ;;  %4921 = vset.pattern.permute.xlu1 %v5152_v29  ;;  %4920 = vset.pattern.permute.xlu0 %v5152_v29 }
 0xa39   :  { %4576 = vmatpush3.bf16.msra.mxu1 %v1693_v17 }
 0xa3a   :  { %2013 = vmatprep.subr.bf16.mxu1 %v5130_v0  ;;  %v1780_v2 = vpop.permute.xlu1 %1779  ;;  %v1782_v45 = vpop.permute.xlu0 %1781 }
 0xa3b   :  { %v1785_v42 = vsel %vm6794_vm15, %v1780_v2, 0  ;;  %v1788_v53 = vsel %vm6794_vm15, %v1782_v45, 0  ;;  %vm1827_vm15 = vcmask 97280  }
 0xa3c   :  { %1997 = vmatmul.mubr.bf16.vlgmr.msra.gmra.mrb[16].mxu1 %v4957_v54  ;;  %v1799_v51 = vsel %vm5921_vm8, %v1785_v42, 0  ;;  %v1800_v1 = vsel %vm5921_vm8, %v1788_v53, 0 }
 0xa3d   :  { %2014 = vmatpush1.bf16.msra.mxu1 %v1777_v4  ;;  %2004 = vmatprep.mubr.bf16.mxu1 %v4960_v31 }
 0xa3e   :  { %2015 = vmatprep.subr.bf16.mxu1 %v5130_v0  ;;  %v1802_v61 = vpop.permute.xlu1 %1801  ;;  %v1804_v5 = vpop.permute.xlu0 %1803 }
 0xa3f   :  { %v1807_v15 = vsel %vm1805_vm3, %v1802_v61, 0  ;;  %v1810_v21 = vsel %vm1805_vm3, %v1804_v5, 0  ;;  %vm1602_vm3 = vcmp.lt.s32.totalorder %v1600_v28, 8  ;;  %v4968_v28 = vld [vmem:[#allocation2 + $0xa8] ss:$16 sps:$4 sm:$0xff]  }
 0xa40   :  { %v1821_v62 = vsel %vm5937_vm13, %v1807_v15, 0  ;;  %v1822_v24 = vsel %vm5937_vm13, %v1810_v21, 0  ;;  %vm1849_vm13 = vcmask 89088  }
 0xa41   :  { %2016 = vmatpush1.bf16.msra.mxu1 %v1778_v37 }
 0xa42   :  { %2017 = vmatprep.subr.bf16.mxu1 %v5130_v0  ;;  %v1824_v22 = vpop.permute.xlu1 %1823  ;;  %v1826_v54 = vpop.permute.xlu0 %1825 }
 0xa43   :  { %v1829_v17 = vsel %vm1827_vm15, %v1824_v22, 0  ;;  %v1832_v31 = vsel %vm1827_vm15, %v1826_v54, 0  ;;  %vm1606_vm15 = vcmp.lt.s32.totalorder %v1604_v35, 8  ;;  %v4963_v22 = vld [vmem:[#allocation2 + $0x88] ss:$16 sps:$4 sm:$0xff]  }
 0xa44   :  { %2005 = vmatmul.mubr.bf16.gmra.mrb[20].mxu1 %v4962_v39  ;;  %v1843_v9 = vsel %vm5950_vm5, %v1829_v17, 0  ;;  %v1844_v4 = vsel %vm5950_vm5, %v1832_v31, 0  ;;  %vm1871_vm5 = vcmask 80896  }
 0xa45   :  { %2018 = vmatpush1.bf16.msra.mxu1 %v1799_v51  ;;  %4482 = vmatprep.mubr.msk.bf16.mxu1 %vm6795_vm1, %v4965_v43  ;;  %vm1858_vm1 = vmpackc.low %vm1598_vm6, %vm1598_vm6 }
 0xa46   :  { %2019 = vmatprep.subr.bf16.mxu1 %v5130_v0  ;;  %v1859_v14 = vsel %vm1858_vm1, 65537, %v5130_v0  ;;  %v1846_v34 = vpop.permute.xlu1 %1845  ;;  %vm1880_vm6 = vmpackc.low %vm1602_vm3, %vm1602_vm3  ;;  %v1848_v37 = vpop.permute.xlu0 %1847 }
 0xa47   :  { %v1863_v33 = vrot.slane %v1859_v14, %v5268_v13  ;;  %v1851_v2 = vsel %vm1849_vm13, %v1846_v34, 0  ;;  %v1881_v38 = vsel %vm1880_vm6, 65537, %v5130_v0  ;;  %v1854_v42 = vsel %vm1849_vm13, %v1848_v37, 0  ;;  %vm1902_vm3 = vmpackc.low %vm1606_vm15, %vm1606_vm15 }
 0xa48   :  { %v1885_v43 = vrot.slane %v1881_v38, %v5268_v13  ;;  %v1903_v60 = vsel %vm1902_vm3, 65537, %v5130_v0  ;;  %vm1893_vm13 = vcmask 72704  }
 0xa49   :  { %2020 = vmatpush1.bf16.msra.mxu1 %v1800_v1  ;;  %vm5963_vm1 = vcmp.ne.s16.totalorder %v1863_v33, 0  ;;  %v1907_v10 = vrot.slane %v1903_v60, %v5268_v13 }
 0xa4a   :  { %2021 = vmatprep.subr.bf16.mxu1 %v5130_v0  ;;  %v1865_v39 = vsel %vm5963_vm1, %v1851_v2, 0  ;;  %v1868_v32 = vpop.permute.xlu1 %1867  ;;  %v1866_v45 = vsel %vm5963_vm1, %v1854_v42, 0  ;;  %vm5975_vm12 = vcmp.ne.s16.totalorder %v1885_v43, 0  ;;  %v1870_v53 = vpop.permute.xlu0 %1869  ;;  %vm6887_vm1 = vcmask 785408  }
 0xa4b   :  { %v1873_v51 = vsel %vm1871_vm5, %v1868_v32, 0  ;;  %v1876_v1 = vsel %vm1871_vm5, %v1870_v53, 0  ;;  %vm1908_vm6 = vcmp.ne.s16.totalorder %v1907_v10, 0 }
 0xa4c   :  { %v1887_v61 = vsel %vm5975_vm12, %v1873_v51, 0  ;;  %v1888_v15 = vsel %vm5975_vm12, %v1876_v1, 0  ;;  %vm6798_vm12 = vcmask 130048  }
 0xa4d   :  { %2022 = vmatpush1.bf16.msra.mxu1 %v1821_v62 }
 0xa4e   :  { %2023 = vmatprep.subr.bf16.mxu1 %v5130_v0  ;;  %v1890_v11 = vpop.permute.xlu1 %1889  ;;  %v1892_v3 = vpop.permute.xlu0 %1891 }
 0xa4f   :  { %v1895_v5 = vsel %vm1893_vm13, %v1890_v11, 0  ;;  %v1898_v21 = vsel %vm1893_vm13, %v1892_v3, 0 }
 0xa50   :  { %v1909_v62 = vsel %vm1908_vm6, %v1895_v5, 0  ;;  %v1910_v57 = vsel %vm1908_vm6, %v1898_v21, 0 }
 0xa51   :  { %2024 = vmatpush1.bf16.msra.mxu1 %v1822_v24  ;;  %v4966_v24 = vld [vmem:[#allocation2 + $0xac] ss:$16 sps:$4 sm:$0xff]  }
 0xa52   :  { %2025 = vmatprep.subr.bf16.mxu1 %v5130_v0 }
 0xa55   :  { %2026 = vmatpush1.bf16.msra.mxu1 %v1843_v9 }
 0xa56   :  { %2027 = vmatprep.subr.bf16.mxu1 %v5130_v0 }
 0xa59   :  { %2028 = vmatpush1.bf16.msra.mxu1 %v1844_v4 }
 0xa5a   :  { %2029 = vmatprep.subr.bf16.mxu1 %v5130_v0 }
 0xa5d   :  { %2030 = vmatpush1.bf16.msra.mxu1 %v1865_v39 }
 0xa5e   :  { %2031 = vmatprep.subr.bf16.mxu1 %v5130_v0 }
 0xa61   :  { %2032 = vmatpush1.bf16.msra.mxu1 %v1866_v45 }
 0xa62   :  { %2033 = vmatprep.subr.bf16.mxu1 %v5130_v0 }
 0xa65   :  { %2034 = vmatpush1.bf16.msra.mxu1 %v1887_v61 }
 0xa66   :  { %2035 = vmatprep.subr.bf16.mxu1 %v5130_v0 }
 0xa69   :  { %2036 = vmatpush1.bf16.msra.mxu1 %v1888_v15 }
 0xa6a   :  { %2037 = vmatprep.subr.bf16.mxu1 %v5130_v0 }
 0xa6d   :  { %2038 = vmatpush1.bf16.msra.mxu1 %v1909_v62 }
 0xa6e   :  { %2039 = vmatprep.subr.bf16.mxu1 %v5130_v0 }
 0xa71   :  { %2040 = vmatpush1.bf16.msra.mxu1 %v1910_v57 }
 0xa74   :  { %2046 = vmatmul.mubr.bf16.vlgmr.msra.gmra.mrb[24].mxu1 %v4963_v22 }
 0xa75   :  { %4483 = vmatprep.mubr.msk.bf16.mxu1 %vm6887_vm1, %v4966_v24  ;;  %vm2323_vm1 = vmpackc.low %vm6829_vm10, %vm6829_vm10 }
 0xa7c   :  { %2054 = vmatmul.mubr.bf16.gmra.mrb[28].mxu1 %v4968_v28  ;;  %v5153_v28 = vmov 7  }
 0xb0f   :  { %v4577_v17 = vpop.f32.mrb[16].mxu1 }
 0xb10   :  { %v4578_v54 = vpop.f32.mrb[17].mxu1 }
 0xb11   :  { %v4579_v14 = vadd.f32 %v4578_v54, %v4577_v17  ;;  %v4580_v9 = vpop.f32.mrb[18].mxu1  ;;  %v2181_v54 = vld [vmem:[#allocation4 + $0xe0] sm:$0xff] }
 0xb12   :  { %v4581_v31 = vpop.f32.mrb[19].mxu1 }
 0xb13   :  { %v4582_v33 = vadd.f32 %v4581_v31, %v4580_v9 }
 0xb17   :  { %v4583_v34 = vpop.f32.mrb[20].mxu1 }
 0xb18   :  { %v4584_v4 = vpop.f32.mrb[21].mxu1 }
 0xb19   :  { %v4585_v35 = vadd.f32 %v4584_v4, %v4583_v34  ;;  %v4586_v48 = vpop.f32.mrb[22].mxu1 }
 0xb1a   :  { %v4587_v2 = vpop.f32.mrb[23].mxu1 }
 0xb1b   :  { %v4588_v37 = vadd.f32 %v4587_v2, %v4586_v48 }
 0xb47   :  { %v2047_v38 = vpop.f32.mrb[24].mxu1 }
 0xb48   :  { %v5990_v39 = vadd.f32 %v4579_v14, %v2047_v38  ;;  %v2049_v42 = vpop.f32.mrb[25].mxu1  ;;  %v2182_v14 = vld [vmem:[#allocation4 + $0xe8] sm:$0xff] }
 0xb49   :  { %v2050_v43 = vpop.f32.mrb[26].mxu1  ;;  %v2183_v9 = vpack.c.bf16 %v2182_v14, %v2181_v54 }
 0xb4a   :  { %v5992_v32 = vadd.f32 %v4582_v33, %v2050_v43  ;;  %v2052_v45 = vpop.f32.mrb[27].mxu1  ;;  %v2063_v47 = vsel %vm6798_vm12, %v5990_v39, 0.0  ;;  %v2075_v60 = vmul.f32 %v5990_v39, %v5990_v39 }
 0xb4b   :  { %2064 = vadd.xlane.f32.xlu1 %v2063_v47  ;;  %4707 = vmatprep.subr.bf16.mxu0 %v2183_v9 }
 0xb4c   :  { %v2066_v51 = vsel %vm6798_vm12, %v5992_v32, 0.0  ;;  %v2076_v53 = vmul.f32 %v5992_v32, %v5992_v32  ;;  %v2079_v15 = vsel %vm6798_vm12, %v2075_v60, 0.0  ;;  %4708 = vmatpush3.bf16.msra.mxu0 %v2183_v9 }
 0xb4d   :  { %2067 = vadd.xlane.f32.xlu0 %v2066_v51 }
 0xb4e   :  { %v2082_v61 = vsel %vm6798_vm12, %v2076_v53, 0.0 }
 0xb4f   :  { %v2055_v1 = vpop.f32.mrb[28].mxu1  ;;  %2083 = vadd.xlane.f32.xlu1 %v2082_v61 }
 0xb50   :  { %v6003_v10 = vadd.f32 %v4585_v35, %v2055_v1  ;;  %v2057_v11 = vpop.f32.mrb[29].mxu1 }
 0xb51   :  { %v2058_v5 = vpop.f32.mrb[30].mxu1  ;;  %2080 = vadd.xlane.f32.xlu0 %v2079_v15 }
 0xb52   :  { %v6006_v3 = vadd.f32 %v4588_v37, %v2058_v5  ;;  %v2060_v62 = vpop.f32.mrb[31].mxu1  ;;  %v2069_v21 = vsel %vm6798_vm12, %v6003_v10, 0.0  ;;  %v2077_v22 = vmul.f32 %v6003_v10, %v6003_v10 }
 0xb54   :  { %v2072_v57 = vsel %vm6798_vm12, %v6006_v3, 0.0  ;;  %v2085_v24 = vsel %vm6798_vm12, %v2077_v22, 0.0  ;;  %v2078_v29 = vmul.f32 %v6006_v3, %v6006_v3 }
 0xb55   :  { %2070 = vadd.xlane.f32.xlu0 %v2069_v21  ;;  %2073 = vadd.xlane.f32.xlu1 %v2072_v57 }
 0xb56   :  { %v2088_v17 = vsel %vm6798_vm12, %v2078_v29, 0.0 }
 0xb59   :  { %2086 = vadd.xlane.f32.xlu0 %v2085_v24 }
 0xb66   :  { %2132 = vperm.xlu1 %4921, %v5705_v25  }
 0xb6a   :  { %2136 = vperm.xlu1 %4921, %v5711_v26  }
 0xb6e   :  { %2140 = vperm.xlu1 %4921, %v5717_v8  }
 0xb6f   :  { %2128 = vperm.xlu0 %4920, %v5722_v27  }
 0xb72   :  { %4922 = vset.pattern.permute.xlu1 %v5153_v28 }
 0xb73   :  { %2148 = vperm.xlu1 %4922, %v5722_v27  }
 0xb77   :  { %2152 = vperm.xlu1 %4922, %v5705_v25  }
 0xb7b   :  { %2156 = vperm.xlu1 %4922, %v5711_v26  }
 0xb9f   :  { %2089 = vadd.xlane.f32.xlu1 %v2088_v17 }
 0xbb0   :  { %2160 = vperm.xlu1 %4922, %v5717_v8  }
 0xbd8   :  { %v2065_v31 = vpop.xlane.xlu1 %2064 }
 0xbd9   :  { %v2091_v27 = vmul.f32 0.0625, %v2065_v31 }
 0xbda   :  { %v2068_v33 = vpop.xlane.xlu0 %2067 }
 0xbdb   :  { %v2092_v34 = vmul.f32 0.0625, %v2068_v33  ;;  %v2099_v48 = vmul.f32 %v2091_v27, %v2091_v27  ;;  %v2111_v5 = vsub.f32 %v5990_v39, %v2091_v27 }
 0xbdc   :  { %v2084_v25 = vpop.xlane.xlu1 %2083 }
 0xbdd   :  { %v2100_v4 = vmul.f32 %v2092_v34, %v2092_v34  ;;  %v2096_v26 = vmul.f32 0.0625, %v2084_v25  ;;  %v2112_v15 = vsub.f32 %v5992_v32, %v2092_v34 }
 0xbde   :  { %v2081_v35 = vpop.xlane.xlu0 %2080 }
 0xbdf   :  { %v2104_v2 = vsub.f32 %v2096_v26, %v2100_v4  ;;  %v2095_v37 = vmul.f32 0.0625, %v2081_v35 }
 0xbe1   :  { %v2108_v38 = vmax.f32 %v2104_v2, 0.0  ;;  %v2103_v42 = vsub.f32 %v2095_v37, %v2099_v48 }
 0xbe2   :  { %v2074_v43 = vpop.xlane.xlu1 %2073  ;;  %v2071_v53 = vpop.xlane.xlu0 %2070 }
 0xbe3   :  { %v2116_v8 = vadd.f32 1e-05, %v2108_v38  ;;  %v2107_v45 = vmax.f32 %v2103_v42, 0.0  ;;  %v2093_v39 = vmul.f32 0.0625, %v2071_v53  ;;  %v2094_v2 = vmul.f32 0.0625, %v2074_v43 }
 0xbe5   :  { %5027 = vrsqrt.f32 %v2116_v8  ;;  %v2115_v47 = vadd.f32 1e-05, %v2107_v45  ;;  %v2101_v27 = vmul.f32 %v2093_v39, %v2093_v39  ;;  %v2102_v38 = vmul.f32 %v2094_v2, %v2094_v2 }
 0xbe6   :  { %v2133_v51 = vpop.permute.xlu1 %2132  ;;  %v2087_v61 = vpop.xlane.xlu0 %2086 }
 0xbe7   :  { %5029 = vrsqrt.f32 %v2115_v47  ;;  %v2097_v32 = vmul.f32 0.0625, %v2087_v61  ;;  %v2114_v61 = vsub.f32 %v6006_v3, %v2094_v2 }
 0xbe9   :  { %v2105_v34 = vsub.f32 %v2097_v32, %v2101_v27  ;;  %v2324_v32 = vsel %vm2323_vm1, 65537, %v5130_v0  ;;  %vm6893_vm1 = vcmask 56320  }
 0xbea   :  { %v2137_v60 = vpop.permute.xlu1 %2136  ;;  %vm6895_vm10 = vmmov %vm6893_vm1 }
 0xbeb   :  { %v2109_v26 = vmax.f32 %v2105_v34, 0.0  ;;  %v2328_v34 = vrot.slane %v2324_v32, %v5268_v13 }
 0xbed   :  { %v2117_v35 = vadd.f32 1e-05, %v2109_v26 }
 0xbee   :  { %v2141_v1 = vpop.permute.xlu1 %2140  ;;  %v2129_v57 = vpop.permute.xlu0 %2128 }
 0xbef   :  { %v5028_v11 = vpop.eup %5027  ;;  %5031 = vrsqrt.f32 %v2117_v35  ;;  %v5155_v35 = vmov 9  }
 0xbf0   :  { %v2124_v21 = vmul.f32 %v5028_v11, %v2112_v15  ;;  %v2113_v11 = vsub.f32 %v6003_v10, %v2093_v39 }
 0xbf1   :  { %v5030_v62 = vpop.eup %5029 }
 0xbf2   :  { %v2149_v22 = vpop.permute.xlu1 %2148  ;;  %v2123_v24 = vmul.f32 %v5030_v62, %v2111_v5  ;;  %v2144_v29 = vmul.f32 %v2133_v51, %v2124_v21 }
 0xbf4   :  { %v2143_v28 = vmul.f32 %v2129_v57, %v2123_v24 }
 0xbf6   :  { %v2163_v17 = vadd.f32 %v2149_v22, %v2143_v28  ;;  %v2153_v54 = vpop.permute.xlu1 %2152 }
 0xbf7   :  { %v2164_v14 = vadd.f32 %v2153_v54, %v2144_v29 }
 0xbf8   :  { %vm2167_vm15 = vcmp.ge.f32.partialorder %v2163_v17, 0.0  ;;  %v2171_v9 = vmul.f32 0.1, %v2163_v17 }
 0xbf9   :  { %vm2168_vm5 = vcmp.ge.f32.partialorder %v2164_v14, 0.0  ;;  %v2172_v31 = vmul.f32 0.1, %v2164_v14  ;;  %v5032_v51 = vpop.eup %5031 }
 0xbfa   :  { %v2175_v33 = vsel %vm2167_vm15, %v2163_v17, %v2171_v9  ;;  %v2157_v48 = vpop.permute.xlu1 %2156  ;;  %v2125_v15 = vmul.f32 %v5032_v51, %v2113_v11 }
 0xbfb   :  { %v2176_v25 = vsel %vm2168_vm5, %v2164_v14, %v2172_v31  ;;  %v4971_v31 = vld [vmem:[#allocation2 + $0xc4] ss:$16 sps:$4 sm:$0xff]  }
 0xbfc   :  { %v6028_v4 = vpack.c.bf16 %v2176_v25, %v2175_v33  ;;  %v2145_v53 = vmul.f32 %v2137_v60, %v2125_v15  ;;  %v6099_v33 = vand.u32 3, %v5260_v7 }
 0xbfe   :  { %4709 = vmatprep.mubr.msk.bf16.mxu0 %vm6798_vm12, %v6028_v4  ;;  %v2165_v62 = vadd.f32 %v2157_v48, %v2145_v53  ;;  %v2269_v25 = vadd.s32 4294967293, %v6099_v33  ;;  %v2273_v39 = vadd.s32 4294967294, %v6099_v33  ;;  %v2277_v7 = vadd.s32 4294967295, %v6099_v33 }
 0xc00   :  { %v2173_v22 = vmul.f32 0.1, %v2165_v62  ;;  %vm2169_vm3 = vcmp.ge.f32.partialorder %v2165_v62, 0.0  ;;  %vm2270_vm6 = vcmp.ge.s32.totalorder %v2269_v25, 0  ;;  %vm2274_vm5 = vcmp.ge.s32.totalorder %v2273_v39, 0 }
 0xc01   :  { %vm2407_vm15 = vmpackc.low %vm2270_vm6, %vm2270_vm6  ;;  %vm6892_vm6 = vcmask 23552  }
 0xc02   :  { %v2177_v29 = vsel %vm2169_vm3, %v2165_v62, %v2173_v22  ;;  %v2408_v27 = vsel %vm2407_vm15, 65537, %v5130_v0  ;;  %vm2428_vm3 = vmpackc.low %vm2274_vm5, %vm2274_vm5  ;;  %vm2278_vm15 = vcmp.ge.s32.totalorder %v2277_v7, 0 }
 0xc03   :  { %v2412_v26 = vrot.slane %v2408_v27, %v5268_v13  ;;  %vm6894_vm5 = vmmov %vm6892_vm6 }
 0xc2c   :  { %v2090_v37 = vpop.xlane.xlu1 %2089 }
 0xc2d   :  { %v2098_v42 = vmul.f32 0.0625, %v2090_v37 }
 0xc2f   :  { %v2106_v8 = vsub.f32 %v2098_v42, %v2102_v38  ;;  %v2429_v38 = vsel %vm2428_vm3, 65537, %v5130_v0  ;;  %vm2449_vm3 = vmpackc.low %vm2278_vm15, %vm2278_vm15  ;;  %vm6900_vm15 = vcmask 7168  }
 0xc30   :  { %v2161_v43 = vpop.permute.xlu1 %2160 }
 0xc31   :  { %v2110_v45 = vmax.f32 %v2106_v8, 0.0 }
 0xc33   :  { %v2118_v47 = vadd.f32 1e-05, %v2110_v45 }
 0xc35   :  { %5033 = vrsqrt.f32 %v2118_v47  ;;  %v2433_v47 = vrot.slane %v2429_v38, %v5268_v13 }
 0xc3f   :  { %v5034_v5 = vpop.eup %5033 }
 0xc40   :  { %v2126_v21 = vmul.f32 %v5034_v5, %v2114_v61 }
 0xc42   :  { %v2146_v57 = vmul.f32 %v2141_v1, %v2126_v21  ;;  %v2450_v21 = vsel %vm2449_vm3, 65537, %v5130_v0 }
 0xc44   :  { %v2166_v24 = vadd.f32 %v2161_v43, %v2146_v57 }
 0xc46   :  { %vm2170_vm13 = vcmp.ge.f32.partialorder %v2166_v24, 0.0  ;;  %v2174_v28 = vmul.f32 0.1, %v2166_v24 }
 0xc48   :  { %v2178_v17 = vsel %vm2170_vm13, %v2166_v24, %v2174_v28  ;;  %vm6110_vm13 = vcmp.ne.s16.totalorder %v2328_v34, 0  ;;  %v2454_v24 = vrot.slane %v2450_v21, %v5268_v13 }
 0xc49   :  { %v6034_v54 = vpack.c.bf16 %v2178_v17, %v2177_v29 }
 0xc4b   :  { %4710 = vmatmul.mubr.msk.bf16.vlgmr.msra.gmra.mrb[12].mxu0 %vm6798_vm12, %v6034_v54  ;;  %vm6114_vm12 = vcmp.ne.s16.totalorder %v2412_v26, 0 }
 0xc4c   :  { %2689 = vmatprep.mubr.bf16.mxu0 %v4971_v31 }
 0xd1e   :  { %v4711_v10 = vpop.f32.mrb[12].mxu0 }
 0xd1f   :  { %v2224_v60 = vpop.f32.mrb[13].mxu0 }
 0xd20   :  { %v4712_v3 = vpop.f32.mrb[14].mxu0 }
 0xd21   :  { %v6038_v14 = vpack.c.bf16 %v4712_v3, %v4711_v10  ;;  %v2227_v9 = vpop.f32.mrb[15].mxu0  ;;  %v2281_v3 = vadd.s32 1, %v6099_v33 }
 0xd22   :  { %v6040_v1 = vpack.c.bf16 %v2227_v9, %v2224_v60 }
 0xd23   :  { %vm2283_vm3 = vcmp.lt.s32.totalorder %v2281_v3, 4 }
 0xd24   :  { %2395 = vrot.lane.b32.xlu1 %v6040_v1, %s5135_s23  ;;  %2311 = vrot.lane.b32.xlu0 %v6040_v1, %s5131_s3 }
 0xd28   :  { %2397 = vrot.lane.b32.xlu1 %v6038_v14, %s5135_s23  ;;  %2313 = vrot.lane.b32.xlu0 %v6038_v14, %s5131_s3 }
 0xd2c   :  { %2416 = vrot.lane.b32.xlu1 %v6040_v1, %s5136_s24  ;;  %2332 = vrot.lane.b32.xlu0 %v6040_v1, %s5133_s21 }
 0xd30   :  { %2418 = vrot.lane.b32.xlu1 %v6038_v14, %s5136_s24  ;;  %2334 = vrot.lane.b32.xlu0 %v6038_v14, %s5133_s21 }
 0xd34   :  { %2437 = vrot.lane.b32.xlu1 %v6040_v1, %s5137_s25  ;;  %2353 = vrot.lane.b32.xlu0 %v6040_v1, %s5132_s20 }
 0xd38   :  { %2439 = vrot.lane.b32.xlu1 %v6038_v14, %s5137_s25  ;;  %2355 = vrot.lane.b32.xlu0 %v6038_v14, %s5132_s20 }
 0xd3c   :  { %2376 = vrot.lane.b32.xlu1 %v6038_v14, %s5134_s22  ;;  %2374 = vrot.lane.b32.xlu0 %v6040_v1, %s5134_s22 }
 0xd40   :  { %2460 = vrot.lane.b32.xlu1 %v6038_v14, %s5138_s26  ;;  %2458 = vrot.lane.b32.xlu0 %v6040_v1, %s5138_s26 }
 0xd44   :  { %2481 = vrot.lane.b32.xlu1 %v6038_v14, %s5139_s27  ;;  %2479 = vrot.lane.b32.xlu0 %v6040_v1, %s5139_s27 }
 0xd48   :  { %2502 = vrot.lane.b32.xlu1 %v6038_v14, %s5140_s28  ;;  %2500 = vrot.lane.b32.xlu0 %v6040_v1, %s5140_s28 }
 0xd4c   :  { %2523 = vrot.lane.b32.xlu1 %v6038_v14, %s5141_s29  ;;  %2521 = vrot.lane.b32.xlu0 %v6040_v1, %s5141_s29 }
 0xd50   :  { %2544 = vrot.lane.b32.xlu1 %v6038_v14, %s5142_s30  ;;  %2542 = vrot.lane.b32.xlu0 %v6040_v1, %s5142_s30 }
 0xd54   :  { %2565 = vrot.lane.b32.xlu1 %v6038_v14, %s5143_s5  ;;  %2563 = vrot.lane.b32.xlu0 %v6040_v1, %s5143_s5 }
 0xd58   :  { %2586 = vrot.lane.b32.xlu1 %v6038_v14, %s5144_s6  ;;  %2584 = vrot.lane.b32.xlu0 %v6040_v1, %s5144_s6 }
 0xd96   :  { %v2396_v2 = vpop.permute.xlu1 %2395  ;;  %v2312_v37 = vpop.permute.xlu0 %2311 }
 0xd97   :  { %v2400_v42 = vsel %vm6892_vm6, 0, %v2396_v2  ;;  %v2316_v8 = vsel %vm6893_vm1, 0, %v2312_v37  ;;  %vm2434_vm6 = vcmp.ne.s16.totalorder %v2433_v47, 0  ;;  %vm6896_vm1 = vcmask 15360  }
 0xd98   :  { %v2330_v45 = vsel %vm6110_vm13, %v2316_v8, 0  ;;  %4864 = vmatprep.subr.msk.bf16.mxu0 %vm6114_vm12, %v2400_v42  ;;  %v2285_v2 = vadd.s32 2, %v6099_v33 }
 0xd99   :  { %4593 = vmatpush3.bf16.msra.mxu0 %v2330_v45 }
 0xd9a   :  { %v2398_v51 = vpop.permute.xlu1 %2397  ;;  %v2314_v11 = vpop.permute.xlu0 %2313 }
 0xd9b   :  { %v2403_v15 = vsel %vm6894_vm5, 0, %v2398_v51  ;;  %v2319_v53 = vsel %vm6895_vm10, 0, %v2314_v11  ;;  %vm6898_vm10 = vmmov %vm6896_vm1  ;;  %vm6901_vm5 = vcmask 39936  }
 0xd9c   :  { %v2331_v61 = vsel %vm6110_vm13, %v2319_v53, 0  ;;  %4865 = vmatprep.subr.msk.bf16.mxu0 %vm6114_vm12, %v2403_v15  ;;  %vm6899_vm12 = vmmov %vm6897_vm9  ;;  %v4969_v15 = vld [vmem:[#allocation2 + $0xc0] ss:$16 sps:$4 sm:$0xff]   ;;  %v2289_v53 = vadd.s32 3, %v6099_v33 }
 0xd9d   :  { %4595 = vmatpush3.bf16.msra.mxu0 %v2331_v61 }
 0xd9e   :  { %v2417_v5 = vpop.permute.xlu1 %2416  ;;  %v2333_v62 = vpop.permute.xlu0 %2332 }
 0xd9f   :  { %v2421_v57 = vsel %vm6896_vm1, 0, %v2417_v5  ;;  %v2337_v43 = vsel %vm6897_vm9, 0, %v2333_v62  ;;  %vm2455_vm9 = vcmp.ne.s16.totalorder %v2454_v24, 0  ;;  %vm6902_vm1 = vmmov %vm6900_vm15  ;;  %v4972_v62 = vld [vmem:[#allocation2 + $0xe4] ss:$16 sps:$4 sm:$0xff]  }
 0xda0   :  { %v2351_v22 = vsel %vm6110_vm13, %v2337_v43, 0  ;;  %4866 = vmatprep.subr.msk.bf16.mxu0 %vm2434_vm6, %v2421_v57 }
 0xda1   :  { %4597 = vmatpush3.bf16.msra.mxu0 %v2351_v22 }
 0xda2   :  { %v2419_v28 = vpop.permute.xlu1 %2418  ;;  %v2335_v29 = vpop.permute.xlu0 %2334 }
 0xda3   :  { %v2424_v17 = vsel %vm6898_vm10, 0, %v2419_v28  ;;  %v2340_v10 = vsel %vm6899_vm12, 0, %v2335_v29  ;;  %vm2470_vm10 = vmpackc.low %vm2283_vm3, %vm2283_vm3  ;;  %vm6904_vm12 = vcmask 31744   ;;  %v4974_v28 = vld [vmem:[#allocation2 + $0xe0] ss:$16 sps:$4 sm:$0xff]  }
 0xda4   :  { %v2352_v60 = vsel %vm6110_vm13, %v2340_v10, 0  ;;  %4867 = vmatprep.subr.msk.bf16.mxu0 %vm2434_vm6, %v2424_v17  ;;  %vm6903_vm6 = vmmov %vm6901_vm5  ;;  %v2471_v42 = vsel %vm2470_vm10, 65537, %v5130_v0  ;;  %v4977_v10 = vld [vmem:[#allocation2 + $0xcc] ss:$16 sps:$4 sm:$0xff]   ;;  %v4975_v29 = vld [vmem:[#allocation2 + $0xc8] ss:$16 sps:$4 sm:$0xff]  }
 0xda5   :  { %4599 = vmatpush3.bf16.msra.mxu0 %v2352_v60  ;;  %v2475_v51 = vrot.slane %v2471_v42, %v5268_v13 }
 0xda6   :  { %v2438_v9 = vpop.permute.xlu1 %2437  ;;  %v2354_v31 = vpop.permute.xlu0 %2353 }
 0xda7   :  { %v2442_v25 = vsel %vm6900_vm15, 0, %v2438_v9  ;;  %v2358_v39 = vsel %vm6901_vm5, 0, %v2354_v31  ;;  %vm2287_vm15 = vcmp.lt.s32.totalorder %v2285_v2, 4  ;;  %vm6905_vm5 = vmmov %vm6904_vm12  ;;  %vm6163_vm3 = vcmp.ne.s16.totalorder %v2475_v51, 0 }
 0xda8   :  { %v2372_v32 = vsel %vm6110_vm13, %v2358_v39, 0  ;;  %4868 = vmatprep.subr.msk.bf16.mxu0 %vm2455_vm9, %v2442_v25 }
 0xda9   :  { %4601 = vmatpush3.bf16.msra.mxu0 %v2372_v32 }
 0xdaa   :  { %v2440_v27 = vpop.permute.xlu1 %2439  ;;  %v2356_v34 = vpop.permute.xlu0 %2355 }
 0xdab   :  { %v2445_v26 = vsel %vm6902_vm1, 0, %v2440_v27  ;;  %v2361_v7 = vsel %vm6903_vm6, 0, %v2356_v34  ;;  %vm6908_vm1 = vcmask 56320   ;;  %vm2291_vm6 = vcmp.lt.s32.totalorder %v2289_v53, 4 }
 0xdac   :  { %v2373_v48 = vsel %vm6110_vm13, %v2361_v7, 0  ;;  %4869 = vmatprep.subr.msk.bf16.mxu0 %vm2455_vm9, %v2445_v26  ;;  %vm2491_vm9 = vmpackc.low %vm2287_vm15, %vm2287_vm15 }
 0xdad   :  { %4603 = vmatpush3.bf16.msra.mxu0 %v2373_v48  ;;  %v2492_v57 = vsel %vm2491_vm9, 65537, %v5130_v0  ;;  %vm6909_vm10 = vmmov %vm6908_vm1 }
 0xdae   :  { %v2377_v37 = vpop.permute.xlu1 %2376  ;;  %4604 = vmatprep.subr.bf16.mxu0 %v6040_v1  ;;  %v2375_v38 = vpop.permute.xlu0 %2374  ;;  %v2496_v43 = vrot.slane %v2492_v57, %v5268_v13 }
 0xdaf   :  { %v2379_v8 = vsel %vm6904_vm12, 0, %v2375_v38  ;;  %v2382_v47 = vsel %vm6905_vm5, 0, %v2377_v37  ;;  %vm2512_vm12 = vmpackc.low %vm2291_vm6, %vm2291_vm6  ;;  %vm6912_vm5 = vcmask 48128   ;;  %vm6915_vm6 = vcmask 39936  }
 0xdb0   :  { %v2393_v45 = vsel %vm6110_vm13, %v2379_v8, 0  ;;  %v2394_v1 = vsel %vm6110_vm13, %v2382_v47, 0  ;;  %vm6177_vm15 = vcmp.ne.s16.totalorder %v2496_v43, 0  ;;  %v2513_v3 = vsel %vm2512_vm12, 65537, %v5130_v0  ;;  %vm6913_vm9 = vmmov %vm6912_vm5 }
 0xdb1   :  { %4605 = vmatpush3.bf16.msra.mxu0 %v2393_v45  ;;  %v2517_v25 = vrot.slane %v2513_v3, %v5268_v13  ;;  %vm6917_vm12 = vcmask 31744   ;;  %v6232_v3 = vld [vmem:[%s6758_s2] sm:$0xff] }
 0xdb2   :  { %4606 = vmatprep.subr.bf16.mxu0 %v6038_v14  ;;  %v2459_v11 = vpop.permute.xlu0 %2458  ;;  %v2461_v21 = vpop.permute.xlu1 %2460 }
 0xdb3   :  { %v2463_v5 = vsel %vm6908_vm1, %v2459_v11, 0  ;;  %v2466_v33 = vsel %vm6909_vm10, %v2461_v21, 0  ;;  %vm2518_vm1 = vcmp.ne.s16.totalorder %v2517_v25, 0  ;;  %vm6916_vm10 = vmmov %vm6915_vm6 }
 0xdb4   :  { %v2477_v14 = vsel %vm6163_vm3, %v2463_v5, 0  ;;  %v2478_v24 = vsel %vm6163_vm3, %v2466_v33, 0  ;;  %vm6914_vm3 = vcmask 785408  }
 0xdb5   :  { %4607 = vmatpush3.bf16.msra.mxu0 %v2394_v1 }
 0xdb6   :  { %2706 = vmatprep.subr.bf16.mxu0 %v5130_v0  ;;  %v2480_v22 = vpop.permute.xlu0 %2479  ;;  %v2482_v60 = vpop.permute.xlu1 %2481 }
 0xdb7   :  { %v2484_v17 = vsel %vm6912_vm5, %v2480_v22, 0  ;;  %v2487_v31 = vsel %vm6913_vm9, %v2482_v60, 0  ;;  %vm6919_vm5 = vcmask 23552   ;;  %v5154_v60 = vmov 8  }
 0xdb8   :  { %2690 = vmatmul.mubr.bf16.vlgmr.msra.gmra.mrb[16].mxu0 %v4969_v15  ;;  %v2498_v9 = vsel %vm6177_vm15, %v2484_v17, 0  ;;  %v2499_v32 = vsel %vm6177_vm15, %v2487_v31, 0  ;;  %vm6918_vm15 = vmmov %vm6917_vm12  ;;  %v4978_v17 = vld [vmem:[#allocation2 + $0xec] ss:$16 sps:$4 sm:$0xff]   ;;  %4923 = vset.pattern.permute.xlu1 %v5154_v60 }
 0xdb9   :  { %2707 = vmatpush1.bf16.msra.mxu0 %v2477_v14  ;;  %2697 = vmatprep.mubr.bf16.mxu0 %v4972_v62  ;;  %vm6920_vm9 = vmmov %vm6919_vm5 }
 0xdba   :  { %2708 = vmatprep.subr.bf16.mxu0 %v5130_v0  ;;  %v2501_v39 = vpop.permute.xlu0 %2500  ;;  %v2503_v34 = vpop.permute.xlu1 %2502  ;;  %4924 = vset.pattern.permute.xlu0 %v5154_v60 }
 0xdbb   :  { %v2505_v27 = vsel %vm6915_vm6, %v2501_v39, 0  ;;  %v2508_v7 = vsel %vm6916_vm10, %v2503_v34, 0  ;;  %vm6923_vm6 = vcmask 7168   ;;  %2821 = vperm.xlu1 %4923, %v6232_v3  }
 0xdbc   :  { %v2519_v26 = vsel %vm2518_vm1, %v2505_v27, 0  ;;  %v2520_v48 = vsel %vm2518_vm1, %v2508_v7, 0  ;;  %vm6924_vm10 = vmmov %vm6923_vm6 }
 0xdbd   :  { %2709 = vmatpush1.bf16.msra.mxu0 %v2478_v24 }
 0xdbe   :  { %2710 = vmatprep.subr.bf16.mxu0 %v5130_v0  ;;  %v2522_v13 = vpop.permute.xlu0 %2521  ;;  %v2524_v37 = vpop.permute.xlu1 %2523 }
 0xdbf   :  { %v2526_v2 = vsel %vm6917_vm12, %v2522_v13, 0  ;;  %v2529_v42 = vsel %vm6918_vm15, %v2524_v37, 0  ;;  %vm6925_vm12 = vcmask 785408   ;;  %4925 = vset.pattern.permute.xlu1 %v5155_v35 }
 0xdc0   :  { %2698 = vmatmul.mubr.bf16.gmra.mrb[20].mxu0 %v4974_v28  ;;  %v2540_v38 = vsel %vm6110_vm13, %v2526_v2, 0  ;;  %v2541_v45 = vsel %vm6110_vm13, %v2529_v42, 0 }
 0xdc1   :  { %2711 = vmatpush1.bf16.msra.mxu0 %v2498_v9  ;;  %4494 = vmatprep.mubr.msk.bf16.mxu0 %vm6914_vm3, %v4977_v10  ;;  %vm6921_vm3 = vcmask 15360   ;;  %v4980_v10 = vld [vmem:[#allocation2 + $0xe8] ss:$16 sps:$4 sm:$0xff]  }
 0xdc2   :  { %2712 = vmatprep.subr.bf16.mxu0 %v5130_v0  ;;  %v2543_v8 = vpop.permute.xlu0 %2542  ;;  %v2545_v51 = vpop.permute.xlu1 %2544  ;;  %vm6922_vm1 = vmmov %vm6921_vm3 }
 0xdc3   :  { %v2547_v47 = vsel %vm6919_vm5, %v2543_v8, 0  ;;  %v2550_v1 = vsel %vm6920_vm9, %v2545_v51, 0 }
 0xdc4   :  { %v2561_v11 = vsel %vm6110_vm13, %v2547_v47, 0  ;;  %v2562_v53 = vsel %vm6110_vm13, %v2550_v1, 0 }
 0xdc5   :  { %2713 = vmatpush1.bf16.msra.mxu0 %v2499_v32 }
 0xdc6   :  { %2714 = vmatprep.subr.bf16.mxu0 %v5130_v0  ;;  %v2564_v15 = vpop.permute.xlu0 %2563  ;;  %v2566_v5 = vpop.permute.xlu1 %2565 }
 0xdc7   :  { %v2568_v61 = vsel %vm6921_vm3, %v2564_v15, 0  ;;  %v2571_v21 = vsel %vm6922_vm1, %v2566_v5, 0  ;;  %vm6926_vm3 = vmmov %vm6922_vm1 }
 0xdc8   :  { %v2582_v62 = vsel %vm6110_vm13, %v2568_v61, 0  ;;  %v2583_v14 = vsel %vm6110_vm13, %v2571_v21, 0 }
 0xdc9   :  { %2715 = vmatpush1.bf16.msra.mxu0 %v2519_v26 }
 0xdca   :  { %2716 = vmatprep.subr.bf16.mxu0 %v5130_v0  ;;  %v2585_v57 = vpop.permute.xlu0 %2584  ;;  %v2587_v43 = vpop.permute.xlu1 %2586 }
 0xdcb   :  { %v2589_v33 = vsel %vm6923_vm6, %v2585_v57, 0  ;;  %v2592_v24 = vsel %vm6924_vm10, %v2587_v43, 0  ;;  %vm6927_vm6 = vmmov %vm6926_vm3 }
 0xdcc   :  { %v2603_v22 = vsel %vm6110_vm13, %v2589_v33, 0  ;;  %v2604_v28 = vsel %vm6110_vm13, %v2592_v24, 0  ;;  %vm2755_vm13 = vcmask 64512  }
 0xdcd   :  { %2717 = vmatpush1.bf16.msra.mxu0 %v2520_v48 }
 0xdce   :  { %2718 = vmatprep.subr.bf16.mxu0 %v5130_v0 }
 0xdd1   :  { %2719 = vmatpush1.bf16.msra.mxu0 %v2540_v38 }
 0xdd2   :  { %2720 = vmatprep.subr.bf16.mxu0 %v5130_v0 }
 0xdd5   :  { %2721 = vmatpush1.bf16.msra.mxu0 %v2541_v45 }
 0xdd6   :  { %2722 = vmatprep.subr.bf16.mxu0 %v5130_v0 }
 0xdd9   :  { %2723 = vmatpush1.bf16.msra.mxu0 %v2561_v11 }
 0xdda   :  { %2724 = vmatprep.subr.bf16.mxu0 %v5130_v0 }
 0xddd   :  { %2725 = vmatpush1.bf16.msra.mxu0 %v2562_v53 }
 0xdde   :  { %2726 = vmatprep.subr.bf16.mxu0 %v5130_v0 }
 0xde1   :  { %2727 = vmatpush1.bf16.msra.mxu0 %v2582_v62 }
 0xde2   :  { %2728 = vmatprep.subr.bf16.mxu0 %v5130_v0 }
 0xde5   :  { %2729 = vmatpush1.bf16.msra.mxu0 %v2583_v14 }
 0xde6   :  { %2730 = vmatprep.subr.bf16.mxu0 %v5130_v0 }
 0xde9   :  { %2731 = vmatpush1.bf16.msra.mxu0 %v2603_v22 }
 0xdea   :  { %2732 = vmatprep.subr.bf16.mxu0 %v5130_v0 }
 0xded   :  { %2733 = vmatpush1.bf16.msra.mxu0 %v2604_v28 }
 0xdf0   :  { %2739 = vmatmul.mubr.bf16.vlgmr.msra.gmra.mrb[24].mxu0 %v4975_v29 }
 0xdf1   :  { %4495 = vmatprep.mubr.msk.bf16.mxu0 %vm6925_vm12, %v4978_v17  ;;  %vm6928_vm12 = vmmov %vm6924_vm10 }
 0xdf8   :  { %2747 = vmatmul.mubr.bf16.gmra.mrb[28].mxu0 %v4980_v10  ;;  %v6267_v10 = vld [vmem:[%s6758_s2 + $0x8] sm:$0xff] }
 0xe8b   :  { %v4608_v9 = vpop.f32.mrb[16].mxu0 }
 0xe8c   :  { %v4609_v31 = vpop.f32.mrb[17].mxu0 }
 0xe8d   :  { %v4610_v25 = vadd.f32 %v4609_v31, %v4608_v9  ;;  %v4611_v39 = vpop.f32.mrb[18].mxu0  ;;  %v6273_v9 = vld [vmem:[%s6758_s2 + $0x10] sm:$0xff]  ;;  %v6280_v31 = vld [vmem:[%s6758_s2 + $0x18] sm:$0xff] }
 0xe8e   :  { %v4612_v32 = vpop.f32.mrb[19].mxu0 }
 0xe8f   :  { %v4613_v27 = vadd.f32 %v4612_v32, %v4611_v39 }
 0xe93   :  { %v4614_v34 = vpop.f32.mrb[20].mxu0 }
 0xe94   :  { %v4615_v26 = vpop.f32.mrb[21].mxu0 }
 0xe95   :  { %v4616_v7 = vadd.f32 %v4615_v26, %v4614_v34  ;;  %v4617_v13 = vpop.f32.mrb[22].mxu0 }
 0xe96   :  { %v4618_v48 = vpop.f32.mrb[23].mxu0 }
 0xe97   :  { %v4619_v2 = vadd.f32 %v4618_v48, %v4617_v13 }
 0xec3   :  { %v2740_v37 = vpop.f32.mrb[24].mxu0 }
 0xec4   :  { %v6235_v38 = vadd.f32 %v4610_v25, %v2740_v37  ;;  %v2742_v42 = vpop.f32.mrb[25].mxu0 }
 0xec5   :  { %v2743_v8 = vpop.f32.mrb[26].mxu0 }
 0xec6   :  { %v6237_v45 = vadd.f32 %v4613_v27, %v2743_v8  ;;  %v2745_v47 = vpop.f32.mrb[27].mxu0  ;;  %v2756_v51 = vsel %vm2755_vm13, %v6235_v38, 0.0  ;;  %v2768_v11 = vmul.f32 %v6235_v38, %v6235_v38 }
 0xec7   :  { %2757 = vadd.xlane.f32.xlu0 %v2756_v51 }
 0xec8   :  { %v2759_v1 = vsel %vm2755_vm13, %v6237_v45, 0.0  ;;  %v2772_v15 = vsel %vm2755_vm13, %v2768_v11, 0.0  ;;  %v2769_v53 = vmul.f32 %v6237_v45, %v6237_v45 }
 0xec9   :  { %2760 = vadd.xlane.f32.xlu1 %v2759_v1 }
 0xeca   :  { %v2775_v43 = vsel %vm2755_vm13, %v2769_v53, 0.0 }
 0xecb   :  { %v2748_v61 = vpop.f32.mrb[28].mxu0  ;;  %2773 = vadd.xlane.f32.xlu0 %v2772_v15 }
 0xecc   :  { %v6248_v5 = vadd.f32 %v4616_v7, %v2748_v61  ;;  %v2750_v62 = vpop.f32.mrb[29].mxu0 }
 0xecd   :  { %v2751_v21 = vpop.f32.mrb[30].mxu0 }
 0xece   :  { %v6250_v57 = vadd.f32 %v4619_v2, %v2751_v21  ;;  %v2753_v14 = vpop.f32.mrb[31].mxu0  ;;  %v2762_v33 = vsel %vm2755_vm13, %v6248_v5, 0.0  ;;  %v2770_v22 = vmul.f32 %v6248_v5, %v6248_v5 }
 0xecf   :  { %2763 = vadd.xlane.f32.xlu1 %v2762_v33  ;;  %2776 = vadd.xlane.f32.xlu0 %v2775_v43 }
 0xed0   :  { %v2778_v24 = vsel %vm2755_vm13, %v2770_v22, 0.0  ;;  %v2765_v28 = vsel %vm2755_vm13, %v6250_v57, 0.0  ;;  %v2771_v29 = vmul.f32 %v6250_v57, %v6250_v57 }
 0xed2   :  { %v2781_v17 = vsel %vm2755_vm13, %v2771_v29, 0.0 }
 0xed3   :  { %2779 = vadd.xlane.f32.xlu1 %v2778_v24  ;;  %2766 = vadd.xlane.f32.xlu0 %v2765_v28 }
 0xed7   :  { %2782 = vadd.xlane.f32.xlu0 %v2781_v17 }
 0xee4   :  { %2841 = vperm.xlu1 %4925, %v6232_v3  }
 0xee8   :  { %2845 = vperm.xlu1 %4925, %v6267_v10  }
 0xeec   :  { %4926 = vset.pattern.permute.xlu1 %v5154_v60  ;;  %v2872_v60 = vld [vmem:[#allocation4 + $0xf0] sm:$0xff] }
 0xeed   :  { %2829 = vperm.xlu1 %4926, %v6273_v9   ;;  %2825 = vperm.xlu0 %4924, %v6267_v10  }
 0xeee   :  { %4713 = vmatprep.subr.mxu1 %v2872_v60 }
 0xeef   :  { %4714 = vmatpush3.msra.mxu1 %v2872_v60 }
 0xef0   :  { %3104 = vmatprep.subr.bf16.mxu1 %v5130_v0 }
 0xef1   :  { %2833 = vperm.xlu1 %4926, %v6280_v31   ;;  %3040 = vrot.lane.b32.xlu0 %v6028_v4, %s5137_s25 }
 0xef5   :  { %4927 = vset.pattern.permute.xlu1 %v5155_v35  ;;  %3052 = vrot.lane.b32.xlu0 %v6028_v4, %s5138_s26  ;;  %v2822_v35 = vpop.permute.xlu1 %2821 }
 0xef6   :  { %2849 = vperm.xlu1 %4927, %v6273_v9  }
 0xef9   :  { %3064 = vrot.lane.b32.xlu0 %v6028_v4, %s5139_s27 }
 0xefa   :  { %2853 = vperm.xlu1 %4927, %v6280_v31  }
 0xefe   :  { %3028 = vrot.lane.b32.xlu1 %v6028_v4, %s5136_s24 }
 0xf02   :  { %3030 = vrot.lane.b32.xlu1 %v6034_v54, %s5136_s24 }
 0xf06   :  { %3042 = vrot.lane.b32.xlu1 %v6034_v54, %s5137_s25 }
 0xf0a   :  { %3054 = vrot.lane.b32.xlu1 %v6034_v54, %s5138_s26 }
 0xf0e   :  { %3066 = vrot.lane.b32.xlu1 %v6034_v54, %s5139_s27 }
 0xf54   :  { %v2758_v25 = vpop.xlane.xlu0 %2757 }
 0xf55   :  { %v2784_v39 = vmul.f32 0.125, %v2758_v25 }
 0xf56   :  { %v2761_v32 = vpop.xlane.xlu1 %2760 }
 0xf57   :  { %v2792_v34 = vmul.f32 %v2784_v39, %v2784_v39  ;;  %v2785_v26 = vmul.f32 0.125, %v2761_v32 }
 0xf58   :  { %v2774_v27 = vpop.xlane.xlu0 %2773 }
 0xf59   :  { %v2788_v7 = vmul.f32 0.125, %v2774_v27  ;;  %v2793_v37 = vmul.f32 %v2785_v26, %v2785_v26  ;;  %v2804_v27 = vsub.f32 %v6235_v38, %v2784_v39 }
 0xf5b   :  { %v2796_v13 = vsub.f32 %v2788_v7, %v2792_v34 }
 0xf5c   :  { %v2764_v48 = vpop.xlane.xlu1 %2763  ;;  %v2777_v2 = vpop.xlane.xlu0 %2776 }
 0xf5d   :  { %v2800_v42 = vmax.f32 %v2796_v13, 0.0  ;;  %v2786_v8 = vmul.f32 0.125, %v2764_v48  ;;  %v2789_v47 = vmul.f32 0.125, %v2777_v2  ;;  %v2805_v2 = vsub.f32 %v6237_v45, %v2785_v26 }
 0xf5f   :  { %v2808_v51 = vadd.f32 1e-05, %v2800_v42  ;;  %v2797_v11 = vsub.f32 %v2789_v47, %v2793_v37  ;;  %v2794_v1 = vmul.f32 %v2786_v8, %v2786_v8 }
 0xf60   :  { %v2780_v15 = vpop.xlane.xlu1 %2779  ;;  %v2767_v53 = vpop.xlane.xlu0 %2766 }
 0xf61   :  { %5035 = vrsqrt.f32 %v2808_v51  ;;  %v2801_v61 = vmax.f32 %v2797_v11, 0.0  ;;  %v2790_v62 = vmul.f32 0.125, %v2780_v15  ;;  %v2787_v21 = vmul.f32 0.125, %v2767_v53 }
 0xf62   :  { %v2806_v15 = vsub.f32 %v6248_v5, %v2786_v8 }
 0xf63   :  { %v2809_v14 = vadd.f32 1e-05, %v2801_v61  ;;  %v2798_v33 = vsub.f32 %v2790_v62, %v2794_v1  ;;  %v2795_v28 = vmul.f32 %v2787_v21, %v2787_v21  ;;  %v2807_v45 = vsub.f32 %v6250_v57, %v2787_v21 }
 0xf64   :  { %v2842_v43 = vpop.permute.xlu1 %2841  ;;  %v2783_v22 = vpop.xlane.xlu0 %2782 }
 0xf65   :  { %5037 = vrsqrt.f32 %v2809_v14  ;;  %v2802_v24 = vmax.f32 %v2798_v33, 0.0  ;;  %v2791_v29 = vmul.f32 0.125, %v2783_v22 }
 0xf67   :  { %v2810_v17 = vadd.f32 1e-05, %v2802_v24  ;;  %v2799_v60 = vsub.f32 %v2791_v29, %v2795_v28 }
 0xf68   :  { %v2846_v25 = vpop.permute.xlu1 %2845 }
 0xf69   :  { %5039 = vrsqrt.f32 %v2810_v17  ;;  %v2803_v32 = vmax.f32 %v2799_v60, 0.0 }
 0xf6b   :  { %v5036_v34 = vpop.eup %5035  ;;  %v2811_v7 = vadd.f32 1e-05, %v2803_v32 }
 0xf6c   :  { %v2816_v13 = vmul.f32 %v5036_v34, %v2804_v27  ;;  %v2830_v48 = vpop.permute.xlu1 %2829  ;;  %v2826_v1 = vpop.permute.xlu0 %2825 }
 0xf6d   :  { %5041 = vrsqrt.f32 %v2811_v7 }
 0xf6e   :  { %v2836_v37 = vmul.f32 %v2822_v35, %v2816_v13 }
 0xf6f   :  { %v5038_v42 = vpop.eup %5037 }
 0xf70   :  { %v2856_v47 = vadd.f32 %v2842_v43, %v2836_v37  ;;  %v2817_v51 = vmul.f32 %v5038_v42, %v2805_v2  ;;  %v2834_v11 = vpop.permute.xlu1 %2833  ;;  %v3041_v34 = vpop.permute.xlu0 %3040 }
 0xf71   :  { %v3045_v2 = vsel %vm6924_vm10, 0, %v3041_v34  ;;  %vm6936_vm10 = vcmask 15360  }
 0xf72   :  { %v2864_v53 = vmul.f32 0.1, %v2856_v47  ;;  %v2837_v61 = vmul.f32 %v2826_v1, %v2817_v51  ;;  %vm2860_vm15 = vcmp.ge.f32.partialorder %v2856_v47, 0.0  ;;  %v3050_v42 = vsel %vm5872_vm14, %v3045_v2, 0 }
 0xf73   :  { %v5040_v62 = vpop.eup %5039 }
 0xf74   :  { %v2818_v38 = vmul.f32 %v5040_v62, %v2806_v15  ;;  %v2857_v39 = vadd.f32 %v2846_v25, %v2837_v61  ;;  %v2868_v14 = vsel %vm2860_vm15, %v2856_v47, %v2864_v53 }
 0xf75   :  { %v2850_v33 = vpop.permute.xlu1 %2849  ;;  %4715 = vmatprep.mubr.msk.f32.mxu1 %vm2755_vm13, %v2868_v14 }
 0xf76   :  { %v2838_v35 = vmul.f32 %v2830_v48, %v2818_v38  ;;  %vm2861_vm5 = vcmp.ge.f32.partialorder %v2857_v39, 0.0  ;;  %v2865_v26 = vmul.f32 0.1, %v2857_v39 }
 0xf77   :  { %v5042_v43 = vpop.eup %5041 }
 0xf78   :  { %v2869_v22 = vsel %vm2861_vm5, %v2857_v39, %v2865_v26  ;;  %v2819_v24 = vmul.f32 %v5042_v43, %v2807_v45  ;;  %v2858_v28 = vadd.f32 %v2850_v33, %v2838_v35  ;;  %vm6931_vm5 = vcmask 113664   ;;  %v4983_v45 = vld [vmem:[#allocation2 + $0x144] ss:$16 sps:$4 sm:$0xff]   ;;  %v4981_v35 = vld [vmem:[#allocation2 + $0x140] ss:$16 sps:$4 sm:$0xff]  }
 0xf79   :  { %v2854_v5 = vpop.permute.xlu1 %2853  ;;  %4716 = vmatmul.mubr.msk.f32.vlgmr.msra.gmra.mrb[32].mxu1 %vm2755_vm13, %v2869_v22 }
 0xf7a   :  { %v2839_v8 = vmul.f32 %v2834_v11, %v2819_v24  ;;  %v2866_v29 = vmul.f32 0.1, %v2858_v28  ;;  %vm2862_vm9 = vcmp.ge.f32.partialorder %v2858_v28, 0.0  ;;  %v3053_v11 = vpop.permute.xlu0 %3052 }
 0xf7c   :  { %v2859_v17 = vadd.f32 %v2854_v5, %v2839_v8  ;;  %v2870_v60 = vsel %vm2862_vm9, %v2858_v28, %v2866_v29  ;;  %vm6932_vm9 = vmmov %vm6931_vm5  ;;  %v4984_v8 = vld [vmem:[#allocation2 + $0x164] ss:$16 sps:$4 sm:$0xff]   ;;  %v4986_v29 = vld [vmem:[#allocation2 + $0x160] ss:$16 sps:$4 sm:$0xff]  }
 0xf7d   :  { %v3029_v25 = vpop.permute.xlu1 %3028  ;;  %4718 = vmatprep.mubr.msk.f32.mxu1 %vm2755_vm13, %v2870_v60  ;;  %v5156_v60 = vmov 10  }
 0xf7e   :  { %v2867_v32 = vmul.f32 0.1, %v2859_v17  ;;  %v3033_v57 = vsel %vm6926_vm3, 0, %v3029_v25  ;;  %vm2863_vm1 = vcmp.ge.f32.partialorder %v2859_v17, 0.0  ;;  %v3065_v62 = vpop.permute.xlu0 %3064  ;;  %vm6933_vm3 = vcmask 261120   ;;  %4928 = vset.pattern.permute.xlu1 %v5156_v60  ;;  %4929 = vset.pattern.permute.xlu0 %v5156_v60 }
 0xf7f   :  { %v3038_v21 = vsel %vm5847_vm11, %v3033_v57, 0  ;;  %v3069_v38 = vsel %vm6931_vm5, %v3065_v62, 0 }
 0xf80   :  { %3105 = vmatpush1.bf16.msra.mxu1 %v3038_v21  ;;  %v2871_v27 = vsel %vm2863_vm1, %v2859_v17, %v2867_v32  ;;  %vm6934_vm1 = vmmov %vm6933_vm3  ;;  %v4989_v17 = vld [vmem:[#allocation2 + $0x104] ss:$16 sps:$4 sm:$0xff]  }
 0xf81   :  { %v3031_v7 = vpop.permute.xlu1 %3030  ;;  %4719 = vmatmul.mubr.msk.f32.gmra.mrb[34].mxu1 %vm2755_vm13, %v2871_v27  ;;  %3106 = vmatprep.subr.bf16.mxu1 %v5130_v0  ;;  %vm6929_vm13 = vcmask 121856  }
 0xf82   :  { %v3036_v13 = vsel %vm6927_vm6, 0, %v3031_v7  ;;  %v3057_v1 = vsel %vm6929_vm13, %v3053_v11, 0  ;;  %vm6930_vm15 = vmmov %vm6929_vm13  ;;  %4504 = vmatprep.mubr.msk.bf16.mxu1 %vm6933_vm3, %v4983_v45  ;;  %vm6938_vm13 = vcmask 7168   ;;  %vm6944_vm3 = vcmask 130048  }
 0xf83   :  { %v3039_v48 = vsel %vm5847_vm11, %v3036_v13, 0  ;;  %v3062_v53 = vsel %vm5906_vm0, %v3057_v1, 0  ;;  %vm6935_vm6 = vmmov %vm6934_vm1 }
 0xf84   :  { %3107 = vmatpush1.bf16.msra.mxu1 %v3039_v48 }
 0xf85   :  { %v3043_v37 = vpop.permute.xlu1 %3042  ;;  %3108 = vmatprep.subr.bf16.mxu1 %v5130_v0 }
 0xf86   :  { %v3048_v47 = vsel %vm6928_vm12, 0, %v3043_v37  ;;  %vm6937_vm12 = vmmov %vm6936_vm10 }
 0xf87   :  { %v3051_v51 = vsel %vm5872_vm14, %v3048_v47, 0 }
 0xf88   :  { %3109 = vmatpush1.bf16.msra.mxu1 %v3050_v42 }
 0xf89   :  { %3110 = vmatprep.subr.bf16.mxu1 %v5130_v0  ;;  %v3055_v15 = vpop.permute.xlu1 %3054 }
 0xf8a   :  { %v3060_v61 = vsel %vm6930_vm15, %v3055_v15, 0  ;;  %vm6939_vm15 = vmmov %vm6938_vm13 }
 0xf8c   :  { %3111 = vmatpush1.bf16.msra.mxu1 %v3051_v51 }
 0xf8d   :  { %3112 = vmatprep.subr.bf16.mxu1 %v5130_v0  ;;  %v3067_v39 = vpop.permute.xlu1 %3066 }
 0xf8e   :  { %v3072_v14 = vsel %vm6932_vm9, %v3067_v39, 0  ;;  %v4987_v39 = vld [vmem:[#allocation2 + $0x100] ss:$16 sps:$4 sm:$0xff]  }
 0xf8f   :  { %v3075_v33 = vsel %vm5921_vm8, %v3072_v14, 0  ;;  %v5157_v14 = vmov 11  }
 0xf90   :  { %3113 = vmatpush1.bf16.msra.mxu1 %v6028_v4  ;;  %v3063_v4 = vsel %vm5906_vm0, %v3060_v61, 0 }
 0xf91   :  { %3114 = vmatprep.subr.bf16.mxu1 %v5130_v0 }
 0xf94   :  { %3115 = vmatpush1.bf16.msra.mxu1 %v6034_v54  ;;  %v3074_v54 = vsel %vm5921_vm8, %v3069_v38, 0 }
 0xf95   :  { %3116 = vmatprep.subr.bf16.mxu1 %v5130_v0 }
 0xf98   :  { %3117 = vmatpush1.bf16.msra.mxu1 %v3062_v53 }
 0xf99   :  { %3118 = vmatprep.subr.bf16.mxu1 %v5130_v0 }
 0xf9c   :  { %3119 = vmatpush1.bf16.msra.mxu1 %v3063_v4 }
 0xf9d   :  { %3120 = vmatprep.subr.bf16.mxu1 %v5130_v0 }
 0xfa0   :  { %3121 = vmatpush1.bf16.msra.mxu1 %v3074_v54  ;;  %v4992_v54 = vld [vmem:[#allocation2 + $0x120] ss:$16 sps:$4 sm:$0xff]  }
 0xfa1   :  { %3122 = vmatprep.subr.bf16.mxu1 %v5130_v0 }
 0xfa4   :  { %3123 = vmatpush1.bf16.msra.mxu1 %v3075_v33 }
 0xfa5   :  { %3177 = vmatprep.subr.bf16.mxu1 %v5130_v0 }
 0xfa7   :  { %3137 = vmatmul.mubr.bf16.vlgmr.msra.gmra.mrb[36].mxu1 %v4981_v35 }
 0xfa8   :  { %4505 = vmatprep.mubr.msk.bf16.mxu1 %vm6934_vm1, %v4984_v8 }
 0xfaf   :  { %3145 = vmatmul.mubr.bf16.gmra.mrb[40].mxu1 %v4986_v29 }
 0xfb0   :  { %4510 = vmatprep.mubr.msk.bf16.mxu1 %vm6935_vm6, %v4989_v17 }
0x104c   :  { %v4717_v26 = vpop.f32.mrb[32].mxu1 }
0x104d   :  { %v2951_v43 = vpop.f32.mrb[33].mxu1 }
0x104e   :  { %v2970_v22 = vpack.c.bf16 %v4717_v26, %v2951_v43 }
0x1050   :  { %2974 = vrot.lane.b32.xlu0 %v2970_v22, %s5136_s24 }
0x1054   :  { %2986 = vrot.lane.b32.xlu0 %v2970_v22, %s5137_s25  ;;  %v4720_v24 = vpop.f32.mrb[34].mxu1 }
0x1055   :  { %v2961_v28 = vpop.f32.mrb[35].mxu1 }
0x1056   :  { %v2971_v5 = vpack.c.bf16 %v4720_v24, %v2961_v28 }
0x1058   :  { %2998 = vrot.lane.b32.xlu0 %v2970_v22, %s5138_s26  ;;  %2976 = vrot.lane.b32.xlu1 %v2971_v5, %s5136_s24 }
0x105c   :  { %3010 = vrot.lane.b32.xlu0 %v2970_v22, %s5139_s27  ;;  %2988 = vrot.lane.b32.xlu1 %v2971_v5, %s5137_s25 }
0x1060   :  { %3000 = vrot.lane.b32.xlu1 %v2971_v5, %s5138_s26 }
0x1064   :  { %3012 = vrot.lane.b32.xlu1 %v2971_v5, %s5139_s27 }
0x1068   :  { %3291 = vperm.xlu1 %4928, %v6232_v3  }
0x106c   :  { %4930 = vset.pattern.permute.xlu1 %v5157_v14 }
0x10c2   :  { %v2975_v25 = vpop.permute.xlu0 %2974 }
0x10c3   :  { %v2979_v32 = vsel %vm6936_vm10, 0, %v2975_v25 }
0x10c4   :  { %v2984_v57 = vsel %vm5847_vm11, %v2979_v32, 0 }
0x10c5   :  { %3178 = vmatpush1.bf16.msra.mxu1 %v2984_v57 }
0x10c6   :  { %3179 = vmatprep.subr.bf16.mxu1 %v5130_v0  ;;  %v2987_v21 = vpop.permute.xlu0 %2986 }
0x10c7   :  { %v2991_v13 = vsel %vm6938_vm13, 0, %v2987_v21 }
0x10c8   :  { %v2996_v2 = vsel %vm5872_vm14, %v2991_v13, 0  ;;  %v3342_v13 = vld [vmem:[#allocation4 + $0xf8] sm:$0xff] }
0x10ca   :  { %v2977_v27 = vpop.permute.xlu1 %2976  ;;  %v2999_v63 = vpop.permute.xlu0 %2998 }
0x10cb   :  { %v2982_v34 = vsel %vm6937_vm12, 0, %v2977_v27 }
0x10cc   :  { %v2985_v7 = vsel %vm5847_vm11, %v2982_v34, 0  ;;  %vm6940_vm11 = vcmask 121856  }
0x10cd   :  { %3180 = vmatpush1.bf16.msra.mxu1 %v2985_v7  ;;  %v3003_v47 = vsel %vm6940_vm11, %v2999_v63, 0  ;;  %vm6941_vm5 = vmmov %vm6940_vm11 }
0x10ce   :  { %v2989_v48 = vpop.permute.xlu1 %2988  ;;  %3181 = vmatprep.subr.bf16.mxu1 %v5130_v0  ;;  %v3008_v11 = vsel %vm5906_vm0, %v3003_v47, 0  ;;  %v3011_v40 = vpop.permute.xlu0 %3010 }
0x10cf   :  { %v2994_v37 = vsel %vm6939_vm15, 0, %v2989_v48  ;;  %v3343_v48 = vld [vmem:[#allocation4 + $0x100] sm:$0xff] }
0x10d0   :  { %v2997_v42 = vsel %vm5872_vm14, %v2994_v37, 0  ;;  %vm6942_vm14 = vmmov %vm6932_vm9 }
0x10d1   :  { %3182 = vmatpush1.bf16.msra.mxu1 %v2996_v2  ;;  %v3015_v53 = vsel %vm6942_vm14, %v3011_v40, 0  ;;  %v4806_v2 = vpack.c.bf16 %v3343_v48, %v3342_v13 }
0x10d2   :  { %3183 = vmatprep.subr.bf16.mxu1 %v5130_v0  ;;  %v3001_v51 = vpop.permute.xlu1 %3000  ;;  %v3020_v62 = vsel %vm5921_vm8, %v3015_v53, 0 }
0x10d3   :  { %v3006_v1 = vsel %vm6941_vm5, %v3001_v51, 0  ;;  %4807 = vmatprep.subr.bf16.mxu0 %v4806_v2 }
0x10d4   :  { %v3009_v15 = vsel %vm5906_vm0, %v3006_v1, 0  ;;  %vm6943_vm0 = vmmov %vm6934_vm1  ;;  %4809 = vmatpush3.bf16.msra.mxu0 %v4806_v2 }
0x10d5   :  { %3184 = vmatpush1.bf16.msra.mxu1 %v2997_v42  ;;  %vm6946_vm1 = vmmov %vm6944_vm3  ;;  %3575 = vmatprep.subr.bf16.mxu0 %v5130_v0 }
0x10d6   :  { %3185 = vmatprep.subr.bf16.mxu1 %v5130_v0  ;;  %v3013_v61 = vpop.permute.xlu1 %3012  ;;  %vm6947_vm6 = vmmov %vm6946_vm1 }
0x10d7   :  { %v3018_v4 = vsel %vm6932_vm9, %v3013_v61, 0  ;;  %vm6948_vm10 = vmmov %vm6946_vm1 }
0x10d8   :  { %v3021_v38 = vsel %vm5921_vm8, %v3018_v4, 0  ;;  %vm6945_vm8 = vmmov %vm6944_vm3 }
0x10d9   :  { %3186 = vmatpush1.bf16.msra.mxu1 %v2970_v22  ;;  %vm6949_vm12 = vmmov %vm6946_vm1 }
0x10da   :  { %3187 = vmatprep.subr.bf16.mxu1 %v5130_v0  ;;  %vm6950_vm13 = vmmov %vm6946_vm1 }
0x10db   :  { %vm6951_vm15 = vmmov %vm6946_vm1 }
0x10dc   :  { %vm6952_vm5 = vmmov %vm6946_vm1 }
0x10dd   :  { %3188 = vmatpush1.bf16.msra.mxu1 %v2971_v5  ;;  %vm6953_vm9 = vmmov %vm6946_vm1 }
0x10de   :  { %3189 = vmatprep.subr.bf16.mxu1 %v5130_v0 }
0x10e1   :  { %3190 = vmatpush1.bf16.msra.mxu1 %v3008_v11 }
0x10e2   :  { %3191 = vmatprep.subr.bf16.mxu1 %v5130_v0 }
0x10e5   :  { %3192 = vmatpush1.bf16.msra.mxu1 %v3009_v15 }
0x10e6   :  { %3193 = vmatprep.subr.bf16.mxu1 %v5130_v0 }
0x10e9   :  { %3194 = vmatpush1.bf16.msra.mxu1 %v3020_v62 }
0x10ea   :  { %3195 = vmatprep.subr.bf16.mxu1 %v5130_v0 }
0x10ed   :  { %3196 = vmatpush1.bf16.msra.mxu1 %v3021_v38 }
0x10f0   :  { %3210 = vmatmul.mubr.bf16.vlgmr.msra.gmra.mrb[36].mxu1 %v4987_v39 }
0x10f1   :  { %4511 = vmatprep.mubr.msk.bf16.mxu1 %vm6943_vm0, %v4990_v20 }
0x10f8   :  { %3218 = vmatmul.mubr.bf16.gmra.mrb[40].mxu1 %v4992_v54 }
0x11c3   :  { %v6394_v33 = vpop.f32.mrb[36].mxu1 }
0x11c4   :  { %v3238_v45 = vmul.f32 %v6394_v33, %v6394_v33  ;;  %v3213_v35 = vpop.f32.mrb[37].mxu1  ;;  %v3226_v41 = vsel %vm6944_vm3, %v6394_v33, 0.0  ;;  %vm6954_vm3 = vmmov %vm6946_vm1 }
0x11c5   :  { %3227 = vadd.xlane.f32.xlu0 %v3226_v41  ;;  %v6400_v26 = vpop.f32.mrb[38].mxu1 }
0x11c6   :  { %v3216_v43 = vpop.f32.mrb[39].mxu1  ;;  %v3229_v22 = vsel %vm6945_vm8, %v6400_v26, 0.0  ;;  %v3239_v24 = vmul.f32 %v6400_v26, %v6400_v26  ;;  %v3242_v28 = vsel %vm6946_vm1, %v3238_v45, 0.0  ;;  %vm6955_vm1 = vcmask 15360  }
0x11c7   :  { %3230 = vadd.xlane.f32.xlu1 %v3229_v22 }
0x11c8   :  { %v3245_v17 = vsel %vm6947_vm6, %v3239_v24, 0.0  ;;  %vm6956_vm6 = vmmov %vm6955_vm1 }
0x11c9   :  { %3243 = vadd.xlane.f32.xlu0 %v3242_v28 }
0x11cb   :  { %v6407_v5 = vpop.f32.mrb[40].mxu1 }
0x11cc   :  { %v3240_v8 = vmul.f32 %v6407_v5, %v6407_v5  ;;  %v3221_v29 = vpop.f32.mrb[41].mxu1  ;;  %v3232_v25 = vsel %vm6948_vm10, %v6407_v5, 0.0  ;;  %vm6957_vm10 = vmmov %vm6954_vm3 }
0x11cd   :  { %3246 = vadd.xlane.f32.xlu0 %v3245_v17  ;;  %3233 = vadd.xlane.f32.xlu1 %v3232_v25  ;;  %v6414_v32 = vpop.f32.mrb[42].mxu1 }
0x11ce   :  { %v3224_v57 = vpop.f32.mrb[43].mxu1  ;;  %v3241_v21 = vmul.f32 %v6414_v32, %v6414_v32  ;;  %v3248_v27 = vsel %vm6949_vm12, %v3240_v8, 0.0  ;;  %v3235_v34 = vsel %vm6950_vm13, %v6414_v32, 0.0  ;;  %vm6958_vm12 = vcmask 7168  }
0x11cf   :  { %vm6959_vm13 = vmmov %vm6958_vm12 }
0x11d0   :  { %v3251_v7 = vsel %vm6951_vm15, %v3241_v21, 0.0  ;;  %vm6960_vm15 = vcmask 252928  }
0x11d1   :  { %3249 = vadd.xlane.f32.xlu1 %v3248_v27  ;;  %3236 = vadd.xlane.f32.xlu0 %v3235_v34 }
0x11d5   :  { %3252 = vadd.xlane.f32.xlu0 %v3251_v7 }
0x11e2   :  { %3311 = vperm.xlu1 %4930, %v6232_v3   ;;  %v3292_v3 = vpop.permute.xlu1 %3291 }
0x11e6   :  { %3315 = vperm.xlu1 %4930, %v6267_v10  }
0x11ea   :  { %4931 = vset.pattern.permute.xlu1 %v5156_v60 }
0x11eb   :  { %3299 = vperm.xlu1 %4931, %v6273_v9   ;;  %3295 = vperm.xlu0 %4929, %v6267_v10  }
0x11ef   :  { %3303 = vperm.xlu1 %4931, %v6280_v31   ;;  %3501 = vrot.lane.b32.xlu0 %v5741_v30, %s5136_s24 }
0x11f3   :  { %4932 = vset.pattern.permute.xlu1 %v5157_v14  ;;  %3513 = vrot.lane.b32.xlu0 %v5741_v30, %s5137_s25 }
0x11f4   :  { %3319 = vperm.xlu1 %4932, %v6273_v9  }
0x11f7   :  { %3525 = vrot.lane.b32.xlu0 %v5741_v30, %s5138_s26 }
0x11f8   :  { %3323 = vperm.xlu1 %4932, %v6280_v31  }
0x11fb   :  { %3537 = vrot.lane.b32.xlu0 %v5741_v30, %s5139_s27 }
0x11fc   :  { %3499 = vrot.lane.b32.xlu1 %v5735_v36, %s5136_s24 }
0x1200   :  { %3511 = vrot.lane.b32.xlu1 %v5735_v36, %s5137_s25 }
0x1204   :  { %3523 = vrot.lane.b32.xlu1 %v5735_v36, %s5138_s26 }
0x1208   :  { %3535 = vrot.lane.b32.xlu1 %v5735_v36, %s5139_s27 }
0x1252   :  { %v3228_v60 = vpop.xlane.xlu0 %3227 }
0x1253   :  { %v3254_v37 = vmul.f32 0.0625, %v3228_v60 }
0x1254   :  { %v3231_v42 = vpop.xlane.xlu1 %3230 }
0x1255   :  { %v3262_v63 = vmul.f32 %v3254_v37, %v3254_v37  ;;  %v3255_v47 = vmul.f32 0.0625, %v3231_v42  ;;  %v3274_v27 = vsub.f32 %v6394_v33, %v3254_v37 }
0x1256   :  { %v3244_v31 = vpop.xlane.xlu0 %3243 }
0x1257   :  { %v3258_v51 = vmul.f32 0.0625, %v3244_v31  ;;  %v3263_v15 = vmul.f32 %v3255_v47, %v3255_v47  ;;  %v3275_v2 = vsub.f32 %v6400_v26, %v3255_v47 }
0x1259   :  { %v3266_v11 = vsub.f32 %v3258_v51, %v3262_v63 }
0x125a   :  { %v3247_v1 = vpop.xlane.xlu0 %3246  ;;  %v3234_v40 = vpop.xlane.xlu1 %3233 }
0x125b   :  { %v3270_v53 = vmax.f32 %v3266_v11, 0.0  ;;  %v3259_v61 = vmul.f32 0.0625, %v3247_v1  ;;  %v3256_v62 = vmul.f32 0.0625, %v3234_v40 }
0x125d   :  { %v3278_v4 = vadd.f32 1e-05, %v3270_v53  ;;  %v3267_v38 = vsub.f32 %v3259_v61, %v3263_v15  ;;  %v3264_v39 = vmul.f32 %v3256_v62, %v3256_v62  ;;  %v3276_v1 = vsub.f32 %v6407_v5, %v3256_v62 }
0x125e   :  { %v3250_v20 = vpop.xlane.xlu1 %3249  ;;  %v3237_v54 = vpop.xlane.xlu0 %3236 }
0x125f   :  { %5043 = vrsqrt.f32 %v3278_v4  ;;  %v3271_v14 = vmax.f32 %v3267_v38, 0.0  ;;  %v3260_v45 = vmul.f32 0.0625, %v3250_v20  ;;  %v3257_v35 = vmul.f32 0.0625, %v3237_v54 }
0x1261   :  { %v3279_v41 = vadd.f32 1e-05, %v3271_v14  ;;  %v3268_v43 = vsub.f32 %v3260_v45, %v3264_v39  ;;  %v3265_v8 = vmul.f32 %v3257_v35, %v3257_v35  ;;  %v3277_v26 = vsub.f32 %v6414_v32, %v3257_v35 }
0x1262   :  { %v3312_v22 = vpop.permute.xlu1 %3311  ;;  %v3253_v24 = vpop.xlane.xlu0 %3252 }
0x1263   :  { %5045 = vrsqrt.f32 %v3279_v41  ;;  %v3272_v28 = vmax.f32 %v3268_v43, 0.0  ;;  %v3261_v29 = vmul.f32 0.0625, %v3253_v24 }
0x1265   :  { %v3280_v17 = vadd.f32 1e-05, %v3272_v28  ;;  %v3269_v25 = vsub.f32 %v3261_v29, %v3265_v8 }
0x1266   :  { %v3316_v57 = vpop.permute.xlu1 %3315 }
0x1267   :  { %5047 = vrsqrt.f32 %v3280_v17  ;;  %v3273_v21 = vmax.f32 %v3269_v25, 0.0 }
0x1269   :  { %v5044_v34 = vpop.eup %5043  ;;  %v3281_v7 = vadd.f32 1e-05, %v3273_v21 }
0x126a   :  { %v3286_v13 = vmul.f32 %v5044_v34, %v3274_v27  ;;  %v3300_v48 = vpop.permute.xlu1 %3299  ;;  %v3296_v11 = vpop.permute.xlu0 %3295 }
0x126b   :  { %5049 = vrsqrt.f32 %v3281_v7 }
0x126c   :  { %v3306_v60 = vmul.f32 %v3292_v3, %v3286_v13 }
0x126d   :  { %v5046_v42 = vpop.eup %5045 }
0x126e   :  { %v3326_v31 = vadd.f32 %v3312_v22, %v3306_v60  ;;  %v3287_v63 = vmul.f32 %v5046_v42, %v3275_v2  ;;  %v3304_v51 = vpop.permute.xlu1 %3303  ;;  %v3502_v43 = vpop.permute.xlu0 %3501 }
0x126f   :  { %v3507_v28 = vsel %vm6956_vm6, 0, %v3502_v43  ;;  %vm6968_vm6 = vmmov %vm6955_vm1 }
0x1270   :  { %vm3330_vm11 = vcmp.ge.f32.partialorder %v3326_v31, 0.0  ;;  %v3334_v40 = vmul.f32 0.1, %v3326_v31  ;;  %v3307_v15 = vmul.f32 %v3296_v11, %v3287_v63  ;;  %v3510_v17 = vsel %vm5617_vm7, %v3507_v28, 0 }
0x1271   :  { %v5048_v53 = vpop.eup %5047 }
0x1272   :  { %v3288_v33 = vmul.f32 %v5048_v53, %v3276_v1  ;;  %v3327_v37 = vadd.f32 %v3316_v57, %v3307_v15  ;;  %v3338_v61 = vsel %vm3330_vm11, %v3326_v31, %v3334_v40  ;;  %v3514_v57 = vpop.permute.xlu0 %3513  ;;  %vm6961_vm11 = vmmov %vm6960_vm15  ;;  %v4995_v1 = vld [vmem:[#allocation2 + $0x1c4] ss:$16 sps:$4 sm:$0xff]   ;;  %v4993_v40 = vld [vmem:[#allocation2 + $0x1c0] ss:$16 sps:$4 sm:$0xff]  }
0x1273   :  { %4725 = vmatprep.mubr.msk.f32.mxu0 %vm6952_vm5, %v3338_v61  ;;  %v3320_v4 = vpop.permute.xlu1 %3319  ;;  %v3519_v27 = vsel %vm6959_vm13, 0, %v3514_v57  ;;  %vm6962_vm5 = vcmask 244736  }
0x1274   :  { %v3308_v3 = vmul.f32 %v3300_v48, %v3288_v33  ;;  %vm3331_vm14 = vcmp.ge.f32.partialorder %v3327_v37, 0.0  ;;  %v3335_v47 = vmul.f32 0.1, %v3327_v37  ;;  %v3522_v34 = vsel %vm5627_vm4, %v3519_v27, 0 }
0x1275   :  { %v5050_v38 = vpop.eup %5049 }
0x1276   :  { %v3339_v39 = vsel %vm3331_vm14, %v3327_v37, %v3335_v47  ;;  %v3289_v20 = vmul.f32 %v5050_v38, %v3277_v26  ;;  %v3328_v54 = vadd.f32 %v3320_v4, %v3308_v3  ;;  %v3526_v48 = vpop.permute.xlu0 %3525  ;;  %vm6963_vm14 = vnez %v6845_v23  ;;  %v4996_v26 = vld [vmem:[#allocation2 + $0x1e4] ss:$16 sps:$4 sm:$0xff]   ;;  %v4998_v3 = vld [vmem:[#allocation2 + $0x1e0] ss:$16 sps:$4 sm:$0xff]  }
0x1277   :  { %v3324_v5 = vpop.permute.xlu1 %3323  ;;  %4726 = vmatmul.mubr.msk.f32.vlgmr.msra.gmra.mrb[32].mxu0 %vm6953_vm9, %v3339_v39  ;;  %v3531_v60 = vsel %vm6961_vm11, %v3526_v48, 0  ;;  %vm6964_vm9 = vmmov %vm6962_vm5  ;;  %v5001_v47 = vld [vmem:[#allocation2 + $0x184] ss:$16 sps:$4 sm:$0xff]  }
0x1278   :  { %v3309_v62 = vmul.f32 %v3304_v51, %v3289_v20  ;;  %vm3332_vm0 = vcmp.ge.f32.partialorder %v3328_v54, 0.0  ;;  %v3336_v14 = vmul.f32 0.1, %v3328_v54 }
0x127a   :  { %v3329_v45 = vadd.f32 %v3324_v5, %v3309_v62  ;;  %v3340_v41 = vsel %vm3332_vm0, %v3328_v54, %v3336_v14  ;;  %v3538_v63 = vpop.permute.xlu0 %3537  ;;  %vm6965_vm0 = vcmask 261120  }
0x127b   :  { %v3500_v22 = vpop.permute.xlu1 %3499  ;;  %4728 = vmatprep.mubr.msk.f32.mxu0 %vm6954_vm3, %v3340_v41  ;;  %v3543_v51 = vsel %vm6964_vm9, %v3538_v63, 0  ;;  %vm6966_vm3 = vmmov %vm6965_vm0 }
0x127c   :  { %vm3333_vm8 = vcmp.ge.f32.partialorder %v3329_v45, 0.0  ;;  %v3337_v32 = vmul.f32 0.1, %v3329_v45  ;;  %v3504_v35 = vsel %vm6955_vm1, 0, %v3500_v22  ;;  %v3546_v11 = vsel %vm6963_vm14, %v3543_v51, 0  ;;  %vm6979_vm9 = vmmov %vm6965_vm0 }
0x127d   :  { %v3509_v24 = vsel %vm5617_vm7, %v3504_v35, 0 }
0x127e   :  { %3576 = vmatpush1.bf16.msra.mxu0 %v3509_v24  ;;  %v3341_v8 = vsel %vm3333_vm8, %v3329_v45, %v3337_v32  ;;  %vm6967_vm8 = vmmov %vm6965_vm0 }
0x127f   :  { %v3512_v29 = vpop.permute.xlu1 %3511  ;;  %4729 = vmatmul.mubr.msk.f32.gmra.mrb[34].mxu0 %vm6957_vm10, %v3341_v8  ;;  %3577 = vmatprep.subr.bf16.mxu0 %v5130_v0  ;;  %vm6969_vm10 = vmmov %vm6958_vm12 }
0x1280   :  { %v3516_v25 = vsel %vm6958_vm12, 0, %v3512_v29  ;;  %4520 = vmatprep.mubr.msk.bf16.mxu0 %vm6965_vm0, %v4995_v1  ;;  %vm6970_vm12 = vmmov %vm6969_vm10 }
0x1281   :  { %v3521_v21 = vsel %vm5627_vm4, %v3516_v25, 0 }
0x1282   :  { %3578 = vmatpush1.bf16.msra.mxu0 %v3510_v17 }
0x1283   :  { %3579 = vmatprep.subr.bf16.mxu0 %v5130_v0  ;;  %v3524_v7 = vpop.permute.xlu1 %3523 }
0x1284   :  { %v3528_v13 = vsel %vm6960_vm15, %v3524_v7, 0  ;;  %v5004_v7 = vld [vmem:[#allocation2 + $0x1a0] ss:$16 sps:$4 sm:$0xff]  }
0x1285   :  { %v3533_v2 = vsel %vm5641_vm2, %v3528_v13, 0  ;;  %v5158_v13 = vmov 12  }
0x1286   :  { %3580 = vmatpush1.bf16.msra.mxu0 %v3521_v21  ;;  %4934 = vset.pattern.permute.xlu1 %v5158_v13 }
0x1287   :  { %3581 = vmatprep.subr.bf16.mxu0 %v5130_v0  ;;  %v3536_v42 = vpop.permute.xlu1 %3535  ;;  %4933 = vset.pattern.permute.xlu0 %v5158_v13 }
0x1288   :  { %v3540_v31 = vsel %vm6962_vm5, %v3536_v42, 0 }
0x128a   :  { %3582 = vmatpush1.bf16.msra.mxu0 %v3522_v34  ;;  %v4999_v34 = vld [vmem:[#allocation2 + $0x180] ss:$16 sps:$4 sm:$0xff]  }
0x128b   :  { %3583 = vmatprep.subr.bf16.mxu0 %v5130_v0 }
0x128e   :  { %3584 = vmatpush1.bf16.msra.mxu0 %v5735_v36  ;;  %v3534_v36 = vsel %vm5641_vm2, %v3531_v60, 0 }
0x128f   :  { %3585 = vmatprep.subr.bf16.mxu0 %v5130_v0 }
0x1292   :  { %3586 = vmatpush1.bf16.msra.mxu0 %v5741_v30  ;;  %v3545_v30 = vsel %vm6963_vm14, %v3540_v31, 0 }
0x1293   :  { %3587 = vmatprep.subr.bf16.mxu0 %v5130_v0 }
0x1296   :  { %3588 = vmatpush1.bf16.msra.mxu0 %v3533_v2 }
0x1297   :  { %3589 = vmatprep.subr.bf16.mxu0 %v5130_v0 }
0x129a   :  { %3590 = vmatpush1.bf16.msra.mxu0 %v3534_v36 }
0x129b   :  { %3591 = vmatprep.subr.bf16.mxu0 %v5130_v0 }
0x129e   :  { %3592 = vmatpush1.bf16.msra.mxu0 %v3545_v30 }
0x129f   :  { %3593 = vmatprep.subr.bf16.mxu0 %v5130_v0 }
0x12a2   :  { %3594 = vmatpush1.bf16.msra.mxu0 %v3546_v11 }
0x12a3   :  { %3648 = vmatprep.subr.bf16.mxu0 %v5130_v0 }
0x12a5   :  { %3608 = vmatmul.mubr.bf16.vlgmr.msra.gmra.mrb[36].mxu0 %v4993_v40 }
0x12a6   :  { %4521 = vmatprep.mubr.msk.bf16.mxu0 %vm6966_vm3, %v4996_v26  ;;  %vm6980_vm3 = vmmov %vm6965_vm0  ;;  %v5071_v26 = vld [vmem:[%s6758_s2] sm:$0xff] }
0x12ad   :  { %3616 = vmatmul.mubr.bf16.gmra.mrb[40].mxu0 %v4998_v3  ;;  %v3813_v3 = vld [vmem:[#allocation4 + $0x108] sm:$0xff] }
0x12ae   :  { %4526 = vmatprep.mubr.msk.bf16.mxu0 %vm6967_vm8, %v5001_v47  ;;  %vm6981_vm8 = vmmov %vm6965_vm0  ;;  %v3814_v47 = vld [vmem:[#allocation4 + $0x110] sm:$0xff] }
0x134a   :  { %v4727_v15 = vpop.f32.mrb[32].mxu0 }
0x134b   :  { %v3422_v53 = vpop.f32.mrb[33].mxu0 }
0x134c   :  { %v3441_v33 = vpack.c.bf16 %v4727_v15, %v3422_v53 }
0x134e   :  { %3445 = vrot.lane.b32.xlu1 %v3441_v33, %s5136_s24 }
0x1352   :  { %3457 = vrot.lane.b32.xlu1 %v3441_v33, %s5137_s25  ;;  %v4730_v37 = vpop.f32.mrb[34].mxu0 }
0x1353   :  { %v3432_v61 = vpop.f32.mrb[35].mxu0 }
0x1354   :  { %v3442_v4 = vpack.c.bf16 %v4730_v37, %v3432_v61 }
0x1356   :  { %3469 = vrot.lane.b32.xlu1 %v3441_v33, %s5138_s26  ;;  %3447 = vrot.lane.b32.xlu0 %v3442_v4, %s5136_s24 }
0x135a   :  { %3481 = vrot.lane.b32.xlu1 %v3441_v33, %s5139_s27  ;;  %3459 = vrot.lane.b32.xlu0 %v3442_v4, %s5137_s25 }
0x135e   :  { %3471 = vrot.lane.b32.xlu0 %v3442_v4, %s5138_s26 }
0x1362   :  { %3483 = vrot.lane.b32.xlu0 %v3442_v4, %s5139_s27 }
0x13c0   :  { %v3446_v38 = vpop.permute.xlu1 %3445 }
0x13c1   :  { %v3450_v39 = vsel %vm6955_vm1, 0, %v3446_v38  ;;  %v4810_v38 = vpack.c.bf16 %v3814_v47, %v3813_v3  ;;  %vm6982_vm1 = vmmov %vm6965_vm0 }
0x13c2   :  { %v3455_v20 = vsel %vm5617_vm7, %v3450_v39, 0  ;;  %v3815_v39 = vld [vmem:[#allocation4 + $0x118] sm:$0xff] }
0x13c3   :  { %3649 = vmatpush1.bf16.msra.mxu0 %v3455_v20  ;;  %4811 = vmatprep.subr.bf16.mxu1 %v4810_v38  ;;  %v3816_v20 = vld [vmem:[#allocation4 + $0x120] sm:$0xff] }
0x13c4   :  { %3650 = vmatprep.subr.bf16.mxu0 %v5130_v0  ;;  %v3458_v54 = vpop.permute.xlu1 %3457  ;;  %4813 = vmatpush3.bf16.msra.mxu1 %v4810_v38 }
0x13c5   :  { %v3462_v45 = vsel %vm6969_vm10, 0, %v3458_v54  ;;  %v4814_v54 = vpack.c.bf16 %v3816_v20, %v3815_v39 }
0x13c6   :  { %v3467_v43 = vsel %vm5627_vm4, %v3462_v45, 0 }
0x13c7   :  { %4815 = vmatprep.subr.bf16.mxu1 %v4814_v54 }
0x13c8   :  { %v3448_v5 = vpop.permute.xlu0 %3447  ;;  %v3470_v50 = vpop.permute.xlu1 %3469  ;;  %4817 = vmatpush3.bf16.msra.mxu1 %v4814_v54 }
0x13c9   :  { %v3453_v62 = vsel %vm6968_vm6, 0, %v3448_v5  ;;  %4745 = vmatprep.subr.bf16.mxu1 %v5146_v55 }
0x13ca   :  { %v3456_v14 = vsel %vm5617_vm7, %v3453_v62, 0  ;;  %vm6971_vm7 = vmmov %vm6961_vm11 }
0x13cb   :  { %3651 = vmatpush1.bf16.msra.mxu0 %v3456_v14  ;;  %v3474_v35 = vsel %vm6971_vm7, %v3470_v50, 0  ;;  %vm6972_vm13 = vmmov %vm6971_vm7 }
0x13cc   :  { %v3460_v41 = vpop.permute.xlu0 %3459  ;;  %3652 = vmatprep.subr.bf16.mxu0 %v5130_v0  ;;  %v3479_v28 = vsel %vm5641_vm2, %v3474_v35, 0  ;;  %v3482_v56 = vpop.permute.xlu1 %3481  ;;  %vm6976_vm11 = vmmov %vm6965_vm0 }
0x13cd   :  { %v3465_v22 = vsel %vm6970_vm12, 0, %v3460_v41  ;;  %vm6983_vm12 = vmmov %vm6965_vm0 }
0x13ce   :  { %v3468_v32 = vsel %vm5627_vm4, %v3465_v22, 0  ;;  %vm6973_vm4 = vmmov %vm6962_vm5 }
0x13cf   :  { %3653 = vmatpush1.bf16.msra.mxu0 %v3467_v43  ;;  %v3486_v17 = vsel %vm6973_vm4, %v3482_v56, 0  ;;  %vm6974_vm15 = vmmov %vm6973_vm4 }
0x13d0   :  { %3654 = vmatprep.subr.bf16.mxu0 %v5130_v0  ;;  %v3472_v24 = vpop.permute.xlu0 %3471  ;;  %v3491_v57 = vsel %vm6963_vm14, %v3486_v17, 0  ;;  %vm6977_vm5 = vmmov %vm6965_vm0 }
0x13d1   :  { %v3477_v8 = vsel %vm6972_vm13, %v3472_v24, 0  ;;  %vm6984_vm7 = vmmov %vm6965_vm0 }
0x13d2   :  { %v3480_v29 = vsel %vm5641_vm2, %v3477_v8, 0  ;;  %vm6975_vm2 = vmmov %vm6965_vm0 }
0x13d3   :  { %3655 = vmatpush1.bf16.msra.mxu0 %v3468_v32  ;;  %vm6985_vm4 = vmmov %vm6965_vm0 }
0x13d4   :  { %3656 = vmatprep.subr.bf16.mxu0 %v5130_v0  ;;  %v3484_v25 = vpop.permute.xlu0 %3483 }
0x13d5   :  { %v3489_v21 = vsel %vm6974_vm15, %v3484_v25, 0  ;;  %vm6986_vm15 = vcmask 15360  }
0x13d6   :  { %v3492_v27 = vsel %vm6963_vm14, %v3489_v21, 0  ;;  %vm6978_vm14 = vmmov %vm6965_vm0 }
0x13d7   :  { %3657 = vmatpush1.bf16.msra.mxu0 %v3441_v33 }
0x13d8   :  { %3658 = vmatprep.subr.bf16.mxu0 %v5130_v0 }
0x13db   :  { %3659 = vmatpush1.bf16.msra.mxu0 %v3442_v4  ;;  %v5159_v4 = vmov 13  }
0x13dc   :  { %3660 = vmatprep.subr.bf16.mxu0 %v5130_v0 }
0x13df   :  { %3661 = vmatpush1.bf16.msra.mxu0 %v3479_v28 }
0x13e0   :  { %3662 = vmatprep.subr.bf16.mxu0 %v5130_v0 }
0x13e3   :  { %3663 = vmatpush1.bf16.msra.mxu0 %v3480_v29 }
0x13e4   :  { %3664 = vmatprep.subr.bf16.mxu0 %v5130_v0 }
0x13e7   :  { %3665 = vmatpush1.bf16.msra.mxu0 %v3491_v57 }
0x13e8   :  { %3666 = vmatprep.subr.bf16.mxu0 %v5130_v0 }
0x13eb   :  { %3667 = vmatpush1.bf16.msra.mxu0 %v3492_v27 }
0x13ee   :  { %3681 = vmatmul.mubr.bf16.vlgmr.msra.gmra.mrb[36].mxu0 %v4999_v34 }
0x13ef   :  { %4527 = vmatprep.mubr.msk.bf16.mxu0 %vm6975_vm2, %v5002_v18  ;;  %vm6987_vm2 = vnez %v6820_v49 }
0x13f6   :  { %3689 = vmatmul.mubr.bf16.gmra.mrb[40].mxu0 %v5004_v7 }
0x14c1   :  { %v6536_v48 = vpop.f32.mrb[36].mxu0 }
0x14c2   :  { %v3684_v2 = vpop.f32.mrb[37].mxu0  ;;  %v3697_v60 = vsel %vm6976_vm11, %v6536_v48, 0.0  ;;  %v3709_v42 = vmul.f32 %v6536_v48, %v6536_v48  ;;  %vm6988_vm11 = vcmask 7168  }
0x14c3   :  { %3698 = vadd.xlane.f32.xlu1 %v3697_v60  ;;  %v6540_v23 = vpop.f32.mrb[38].mxu0 }
0x14c4   :  { %v3710_v36 = vmul.f32 %v6540_v23, %v6540_v23  ;;  %v3687_v31 = vpop.f32.mrb[39].mxu0  ;;  %v3700_v63 = vsel %vm6977_vm5, %v6540_v23, 0.0  ;;  %v3713_v51 = vsel %vm6979_vm9, %v3709_v42, 0.0  ;;  %vm6989_vm5 = vnez %v6823_v59 }
0x14c5   :  { %3701 = vadd.xlane.f32.xlu0 %v3700_v63  ;;  %vm6991_vm9 = vnez %v6826_v12  ;;  %v5160_v12 = vmov 14  }
0x14c6   :  { %v3716_v30 = vsel %vm6978_vm14, %v3710_v36, 0.0  ;;  %vm6990_vm14 = vcmask 515072  }
0x14c7   :  { %3717 = vadd.xlane.f32.xlu1 %v3716_v30 }
0x14c9   :  { %3714 = vadd.xlane.f32.xlu0 %v3713_v51  ;;  %v6550_v11 = vpop.f32.mrb[40].mxu0 }
0x14ca   :  { %v3692_v1 = vpop.f32.mrb[41].mxu0  ;;  %v3711_v15 = vmul.f32 %v6550_v11, %v6550_v11  ;;  %v3703_v33 = vsel %vm6965_vm0, %v6550_v11, 0.0  ;;  %vm6992_vm0 = vcmask 506880  }
0x14cb   :  { %v6552_v40 = vpop.f32.mrb[42].mxu0 }
0x14cc   :  { %v3695_v53 = vpop.f32.mrb[43].mxu0  ;;  %v3706_v37 = vsel %vm6980_vm3, %v6552_v40, 0.0  ;;  %v3719_v61 = vsel %vm6981_vm8, %v3711_v15, 0.0  ;;  %v3712_v5 = vmul.f32 %v6552_v40, %v6552_v40  ;;  %vm6993_vm3 = vnez %v6828_v19 }
0x14cd   :  { %3704 = vadd.xlane.f32.xlu0 %v3703_v33  ;;  %3707 = vadd.xlane.f32.xlu1 %v3706_v37 }
0x14ce   :  { %v3722_v62 = vsel %vm6982_vm1, %v3712_v5, 0.0 }
0x14d1   :  { %3720 = vadd.xlane.f32.xlu0 %v3719_v61 }
0x14de   :  { %3766 = vperm.xlu1 %4934, %v6267_v10  }
0x14e2   :  { %4935 = vset.pattern.permute.xlu1 %v5159_v4 }
0x14e3   :  { %3782 = vperm.xlu1 %4935, %v5071_v26  }
0x14e7   :  { %3762 = vperm.xlu0 %4933, %v5071_v26   ;;  %3786 = vperm.xlu1 %4935, %v6267_v10   ;;  %v5072_v10 = vld [vmem:[%s6758_s2 + $0x18] sm:$0xff] }
0x14eb   :  { %3975 = vrot.lane.b32.xlu0 %v5548_v46, %s5137_s25  ;;  %4936 = vset.pattern.permute.xlu1 %v5158_v13 }
0x14ec   :  { %3770 = vperm.xlu1 %4936, %v6273_v9   ;;  %v5073_v9 = vld [vmem:[%s6758_s2 + $0x10] sm:$0xff]  ;;  %4938 = vset.pattern.permute.xlu0 %v5160_v12 }
0x14ef   :  { %3987 = vrot.lane.b32.xlu0 %v5548_v46, %s5139_s27 }
0x14f0   :  { %3774 = vperm.xlu1 %4936, %v5072_v10  }
0x14f4   :  { %4937 = vset.pattern.permute.xlu1 %v5159_v4 }
0x14f5   :  { %3790 = vperm.xlu1 %4937, %v5073_v9  }
0x1519   :  { %3723 = vadd.xlane.f32.xlu1 %v3722_v62 }
0x152a   :  { %3794 = vperm.xlu1 %4937, %v5072_v10  }
0x152e   :  { %3969 = vrot.lane.b32.xlu1 %v5548_v46, %s5136_s24 }
0x152f   :  { %4939 = vset.pattern.permute.xlu1 %v5160_v12 }
0x1532   :  { %3981 = vrot.lane.b32.xlu1 %v5548_v46, %s5138_s26 }
0x1550   :  { %v3699_v14 = vpop.xlane.xlu1 %3698 }
0x1551   :  { %v3725_v41 = vmul.f32 0.03125, %v3699_v14 }
0x1552   :  { %v3702_v45 = vpop.xlane.xlu0 %3701 }
0x1553   :  { %v3726_v43 = vmul.f32 0.03125, %v3702_v45  ;;  %v3733_v24 = vmul.f32 %v3725_v41, %v3725_v41  ;;  %v3745_v53 = vsub.f32 %v6536_v48, %v3725_v41 }
0x1554   :  { %v3718_v22 = vpop.xlane.xlu1 %3717 }
0x1555   :  { %v3734_v32 = vmul.f32 %v3726_v43, %v3726_v43  ;;  %v3730_v50 = vmul.f32 0.03125, %v3718_v22  ;;  %v3746_v51 = vsub.f32 %v6540_v23, %v3726_v43 }
0x1556   :  { %v3715_v35 = vpop.xlane.xlu0 %3714 }
0x1557   :  { %v3738_v28 = vsub.f32 %v3730_v50, %v3734_v32  ;;  %v3729_v8 = vmul.f32 0.03125, %v3715_v35 }
0x1559   :  { %v3742_v56 = vmax.f32 %v3738_v28, 0.0  ;;  %v3737_v29 = vsub.f32 %v3729_v8, %v3733_v24 }
0x155a   :  { %v3705_v17 = vpop.xlane.xlu0 %3704  ;;  %v3708_v25 = vpop.xlane.xlu1 %3707 }
0x155b   :  { %v3750_v57 = vadd.f32 1e-05, %v3742_v56  ;;  %v3741_v21 = vmax.f32 %v3737_v29, 0.0  ;;  %v3727_v27 = vmul.f32 0.03125, %v3705_v17  ;;  %v6585_v34 = vmul.f32 0.03125, %v3708_v25 }
0x155d   :  { %5051 = vrsqrt.f32 %v3750_v57  ;;  %v3749_v18 = vadd.f32 1e-05, %v3741_v21  ;;  %v3748_v7 = vsub.f32 %v6552_v40, %v6585_v34  ;;  %v3735_v60 = vmul.f32 %v3727_v27, %v3727_v27 }
0x155e   :  { %v3721_v13 = vpop.xlane.xlu0 %3720  ;;  %v3767_v2 = vpop.permute.xlu1 %3766  ;;  %v3747_v10 = vsub.f32 %v6550_v11, %v3727_v27  ;;  %v3736_v32 = vmul.f32 %v6585_v34, %v6585_v34  ;;  %v5005_v34 = vld [vmem:[#allocation2 + $0x220] ss:$16 sps:$4 sm:$0xff]  }
0x155f   :  { %5053 = vrsqrt.f32 %v3749_v18  ;;  %v3731_v42 = vmul.f32 0.03125, %v3721_v13 }
0x1561   :  { %v3739_v36 = vsub.f32 %v3731_v42, %v3735_v60 }
0x1562   :  { %v3783_v31 = vpop.permute.xlu1 %3782 }
0x1563   :  { %v3743_v63 = vmax.f32 %v3739_v36, 0.0 }
0x1565   :  { %v3751_v30 = vadd.f32 1e-05, %v3743_v63 }
0x1566   :  { %v3787_v1 = vpop.permute.xlu1 %3786  ;;  %v3763_v26 = vpop.permute.xlu0 %3762 }
0x1567   :  { %v5052_v15 = vpop.eup %5051  ;;  %5055 = vrsqrt.f32 %v3751_v30 }
0x1568   :  { %v3758_v33 = vmul.f32 %v5052_v15, %v3746_v51 }
0x1569   :  { %v5054_v37 = vpop.eup %5053 }
0x156a   :  { %v3778_v61 = vmul.f32 %v3767_v2, %v3758_v33  ;;  %v3757_v4 = vmul.f32 %v5054_v37, %v3745_v53  ;;  %v3976_v56 = vpop.permute.xlu0 %3975  ;;  %v5006_v37 = vld [vmem:[#allocation2 + $0x204] ss:$16 sps:$4 sm:$0xff]  }
0x156b   :  { %v3771_v3 = vpop.permute.xlu1 %3770  ;;  %v3978_v57 = vsel %vm6988_vm11, 0, %v3976_v56 }
0x156c   :  { %v3777_v47 = vmul.f32 %v3763_v26, %v3757_v4  ;;  %v3798_v38 = vadd.f32 %v3787_v1, %v3778_v61  ;;  %v3980_v21 = vsel %vm6989_vm5, %v3978_v57, 0  ;;  %v6676_v57 = vld [vmem:[%s6758_s2] sm:$0xff] }
0x156e   :  { %v3797_v39 = vadd.f32 %v3783_v31, %v3777_v47  ;;  %v3806_v20 = vmul.f32 0.1, %v3798_v38  ;;  %vm3802_vm6 = vcmp.ge.f32.partialorder %v3798_v38, 0.0  ;;  %v3988_v2 = vpop.permute.xlu0 %3987 }
0x156f   :  { %v3775_v54 = vpop.permute.xlu1 %3774  ;;  %v3990_v31 = vsel %vm6992_vm0, %v3988_v2, 0 }
0x1570   :  { %v3805_v9 = vmul.f32 0.1, %v3797_v39  ;;  %vm3801_vm10 = vcmp.ge.f32.partialorder %v3797_v39, 0.0  ;;  %v3810_v48 = vsel %vm3802_vm6, %v3798_v38, %v3806_v20  ;;  %vm6994_vm6 = vmmov 0  }
0x1571   :  { %v5056_v23 = vpop.eup %5055 }
0x1572   :  { %v3759_v5 = vmul.f32 %v5056_v23, %v3747_v10  ;;  %v3809_v62 = vsel %vm3801_vm10, %v3797_v39, %v3805_v9  ;;  %vm4000_vm10 = vcmask 654336  }
0x1573   :  { %4739 = vmatprep.mubr.msk.f32.mxu1 %vm6983_vm12, %v3809_v62  ;;  %vm6995_vm12 = vmmov %vm6982_vm1 }
0x1574   :  { %v3779_v14 = vmul.f32 %v3771_v3, %v3759_v5  ;;  %4740 = vmatmul.mubr.msk.f32.vlgmr.msra.gmra.mrb[44].mxu1 %vm6984_vm7, %v3810_v48  ;;  %v3791_v45 = vpop.permute.xlu1 %3790  ;;  %vm6996_vm7 = vmmov %vm6986_vm15 }
0x1576   :  { %v3799_v41 = vadd.f32 %v3791_v45, %v3779_v14 }
0x1578   :  { %vm3803_vm13 = vcmp.ge.f32.partialorder %v3799_v41, 0.0  ;;  %v3807_v43 = vmul.f32 0.1, %v3799_v41 }
0x157a   :  { %v3811_v22 = vsel %vm3803_vm13, %v3799_v41, %v3807_v43  ;;  %vm6997_vm13 = vmmov %vm6996_vm7 }
0x157b   :  { %4742 = vmatprep.mubr.msk.f32.mxu1 %vm6985_vm4, %v3811_v22  ;;  %vm6998_vm4 = vmmov %vm6988_vm11 }
0x15a6   :  { %v3724_v11 = vpop.xlane.xlu1 %3723 }
0x15a7   :  { %v3732_v50 = vmul.f32 0.03125, %v3724_v11 }
0x15a9   :  { %v3740_v35 = vsub.f32 %v3732_v50, %v3736_v32  ;;  %v5008_v50 = vld [vmem:[#allocation2 + $0x200] ss:$16 sps:$4 sm:$0xff]  }
0x15aa   :  { %v3795_v24 = vpop.permute.xlu1 %3794 }
0x15ab   :  { %v3744_v28 = vmax.f32 %v3740_v35, 0.0 }
0x15ad   :  { %v3752_v8 = vadd.f32 1e-05, %v3744_v28 }
0x15ae   :  { %v3970_v29 = vpop.permute.xlu1 %3969 }
0x15af   :  { %5057 = vrsqrt.f32 %v3752_v8  ;;  %v3972_v17 = vsel %vm6986_vm15, 0, %v3970_v29  ;;  %vm6999_vm15 = vmmov %vm6998_vm4 }
0x15b0   :  { %v3974_v25 = vsel %vm6987_vm2, %v3972_v17, 0  ;;  %v5074_v17 = vld [vmem:[%s6758_s2 + $0x8] sm:$0xff] }
0x15b1   :  { %4746 = vmatpush3.bf16.msra.mxu1 %v3974_v25  ;;  %v5161_v25 = vmov 15  }
0x15b2   :  { %4747 = vmatprep.subr.bf16.mxu1 %v5146_v55  ;;  %v3982_v27 = vpop.permute.xlu1 %3981 }
0x15b3   :  { %v3984_v13 = vsel %vm6990_vm14, %v3982_v27, 0 }
0x15b4   :  { %v3986_v36 = vsel %vm6991_vm9, %v3984_v13, 0  ;;  %v4157_v13 = vld [vmem:[#allocation4 + $0x130] sm:$0xff] }
0x15b5   :  { %4748 = vmatpush3.bf16.msra.mxu1 %v3980_v21 }
0x15b6   :  { %4749 = vmatprep.subr.bf16.mxu1 %v5146_v55 }
0x15b9   :  { %v5058_v18 = vpop.eup %5057  ;;  %4750 = vmatpush3.bf16.msra.mxu1 %v5548_v46  ;;  %v3992_v46 = vsel %vm6993_vm3, %v3990_v31, 0  ;;  %v4160_v31 = vld [vmem:[#allocation4 + $0x148] sm:$0xff] }
0x15ba   :  { %v3760_v60 = vmul.f32 %v5058_v18, %v3748_v7  ;;  %4751 = vmatprep.subr.bf16.mxu1 %v5146_v55  ;;  %v4156_v18 = vld [vmem:[#allocation4 + $0x128] sm:$0xff] }
0x15bb   :  { %v4818_v2 = vpack.c.bf16 %v4157_v13, %v4156_v18  ;;  %v5009_v13 = vld [vmem:[#allocation2 + $0x260] ss:$16 sps:$4 sm:$0xff]  }
0x15bc   :  { %v3780_v42 = vmul.f32 %v3775_v54, %v3760_v60  ;;  %v4158_v60 = vld [vmem:[#allocation4 + $0x138] sm:$0xff] }
0x15bd   :  { %4752 = vmatpush3.bf16.msra.mxu1 %v3986_v36  ;;  %4819 = vmatprep.subr.bf16.mxu0 %v4818_v2 }
0x15be   :  { %v3800_v63 = vadd.f32 %v3795_v24, %v3780_v42  ;;  %4753 = vmatprep.subr.bf16.mxu1 %v5146_v55  ;;  %4821 = vmatpush3.bf16.msra.mxu0 %v4818_v2  ;;  %v4159_v42 = vld [vmem:[#allocation4 + $0x140] sm:$0xff] }
0x15bf   :  { %v4822_v36 = vpack.c.bf16 %v4159_v42, %v4158_v60  ;;  %v5162_v42 = vmov 17  }
0x15c0   :  { %vm3804_vm8 = vcmp.ge.f32.partialorder %v3800_v63, 0.0  ;;  %v3808_v30 = vmul.f32 0.1, %v3800_v63 }
0x15c1   :  { %4754 = vmatpush3.bf16.msra.mxu1 %v3992_v46  ;;  %4823 = vmatprep.subr.bf16.mxu0 %v4822_v36 }
0x15c2   :  { %v3812_v40 = vsel %vm3804_vm8, %v3800_v63, %v3808_v30  ;;  %4057 = vmatprep.subr.bf16.mxu1 %v5130_v0  ;;  %4825 = vmatpush3.bf16.msra.mxu0 %v4822_v36  ;;  %v4161_v63 = vld [vmem:[#allocation4 + $0x150] sm:$0xff]  ;;  %v4162_v30 = vld [vmem:[#allocation4 + $0x158] sm:$0xff] }
0x15c3   :  { %4743 = vmatmul.mubr.msk.f32.gmra.mrb[46].mxu1 %vm6982_vm1, %v3812_v40  ;;  %v4826_v46 = vpack.c.bf16 %v4161_v63, %v4160_v31  ;;  %v4163_v40 = vld [vmem:[#allocation4 + $0x160] sm:$0xff] }
0x15c4   :  { %4755 = vmatprep.mubr.msk.bf16.mxu1 %vm6994_vm6, %v5146_v55 }
0x15c5   :  { %4827 = vmatprep.subr.bf16.mxu0 %v4826_v46 }
0x15c6   :  { %4829 = vmatpush3.bf16.msra.mxu0 %v4826_v46 }
0x15c7   :  { %4756 = vmatmul.mubr.msk.bf16.vlgmr.msra.gmra.mrb[48].mxu1 %vm4000_vm10, %v5005_v34  ;;  %v4830_v34 = vpack.c.bf16 %v4163_v40, %v4162_v30 }
0x15c8   :  { %4536 = vmatprep.mubr.msk.bf16.mxu1 %vm6995_vm12, %v5006_v37 }
0x15c9   :  { %4831 = vmatprep.subr.bf16.mxu0 %v4830_v34 }
0x15ca   :  { %4833 = vmatpush3.bf16.msra.mxu0 %v4830_v34 }
0x15cb   :  { %4778 = vmatprep.subr.bf16.mxu0 %v5146_v55 }
0x1647   :  { %v4741_v7 = vpop.f32.mrb[44].mxu1 }
0x1648   :  { %v3895_v51 = vpop.f32.mrb[45].mxu1 }
0x1649   :  { %v3914_v1 = vpack.c.bf16 %v4741_v7, %v3895_v51 }
0x164b   :  { %3918 = vrot.lane.b32.xlu1 %v3914_v1, %s5136_s24 }
0x164f   :  { %3930 = vrot.lane.b32.xlu1 %v3914_v1, %s5137_s25 }
0x1653   :  { %3942 = vrot.lane.b32.xlu1 %v3914_v1, %s5138_s26 }
0x1657   :  { %3954 = vrot.lane.b32.xlu1 %v3914_v1, %s5139_s27 }
0x1696   :  { %v4744_v15 = vpop.f32.mrb[46].mxu1 }
0x1697   :  { %v3905_v53 = vpop.f32.mrb[47].mxu1 }
0x1698   :  { %v3915_v33 = vpack.c.bf16 %v4744_v15, %v3905_v53 }
0x169a   :  { %3920 = vrot.lane.b32.xlu0 %v3915_v33, %s5136_s24 }
0x169e   :  { %3932 = vrot.lane.b32.xlu0 %v3915_v33, %s5137_s25 }
0x16a2   :  { %3944 = vrot.lane.b32.xlu0 %v3915_v33, %s5138_s26 }
0x16a6   :  { %3956 = vrot.lane.b32.xlu0 %v3915_v33, %s5139_s27 }
0x16bd   :  { %v3919_v61 = vpop.permute.xlu1 %3918 }
0x16be   :  { %v3923_v4 = vsel %vm6996_vm7, 0, %v3919_v61 }
0x16bf   :  { %v3928_v26 = vsel %vm6987_vm2, %v3923_v4, 0 }
0x16c0   :  { %4058 = vmatpush1.bf16.msra.mxu1 %v3928_v26 }
0x16c1   :  { %4059 = vmatprep.subr.bf16.mxu1 %v5130_v0  ;;  %v3931_v3 = vpop.permute.xlu1 %3930 }
0x16c2   :  { %v3935_v20 = vsel %vm6998_vm4, 0, %v3931_v3  ;;  %vm7009_vm4 = vnez %v6807_v52 }
0x16c3   :  { %v3940_v10 = vsel %vm6989_vm5, %v3935_v20, 0 }
0x16c5   :  { %v3943_v49 = vpop.permute.xlu1 %3942 }
0x16c9   :  { %v3955_v59 = vpop.permute.xlu1 %3954 }
0x170c   :  { %v3921_v47 = vpop.permute.xlu0 %3920 }
0x170d   :  { %v3926_v38 = vsel %vm6997_vm13, 0, %v3921_v47 }
0x170e   :  { %v3929_v39 = vsel %vm6987_vm2, %v3926_v38, 0  ;;  %vm7000_vm2 = vmmov %vm6990_vm14 }
0x170f   :  { %4060 = vmatpush1.bf16.msra.mxu1 %v3929_v39  ;;  %v3947_v5 = vsel %vm7000_vm2, %v3943_v49, 0  ;;  %vm7001_vm11 = vmmov %vm7000_vm2  ;;  %vm7011_vm2 = vcmask 7168  }
0x1710   :  { %v3933_v54 = vpop.permute.xlu0 %3932  ;;  %4061 = vmatprep.subr.bf16.mxu1 %v5130_v0  ;;  %v3952_v48 = vsel %vm6991_vm9, %v3947_v5, 0  ;;  %vm7003_vm14 = vmmov %vm6992_vm0 }
0x1711   :  { %v3938_v9 = vsel %vm6999_vm15, 0, %v3933_v54 }
0x1712   :  { %v3941_v23 = vsel %vm6989_vm5, %v3938_v9, 0  ;;  %vm7002_vm5 = vmmov %vm6992_vm0 }
0x1713   :  { %4062 = vmatpush1.bf16.msra.mxu1 %v3940_v10  ;;  %v3959_v41 = vsel %vm7002_vm5, %v3955_v59, 0  ;;  %vm7013_vm5 = vcmask 1039360  }
0x1714   :  { %4063 = vmatprep.subr.bf16.mxu1 %v5130_v0  ;;  %v3945_v62 = vpop.permute.xlu0 %3944  ;;  %v3964_v22 = vsel %vm6993_vm3, %v3959_v41, 0 }
0x1715   :  { %v3950_v14 = vsel %vm7001_vm11, %v3945_v62, 0  ;;  %vm7012_vm11 = vnez %v6809_v58 }
0x1716   :  { %v3953_v45 = vsel %vm6991_vm9, %v3950_v14, 0  ;;  %vm7004_vm9 = vcmask 523264  }
0x1717   :  { %4064 = vmatpush1.bf16.msra.mxu1 %v3941_v23  ;;  %vm7005_vm0 = vmmov %vm7004_vm9 }
0x1718   :  { %4065 = vmatprep.subr.bf16.mxu1 %v5130_v0  ;;  %v3957_v43 = vpop.permute.xlu0 %3956  ;;  %vm7007_vm8 = vmmov %vm7005_vm0 }
0x1719   :  { %v3962_v11 = vsel %vm7003_vm14, %v3957_v43, 0  ;;  %vm7008_vm12 = vmmov %vm7005_vm0  ;;  %vm7014_vm14 = vnez %v6811_v6 }
0x171a   :  { %v3965_v32 = vsel %vm6993_vm3, %v3962_v11, 0  ;;  %vm7006_vm3 = vmmov %vm7005_vm0 }
0x171b   :  { %4066 = vmatpush1.bf16.msra.mxu1 %v3914_v1  ;;  %vm7010_vm15 = vmmov %vm7005_vm0 }
0x171c   :  { %4067 = vmatprep.subr.bf16.mxu1 %v5130_v0 }
0x171f   :  { %4068 = vmatpush1.bf16.msra.mxu1 %v3915_v33 }
0x1720   :  { %4069 = vmatprep.subr.bf16.mxu1 %v5130_v0 }
0x1723   :  { %4070 = vmatpush1.bf16.msra.mxu1 %v3952_v48 }
0x1724   :  { %4071 = vmatprep.subr.bf16.mxu1 %v5130_v0 }
0x1727   :  { %4072 = vmatpush1.bf16.msra.mxu1 %v3953_v45 }
0x1728   :  { %4073 = vmatprep.subr.bf16.mxu1 %v5130_v0 }
0x172b   :  { %4074 = vmatpush1.bf16.msra.mxu1 %v3964_v22 }
0x172c   :  { %4075 = vmatprep.subr.bf16.mxu1 %v5130_v0 }
0x172f   :  { %4076 = vmatpush1.bf16.msra.mxu1 %v3965_v32 }
0x1732   :  { %4090 = vmatmul.mubr.bf16.vlgmr.msra.gmra.mrb[48].mxu1 %v5008_v50 }
0x1805   :  { %v4091_v35 = vpop.f32.mrb[48].mxu1 }
0x1806   :  { %v4093_v24 = vpop.f32.mrb[49].mxu1  ;;  %v4098_v28 = vsel %vm7004_vm9, %v4091_v35, 0.0  ;;  %v4104_v56 = vmul.f32 %v4091_v35, %v4091_v35  ;;  %vm7015_vm9 = vcmask 1031168  }
0x1807   :  { %4099 = vadd.xlane.f32.xlu1 %v4098_v28  ;;  %v6665_v8 = vpop.f32.mrb[50].mxu1 }
0x1808   :  { %v4096_v29 = vpop.f32.mrb[51].mxu1  ;;  %v4101_v0 = vsel %vm7005_vm0, %v6665_v8, 0.0  ;;  %v4106_v19 = vsel %vm7006_vm3, %v4104_v56, 0.0  ;;  %v4105_v21 = vmul.f32 %v6665_v8, %v6665_v8  ;;  %vm7016_vm0 = vnez %v6813_v16  ;;  %vm7017_vm3 = vmmov %vm6997_vm13  ;;  %v4423_v16 = vld [vmem:[%s6758_s2] sm:$0xff] }
0x1809   :  { %4102 = vadd.xlane.f32.xlu0 %v4101_v0 }
0x180a   :  { %v4109_v27 = vsel %vm7007_vm8, %v4105_v21, 0.0  ;;  %vm7019_vm8 = vmmov %vm7013_vm5 }
0x180d   :  { %4107 = vadd.xlane.f32.xlu0 %v4106_v19 }
0x1818   :  { %4135 = vperm.xlu1 %4939, %v5074_v17  }
0x181c   :  { %4940 = vset.pattern.permute.xlu1 %v5161_v25 }
0x181d   :  { %4141 = vperm.xlu1 %4940, %v6676_v57  }
0x1823   :  { %4131 = vperm.xlu0 %4938, %v6676_v57  }
0x1841   :  { %4110 = vadd.xlane.f32.xlu1 %v4109_v27 }
0x1852   :  { %4145 = vperm.xlu1 %4940, %v5074_v17  }
0x1856   :  { %4274 = vrot.lane.b32.xlu1 %v5407_v44, %s5136_s24 }
0x1857   :  { %4942 = vset.pattern.permute.xlu1 %v5162_v42 }
0x185a   :  { %4280 = vrot.lane.b32.xlu1 %v5407_v44, %s5137_s25 }
0x185e   :  { %4286 = vrot.lane.b32.xlu1 %v5407_v44, %s5138_s26 }
0x1862   :  { %4292 = vrot.lane.b32.xlu1 %v5407_v44, %s5139_s27 }
0x1894   :  { %v4100_v7 = vpop.xlane.xlu1 %4099 }
0x1895   :  { %v4112_v1 = vmul.f32 0.015625, %v4100_v7 }
0x1896   :  { %v4103_v51 = vpop.xlane.xlu0 %4102 }
0x1897   :  { %v4116_v53 = vmul.f32 %v4112_v1, %v4112_v1  ;;  %v4122_v3 = vsub.f32 %v4091_v35, %v4112_v1  ;;  %v4113_v49 = vmul.f32 0.015625, %v4103_v51 }
0x1898   :  { %v4136_v26 = vpop.permute.xlu1 %4135 }
0x1899   :  { %v4117_v62 = vmul.f32 %v4113_v49, %v4113_v49  ;;  %v4123_v43 = vsub.f32 %v6665_v8, %v4113_v49 }
0x189a   :  { %v4108_v15 = vpop.xlane.xlu0 %4107 }
0x189b   :  { %v4114_v33 = vmul.f32 0.015625, %v4108_v15  ;;  %v5010_v15 = vld [vmem:[#allocation2 + $0x240] ss:$16 sps:$4 sm:$0xff]  }
0x189c   :  { %v4142_v54 = vpop.permute.xlu1 %4141 }
0x189d   :  { %v4118_v37 = vsub.f32 %v4114_v33, %v4116_v53  ;;  %v5163_v53 = vmov 18   ;;  %v5164_v33 = vmov 16  }
0x189e   :  { %4941 = vset.pattern.permute.xlu0 %v5164_v33 }
0x189f   :  { %v4120_v61 = vmax.f32 %v4118_v37, 0.0 }
0x18a1   :  { %v4124_v4 = vadd.f32 1e-05, %v4120_v61 }
0x18a2   :  { %v4132_v38 = vpop.permute.xlu0 %4131 }
0x18a3   :  { %5059 = vrsqrt.f32 %v4124_v4 }
0x18ad   :  { %v5060_v47 = vpop.eup %5059 }
0x18ae   :  { %v4128_v39 = vmul.f32 %v5060_v47, %v4122_v3  ;;  %v4425_v3 = vld [vmem:[%s6758_s2 + $0x9] sm:$0x1] }
0x18b0   :  { %v4138_v20 = vmul.f32 %v4132_v38, %v4128_v39 }
0x18b2   :  { %v4148_v10 = vadd.f32 %v4142_v54, %v4138_v20 }
0x18b4   :  { %v4152_v9 = vmul.f32 0.1, %v4148_v10  ;;  %vm4150_vm1 = vcmp.ge.f32.partialorder %v4148_v10, 0.0 }
0x18b6   :  { %v4154_v23 = vsel %vm4150_vm1, %v4148_v10, %v4152_v9  ;;  %vm7020_vm1 = vmmov %vm7015_vm9 }
0x18b7   :  { %4775 = vmatprep.mubr.msk.f32.mxu0 %vm7008_vm12, %v4154_v23 }
0x18ce   :  { %v4111_v5 = vpop.xlane.xlu1 %4110 }
0x18cf   :  { %v4115_v48 = vmul.f32 0.015625, %v4111_v5 }
0x18d1   :  { %v4119_v14 = vsub.f32 %v4115_v48, %v4117_v62 }
0x18d2   :  { %v4146_v41 = vpop.permute.xlu1 %4145 }
0x18d3   :  { %v4121_v59 = vmax.f32 %v4119_v14, 0.0 }
0x18d5   :  { %v4125_v45 = vadd.f32 1e-05, %v4121_v59 }
0x18d6   :  { %v4275_v32 = vpop.permute.xlu1 %4274 }
0x18d7   :  { %5061 = vrsqrt.f32 %v4125_v45  ;;  %v4277_v24 = vsel %vm6997_vm13, 0, %v4275_v32 }
0x18d8   :  { %v4279_v29 = vsel %vm7009_vm4, %v4277_v24, 0  ;;  %v48_v24 = vld [vmem:[%s6756_s0] sm:$0x1] }
0x18da   :  { %v4281_v28 = vpop.permute.xlu1 %4280 }
0x18db   :  { %v4283_v0 = vsel %vm7011_vm2, 0, %v4281_v28 }
0x18dc   :  { %v4285_v8 = vsel %vm7012_vm11, %v4283_v0, 0 }
0x18de   :  { %v4287_v19 = vpop.permute.xlu1 %4286 }
0x18df   :  { %v4289_v17 = vsel %vm7013_vm5, %v4287_v19, 0 }
0x18e0   :  { %v4291_v21 = vsel %vm7014_vm14, %v4289_v17, 0 }
0x18e1   :  { %v5062_v22 = vpop.eup %5061 }
0x18e2   :  { %v4129_v11 = vmul.f32 %v5062_v22, %v4123_v43  ;;  %v4293_v25 = vpop.permute.xlu1 %4292 }
0x18e3   :  { %v4295_v27 = vsel %vm7015_vm9, %v4293_v25, 0 }
0x18e4   :  { %v4139_v50 = vmul.f32 %v4136_v26, %v4129_v11  ;;  %v4297_v18 = vsel %vm7016_vm0, %v4295_v27, 0 }
0x18e6   :  { %v4149_v12 = vadd.f32 %v4146_v41, %v4139_v50 }
0x18e8   :  { %vm4151_vm7 = vcmp.ge.f32.partialorder %v4149_v12, 0.0  ;;  %v4153_v35 = vmul.f32 0.1, %v4149_v12 }
0x18ea   :  { %v4155_v56 = vsel %vm4151_vm7, %v4149_v12, %v4153_v35 }
0x18eb   :  { %4776 = vmatmul.mubr.msk.f32.vlgmr.msra.gmra.mrb[44].mxu0 %vm7010_vm15, %v4155_v56 }
0x18ec   :  { %4779 = vmatpush3.bf16.msra.mxu0 %v4279_v29  ;;  %4788 = vmatprep.mubr.msk.bf16.mxu0 %vm6994_vm6, %v5146_v55 }
0x18ed   :  { %4780 = vmatprep.subr.bf16.mxu0 %v5146_v55 }
0x18f0   :  { %4781 = vmatpush3.bf16.msra.mxu0 %v4285_v8 }
0x18f1   :  { %4782 = vmatprep.subr.bf16.mxu0 %v5146_v55 }
0x18f4   :  { %4783 = vmatpush3.bf16.msra.mxu0 %v5407_v44 }
0x18f5   :  { %4784 = vmatprep.subr.bf16.mxu0 %v5146_v55 }
0x18f8   :  { %4785 = vmatpush3.bf16.msra.mxu0 %v4291_v21 }
0x18f9   :  { %4786 = vmatprep.subr.bf16.mxu0 %v5146_v55 }
0x18fc   :  { %4787 = vmatpush3.bf16.msra.mxu0 %v4297_v18 }
0x18fd   :  { %4792 = vmatprep.subr.bf16.mxu0 %v5146_v55 }
0x18ff   :  { %4789 = vmatmul.mubr.msk.bf16.vlgmr.msra.gmra.mrb[48].mxu0 %vm4000_vm10, %v5009_v13 }
0x1900   :  { %4802 = vmatprep.mubr.msk.bf16.mxu0 %vm6994_vm6, %v5146_v55  ;;  %vm7018_vm6 = vmmov %vm7011_vm2 }
0x19be   :  { %v4777_v44 = vpop.f32.mrb[44].mxu0 }
0x19bf   :  { %v4236_v2 = vpop.f32.mrb[45].mxu0 }
0x19c0   :  { %v4245_v60 = vpack.c.bf16 %v4777_v44, %v4236_v2 }
0x19c2   :  { %4253 = vrot.lane.b32.xlu1 %v4245_v60, %s5137_s25  ;;  %4247 = vrot.lane.b32.xlu0 %v4245_v60, %s5136_s24 }
0x19c6   :  { %4265 = vrot.lane.b32.xlu1 %v4245_v60, %s5139_s27  ;;  %4259 = vrot.lane.b32.xlu0 %v4245_v60, %s5138_s26 }
0x19ca   :  { %4416 = vperm.xlu1 %4942, %v6676_v57  }
0x19ce   :  { %4943 = vset.pattern.permute.xlu1 %v5163_v53 }
0x1a34   :  { %v4254_v36 = vpop.permute.xlu1 %4253  ;;  %v4248_v31 = vpop.permute.xlu0 %4247 }
0x1a35   :  { %v4250_v63 = vsel %vm7017_vm3, 0, %v4248_v31  ;;  %v4256_v30 = vsel %vm7018_vm6, 0, %v4254_v36 }
0x1a36   :  { %v4252_v46 = vsel %vm7009_vm4, %v4250_v63, 0  ;;  %v4258_v40 = vsel %vm7012_vm11, %v4256_v30, 0 }
0x1a37   :  { %4793 = vmatpush3.bf16.msra.mxu0 %v4252_v46 }
0x1a38   :  { %4794 = vmatprep.subr.bf16.mxu0 %v5146_v55  ;;  %v4260_v34 = vpop.permute.xlu0 %4259  ;;  %v4266_v51 = vpop.permute.xlu1 %4265 }
0x1a39   :  { %v4262_v7 = vsel %vm7019_vm8, %v4260_v34, 0  ;;  %v4268_v1 = vsel %vm7020_vm1, %v4266_v51, 0 }
0x1a3a   :  { %v4264_v52 = vsel %vm7014_vm14, %v4262_v7, 0  ;;  %v4270_v58 = vsel %vm7016_vm0, %v4268_v1, 0 }
0x1a3b   :  { %4795 = vmatpush3.bf16.msra.mxu0 %v4258_v40 }
0x1a3c   :  { %4796 = vmatprep.subr.bf16.mxu0 %v5146_v55 }
0x1a3f   :  { %4797 = vmatpush3.bf16.msra.mxu0 %v4245_v60 }
0x1a40   :  { %4798 = vmatprep.subr.bf16.mxu0 %v5146_v55 }
0x1a43   :  { %4799 = vmatpush3.bf16.msra.mxu0 %v4264_v52 }
0x1a44   :  { %4800 = vmatprep.subr.bf16.mxu0 %v5146_v55  ;;  %v4424_v55 = vld [vmem:[%s6758_s2 + $0x8] sm:$0x1] }
0x1a47   :  { %4801 = vmatpush3.bf16.msra.mxu0 %v4270_v58 }
0x1a49   :  { %v4417_v47 = vpop.permute.xlu1 %4416 }
0x1a4a   :  { %4803 = vmatmul.mubr.msk.bf16.vlgmr.msra.gmra.mrb[48].mxu0 %vm4000_vm10, %v5010_v15 }
0x1b1d   :  { %v4390_v37 = vpop.f32.mrb[48].mxu0 }
0x1b1e   :  { %v4398_v61 = vmul.f32 %v4390_v37, %v4390_v37  ;;  %4396 = vadd.xlane.f32.xlu0 %v4390_v37  ;;  %v4804_v6 = vpop.f32.mrb[49].mxu0 }
0x1b1f   :  { %v4393_v4 = vpop.f32.mrb[50].mxu0 }
0x1b20   :  { %4399 = vadd.xlane.f32.xlu1 %v4398_v61  ;;  %v4805_v26 = vpop.f32.mrb[51].mxu0 }
0x1b31   :  { %4428 = vperm.xlu1 %4943, %v4423_v16  }
0x1b34   :  { %4411 = vperm.xlu0 %4941, %v6676_v57  }
0x1b35   :  { %4440 = vperm.xlu1 %4943, %v4424_v55  }
0x1b38   :  { %4944 = vset.pattern.permute.xlu0 %v5163_v53 }
0x1b39   :  { %4447 = vperm.xlu1 %4943, %v4425_v3  }
0x1bab   :  { %v4397_v38 = vpop.xlane.xlu0 %4396 }
0x1bac   :  { %v4401_v39 = vmul.f32 0.0078125, %v4397_v38 }
0x1bad   :  { %v4400_v20 = vpop.xlane.xlu1 %4399 }
0x1bae   :  { %v4403_v54 = vmul.f32 %v4401_v39, %v4401_v39  ;;  %v4402_v10 = vmul.f32 0.0078125, %v4400_v20  ;;  %v4406_v5 = vsub.f32 %v4390_v37, %v4401_v39 }
0x1bb0   :  { %v4404_v9 = vsub.f32 %v4402_v10, %v4403_v54 }
0x1bb1   :  { %v4429_v41 = vpop.permute.xlu1 %4428 }
0x1bb2   :  { %v4405_v23 = vmax.f32 %v4404_v9, 0.0 }
0x1bb3   :  { %v4412_v57 = vpop.permute.xlu0 %4411 }
0x1bb4   :  { %v4407_v49 = vadd.f32 1e-05, %v4405_v23 }
0x1bb5   :  { %v4441_v35 = vpop.permute.xlu1 %4440 }
0x1bb6   :  { %5063 = vrsqrt.f32 %v4407_v49  ;;  %v4443_v56 = vmul.f32 %v4441_v35, %v48_v24 }
0x1bb9   :  { %v4448_v8 = vpop.permute.xlu1 %4447 }
0x1bc0   :  { %v5064_v62 = vpop.eup %5063 }
0x1bc1   :  { %v4409_v48 = vmul.f32 %v5064_v62, %v4406_v5 }
0x1bc3   :  { %v4414_v14 = vmul.f32 %v4412_v57, %v4409_v48 }
0x1bc5   :  { %v4419_v59 = vadd.f32 %v4417_v47, %v4414_v14 }
0x1bc7   :  { %vm4420_vm10 = vcmp.ge.f32.partialorder %v4419_v59, 0.0  ;;  %v4421_v45 = vmul.f32 0.1, %v4419_v59 }
0x1bc9   :  { %v4422_v43 = vsel %vm4420_vm10, %v4419_v59, %v4421_v45 }
0x1bca   :  { %v4431_v22 = vmul.f32 %v4429_v41, %v4422_v43 }
0x1bcc   :  { %v4432_v11 = vrot.slane %v4431_v22, 4 }
0x1bce   :  { %v4433_v32 = vadd.f32 %v4432_v11, %v4431_v22 }
0x1bd0   :  { %v4434_v50 = vrot.slane %v4433_v32, 2 }
0x1bd2   :  { %v4435_v12 = vadd.f32 %v4434_v50, %v4433_v32 }
0x1bd4   :  { %v4436_v28 = vrot.slane %v4435_v12, 1 }
0x1bd6   :  { %v4437_v29 = vadd.f32 %v4436_v28, %v4435_v12 }
0x1bd8   :  { %v4444_v0 = vadd.f32 %v4443_v56, %v4437_v29 }
0x1bda   :  { %v4450_v19 = vadd.f32 %v4448_v8, %v4444_v0 }
0x1bdc   :  { %5065 = vtanh.f32 %v4450_v19 }
0x1be6   :  { %v5066_v17 = vpop.eup %5065 }
0x1be7   :  { %4452 = vst [vmem:[%s6760_s4] sm:$0x1] %v5066_v17 }
0x1be8   :  { %4457 = vsyncpa [#allocation3], 1 }
0x1be9   :  { %4458 = vsyncpa [#allocation5], 1 }

</bundles_post_ra>
